<compile_context>
chip_gen: v6e
topology: v6e:2x2x1
jax: 0.10.0
libtpu: 0.0.40
codegen_flags: <defaults>
</compile_context>

<pallas_src>
import functools

import jax
import jax.numpy as jnp
from jax import lax
from jax.experimental import pallas as pl
from jax.experimental.pallas import tpu as pltpu

_VMEM_LIMIT = 32 * 1024 * 1024  # safe on v5e/v6e (128 MiB) and v7x (64 MiB)


# ----------------------------------------------------------------------------
# Pallas kernel 1: fused [optional input-affine] -> 1x1 conv (bf16 MXU matmul)
#                  -> output-affine -> activation -> [optional residual add]
# ----------------------------------------------------------------------------
def _make_pointwise_kernel(act: str, has_in_affine: bool, has_residual: bool):
    def kernel(*refs):
        it = iter(refs)
        x_ref = next(it)
        w_ref = next(it)                         # bf16 (Cin, tn)
        isc_ref = next(it) if has_in_affine else None
        ibi_ref = next(it) if has_in_affine else None
        osc_ref = next(it)
        obi_ref = next(it)
        res_ref = next(it) if has_residual else None
        o_ref = next(it)

        x = x_ref[...]                           # (tm, Cin) f32
        if has_in_affine:
            x = x * isc_ref[...] + ibi_ref[...]  # folded pre-BN
        y = jnp.dot(x.astype(jnp.bfloat16), w_ref[...],
                    preferred_element_type=jnp.float32)      # MXU bf16 path
        y = y * osc_ref[...] + obi_ref[...]      # folded conv-BN
        if act == "relu":
            y = jnp.maximum(y, 0.0)
        elif act == "gelu":                      # exact erf GELU (nn.GELU())
            y = 0.5 * y * (1.0 + lax.erf(y * 0.7071067811865476))
        if has_residual:
            y = y + res_ref[...]
        o_ref[...] = y.astype(o_ref.dtype)

    return kernel


def _choose_tm(m):
    return 512 if m >= 512 else m


def _choose_tn(cout):
    if cout <= 512:
        return cout                 # full width (weights stay resident)
    if cout % 256 == 0:
        return 256                  # feeds the 256x256 MXU, bounds weight tile
    if cout % 128 == 0:
        return 128
    return cout


def pointwise(x2d, w_bf16, out_scale, out_bias, *, act="none",
              in_scale=None, in_bias=None, residual=None):
    """x2d: (M, Cin) f32; w_bf16: (Cin, Cout) bf16; affines: (1, C*) f32."""
    M, Cin = x2d.shape
    Cout = w_bf16.shape[1]
    tm = _choose_tm(M)
    tn = _choose_tn(Cout)
    grid = (pl.cdiv(M, tm), Cout // tn)

    has_in = in_scale is not None
    has_res = residual is not None

    in_specs = [
        pl.BlockSpec((tm, Cin), lambda i, j: (i, 0)),
        pl.BlockSpec((Cin, tn), lambda i, j: (0, j)),
    ]
    args = [x2d, w_bf16]
    if has_in:
        in_specs += [pl.BlockSpec((1, Cin), lambda i, j: (0, 0)),
                     pl.BlockSpec((1, Cin), lambda i, j: (0, 0))]
        args += [in_scale, in_bias]
    in_specs += [pl.BlockSpec((1, tn), lambda i, j: (0, j)),
                 pl.BlockSpec((1, tn), lambda i, j: (0, j))]
    args += [out_scale, out_bias]
    if has_res:
        in_specs.append(pl.BlockSpec((tm, tn), lambda i, j: (i, j)))
        args.append(residual)

    return pl.pallas_call(
        _make_pointwise_kernel(act, has_in, has_res),
        out_shape=jax.ShapeDtypeStruct((M, Cout), jnp.float32),
        grid=grid,
        in_specs=in_specs,
        out_specs=pl.BlockSpec((tm, tn), lambda i, j: (i, j)),
        compiler_params=pltpu.CompilerParams(
            dimension_semantics=("parallel", "parallel"),
            vmem_limit_bytes=_VMEM_LIMIT),
    )(*args)


# ----------------------------------------------------------------------------
# Pallas kernel 2: merged reparam large-kernel depthwise conv
#   out = relu( dw_conv_KxK(x; w_merged) + b_merged )
# Padding is built inside the kernel in a VMEM scratch (no HBM pad round trip).
# ----------------------------------------------------------------------------
def _dw_merged_kernel(x_ref, w_ref, b_ref, o_ref, xpad_ref, *, H, W, K, pad_l):
    # x_ref: (H, W, td) f32   w_ref: (K, K, td) f32   b_ref: (1, 1, td) f32
    # xpad_ref: VMEM scratch (H + 2*pad, pad_l + W + pad, td)
    pad = K // 2
    td = o_ref.shape[-1]

    # Zero the padded scratch, then drop the tile in at a sublane-aligned
    # column offset (pad_l is a multiple of 8 -> aligned store).
    xpad_ref[...] = jnp.zeros_like(xpad_ref)
    xpad_ref[pad:pad + H, pad_l:pad_l + W, :] = x_ref[...]

    w = w_ref[...]                              # (K, K, td)
    off_w = pad_l - pad
    acc = jnp.zeros((H, W, td), jnp.float32)    # keep f32 accumulation (v5e VPU)
    # TODO(synk): for very large K (31) realize dj shifts with pltpu.roll on a
    # per-row strip instead of K^2 unaligned sublane slices.
    for di in range(K):
        for dj in range(K):
            acc = acc + (xpad_ref[di:di + H,
                                  off_w + dj:off_w + dj + W, :] * w[di, dj])
    o_ref[...] = jnp.maximum(acc + b_ref[...], 0.0)   # lk_nonlinear = ReLU


def depthwise_merged(x_nhwc, w_merged, b_merged):
    """x: (N,H,W,D) f32; w_merged: (K,K,D) f32; b_merged: (1,1,D) f32."""
    N, H, W, D = x_nhwc.shape
    K = w_merged.shape[0]
    pad = K // 2
    pad_l = ((pad + 7) // 8) * 8                 # sublane-aligned left padding
    td = 128 if D % 128 == 0 else D              # channel tile (lane dim)
    hp = H + 2 * pad
    wp = pad_l + W + pad

    kernel = functools.partial(_dw_merged_kernel, H=H, W=W, K=K, pad_l=pad_l)
    return pl.pallas_call(
        kernel,
        out_shape=jax.ShapeDtypeStruct((N, H, W, D), jnp.float32),
        grid=(N, D // td),
        in_specs=[
            pl.BlockSpec((None, H, W, td), lambda n, d: (n, 0, 0, d)),
            pl.BlockSpec((K, K, td), lambda n, d: (0, 0, d)),
            pl.BlockSpec((1, 1, td), lambda n, d: (0, 0, d)),
        ],
        out_specs=pl.BlockSpec((None, H, W, td), lambda n, d: (n, 0, 0, d)),
        scratch_shapes=[pltpu.VMEM((hp, wp, td), jnp.float32)],
        compiler_params=pltpu.CompilerParams(
            dimension_semantics=("parallel", "parallel"),
            vmem_limit_bytes=_VMEM_LIMIT),
    )(x_nhwc, w_merged, b_merged)


# ----------------------------------------------------------------------------
# Parameter init (deterministic, synthetic); eval-mode BN folded to (scale, shift)
# and the reparam depthwise branches merged offline.
# ----------------------------------------------------------------------------
def _bn_affine(key, c, eps=1e-5):
    k1, k2, k3, k4 = jax.random.split(key, 4)
    gamma = 1.0 + 0.1 * jax.random.normal(k1, (c,))
    beta = 0.1 * jax.random.normal(k2, (c,))
    mean = 0.1 * jax.random.normal(k3, (c,))
    var = jax.random.uniform(k4, (c,), minval=0.5, maxval=1.5)
    scale = gamma / jnp.sqrt(var + eps)
    shift = beta - mean * scale
    return (scale.reshape(1, c).astype(jnp.float32),
            shift.reshape(1, c).astype(jnp.float32))


def _w(key, shape):
    return (0.1 * jax.random.normal(key, shape)).astype(jnp.float32)


def init_stage_params(key, channels, num_blocks, lk_size, small_kernel,
                      dw_ratio=1, ffn_ratio=4):
    C = channels
    D = int(C * dw_ratio)
    I = int(C * ffn_ratio)
    blocks = []
    for _ in range(num_blocks):
        key, *ks = jax.random.split(key, 16)

        # ---- RepLKBlock ----
        pre = _bn_affine(ks[0], C)
        pw1_bn = _bn_affine(ks[2], D)
        lk_w = _w(ks[3], (lk_size, lk_size, D))
        lk_bn = _bn_affine(ks[4], D)
        sk_w = _w(ks[5], (small_kernel, small_kernel, D))
        sk_bn = _bn_affine(ks[6], D)
        pw2_bn = _bn_affine(ks[8], C)

        # Merge reparam branches: fold BN scales into weights, pad the small
        # kernel into the centre of the large one, combine biases.
        dw_w = lk_w * lk_bn[0].reshape(1, 1, D)
        sk_scaled = sk_w * sk_bn[0].reshape(1, 1, D)
        off = (lk_size - small_kernel) // 2
        dw_w = dw_w.at[off:off + small_kernel, off:off + small_kernel, :].add(sk_scaled)
        dw_b = (lk_bn[1] + sk_bn[1]).reshape(1, 1, D)

        blocks.append(dict(
            pre_scale=pre[0], pre_shift=pre[1],
            pw1_w=_w(ks[1], (C, D)).astype(jnp.bfloat16),
            pw1_scale=pw1_bn[0], pw1_shift=pw1_bn[1],
            dw_w=dw_w, dw_b=dw_b,
            pw2_w=_w(ks[7], (D, C)).astype(jnp.bfloat16),
            pw2_scale=pw2_bn[0], pw2_shift=pw2_bn[1],
        ))

        # ---- ConvFFN ----
        fpre = _bn_affine(ks[9], C)
        fpw1_bn = _bn_affine(ks[11], I)
        fpw2_bn = _bn_affine(ks[13], C)
        blocks.append(dict(
            pre_scale=fpre[0], pre_shift=fpre[1],
            pw1_w=_w(ks[10], (C, I)).astype(jnp.bfloat16),
            pw1_scale=fpw1_bn[0], pw1_shift=fpw1_bn[1],
            pw2_w=_w(ks[12], (I, C)).astype(jnp.bfloat16),
            pw2_scale=fpw2_bn[0], pw2_shift=fpw2_bn[1],
        ))
    return {"blocks": blocks}


# ----------------------------------------------------------------------------
# Forward pass glue (reshapes only; compute lives in the Pallas kernels)
# ----------------------------------------------------------------------------
def _replk_block(x_nhwc, p):
    N, H, W, C = x_nhwc.shape
    M = N * H * W
    D = p["pw1_w"].shape[1]
    x2d = x_nhwc.reshape(M, C)

    # prelkb_bn -> pw1 (conv + bn + relu)
    h = pointwise(x2d, p["pw1_w"], p["pw1_scale"], p["pw1_shift"], act="relu",
                  in_scale=p["pre_scale"], in_bias=p["pre_shift"])
    # merged reparam large-kernel depthwise conv + bias + relu
    h = depthwise_merged(h.reshape(N, H, W, D), p["dw_w"], p["dw_b"])
    # pw2 (conv + bn) + residual
    out = pointwise(h.reshape(M, D), p["pw2_w"], p["pw2_scale"], p["pw2_shift"],
                    act="none", residual=x2d)
    return out.reshape(N, H, W, C)


def _ffn_block(x_nhwc, p):
    N, H, W, C = x_nhwc.shape
    M = N * H * W
    x2d = x_nhwc.reshape(M, C)

    h = pointwise(x2d, p["pw1_w"], p["pw1_scale"], p["pw1_shift"], act="gelu",
                  in_scale=p["pre_scale"], in_bias=p["pre_shift"])
    out = pointwise(h, p["pw2_w"], p["pw2_scale"], p["pw2_shift"],
                    act="none", residual=x2d)
    return out.reshape(N, H, W, C)


def replk_stage_forward(x_nchw, params):
    x = jnp.transpose(x_nchw, (0, 2, 3, 1)).astype(jnp.float32)   # NCHW -> NHWC
    for blk in params["blocks"]:
        x = _replk_block(x, blk) if "dw_w" in blk else _ffn_block(x, blk)
    # self.norm = nn.Identity()  (norm_intermediate_features=False)
    return jnp.transpose(x, (0, 3, 1, 2))                         # NHWC -> NCHW


# ----------------------------------------------------------------------------
if __name__ == "__main__":
    key = jax.random.PRNGKey(0)
    kx, kp = jax.random.split(key)

    N, channels, H, W = 2, 8, 16, 16
    num_blocks, stage_lk_size, small_kernel = 2, 7, 3

    x = jax.random.normal(kx, (N, channels, H, W), dtype=jnp.float32)
    params = init_stage_params(kp, channels, num_blocks, stage_lk_size,
                               small_kernel, dw_ratio=1, ffn_ratio=4)

    fwd = jax.jit(replk_stage_forward)
    y = fwd(x, params)
    y = jax.block_until_ready(y)
    assert y.shape == (N, channels, H, W) and bool(jnp.isfinite(y).all())
    print("KERNEL_OK")
</pallas_src>

<mosaic_0001>
module attributes {stable_mosaic.version = 11 : i64} {
  func.func @kernel(%arg0: i32, %arg1: i32, %arg2: memref<512x8xf32, #tpu.memory_space<vmem>>, %arg3: memref<8x8xbf16, #tpu.memory_space<vmem>>, %arg4: memref<1x8xf32, #tpu.memory_space<vmem>>, %arg5: memref<1x8xf32, #tpu.memory_space<vmem>>, %arg6: memref<512x8xf32, #tpu.memory_space<vmem>>, %arg7: memref<512x8xf32, #tpu.memory_space<vmem>>) attributes {dimension_semantics = [#tpu.dimension_semantics<parallel>, #tpu.dimension_semantics<parallel>], iteration_bounds = array<i64: 1, 1>, scalar_prefetch = 0 : i64, scratch_operands = 0 : i64, tpu.core_type = #tpu.core_type<tc>, window_params = [{transform_indices = @transform_0, window_bounds = array<i64: 512, 8>}, {transform_indices = @transform_1, window_bounds = array<i64: 8, 8>}, {transform_indices = @transform_2, window_bounds = array<i64: 1, 8>}, {transform_indices = @transform_3, window_bounds = array<i64: 1, 8>}, {transform_indices = @transform_4, window_bounds = array<i64: 512, 8>}, {transform_indices = @transform_5, window_bounds = array<i64: 512, 8>}]} {
    %c0 = arith.constant 0 : index
    %c0_0 = arith.constant 0 : index
    %0 = vector.load %arg2[%c0, %c0_0] : memref<512x8xf32, #tpu.memory_space<vmem>>, vector<512x8xf32>
    %1 = arith.truncf %0 : vector<512x8xf32> to vector<512x8xbf16>
    %c0_1 = arith.constant 0 : index
    %c0_2 = arith.constant 0 : index
    %2 = vector.load %arg3[%c0_1, %c0_2] : memref<8x8xbf16, #tpu.memory_space<vmem>>, vector<8x8xbf16>
    %cst = arith.constant dense<0.000000e+00> : vector<512x8xf32>
    %3 = tpu.matmul %1, %2, %cst {dimension_numbers = #tpu.dot_dimension_numbers<[1], [0], [0], [1], [0, 0, 1, 1], [], []>} : vector<512x8xbf16>, vector<8x8xbf16>, vector<512x8xf32> -> vector<512x8xf32>
    %c0_3 = arith.constant 0 : index
    %c0_4 = arith.constant 0 : index
    %4 = vector.load %arg4[%c0_3, %c0_4] : memref<1x8xf32, #tpu.memory_space<vmem>>, vector<1x8xf32>
    %5 = vector.broadcast %4 : vector<1x8xf32> to vector<512x8xf32>
    %6 = arith.mulf %3, %5 : vector<512x8xf32>
    %c0_5 = arith.constant 0 : index
    %c0_6 = arith.constant 0 : index
    %7 = vector.load %arg5[%c0_5, %c0_6] : memref<1x8xf32, #tpu.memory_space<vmem>>, vector<1x8xf32>
    %8 = vector.broadcast %7 : vector<1x8xf32> to vector<512x8xf32>
    %9 = arith.addf %6, %8 : vector<512x8xf32>
    %c0_7 = arith.constant 0 : index
    %c0_8 = arith.constant 0 : index
    %10 = vector.load %arg6[%c0_7, %c0_8] : memref<512x8xf32, #tpu.memory_space<vmem>>, vector<512x8xf32>
    %11 = arith.addf %9, %10 : vector<512x8xf32>
    %c0_9 = arith.constant 0 : index
    %c0_10 = arith.constant 0 : index
    %12 = vector.load %arg7[%c0_9, %c0_10] : memref<512x8xf32, #tpu.memory_space<vmem>>, vector<512x8xf32>
    tpu.vector_store %arg7[%c0_9, %c0_10], %11 {strides = array<i32>} : memref<512x8xf32, #tpu.memory_space<vmem>>, vector<512x8xf32>,
    return
  }
  func.func @transform_0(%arg0: i32, %arg1: i32) -> (i32, i32) {
    %c0_i32 = arith.constant 0 : i32
    %c0_i32_0 = arith.constant 0 : i32
    return %arg0, %c0_i32 : i32, i32
  }
  func.func @transform_1(%arg0: i32, %arg1: i32) -> (i32, i32) {
    %c0_i32 = arith.constant 0 : i32
    %c0_i32_0 = arith.constant 0 : i32
    return %c0_i32, %arg1 : i32, i32
  }
  func.func @transform_2(%arg0: i32, %arg1: i32) -> (i32, i32) {
    %c0_i32 = arith.constant 0 : i32
    %c0_i32_0 = arith.constant 0 : i32
    return %c0_i32, %arg1 : i32, i32
  }
  func.func @transform_3(%arg0: i32, %arg1: i32) -> (i32, i32) {
    %c0_i32 = arith.constant 0 : i32
    %c0_i32_0 = arith.constant 0 : i32
    return %c0_i32, %arg1 : i32, i32
  }
  func.func @transform_4(%arg0: i32, %arg1: i32) -> (i32, i32) {
    %c0_i32 = arith.constant 0 : i32
    return %arg0, %arg1 : i32, i32
  }
  func.func @transform_5(%arg0: i32, %arg1: i32) -> (i32, i32) {
    %c0_i32 = arith.constant 0 : i32
    return %arg0, %arg1 : i32, i32
  }
}

module attributes {stable_mosaic.version = 11 : i64} {
  func.func @kernel(%arg0: i32, %arg1: i32, %arg2: memref<512x8xf32, #tpu.memory_space<vmem>>, %arg3: memref<8x8xbf16, #tpu.memory_space<vmem>>, %arg4: memref<1x8xf32, #tpu.memory_space<vmem>>, %arg5: memref<1x8xf32, #tpu.memory_space<vmem>>, %arg6: memref<1x8xf32, #tpu.memory_space<vmem>>, %arg7: memref<1x8xf32, #tpu.memory_space<vmem>>, %arg8: memref<512x8xf32, #tpu.memory_space<vmem>>) attributes {dimension_semantics = [#tpu.dimension_semantics<parallel>, #tpu.dimension_semantics<parallel>], iteration_bounds = array<i64: 1, 1>, scalar_prefetch = 0 : i64, scratch_operands = 0 : i64, tpu.core_type = #tpu.core_type<tc>, window_params = [{transform_indices = @transform_0, window_bounds = array<i64: 512, 8>}, {transform_indices = @transform_1, window_bounds = array<i64: 8, 8>}, {pipeline_mode = #tpu.pipeline_mode<synchronous>, transform_indices = @transform_2, window_bounds = array<i64: 1, 8>}, {pipeline_mode = #tpu.pipeline_mode<synchronous>, transform_indices = @transform_3, window_bounds = array<i64: 1, 8>}, {transform_indices = @transform_4, window_bounds = array<i64: 1, 8>}, {transform_indices = @transform_5, window_bounds = array<i64: 1, 8>}, {transform_indices = @transform_6, window_bounds = array<i64: 512, 8>}]} {
    %c0 = arith.constant 0 : index
    %c0_0 = arith.constant 0 : index
    %0 = vector.load %arg2[%c0, %c0_0] : memref<512x8xf32, #tpu.memory_space<vmem>>, vector<512x8xf32>
    %c0_1 = arith.constant 0 : index
    %c0_2 = arith.constant 0 : index
    %1 = vector.load %arg4[%c0_1, %c0_2] : memref<1x8xf32, #tpu.memory_space<vmem>>, vector<1x8xf32>
    %2 = vector.broadcast %1 : vector<1x8xf32> to vector<512x8xf32>
    %3 = arith.mulf %0, %2 : vector<512x8xf32>
    %c0_3 = arith.constant 0 : index
    %c0_4 = arith.constant 0 : index
    %4 = vector.load %arg5[%c0_3, %c0_4] : memref<1x8xf32, #tpu.memory_space<vmem>>, vector<1x8xf32>
    %5 = vector.broadcast %4 : vector<1x8xf32> to vector<512x8xf32>
    %6 = arith.addf %3, %5 : vector<512x8xf32>
    %7 = arith.truncf %6 : vector<512x8xf32> to vector<512x8xbf16>
    %c0_5 = arith.constant 0 : index
    %c0_6 = arith.constant 0 : index
    %8 = vector.load %arg3[%c0_5, %c0_6] : memref<8x8xbf16, #tpu.memory_space<vmem>>, vector<8x8xbf16>
    %cst = arith.constant dense<0.000000e+00> : vector<512x8xf32>
    %9 = tpu.matmul %7, %8, %cst {dimension_numbers = #tpu.dot_dimension_numbers<[1], [0], [0], [1], [0, 0, 1, 1], [], []>} : vector<512x8xbf16>, vector<8x8xbf16>, vector<512x8xf32> -> vector<512x8xf32>
    %c0_7 = arith.constant 0 : index
    %c0_8 = arith.constant 0 : index
    %10 = vector.load %arg6[%c0_7, %c0_8] : memref<1x8xf32, #tpu.memory_space<vmem>>, vector<1x8xf32>
    %11 = vector.broadcast %10 : vector<1x8xf32> to vector<512x8xf32>
    %12 = arith.mulf %9, %11 : vector<512x8xf32>
    %c0_9 = arith.constant 0 : index
    %c0_10 = arith.constant 0 : index
    %13 = vector.load %arg7[%c0_9, %c0_10] : memref<1x8xf32, #tpu.memory_space<vmem>>, vector<1x8xf32>
    %14 = vector.broadcast %13 : vector<1x8xf32> to vector<512x8xf32>
    %15 = arith.addf %12, %14 : vector<512x8xf32>
    %cst_11 = arith.constant 0.000000e+00 : f32
    %16 = vector.broadcast %cst_11 : f32 to vector<512x8xf32>
    %17 = arith.maximumf %15, %16 : vector<512x8xf32>
    %c0_12 = arith.constant 0 : index
    %c0_13 = arith.constant 0 : index
    %18 = vector.load %arg8[%c0_12, %c0_13] : memref<512x8xf32, #tpu.memory_space<vmem>>, vector<512x8xf32>
    tpu.vector_store %arg8[%c0_12, %c0_13], %17 {strides = array<i32>} : memref<512x8xf32, #tpu.memory_space<vmem>>, vector<512x8xf32>,
    return
  }
  func.func @transform_0(%arg0: i32, %arg1: i32) -> (i32, i32) {
    %c0_i32 = arith.constant 0 : i32
    %c0_i32_0 = arith.constant 0 : i32
    return %arg0, %c0_i32 : i32, i32
  }
  func.func @transform_1(%arg0: i32, %arg1: i32) -> (i32, i32) {
    %c0_i32 = arith.constant 0 : i32
    %c0_i32_0 = arith.constant 0 : i32
    return %c0_i32, %arg1 : i32, i32
  }
  func.func @transform_2(%arg0: i32, %arg1: i32) -> (i32, i32) {
    %c0_i32 = arith.constant 0 : i32
    %c0_i32_0 = arith.constant 0 : i32
    %c0_i32_1 = arith.constant 0 : i32
    return %c0_i32, %c0_i32_0 : i32, i32
  }
  func.func @transform_3(%arg0: i32, %arg1: i32) -> (i32, i32) {
    %c0_i32 = arith.constant 0 : i32
    %c0_i32_0 = arith.constant 0 : i32
    %c0_i32_1 = arith.constant 0 : i32
    return %c0_i32, %c0_i32_0 : i32, i32
  }
  func.func @transform_4(%arg0: i32, %arg1: i32) -> (i32, i32) {
    %c0_i32 = arith.constant 0 : i32
    %c0_i32_0 = arith.constant 0 : i32
    return %c0_i32, %arg1 : i32, i32
  }
  func.func @transform_5(%arg0: i32, %arg1: i32) -> (i32, i32) {
    %c0_i32 = arith.constant 0 : i32
    %c0_i32_0 = arith.constant 0 : i32
    return %c0_i32, %arg1 : i32, i32
  }
  func.func @transform_6(%arg0: i32, %arg1: i32) -> (i32, i32) {
    %c0_i32 = arith.constant 0 : i32
    return %arg0, %arg1 : i32, i32
  }
}

module attributes {stable_mosaic.version = 11 : i64} {
  func.func @_dw_merged_kernel(%arg0: i32, %arg1: i32, %arg2: memref<1x16x16x8xf32, #tpu.memory_space<vmem>>, %arg3: memref<7x7x8xf32, #tpu.memory_space<vmem>>, %arg4: memref<1x1x8xf32, #tpu.memory_space<vmem>>, %arg5: memref<1x16x16x8xf32, #tpu.memory_space<vmem>>, %arg6: memref<22x27x8xf32, #tpu.memory_space<vmem>>) attributes {dimension_semantics = [#tpu.dimension_semantics<parallel>, #tpu.dimension_semantics<parallel>], iteration_bounds = array<i64: 2, 1>, scalar_prefetch = 0 : i64, scratch_operands = 1 : i64, tpu.core_type = #tpu.core_type<tc>, window_params = [{transform_indices = @transform_0, window_bounds = array<i64: 1, 16, 16, 8>}, {transform_indices = @transform_1, window_bounds = array<i64: 7, 7, 8>}, {transform_indices = @transform_2, window_bounds = array<i64: 1, 1, 8>}, {transform_indices = @transform_3, window_bounds = array<i64: 1, 16, 16, 8>}]} {
    %cst = arith.constant 0.000000e+00 : f32
    %0 = vector.broadcast %cst : f32 to vector<22x27x8xf32>
    %c0 = arith.constant 0 : index
    %c0_0 = arith.constant 0 : index
    %c0_1 = arith.constant 0 : index
    %1 = vector.load %arg6[%c0, %c0_0, %c0_1] : memref<22x27x8xf32, #tpu.memory_space<vmem>>, vector<22x27x8xf32>
    tpu.vector_store %arg6[%c0, %c0_0, %c0_1], %0 {strides = array<i32>} : memref<22x27x8xf32, #tpu.memory_space<vmem>>, vector<22x27x8xf32>,
    %c0_2 = arith.constant 0 : index
    %c0_3 = arith.constant 0 : index
    %c0_4 = arith.constant 0 : index
    %c0_5 = arith.constant 0 : index
    %2 = vector.load %arg2[%c0_2, %c0_3, %c0_4, %c0_5] : memref<1x16x16x8xf32, #tpu.memory_space<vmem>>, vector<1x16x16x8xf32>
    %3 = vector.shape_cast %2 : vector<1x16x16x8xf32> to vector<16x16x8xf32>
    %c3 = arith.constant 3 : index
    %c8 = arith.constant 8 : index
    %c0_6 = arith.constant 0 : index
    %4 = vector.load %arg6[%c3, %c8, %c0_6] : memref<22x27x8xf32, #tpu.memory_space<vmem>>, vector<16x16x8xf32>
    tpu.vector_store %arg6[%c3, %c8, %c0_6], %3 {strides = array<i32>} : memref<22x27x8xf32, #tpu.memory_space<vmem>>, vector<16x16x8xf32>,
    %c0_7 = arith.constant 0 : index
    %c0_8 = arith.constant 0 : index
    %c0_9 = arith.constant 0 : index
    %5 = vector.load %arg3[%c0_7, %c0_8, %c0_9] : memref<7x7x8xf32, #tpu.memory_space<vmem>>, vector<7x7x8xf32>
    %cst_10 = arith.constant 0.000000e+00 : f32
    %6 = vector.broadcast %cst_10 : f32 to vector<16x16x8xf32>
    %c0_11 = arith.constant 0 : index
    %c5 = arith.constant 5 : index
    %c0_12 = arith.constant 0 : index
    %7 = vector.load %arg6[%c0_11, %c5, %c0_12] : memref<22x27x8xf32, #tpu.memory_space<vmem>>, vector<16x16x8xf32>
    %8 = vector.extract_strided_slice %5 {offsets = [0, 0, 0], sizes = [1, 1, 8], strides = [1, 1, 1]} : vector<7x7x8xf32> to vector<1x1x8xf32>
    %9 = vector.shape_cast %8 : vector<1x1x8xf32> to vector<8xf32>
    %10 = vector.shape_cast %9 : vector<8xf32> to vector<1x1x8xf32>
    %11 = vector.broadcast %10 : vector<1x1x8xf32> to vector<16x16x8xf32>
    %12 = arith.mulf %7, %11 : vector<16x16x8xf32>
    %13 = arith.addf %6, %12 : vector<16x16x8xf32>
    %c0_13 = arith.constant 0 : index
    %c6 = arith.constant 6 : index
    %c0_14 = arith.constant 0 : index
    %14 = vector.load %arg6[%c0_13, %c6, %c0_14] : memref<22x27x8xf32, #tpu.memory_space<vmem>>, vector<16x16x8xf32>
    %15 = vector.extract_strided_slice %5 {offsets = [0, 1, 0], sizes = [1, 1, 8], strides = [1, 1, 1]} : vector<7x7x8xf32> to vector<1x1x8xf32>
    %16 = vector.shape_cast %15 : vector<1x1x8xf32> to vector<8xf32>
    %17 = vector.shape_cast %16 : vector<8xf32> to vector<1x1x8xf32>
    %18 = vector.broadcast %17 : vector<1x1x8xf32> to vector<16x16x8xf32>
    %19 = arith.mulf %14, %18 : vector<16x16x8xf32>
    %20 = arith.addf %13, %19 : vector<16x16x8xf32>
    %c0_15 = arith.constant 0 : index
    %c7 = arith.constant 7 : index
    %c0_16 = arith.constant 0 : index
    %21 = vector.load %arg6[%c0_15, %c7, %c0_16] : memref<22x27x8xf32, #tpu.memory_space<vmem>>, vector<16x16x8xf32>
    %22 = vector.extract_strided_slice %5 {offsets = [0, 2, 0], sizes = [1, 1, 8], strides = [1, 1, 1]} : vector<7x7x8xf32> to vector<1x1x8xf32>
    %23 = vector.shape_cast %22 : vector<1x1x8xf32> to vector<8xf32>
    %24 = vector.shape_cast %23 : vector<8xf32> to vector<1x1x8xf32>
    %25 = vector.broadcast %24 : vector<1x1x8xf32> to vector<16x16x8xf32>
    %26 = arith.mulf %21, %25 : vector<16x16x8xf32>
    %27 = arith.addf %20, %26 : vector<16x16x8xf32>
    %c0_17 = arith.constant 0 : index
    %c8_18 = arith.constant 8 : index
    %c0_19 = arith.constant 0 : index
    %28 = vector.load %arg6[%c0_17, %c8_18, %c0_19] : memref<22x27x8xf32, #tpu.memory_space<vmem>>, vector<16x16x8xf32>
    %29 = vector.extract_strided_slice %5 {offsets = [0, 3, 0], sizes = [1, 1, 8], strides = [1, 1, 1]} : vector<7x7x8xf32> to vector<1x1x8xf32>
    %30 = vector.shape_cast %29 : vector<1x1x8xf32> to vector<8xf32>
    %31 = vector.shape_cast %30 : vector<8xf32> to vector<1x1x8xf32>
    %32 = vector.broadcast %31 : vector<1x1x8xf32> to vector<16x16x8xf32>
    %33 = arith.mulf %28, %32 : vector<16x16x8xf32>
    %34 = arith.addf %27, %33 : vector<16x16x8xf32>
    %c0_20 = arith.constant 0 : index
    %c9 = arith.constant 9 : index
    %c0_21 = arith.constant 0 : index
    %35 = vector.load %arg6[%c0_20, %c9, %c0_21] : memref<22x27x8xf32, #tpu.memory_space<vmem>>, vector<16x16x8xf32>
    %36 = vector.extract_strided_slice %5 {offsets = [0, 4, 0], sizes = [1, 1, 8], strides = [1, 1, 1]} : vector<7x7x8xf32> to vector<1x1x8xf32>
    %37 = vector.shape_cast %36 : vector<1x1x8xf32> to vector<8xf32>
    %38 = vector.shape_cast %37 : vector<8xf32> to vector<1x1x8xf32>
    %39 = vector.broadcast %38 : vector<1x1x8xf32> to vector<16x16x8xf32>
    %40 = arith.mulf %35, %39 : vector<16x16x8xf32>
    %41 = arith.addf %34, %40 : vector<16x16x8xf32>
    %c0_22 = arith.constant 0 : index
    %c10 = arith.constant 10 : index
    %c0_23 = arith.constant 0 : index
    %42 = vector.load %arg6[%c0_22, %c10, %c0_23] : memref<22x27x8xf32, #tpu.memory_space<vmem>>, vector<16x16x8xf32>
    %43 = vector.extract_strided_slice %5 {offsets = [0, 5, 0], sizes = [1, 1, 8], strides = [1, 1, 1]} : vector<7x7x8xf32> to vector<1x1x8xf32>
    %44 = vector.shape_cast %43 : vector<1x1x8xf32> to vector<8xf32>
    %45 = vector.shape_cast %44 : vector<8xf32> to vector<1x1x8xf32>
    %46 = vector.broadcast %45 : vector<1x1x8xf32> to vector<16x16x8xf32>
    %47 = arith.mulf %42, %46 : vector<16x16x8xf32>
    %48 = arith.addf %41, %47 : vector<16x16x8xf32>
    %c0_24 = arith.constant 0 : index
    %c11 = arith.constant 11 : index
    %c0_25 = arith.constant 0 : index
    %49 = vector.load %arg6[%c0_24, %c11, %c0_25] : memref<22x27x8xf32, #tpu.memory_space<vmem>>, vector<16x16x8xf32>
    %50 = vector.extract_strided_slice %5 {offsets = [0, 6, 0], sizes = [1, 1, 8], strides = [1, 1, 1]} : vector<7x7x8xf32> to vector<1x1x8xf32>
    %51 = vector.shape_cast %50 : vector<1x1x8xf32> to vector<8xf32>
    %52 = vector.shape_cast %51 : vector<8xf32> to vector<1x1x8xf32>
    %53 = vector.broadcast %52 : vector<1x1x8xf32> to vector<16x16x8xf32>
    %54 = arith.mulf %49, %53 : vector<16x16x8xf32>
    %55 = arith.addf %48, %54 : vector<16x16x8xf32>
    %c1 = arith.constant 1 : index
    %c5_26 = arith.constant 5 : index
    %c0_27 = arith.constant 0 : index
    %56 = vector.load %arg6[%c1, %c5_26, %c0_27] : memref<22x27x8xf32, #tpu.memory_space<vmem>>, vector<16x16x8xf32>
    %57 = vector.extract_strided_slice %5 {offsets = [1, 0, 0], sizes = [1, 1, 8], strides = [1, 1, 1]} : vector<7x7x8xf32> to vector<1x1x8xf32>
    %58 = vector.shape_cast %57 : vector<1x1x8xf32> to vector<8xf32>
    %59 = vector.shape_cast %58 : vector<8xf32> to vector<1x1x8xf32>
    %60 = vector.broadcast %59 : vector<1x1x8xf32> to vector<16x16x8xf32>
    %61 = arith.mulf %56, %60 : vector<16x16x8xf32>
    %62 = arith.addf %55, %61 : vector<16x16x8xf32>
    %c1_28 = arith.constant 1 : index
    %c6_29 = arith.constant 6 : index
    %c0_30 = arith.constant 0 : index
    %63 = vector.load %arg6[%c1_28, %c6_29, %c0_30] : memref<22x27x8xf32, #tpu.memory_space<vmem>>, vector<16x16x8xf32>
    %64 = vector.extract_strided_slice %5 {offsets = [1, 1, 0], sizes = [1, 1, 8], strides = [1, 1, 1]} : vector<7x7x8xf32> to vector<1x1x8xf32>
    %65 = vector.shape_cast %64 : vector<1x1x8xf32> to vector<8xf32>
    %66 = vector.shape_cast %65 : vector<8xf32> to vector<1x1x8xf32>
    %67 = vector.broadcast %66 : vector<1x1x8xf32> to vector<16x16x8xf32>
    %68 = arith.mulf %63, %67 : vector<16x16x8xf32>
    %69 = arith.addf %62, %68 : vector<16x16x8xf32>
    %c1_31 = arith.constant 1 : index
    %c7_32 = arith.constant 7 : index
    %c0_33 = arith.constant 0 : index
    %70 = vector.load %arg6[%c1_31, %c7_32, %c0_33] : memref<22x27x8xf32, #tpu.memory_space<vmem>>, vector<16x16x8xf32>
    %71 = vector.extract_strided_slice %5 {offsets = [1, 2, 0], sizes = [1, 1, 8], strides = [1, 1, 1]} : vector<7x7x8xf32> to vector<1x1x8xf32>
    %72 = vector.shape_cast %71 : vector<1x1x8xf32> to vector<8xf32>
    %73 = vector.shape_cast %72 : vector<8xf32> to vector<1x1x8xf32>
    %74 = vector.broadcast %73 : vector<1x1x8xf32> to vector<16x16x8xf32>
    %75 = arith.mulf %70, %74 : vector<16x16x8xf32>
    %76 = arith.addf %69, %75 : vector<16x16x8xf32>
    %c1_34 = arith.constant 1 : index
    %c8_35 = arith.constant 8 : index
    %c0_36 = arith.constant 0 : index
    %77 = vector.load %arg6[%c1_34, %c8_35, %c0_36] : memref<22x27x8xf32, #tpu.memory_space<vmem>>, vector<16x16x8xf32>
    %78 = vector.extract_strided_slice %5 {offsets = [1, 3, 0], sizes = [1, 1, 8], strides = [1, 1, 1]} : vector<7x7x8xf32> to vector<1x1x8xf32>
    %79 = vector.shape_cast %78 : vector<1x1x8xf32> to vector<8xf32>
    %80 = vector.shape_cast %79 : vector<8xf32> to vector<1x1x8xf32>
    %81 = vector.broadcast %80 : vector<1x1x8xf32> to vector<16x16x8xf32>
    %82 = arith.mulf %77, %81 : vector<16x16x8xf32>
    %83 = arith.addf %76, %82 : vector<16x16x8xf32>
    %c1_37 = arith.constant 1 : index
    %c9_38 = arith.constant 9 : index
    %c0_39 = arith.constant 0 : index
    %84 = vector.load %arg6[%c1_37, %c9_38, %c0_39] : memref<22x27x8xf32, #tpu.memory_space<vmem>>, vector<16x16x8xf32>
    %85 = vector.extract_strided_slice %5 {offsets = [1, 4, 0], sizes = [1, 1, 8], strides = [1, 1, 1]} : vector<7x7x8xf32> to vector<1x1x8xf32>
    %86 = vector.shape_cast %85 : vector<1x1x8xf32> to vector<8xf32>
    %87 = vector.shape_cast %86 : vector<8xf32> to vector<1x1x8xf32>
    %88 = vector.broadcast %87 : vector<1x1x8xf32> to vector<16x16x8xf32>
    %89 = arith.mulf %84, %88 : vector<16x16x8xf32>
    %90 = arith.addf %83, %89 : vector<16x16x8xf32>
    %c1_40 = arith.constant 1 : index
    %c10_41 = arith.constant 10 : index
    %c0_42 = arith.constant 0 : index
    %91 = vector.load %arg6[%c1_40, %c10_41, %c0_42] : memref<22x27x8xf32, #tpu.memory_space<vmem>>, vector<16x16x8xf32>
    %92 = vector.extract_strided_slice %5 {offsets = [1, 5, 0], sizes = [1, 1, 8], strides = [1, 1, 1]} : vector<7x7x8xf32> to vector<1x1x8xf32>
    %93 = vector.shape_cast %92 : vector<1x1x8xf32> to vector<8xf32>
    %94 = vector.shape_cast %93 : vector<8xf32> to vector<1x1x8xf32>
    %95 = vector.broadcast %94 : vector<1x1x8xf32> to vector<16x16x8xf32>
    %96 = arith.mulf %91, %95 : vector<16x16x8xf32>
    %97 = arith.addf %90, %96 : vector<16x16x8xf32>
    %c1_43 = arith.constant 1 : index
    %c11_44 = arith.constant 11 : index
    %c0_45 = arith.constant 0 : index
    %98 = vector.load %arg6[%c1_43, %c11_44, %c0_45] : memref<22x27x8xf32, #tpu.memory_space<vmem>>, vector<16x16x8xf32>
    %99 = vector.extract_strided_slice %5 {offsets = [1, 6, 0], sizes = [1, 1, 8], strides = [1, 1, 1]} : vector<7x7x8xf32> to vector<1x1x8xf32>
    %100 = vector.shape_cast %99 : vector<1x1x8xf32> to vector<8xf32>
    %101 = vector.shape_cast %100 : vector<8xf32> to vector<1x1x8xf32>
    %102 = vector.broadcast %101 : vector<1x1x8xf32> to vector<16x16x8xf32>
    %103 = arith.mulf %98, %102 : vector<16x16x8xf32>
    %104 = arith.addf %97, %103 : vector<16x16x8xf32>
    %c2 = arith.constant 2 : index
    %c5_46 = arith.constant 5 : index
    %c0_47 = arith.constant 0 : index
    %105 = vector.load %arg6[%c2, %c5_46, %c0_47] : memref<22x27x8xf32, #tpu.memory_space<vmem>>, vector<16x16x8xf32>
    %106 = vector.extract_strided_slice %5 {offsets = [2, 0, 0], sizes = [1, 1, 8], strides = [1, 1, 1]} : vector<7x7x8xf32> to vector<1x1x8xf32>
    %107 = vector.shape_cast %106 : vector<1x1x8xf32> to vector<8xf32>
    %108 = vector.shape_cast %107 : vector<8xf32> to vector<1x1x8xf32>
    %109 = vector.broadcast %108 : vector<1x1x8xf32> to vector<16x16x8xf32>
    %110 = arith.mulf %105, %109 : vector<16x16x8xf32>
    %111 = arith.addf %104, %110 : vector<16x16x8xf32>
    %c2_48 = arith.constant 2 : index
    %c6_49 = arith.constant 6 : index
    %c0_50 = arith.constant 0 : index
    %112 = vector.load %arg6[%c2_48, %c6_49, %c0_50] : memref<22x27x8xf32, #tpu.memory_space<vmem>>, vector<16x16x8xf32>
    %113 = vector.extract_strided_slice %5 {offsets = [2, 1, 0], sizes = [1, 1, 8], strides = [1, 1, 1]} : vector<7x7x8xf32> to vector<1x1x8xf32>
    %114 = vector.shape_cast %113 : vector<1x1x8xf32> to vector<8xf32>
    %115 = vector.shape_cast %114 : vector<8xf32> to vector<1x1x8xf32>
    %116 = vector.broadcast %115 : vector<1x1x8xf32> to vector<16x16x8xf32>
    %117 = arith.mulf %112, %116 : vector<16x16x8xf32>
    %118 = arith.addf %111, %117 : vector<16x16x8xf32>
    %c2_51 = arith.constant 2 : index
    %c7_52 = arith.constant 7 : index
    %c0_53 = arith.constant 0 : index
    %119 = vector.load %arg6[%c2_51, %c7_52, %c0_53] : memref<22x27x8xf32, #tpu.memory_space<vmem>>, vector<16x16x8xf32>
    %120 = vector.extract_strided_slice %5 {offsets = [2, 2, 0], sizes = [1, 1, 8], strides = [1, 1, 1]} : vector<7x7x8xf32> to vector<1x1x8xf32>
    %121 = vector.shape_cast %120 : vector<1x1x8xf32> to vector<8xf32>
    %122 = vector.shape_cast %121 : vector<8xf32> to vector<1x1x8xf32>
    %123 = vector.broadcast %122 : vector<1x1x8xf32> to vector<16x16x8xf32>
    %124 = arith.mulf %119, %123 : vector<16x16x8xf32>
    %125 = arith.addf %118, %124 : vector<16x16x8xf32>
    %c2_54 = arith.constant 2 : index
    %c8_55 = arith.constant 8 : index
    %c0_56 = arith.constant 0 : index
    %126 = vector.load %arg6[%c2_54, %c8_55, %c0_56] : memref<22x27x8xf32, #tpu.memory_space<vmem>>, vector<16x16x8xf32>
    %127 = vector.extract_strided_slice %5 {offsets = [2, 3, 0], sizes = [1, 1, 8], strides = [1, 1, 1]} : vector<7x7x8xf32> to vector<1x1x8xf32>
    %128 = vector.shape_cast %127 : vector<1x1x8xf32> to vector<8xf32>
    %129 = vector.shape_cast %128 : vector<8xf32> to vector<1x1x8xf32>
    %130 = vector.broadcast %129 : vector<1x1x8xf32> to vector<16x16x8xf32>
    %131 = arith.mulf %126, %130 : vector<16x16x8xf32>
    %132 = arith.addf %125, %131 : vector<16x16x8xf32>
    %c2_57 = arith.constant 2 : index
    %c9_58 = arith.constant 9 : index
    %c0_59 = arith.constant 0 : index
    %133 = vector.load %arg6[%c2_57, %c9_58, %c0_59] : memref<22x27x8xf32, #tpu.memory_space<vmem>>, vector<16x16x8xf32>
    %134 = vector.extract_strided_slice %5 {offsets = [2, 4, 0], sizes = [1, 1, 8], strides = [1, 1, 1]} : vector<7x7x8xf32> to vector<1x1x8xf32>
    %135 = vector.shape_cast %134 : vector<1x1x8xf32> to vector<8xf32>
    %136 = vector.shape_cast %135 : vector<8xf32> to vector<1x1x8xf32>
    %137 = vector.broadcast %136 : vector<1x1x8xf32> to vector<16x16x8xf32>
    %138 = arith.mulf %133, %137 : vector<16x16x8xf32>
    %139 = arith.addf %132, %138 : vector<16x16x8xf32>
    %c2_60 = arith.constant 2 : index
    %c10_61 = arith.constant 10 : index
    %c0_62 = arith.constant 0 : index
    %140 = vector.load %arg6[%c2_60, %c10_61, %c0_62] : memref<22x27x8xf32, #tpu.memory_space<vmem>>, vector<16x16x8xf32>
    %141 = vector.extract_strided_slice %5 {offsets = [2, 5, 0], sizes = [1, 1, 8], strides = [1, 1, 1]} : vector<7x7x8xf32> to vector<1x1x8xf32>
    %142 = vector.shape_cast %141 : vector<1x1x8xf32> to vector<8xf32>
    %143 = vector.shape_cast %142 : vector<8xf32> to vector<1x1x8xf32>
    %144 = vector.broadcast %143 : vector<1x1x8xf32> to vector<16x16x8xf32>
    %145 = arith.mulf %140, %144 : vector<16x16x8xf32>
    %146 = arith.addf %139, %145 : vector<16x16x8xf32>
    %c2_63 = arith.constant 2 : index
    %c11_64 = arith.constant 11 : index
    %c0_65 = arith.constant 0 : index
    %147 = vector.load %arg6[%c2_63, %c11_64, %c0_65] : memref<22x27x8xf32, #tpu.memory_space<vmem>>, vector<16x16x8xf32>
    %148 = vector.extract_strided_slice %5 {offsets = [2, 6, 0], sizes = [1, 1, 8], strides = [1, 1, 1]} : vector<7x7x8xf32> to vector<1x1x8xf32>
    %149 = vector.shape_cast %148 : vector<1x1x8xf32> to vector<8xf32>
    %150 = vector.shape_cast %149 : vector<8xf32> to vector<1x1x8xf32>
    %151 = vector.broadcast %150 : vector<1x1x8xf32> to vector<16x16x8xf32>
    %152 = arith.mulf %147, %151 : vector<16x16x8xf32>
    %153 = arith.addf %146, %152 : vector<16x16x8xf32>
    %c3_66 = arith.constant 3 : index
    %c5_67 = arith.constant 5 : index
    %c0_68 = arith.constant 0 : index
    %154 = vector.load %arg6[%c3_66, %c5_67, %c0_68] : memref<22x27x8xf32, #tpu.memory_space<vmem>>, vector<16x16x8xf32>
    %155 = vector.extract_strided_slice %5 {offsets = [3, 0, 0], sizes = [1, 1, 8], strides = [1, 1, 1]} : vector<7x7x8xf32> to vector<1x1x8xf32>
    %156 = vector.shape_cast %155 : vector<1x1x8xf32> to vector<8xf32>
    %157 = vector.shape_cast %156 : vector<8xf32> to vector<1x1x8xf32>
    %158 = vector.broadcast %157 : vector<1x1x8xf32> to vector<16x16x8xf32>
    %159 = arith.mulf %154, %158 : vector<16x16x8xf32>
    %160 = arith.addf %153, %159 : vector<16x16x8xf32>
    %c3_69 = arith.constant 3 : index
    %c6_70 = arith.constant 6 : index
    %c0_71 = arith.constant 0 : index
    %161 = vector.load %arg6[%c3_69, %c6_70, %c0_71] : memref<22x27x8xf32, #tpu.memory_space<vmem>>, vector<16x16x8xf32>
    %162 = vector.extract_strided_slice %5 {offsets = [3, 1, 0], sizes = [1, 1, 8], strides = [1, 1, 1]} : vector<7x7x8xf32> to vector<1x1x8xf32>
    %163 = vector.shape_cast %162 : vector<1x1x8xf32> to vector<8xf32>
    %164 = vector.shape_cast %163 : vector<8xf32> to vector<1x1x8xf32>
    %165 = vector.broadcast %164 : vector<1x1x8xf32> to vector<16x16x8xf32>
    %166 = arith.mulf %161, %165 : vector<16x16x8xf32>
    %167 = arith.addf %160, %166 : vector<16x16x8xf32>
    %c3_72 = arith.constant 3 : index
    %c7_73 = arith.constant 7 : index
    %c0_74 = arith.constant 0 : index
    %168 = vector.load %arg6[%c3_72, %c7_73, %c0_74] : memref<22x27x8xf32, #tpu.memory_space<vmem>>, vector<16x16x8xf32>
    %169 = vector.extract_strided_slice %5 {offsets = [3, 2, 0], sizes = [1, 1, 8], strides = [1, 1, 1]} : vector<7x7x8xf32> to vector<1x1x8xf32>
    %170 = vector.shape_cast %169 : vector<1x1x8xf32> to vector<8xf32>
    %171 = vector.shape_cast %170 : vector<8xf32> to vector<1x1x8xf32>
    %172 = vector.broadcast %171 : vector<1x1x8xf32> to vector<16x16x8xf32>
    %173 = arith.mulf %168, %172 : vector<16x16x8xf32>
    %174 = arith.addf %167, %173 : vector<16x16x8xf32>
    %c3_75 = arith.constant 3 : index
    %c8_76 = arith.constant 8 : index
    %c0_77 = arith.constant 0 : index
    %175 = vector.load %arg6[%c3_75, %c8_76, %c0_77] : memref<22x27x8xf32, #tpu.memory_space<vmem>>, vector<16x16x8xf32>
    %176 = vector.extract_strided_slice %5 {offsets = [3, 3, 0], sizes = [1, 1, 8], strides = [1, 1, 1]} : vector<7x7x8xf32> to vector<1x1x8xf32>
    %177 = vector.shape_cast %176 : vector<1x1x8xf32> to vector<8xf32>
    %178 = vector.shape_cast %177 : vector<8xf32> to vector<1x1x8xf32>
    %179 = vector.broadcast %178 : vector<1x1x8xf32> to vector<16x16x8xf32>
    %180 = arith.mulf %175, %179 : vector<16x16x8xf32>
    %181 = arith.addf %174, %180 : vector<16x16x8xf32>
    %c3_78 = arith.constant 3 : index
    %c9_79 = arith.constant 9 : index
    %c0_80 = arith.constant 0 : index
    %182 = vector.load %arg6[%c3_78, %c9_79, %c0_80] : memref<22x27x8xf32, #tpu.memory_space<vmem>>, vector<16x16x8xf32>
    %183 = vector.extract_strided_slice %5 {offsets = [3, 4, 0], sizes = [1, 1, 8], strides = [1, 1, 1]} : vector<7x7x8xf32> to vector<1x1x8xf32>
    %184 = vector.shape_cast %183 : vector<1x1x8xf32> to vector<8xf32>
    %185 = vector.shape_cast %184 : vector<8xf32> to vector<1x1x8xf32>
    %186 = vector.broadcast %185 : vector<1x1x8xf32> to vector<16x16x8xf32>
    %187 = arith.mulf %182, %186 : vector<16x16x8xf32>
    %188 = arith.addf %181, %187 : vector<16x16x8xf32>
    %c3_81 = arith.constant 3 : index
    %c10_82 = arith.constant 10 : index
    %c0_83 = arith.constant 0 : index
    %189 = vector.load %arg6[%c3_81, %c10_82, %c0_83] : memref<22x27x8xf32, #tpu.memory_space<vmem>>, vector<16x16x8xf32>
    %190 = vector.extract_strided_slice %5 {offsets = [3, 5, 0], sizes = [1, 1, 8], strides = [1, 1, 1]} : vector<7x7x8xf32> to vector<1x1x8xf32>
    %191 = vector.shape_cast %190 : vector<1x1x8xf32> to vector<8xf32>
    %192 = vector.shape_cast %191 : vector<8xf32> to vector<1x1x8xf32>
    %193 = vector.broadcast %192 : vector<1x1x8xf32> to vector<16x16x8xf32>
    %194 = arith.mulf %189, %193 : vector<16x16x8xf32>
    %195 = arith.addf %188, %194 : vector<16x16x8xf32>
    %c3_84 = arith.constant 3 : index
    %c11_85 = arith.constant 11 : index
    %c0_86 = arith.constant 0 : index
    %196 = vector.load %arg6[%c3_84, %c11_85, %c0_86] : memref<22x27x8xf32, #tpu.memory_space<vmem>>, vector<16x16x8xf32>
    %197 = vector.extract_strided_slice %5 {offsets = [3, 6, 0], sizes = [1, 1, 8], strides = [1, 1, 1]} : vector<7x7x8xf32> to vector<1x1x8xf32>
    %198 = vector.shape_cast %197 : vector<1x1x8xf32> to vector<8xf32>
    %199 = vector.shape_cast %198 : vector<8xf32> to vector<1x1x8xf32>
    %200 = vector.broadcast %199 : vector<1x1x8xf32> to vector<16x16x8xf32>
    %201 = arith.mulf %196, %200 : vector<16x16x8xf32>
    %202 = arith.addf %195, %201 : vector<16x16x8xf32>
    %c4 = arith.constant 4 : index
    %c5_87 = arith.constant 5 : index
    %c0_88 = arith.constant 0 : index
    %203 = vector.load %arg6[%c4, %c5_87, %c0_88] : memref<22x27x8xf32, #tpu.memory_space<vmem>>, vector<16x16x8xf32>
    %204 = vector.extract_strided_slice %5 {offsets = [4, 0, 0], sizes = [1, 1, 8], strides = [1, 1, 1]} : vector<7x7x8xf32> to vector<1x1x8xf32>
    %205 = vector.shape_cast %204 : vector<1x1x8xf32> to vector<8xf32>
    %206 = vector.shape_cast %205 : vector<8xf32> to vector<1x1x8xf32>
    %207 = vector.broadcast %206 : vector<1x1x8xf32> to vector<16x16x8xf32>
    %208 = arith.mulf %203, %207 : vector<16x16x8xf32>
    %209 = arith.addf %202, %208 : vector<16x16x8xf32>
    %c4_89 = arith.constant 4 : index
    %c6_90 = arith.constant 6 : index
    %c0_91 = arith.constant 0 : index
    %210 = vector.load %arg6[%c4_89, %c6_90, %c0_91] : memref<22x27x8xf32, #tpu.memory_space<vmem>>, vector<16x16x8xf32>
    %211 = vector.extract_strided_slice %5 {offsets = [4, 1, 0], sizes = [1, 1, 8], strides = [1, 1, 1]} : vector<7x7x8xf32> to vector<1x1x8xf32>
    %212 = vector.shape_cast %211 : vector<1x1x8xf32> to vector<8xf32>
    %213 = vector.shape_cast %212 : vector<8xf32> to vector<1x1x8xf32>
    %214 = vector.broadcast %213 : vector<1x1x8xf32> to vector<16x16x8xf32>
    %215 = arith.mulf %210, %214 : vector<16x16x8xf32>
    %216 = arith.addf %209, %215 : vector<16x16x8xf32>
    %c4_92 = arith.constant 4 : index
    %c7_93 = arith.constant 7 : index
    %c0_94 = arith.constant 0 : index
    %217 = vector.load %arg6[%c4_92, %c7_93, %c0_94] : memref<22x27x8xf32, #tpu.memory_space<vmem>>, vector<16x16x8xf32>
    %218 = vector.extract_strided_slice %5 {offsets = [4, 2, 0], sizes = [1, 1, 8], strides = [1, 1, 1]} : vector<7x7x8xf32> to vector<1x1x8xf32>
    %219 = vector.shape_cast %218 : vector<1x1x8xf32> to vector<8xf32>
    %220 = vector.shape_cast %219 : vector<8xf32> to vector<1x1x8xf32>
    %221 = vector.broadcast %220 : vector<1x1x8xf32> to vector<16x16x8xf32>
    %222 = arith.mulf %217, %221 : vector<16x16x8xf32>
    %223 = arith.addf %216, %222 : vector<16x16x8xf32>
    %c4_95 = arith.constant 4 : index
    %c8_96 = arith.constant 8 : index
    %c0_97 = arith.constant 0 : index
    %224 = vector.load %arg6[%c4_95, %c8_96, %c0_97] : memref<22x27x8xf32, #tpu.memory_space<vmem>>, vector<16x16x8xf32>
    %225 = vector.extract_strided_slice %5 {offsets = [4, 3, 0], sizes = [1, 1, 8], strides = [1, 1, 1]} : vector<7x7x8xf32> to vector<1x1x8xf32>
    %226 = vector.shape_cast %225 : vector<1x1x8xf32> to vector<8xf32>
    %227 = vector.shape_cast %226 : vector<8xf32> to vector<1x1x8xf32>
    %228 = vector.broadcast %227 : vector<1x1x8xf32> to vector<16x16x8xf32>
    %229 = arith.mulf %224, %228 : vector<16x16x8xf32>
    %230 = arith.addf %223, %229 : vector<16x16x8xf32>
    %c4_98 = arith.constant 4 : index
    %c9_99 = arith.constant 9 : index
    %c0_100 = arith.constant 0 : index
    %231 = vector.load %arg6[%c4_98, %c9_99, %c0_100] : memref<22x27x8xf32, #tpu.memory_space<vmem>>, vector<16x16x8xf32>
    %232 = vector.extract_strided_slice %5 {offsets = [4, 4, 0], sizes = [1, 1, 8], strides = [1, 1, 1]} : vector<7x7x8xf32> to vector<1x1x8xf32>
    %233 = vector.shape_cast %232 : vector<1x1x8xf32> to vector<8xf32>
    %234 = vector.shape_cast %233 : vector<8xf32> to vector<1x1x8xf32>
    %235 = vector.broadcast %234 : vector<1x1x8xf32> to vector<16x16x8xf32>
    %236 = arith.mulf %231, %235 : vector<16x16x8xf32>
    %237 = arith.addf %230, %236 : vector<16x16x8xf32>
    %c4_101 = arith.constant 4 : index
    %c10_102 = arith.constant 10 : index
    %c0_103 = arith.constant 0 : index
    %238 = vector.load %arg6[%c4_101, %c10_102, %c0_103] : memref<22x27x8xf32, #tpu.memory_space<vmem>>, vector<16x16x8xf32>
    %239 = vector.extract_strided_slice %5 {offsets = [4, 5, 0], sizes = [1, 1, 8], strides = [1, 1, 1]} : vector<7x7x8xf32> to vector<1x1x8xf32>
    %240 = vector.shape_cast %239 : vector<1x1x8xf32> to vector<8xf32>
    %241 = vector.shape_cast %240 : vector<8xf32> to vector<1x1x8xf32>
    %242 = vector.broadcast %241 : vector<1x1x8xf32> to vector<16x16x8xf32>
    %243 = arith.mulf %238, %242 : vector<16x16x8xf32>
    %244 = arith.addf %237, %243 : vector<16x16x8xf32>
    %c4_104 = arith.constant 4 : index
    %c11_105 = arith.constant 11 : index
    %c0_106 = arith.constant 0 : index
    %245 = vector.load %arg6[%c4_104, %c11_105, %c0_106] : memref<22x27x8xf32, #tpu.memory_space<vmem>>, vector<16x16x8xf32>
    %246 = vector.extract_strided_slice %5 {offsets = [4, 6, 0], sizes = [1, 1, 8], strides = [1, 1, 1]} : vector<7x7x8xf32> to vector<1x1x8xf32>
    %247 = vector.shape_cast %246 : vector<1x1x8xf32> to vector<8xf32>
    %248 = vector.shape_cast %247 : vector<8xf32> to vector<1x1x8xf32>
    %249 = vector.broadcast %248 : vector<1x1x8xf32> to vector<16x16x8xf32>
    %250 = arith.mulf %245, %249 : vector<16x16x8xf32>
    %251 = arith.addf %244, %250 : vector<16x16x8xf32>
    %c5_107 = arith.constant 5 : index
    %c5_108 = arith.constant 5 : index
    %c0_109 = arith.constant 0 : index
    %252 = vector.load %arg6[%c5_107, %c5_108, %c0_109] : memref<22x27x8xf32, #tpu.memory_space<vmem>>, vector<16x16x8xf32>
    %253 = vector.extract_strided_slice %5 {offsets = [5, 0, 0], sizes = [1, 1, 8], strides = [1, 1, 1]} : vector<7x7x8xf32> to vector<1x1x8xf32>
    %254 = vector.shape_cast %253 : vector<1x1x8xf32> to vector<8xf32>
    %255 = vector.shape_cast %254 : vector<8xf32> to vector<1x1x8xf32>
    %256 = vector.broadcast %255 : vector<1x1x8xf32> to vector<16x16x8xf32>
    %257 = arith.mulf %252, %256 : vector<16x16x8xf32>
    %258 = arith.addf %251, %257 : vector<16x16x8xf32>
    %c5_110 = arith.constant 5 : index
    %c6_111 = arith.constant 6 : index
    %c0_112 = arith.constant 0 : index
    %259 = vector.load %arg6[%c5_110, %c6_111, %c0_112] : memref<22x27x8xf32, #tpu.memory_space<vmem>>, vector<16x16x8xf32>
    %260 = vector.extract_strided_slice %5 {offsets = [5, 1, 0], sizes = [1, 1, 8], strides = [1, 1, 1]} : vector<7x7x8xf32> to vector<1x1x8xf32>
    %261 = vector.shape_cast %260 : vector<1x1x8xf32> to vector<8xf32>
    %262 = vector.shape_cast %261 : vector<8xf32> to vector<1x1x8xf32>
    %263 = vector.broadcast %262 : vector<1x1x8xf32> to vector<16x16x8xf32>
    %264 = arith.mulf %259, %263 : vector<16x16x8xf32>
    %265 = arith.addf %258, %264 : vector<16x16x8xf32>
    %c5_113 = arith.constant 5 : index
    %c7_114 = arith.constant 7 : index
    %c0_115 = arith.constant 0 : index
    %266 = vector.load %arg6[%c5_113, %c7_114, %c0_115] : memref<22x27x8xf32, #tpu.memory_space<vmem>>, vector<16x16x8xf32>
    %267 = vector.extract_strided_slice %5 {offsets = [5, 2, 0], sizes = [1, 1, 8], strides = [1, 1, 1]} : vector<7x7x8xf32> to vector<1x1x8xf32>
    %268 = vector.shape_cast %267 : vector<1x1x8xf32> to vector<8xf32>
    %269 = vector.shape_cast %268 : vector<8xf32> to vector<1x1x8xf32>
    %270 = vector.broadcast %269 : vector<1x1x8xf32> to vector<16x16x8xf32>
    %271 = arith.mulf %266, %270 : vector<16x16x8xf32>
    %272 = arith.addf %265, %271 : vector<16x16x8xf32>
    %c5_116 = arith.constant 5 : index
    %c8_117 = arith.constant 8 : index
    %c0_118 = arith.constant 0 : index
    %273 = vector.load %arg6[%c5_116, %c8_117, %c0_118] : memref<22x27x8xf32, #tpu.memory_space<vmem>>, vector<16x16x8xf32>
    %274 = vector.extract_strided_slice %5 {offsets = [5, 3, 0], sizes = [1, 1, 8], strides = [1, 1, 1]} : vector<7x7x8xf32> to vector<1x1x8xf32>
    %275 = vector.shape_cast %274 : vector<1x1x8xf32> to vector<8xf32>
    %276 = vector.shape_cast %275 : vector<8xf32> to vector<1x1x8xf32>
    %277 = vector.broadcast %276 : vector<1x1x8xf32> to vector<16x16x8xf32>
    %278 = arith.mulf %273, %277 : vector<16x16x8xf32>
    %279 = arith.addf %272, %278 : vector<16x16x8xf32>
    %c5_119 = arith.constant 5 : index
    %c9_120 = arith.constant 9 : index
    %c0_121 = arith.constant 0 : index
    %280 = vector.load %arg6[%c5_119, %c9_120, %c0_121] : memref<22x27x8xf32, #tpu.memory_space<vmem>>, vector<16x16x8xf32>
    %281 = vector.extract_strided_slice %5 {offsets = [5, 4, 0], sizes = [1, 1, 8], strides = [1, 1, 1]} : vector<7x7x8xf32> to vector<1x1x8xf32>
    %282 = vector.shape_cast %281 : vector<1x1x8xf32> to vector<8xf32>
    %283 = vector.shape_cast %282 : vector<8xf32> to vector<1x1x8xf32>
    %284 = vector.broadcast %283 : vector<1x1x8xf32> to vector<16x16x8xf32>
    %285 = arith.mulf %280, %284 : vector<16x16x8xf32>
    %286 = arith.addf %279, %285 : vector<16x16x8xf32>
    %c5_122 = arith.constant 5 : index
    %c10_123 = arith.constant 10 : index
    %c0_124 = arith.constant 0 : index
    %287 = vector.load %arg6[%c5_122, %c10_123, %c0_124] : memref<22x27x8xf32, #tpu.memory_space<vmem>>, vector<16x16x8xf32>
    %288 = vector.extract_strided_slice %5 {offsets = [5, 5, 0], sizes = [1, 1, 8], strides = [1, 1, 1]} : vector<7x7x8xf32> to vector<1x1x8xf32>
    %289 = vector.shape_cast %288 : vector<1x1x8xf32> to vector<8xf32>
    %290 = vector.shape_cast %289 : vector<8xf32> to vector<1x1x8xf32>
    %291 = vector.broadcast %290 : vector<1x1x8xf32> to vector<16x16x8xf32>
    %292 = arith.mulf %287, %291 : vector<16x16x8xf32>
    %293 = arith.addf %286, %292 : vector<16x16x8xf32>
    %c5_125 = arith.constant 5 : index
    %c11_126 = arith.constant 11 : index
    %c0_127 = arith.constant 0 : index
    %294 = vector.load %arg6[%c5_125, %c11_126, %c0_127] : memref<22x27x8xf32, #tpu.memory_space<vmem>>, vector<16x16x8xf32>
    %295 = vector.extract_strided_slice %5 {offsets = [5, 6, 0], sizes = [1, 1, 8], strides = [1, 1, 1]} : vector<7x7x8xf32> to vector<1x1x8xf32>
    %296 = vector.shape_cast %295 : vector<1x1x8xf32> to vector<8xf32>
    %297 = vector.shape_cast %296 : vector<8xf32> to vector<1x1x8xf32>
    %298 = vector.broadcast %297 : vector<1x1x8xf32> to vector<16x16x8xf32>
    %299 = arith.mulf %294, %298 : vector<16x16x8xf32>
    %300 = arith.addf %293, %299 : vector<16x16x8xf32>
    %c6_128 = arith.constant 6 : index
    %c5_129 = arith.constant 5 : index
    %c0_130 = arith.constant 0 : index
    %301 = vector.load %arg6[%c6_128, %c5_129, %c0_130] : memref<22x27x8xf32, #tpu.memory_space<vmem>>, vector<16x16x8xf32>
    %302 = vector.extract_strided_slice %5 {offsets = [6, 0, 0], sizes = [1, 1, 8], strides = [1, 1, 1]} : vector<7x7x8xf32> to vector<1x1x8xf32>
    %303 = vector.shape_cast %302 : vector<1x1x8xf32> to vector<8xf32>
    %304 = vector.shape_cast %303 : vector<8xf32> to vector<1x1x8xf32>
    %305 = vector.broadcast %304 : vector<1x1x8xf32> to vector<16x16x8xf32>
    %306 = arith.mulf %301, %305 : vector<16x16x8xf32>
    %307 = arith.addf %300, %306 : vector<16x16x8xf32>
    %c6_131 = arith.constant 6 : index
    %c6_132 = arith.constant 6 : index
    %c0_133 = arith.constant 0 : index
    %308 = vector.load %arg6[%c6_131, %c6_132, %c0_133] : memref<22x27x8xf32, #tpu.memory_space<vmem>>, vector<16x16x8xf32>
    %309 = vector.extract_strided_slice %5 {offsets = [6, 1, 0], sizes = [1, 1, 8], strides = [1, 1, 1]} : vector<7x7x8xf32> to vector<1x1x8xf32>
    %310 = vector.shape_cast %309 : vector<1x1x8xf32> to vector<8xf32>
    %311 = vector.shape_cast %310 : vector<8xf32> to vector<1x1x8xf32>
    %312 = vector.broadcast %311 : vector<1x1x8xf32> to vector<16x16x8xf32>
    %313 = arith.mulf %308, %312 : vector<16x16x8xf32>
    %314 = arith.addf %307, %313 : vector<16x16x8xf32>
    %c6_134 = arith.constant 6 : index
    %c7_135 = arith.constant 7 : index
    %c0_136 = arith.constant 0 : index
    %315 = vector.load %arg6[%c6_134, %c7_135, %c0_136] : memref<22x27x8xf32, #tpu.memory_space<vmem>>, vector<16x16x8xf32>
    %316 = vector.extract_strided_slice %5 {offsets = [6, 2, 0], sizes = [1, 1, 8], strides = [1, 1, 1]} : vector<7x7x8xf32> to vector<1x1x8xf32>
    %317 = vector.shape_cast %316 : vector<1x1x8xf32> to vector<8xf32>
    %318 = vector.shape_cast %317 : vector<8xf32> to vector<1x1x8xf32>
    %319 = vector.broadcast %318 : vector<1x1x8xf32> to vector<16x16x8xf32>
    %320 = arith.mulf %315, %319 : vector<16x16x8xf32>
    %321 = arith.addf %314, %320 : vector<16x16x8xf32>
    %c6_137 = arith.constant 6 : index
    %c8_138 = arith.constant 8 : index
    %c0_139 = arith.constant 0 : index
    %322 = vector.load %arg6[%c6_137, %c8_138, %c0_139] : memref<22x27x8xf32, #tpu.memory_space<vmem>>, vector<16x16x8xf32>
    %323 = vector.extract_strided_slice %5 {offsets = [6, 3, 0], sizes = [1, 1, 8], strides = [1, 1, 1]} : vector<7x7x8xf32> to vector<1x1x8xf32>
    %324 = vector.shape_cast %323 : vector<1x1x8xf32> to vector<8xf32>
    %325 = vector.shape_cast %324 : vector<8xf32> to vector<1x1x8xf32>
    %326 = vector.broadcast %325 : vector<1x1x8xf32> to vector<16x16x8xf32>
    %327 = arith.mulf %322, %326 : vector<16x16x8xf32>
    %328 = arith.addf %321, %327 : vector<16x16x8xf32>
    %c6_140 = arith.constant 6 : index
    %c9_141 = arith.constant 9 : index
    %c0_142 = arith.constant 0 : index
    %329 = vector.load %arg6[%c6_140, %c9_141, %c0_142] : memref<22x27x8xf32, #tpu.memory_space<vmem>>, vector<16x16x8xf32>
    %330 = vector.extract_strided_slice %5 {offsets = [6, 4, 0], sizes = [1, 1, 8], strides = [1, 1, 1]} : vector<7x7x8xf32> to vector<1x1x8xf32>
    %331 = vector.shape_cast %330 : vector<1x1x8xf32> to vector<8xf32>
    %332 = vector.shape_cast %331 : vector<8xf32> to vector<1x1x8xf32>
    %333 = vector.broadcast %332 : vector<1x1x8xf32> to vector<16x16x8xf32>
    %334 = arith.mulf %329, %333 : vector<16x16x8xf32>
    %335 = arith.addf %328, %334 : vector<16x16x8xf32>
    %c6_143 = arith.constant 6 : index
    %c10_144 = arith.constant 10 : index
    %c0_145 = arith.constant 0 : index
    %336 = vector.load %arg6[%c6_143, %c10_144, %c0_145] : memref<22x27x8xf32, #tpu.memory_space<vmem>>, vector<16x16x8xf32>
    %337 = vector.extract_strided_slice %5 {offsets = [6, 5, 0], sizes = [1, 1, 8], strides = [1, 1, 1]} : vector<7x7x8xf32> to vector<1x1x8xf32>
    %338 = vector.shape_cast %337 : vector<1x1x8xf32> to vector<8xf32>
    %339 = vector.shape_cast %338 : vector<8xf32> to vector<1x1x8xf32>
    %340 = vector.broadcast %339 : vector<1x1x8xf32> to vector<16x16x8xf32>
    %341 = arith.mulf %336, %340 : vector<16x16x8xf32>
    %342 = arith.addf %335, %341 : vector<16x16x8xf32>
    %c6_146 = arith.constant 6 : index
    %c11_147 = arith.constant 11 : index
    %c0_148 = arith.constant 0 : index
    %343 = vector.load %arg6[%c6_146, %c11_147, %c0_148] : memref<22x27x8xf32, #tpu.memory_space<vmem>>, vector<16x16x8xf32>
    %344 = vector.extract_strided_slice %5 {offsets = [6, 6, 0], sizes = [1, 1, 8], strides = [1, 1, 1]} : vector<7x7x8xf32> to vector<1x1x8xf32>
    %345 = vector.shape_cast %344 : vector<1x1x8xf32> to vector<8xf32>
    %346 = vector.shape_cast %345 : vector<8xf32> to vector<1x1x8xf32>
    %347 = vector.broadcast %346 : vector<1x1x8xf32> to vector<16x16x8xf32>
    %348 = arith.mulf %343, %347 : vector<16x16x8xf32>
    %349 = arith.addf %342, %348 : vector<16x16x8xf32>
    %c0_149 = arith.constant 0 : index
    %c0_150 = arith.constant 0 : index
    %c0_151 = arith.constant 0 : index
    %350 = vector.load %arg4[%c0_149, %c0_150, %c0_151] : memref<1x1x8xf32, #tpu.memory_space<vmem>>, vector<1x1x8xf32>
    %351 = vector.broadcast %350 : vector<1x1x8xf32> to vector<16x16x8xf32>
    %352 = arith.addf %349, %351 : vector<16x16x8xf32>
    %cst_152 = arith.constant 0.000000e+00 : f32
    %353 = vector.broadcast %cst_152 : f32 to vector<16x16x8xf32>
    %354 = arith.maximumf %352, %353 : vector<16x16x8xf32>
    %c0_153 = arith.constant 0 : index
    %c0_154 = arith.constant 0 : index
    %c0_155 = arith.constant 0 : index
    %c0_156 = arith.constant 0 : index
    %355 = vector.load %arg5[%c0_153, %c0_154, %c0_155, %c0_156] : memref<1x16x16x8xf32, #tpu.memory_space<vmem>>, vector<1x16x16x8xf32>
    %356 = vector.shape_cast %355 : vector<1x16x16x8xf32> to vector<16x16x8xf32>
    %357 = vector.shape_cast %354 : vector<16x16x8xf32> to vector<1x16x16x8xf32>
    tpu.vector_store %arg5[%c0_153, %c0_154, %c0_155, %c0_156], %357 {strides = array<i32>} : memref<1x16x16x8xf32, #tpu.memory_space<vmem>>, vector<1x16x16x8xf32>,
    return
  }
  func.func @transform_0(%arg0: i32, %arg1: i32) -> (i32, i32, i32, i32) {
    %c0_i32 = arith.constant 0 : i32
    %c0_i32_0 = arith.constant 0 : i32
    %c0_i32_1 = arith.constant 0 : i32
    return %arg0, %c0_i32, %c0_i32_0, %arg1 : i32, i32, i32, i32
  }
  func.func @transform_1(%arg0: i32, %arg1: i32) -> (i32, i32, i32) {
    %c0_i32 = arith.constant 0 : i32
    %c0_i32_0 = arith.constant 0 : i32
    %c0_i32_1 = arith.constant 0 : i32
    return %c0_i32, %c0_i32_0, %arg1 : i32, i32, i32
  }
  func.func @transform_2(%arg0: i32, %arg1: i32) -> (i32, i32, i32) {
    %c0_i32 = arith.constant 0 : i32
    %c0_i32_0 = arith.constant 0 : i32
    %c0_i32_1 = arith.constant 0 : i32
    return %c0_i32, %c0_i32_0, %arg1 : i32, i32, i32
  }
  func.func @transform_3(%arg0: i32, %arg1: i32) -> (i32, i32, i32, i32) {
    %c0_i32 = arith.constant 0 : i32
    %c0_i32_0 = arith.constant 0 : i32
    %c0_i32_1 = arith.constant 0 : i32
    return %arg0, %c0_i32, %c0_i32_0, %arg1 : i32, i32, i32, i32
  }
}

module attributes {stable_mosaic.version = 11 : i64} {
  func.func @kernel(%arg0: i32, %arg1: i32, %arg2: memref<512x8xf32, #tpu.memory_space<vmem>>, %arg3: memref<8x32xbf16, #tpu.memory_space<vmem>>, %arg4: memref<1x8xf32, #tpu.memory_space<vmem>>, %arg5: memref<1x8xf32, #tpu.memory_space<vmem>>, %arg6: memref<1x32xf32, #tpu.memory_space<vmem>>, %arg7: memref<1x32xf32, #tpu.memory_space<vmem>>, %arg8: memref<512x32xf32, #tpu.memory_space<vmem>>) attributes {dimension_semantics = [#tpu.dimension_semantics<parallel>, #tpu.dimension_semantics<parallel>], iteration_bounds = array<i64: 1, 1>, scalar_prefetch = 0 : i64, scratch_operands = 0 : i64, tpu.core_type = #tpu.core_type<tc>, window_params = [{transform_indices = @transform_0, window_bounds = array<i64: 512, 8>}, {transform_indices = @transform_1, window_bounds = array<i64: 8, 32>}, {pipeline_mode = #tpu.pipeline_mode<synchronous>, transform_indices = @transform_2, window_bounds = array<i64: 1, 8>}, {pipeline_mode = #tpu.pipeline_mode<synchronous>, transform_indices = @transform_3, window_bounds = array<i64: 1, 8>}, {transform_indices = @transform_4, window_bounds = array<i64: 1, 32>}, {transform_indices = @transform_5, window_bounds = array<i64: 1, 32>}, {transform_indices = @transform_6, window_bounds = array<i64: 512, 32>}]} {
    %c0 = arith.constant 0 : index
    %c0_0 = arith.constant 0 : index
    %0 = vector.load %arg2[%c0, %c0_0] : memref<512x8xf32, #tpu.memory_space<vmem>>, vector<512x8xf32>
    %c0_1 = arith.constant 0 : index
    %c0_2 = arith.constant 0 : index
    %1 = vector.load %arg4[%c0_1, %c0_2] : memref<1x8xf32, #tpu.memory_space<vmem>>, vector<1x8xf32>
    %2 = vector.broadcast %1 : vector<1x8xf32> to vector<512x8xf32>
    %3 = arith.mulf %0, %2 : vector<512x8xf32>
    %c0_3 = arith.constant 0 : index
    %c0_4 = arith.constant 0 : index
    %4 = vector.load %arg5[%c0_3, %c0_4] : memref<1x8xf32, #tpu.memory_space<vmem>>, vector<1x8xf32>
    %5 = vector.broadcast %4 : vector<1x8xf32> to vector<512x8xf32>
    %6 = arith.addf %3, %5 : vector<512x8xf32>
    %7 = arith.truncf %6 : vector<512x8xf32> to vector<512x8xbf16>
    %c0_5 = arith.constant 0 : index
    %c0_6 = arith.constant 0 : index
    %8 = vector.load %arg3[%c0_5, %c0_6] : memref<8x32xbf16, #tpu.memory_space<vmem>>, vector<8x32xbf16>
    %cst = arith.constant dense<0.000000e+00> : vector<512x32xf32>
    %9 = tpu.matmul %7, %8, %cst {dimension_numbers = #tpu.dot_dimension_numbers<[1], [0], [0], [1], [0, 0, 1, 1], [], []>} : vector<512x8xbf16>, vector<8x32xbf16>, vector<512x32xf32> -> vector<512x32xf32>
    %c0_7 = arith.constant 0 : index
    %c0_8 = arith.constant 0 : index
    %10 = vector.load %arg6[%c0_7, %c0_8] : memref<1x32xf32, #tpu.memory_space<vmem>>, vector<1x32xf32>
    %11 = vector.broadcast %10 : vector<1x32xf32> to vector<512x32xf32>
    %12 = arith.mulf %9, %11 : vector<512x32xf32>
    %c0_9 = arith.constant 0 : index
    %c0_10 = arith.constant 0 : index
    %13 = vector.load %arg7[%c0_9, %c0_10] : memref<1x32xf32, #tpu.memory_space<vmem>>, vector<1x32xf32>
    %14 = vector.broadcast %13 : vector<1x32xf32> to vector<512x32xf32>
    %15 = arith.addf %12, %14 : vector<512x32xf32>
    %cst_11 = arith.constant 5.000000e-01 : f32
    %16 = vector.broadcast %cst_11 : f32 to vector<512x32xf32>
    %17 = arith.mulf %16, %15 : vector<512x32xf32>
    %cst_12 = arith.constant 0.707106769 : f32
    %18 = vector.broadcast %cst_12 : f32 to vector<512x32xf32>
    %19 = arith.mulf %15, %18 : vector<512x32xf32>
    %20 = math.erf %19 : vector<512x32xf32>
    %cst_13 = arith.constant 1.000000e+00 : f32
    %21 = vector.broadcast %cst_13 : f32 to vector<512x32xf32>
    %22 = arith.addf %21, %20 : vector<512x32xf32>
    %23 = arith.mulf %17, %22 : vector<512x32xf32>
    %c0_14 = arith.constant 0 : index
    %c0_15 = arith.constant 0 : index
    %24 = vector.load %arg8[%c0_14, %c0_15] : memref<512x32xf32, #tpu.memory_space<vmem>>, vector<512x32xf32>
    tpu.vector_store %arg8[%c0_14, %c0_15], %23 {strides = array<i32>} : memref<512x32xf32, #tpu.memory_space<vmem>>, vector<512x32xf32>,
    return
  }
  func.func @transform_0(%arg0: i32, %arg1: i32) -> (i32, i32) {
    %c0_i32 = arith.constant 0 : i32
    %c0_i32_0 = arith.constant 0 : i32
    return %arg0, %c0_i32 : i32, i32
  }
  func.func @transform_1(%arg0: i32, %arg1: i32) -> (i32, i32) {
    %c0_i32 = arith.constant 0 : i32
    %c0_i32_0 = arith.constant 0 : i32
    return %c0_i32, %arg1 : i32, i32
  }
  func.func @transform_2(%arg0: i32, %arg1: i32) -> (i32, i32) {
    %c0_i32 = arith.constant 0 : i32
    %c0_i32_0 = arith.constant 0 : i32
    %c0_i32_1 = arith.constant 0 : i32
    return %c0_i32, %c0_i32_0 : i32, i32
  }
  func.func @transform_3(%arg0: i32, %arg1: i32) -> (i32, i32) {
    %c0_i32 = arith.constant 0 : i32
    %c0_i32_0 = arith.constant 0 : i32
    %c0_i32_1 = arith.constant 0 : i32
    return %c0_i32, %c0_i32_0 : i32, i32
  }
  func.func @transform_4(%arg0: i32, %arg1: i32) -> (i32, i32) {
    %c0_i32 = arith.constant 0 : i32
    %c0_i32_0 = arith.constant 0 : i32
    return %c0_i32, %arg1 : i32, i32
  }
  func.func @transform_5(%arg0: i32, %arg1: i32) -> (i32, i32) {
    %c0_i32 = arith.constant 0 : i32
    %c0_i32_0 = arith.constant 0 : i32
    return %c0_i32, %arg1 : i32, i32
  }
  func.func @transform_6(%arg0: i32, %arg1: i32) -> (i32, i32) {
    %c0_i32 = arith.constant 0 : i32
    return %arg0, %arg1 : i32, i32
  }
}

module attributes {stable_mosaic.version = 11 : i64} {
  func.func @kernel(%arg0: i32, %arg1: i32, %arg2: memref<512x32xf32, #tpu.memory_space<vmem>>, %arg3: memref<32x8xbf16, #tpu.memory_space<vmem>>, %arg4: memref<1x8xf32, #tpu.memory_space<vmem>>, %arg5: memref<1x8xf32, #tpu.memory_space<vmem>>, %arg6: memref<512x8xf32, #tpu.memory_space<vmem>>, %arg7: memref<512x8xf32, #tpu.memory_space<vmem>>) attributes {dimension_semantics = [#tpu.dimension_semantics<parallel>, #tpu.dimension_semantics<parallel>], iteration_bounds = array<i64: 1, 1>, scalar_prefetch = 0 : i64, scratch_operands = 0 : i64, tpu.core_type = #tpu.core_type<tc>, window_params = [{transform_indices = @transform_0, window_bounds = array<i64: 512, 32>}, {transform_indices = @transform_1, window_bounds = array<i64: 32, 8>}, {transform_indices = @transform_2, window_bounds = array<i64: 1, 8>}, {transform_indices = @transform_3, window_bounds = array<i64: 1, 8>}, {transform_indices = @transform_4, window_bounds = array<i64: 512, 8>}, {transform_indices = @transform_5, window_bounds = array<i64: 512, 8>}]} {
    %c0 = arith.constant 0 : index
    %c0_0 = arith.constant 0 : index
    %0 = vector.load %arg2[%c0, %c0_0] : memref<512x32xf32, #tpu.memory_space<vmem>>, vector<512x32xf32>
    %1 = arith.truncf %0 : vector<512x32xf32> to vector<512x32xbf16>
    %c0_1 = arith.constant 0 : index
    %c0_2 = arith.constant 0 : index
    %2 = vector.load %arg3[%c0_1, %c0_2] : memref<32x8xbf16, #tpu.memory_space<vmem>>, vector<32x8xbf16>
    %cst = arith.constant dense<0.000000e+00> : vector<512x8xf32>
    %3 = tpu.matmul %1, %2, %cst {dimension_numbers = #tpu.dot_dimension_numbers<[1], [0], [0], [1], [0, 0, 1, 1], [], []>} : vector<512x32xbf16>, vector<32x8xbf16>, vector<512x8xf32> -> vector<512x8xf32>
    %c0_3 = arith.constant 0 : index
    %c0_4 = arith.constant 0 : index
    %4 = vector.load %arg4[%c0_3, %c0_4] : memref<1x8xf32, #tpu.memory_space<vmem>>, vector<1x8xf32>
    %5 = vector.broadcast %4 : vector<1x8xf32> to vector<512x8xf32>
    %6 = arith.mulf %3, %5 : vector<512x8xf32>
    %c0_5 = arith.constant 0 : index
    %c0_6 = arith.constant 0 : index
    %7 = vector.load %arg5[%c0_5, %c0_6] : memref<1x8xf32, #tpu.memory_space<vmem>>, vector<1x8xf32>
    %8 = vector.broadcast %7 : vector<1x8xf32> to vector<512x8xf32>
    %9 = arith.addf %6, %8 : vector<512x8xf32>
    %c0_7 = arith.constant 0 : index
    %c0_8 = arith.constant 0 : index
    %10 = vector.load %arg6[%c0_7, %c0_8] : memref<512x8xf32, #tpu.memory_space<vmem>>, vector<512x8xf32>
    %11 = arith.addf %9, %10 : vector<512x8xf32>
    %c0_9 = arith.constant 0 : index
    %c0_10 = arith.constant 0 : index
    %12 = vector.load %arg7[%c0_9, %c0_10] : memref<512x8xf32, #tpu.memory_space<vmem>>, vector<512x8xf32>
    tpu.vector_store %arg7[%c0_9, %c0_10], %11 {strides = array<i32>} : memref<512x8xf32, #tpu.memory_space<vmem>>, vector<512x8xf32>,
    return
  }
  func.func @transform_0(%arg0: i32, %arg1: i32) -> (i32, i32) {
    %c0_i32 = arith.constant 0 : i32
    %c0_i32_0 = arith.constant 0 : i32
    return %arg0, %c0_i32 : i32, i32
  }
  func.func @transform_1(%arg0: i32, %arg1: i32) -> (i32, i32) {
    %c0_i32 = arith.constant 0 : i32
    %c0_i32_0 = arith.constant 0 : i32
    return %c0_i32, %arg1 : i32, i32
  }
  func.func @transform_2(%arg0: i32, %arg1: i32) -> (i32, i32) {
    %c0_i32 = arith.constant 0 : i32
    %c0_i32_0 = arith.constant 0 : i32
    return %c0_i32, %arg1 : i32, i32
  }
  func.func @transform_3(%arg0: i32, %arg1: i32) -> (i32, i32) {
    %c0_i32 = arith.constant 0 : i32
    %c0_i32_0 = arith.constant 0 : i32
    return %c0_i32, %arg1 : i32, i32
  }
  func.func @transform_4(%arg0: i32, %arg1: i32) -> (i32, i32) {
    %c0_i32 = arith.constant 0 : i32
    return %arg0, %arg1 : i32, i32
  }
  func.func @transform_5(%arg0: i32, %arg1: i32) -> (i32, i32) {
    %c0_i32 = arith.constant 0 : i32
    return %arg0, %arg1 : i32, i32
  }
}

</mosaic_0001>

<bundles_post_ra>
// kernel: replk_stage_forward.12
= control target key start
LH: loop header
LB: loop body
LE: loop exit
PB: predicated region body
PF: predicated region fallthrough
CT: control target
= control target key end

     0   :  { %vm215_vm0 = vcmask 1043456   ;;  %vm118_vm1 = vcmask 64512   ;;  %s1826_s1 = inlined_call_operand.vmem [shape: bf16[8,8], index: 1, kind: input, shape index: {}]   ;;  %s1827_s0 = inlined_call_operand.vmem [shape: f32[512,8], index: 0, kind: input, shape index: {}]   ;;  %s1828_s2 = inlined_call_operand.vmem [shape: f32[1,8], index: 2, kind: input, shape index: {}]   ;;  %s1829_s3 = inlined_call_operand.vmem [shape: f32[1,8], index: 3, kind: input, shape index: {}]   ;;  %s1830_s4 = inlined_call_operand.vmem [shape: f32[512,8], index: 4, kind: input, shape index: {}]   ;;  %s1831_s5 = inlined_call_operand.vmem [shape: f32[512,8], index: 5, kind: output, shape index: {}]  }
   0x1   :  { %v117_v0 = vld [vmem:[%s1826_s1] sm:$0xf]  ;;  %v22_v2 = vld [vmem:[%s1827_s0 + $0x8] sm:$0xff]  ;;  %v23_v7 = vld [vmem:[%s1827_s0 + $0x10] sm:$0xff] }
   0x2   :  { %v21_v1 = vld [vmem:[%s1827_s0] sm:$0xff]  ;;  %981 = vmatprep.subr.msk.bf16.mxu0 %vm215_vm0, %v117_v0  ;;  %982 = vmatprep.subr.msk.bf16.mxu1 %vm215_vm0, %v117_v0  ;;  %v217_v3 = vsel %vm215_vm0, %v117_v0, 0  ;;  %v54_v6 = vld [vmem:[%s1827_s0 + $0x108] sm:$0xff]  ;;  %v24_v9 = vld [vmem:[%s1827_s0 + $0x18] sm:$0xff] }
   0x3   :  { %v85_v4 = vpack.c.bf16 %v22_v2, %v21_v1  ;;  %v53_v5 = vld [vmem:[%s1827_s0 + $0x100] sm:$0xff]  ;;  %914 = vmatpush3.bf16.msra.mxu0 %v217_v3  ;;  %980 = vmatpush3.bf16.msra.mxu1 %v217_v3  ;;  %v55_v10 = vld [vmem:[%s1827_s0 + $0x110] sm:$0xff]  ;;  %v56_v11 = vld [vmem:[%s1827_s0 + $0x118] sm:$0xff]  ;;  %v86_v12 = vpack.c.bf16 %v24_v9, %v23_v7 }
   0x4   :  { %v101_v8 = vpack.c.bf16 %v54_v6, %v53_v5  ;;  %v102_v13 = vpack.c.bf16 %v56_v11, %v55_v10  ;;  %v25_v14 = vld [vmem:[%s1827_s0 + $0x20] sm:$0xff]  ;;  %v26_v15 = vld [vmem:[%s1827_s0 + $0x28] sm:$0xff]  ;;  %v27_v20 = vld [vmem:[%s1827_s0 + $0x30] sm:$0xff] }
   0x5   :  { %915 = vmatprep.mubr.msk.bf16.mxu0 %vm118_vm1, %v85_v4  ;;  %v57_v16 = vld [vmem:[%s1827_s0 + $0x120] sm:$0xff]  ;;  %v87_v17 = vpack.c.bf16 %v26_v15, %v25_v14  ;;  %v58_v18 = vld [vmem:[%s1827_s0 + $0x128] sm:$0xff]  ;;  %v28_v21 = vld [vmem:[%s1827_s0 + $0x38] sm:$0xff] }
   0x6   :  { %947 = vmatprep.mubr.msk.bf16.mxu1 %vm118_vm1, %v101_v8  ;;  %916 = vmatmul.mubr.msk.bf16.vlgmr.msra.gmra.mxu0 %vm118_vm1, %v86_v12  ;;  %v103_v19 = vpack.c.bf16 %v58_v18, %v57_v16  ;;  %v59_v22 = vld [vmem:[%s1827_s0 + $0x130] sm:$0xff]  ;;  %v60_v23 = vld [vmem:[%s1827_s0 + $0x138] sm:$0xff]  ;;  %v29_v24 = vld [vmem:[%s1827_s0 + $0x40] sm:$0xff]  ;;  %v88_v28 = vpack.c.bf16 %v28_v21, %v27_v20 }
   0x7   :  { %948 = vmatmul.mubr.msk.bf16.vlgmr.msra.gmra.mxu1 %vm118_vm1, %v102_v13  ;;  %919 = vmatprep.mubr.msk.bf16.mxu0 %vm118_vm1, %v87_v17  ;;  %v30_v25 = vld [vmem:[%s1827_s0 + $0x48] sm:$0xff]  ;;  %v61_v26 = vld [vmem:[%s1827_s0 + $0x140] sm:$0xff]  ;;  %v104_v29 = vpack.c.bf16 %v60_v23, %v59_v22  ;;  %v31_v32 = vld [vmem:[%s1827_s0 + $0x50] sm:$0xff] }
   0x8   :  { %951 = vmatprep.mubr.msk.bf16.mxu1 %vm118_vm1, %v103_v19  ;;  %v62_v27 = vld [vmem:[%s1827_s0 + $0x148] sm:$0xff]  ;;  %v89_v30 = vpack.c.bf16 %v30_v25, %v29_v24  ;;  %v32_v33 = vld [vmem:[%s1827_s0 + $0x58] sm:$0xff]  ;;  %v63_v34 = vld [vmem:[%s1827_s0 + $0x150] sm:$0xff] }
   0x9   :  { %v105_v31 = vpack.c.bf16 %v62_v27, %v61_v26  ;;  %v64_v35 = vld [vmem:[%s1827_s0 + $0x158] sm:$0xff]  ;;  %v33_v36 = vld [vmem:[%s1827_s0 + $0x60] sm:$0xff]  ;;  %v34_v37 = vld [vmem:[%s1827_s0 + $0x68] sm:$0xff]  ;;  %v90_v40 = vpack.c.bf16 %v32_v33, %v31_v32 }
   0xa   :  { %v65_v38 = vld [vmem:[%s1827_s0 + $0x160] sm:$0xff]  ;;  %v66_v39 = vld [vmem:[%s1827_s0 + $0x168] sm:$0xff]  ;;  %v106_v41 = vpack.c.bf16 %v64_v35, %v63_v34  ;;  %v91_v42 = vpack.c.bf16 %v34_v37, %v33_v36  ;;  %v35_v44 = vld [vmem:[%s1827_s0 + $0x70] sm:$0xff] }
   0xb   :  { %v107_v43 = vpack.c.bf16 %v66_v39, %v65_v38  ;;  %v36_v45 = vld [vmem:[%s1827_s0 + $0x78] sm:$0xff]  ;;  %v67_v46 = vld [vmem:[%s1827_s0 + $0x170] sm:$0xff]  ;;  %v37_v48 = vld [vmem:[%s1827_s0 + $0x80] sm:$0xff] }
   0xc   :  { %v68_v47 = vld [vmem:[%s1827_s0 + $0x178] sm:$0xff]  ;;  %v38_v49 = vld [vmem:[%s1827_s0 + $0x88] sm:$0xff]  ;;  %v69_v50 = vld [vmem:[%s1827_s0 + $0x180] sm:$0xff]  ;;  %v92_v52 = vpack.c.bf16 %v36_v45, %v35_v44 }
   0xd   :  { %v70_v51 = vld [vmem:[%s1827_s0 + $0x188] sm:$0xff]  ;;  %v108_v53 = vpack.c.bf16 %v68_v47, %v67_v46  ;;  %v93_v54 = vpack.c.bf16 %v38_v49, %v37_v48  ;;  %v39_v56 = vld [vmem:[%s1827_s0 + $0x90] sm:$0xff]  ;;  %v40_v57 = vld [vmem:[%s1827_s0 + $0x98] sm:$0xff] }
   0xe   :  { %920 = vmatmul.mubr.msk.bf16.gmra.mxu0 %vm118_vm1, %v88_v28  ;;  %v109_v55 = vpack.c.bf16 %v70_v51, %v69_v50  ;;  %v71_v58 = vld [vmem:[%s1827_s0 + $0x190] sm:$0xff]  ;;  %v72_v59 = vld [vmem:[%s1827_s0 + $0x198] sm:$0xff]  ;;  %v41_v60 = vld [vmem:[%s1827_s0 + $0xa0] sm:$0xff]  ;;  %v94_v0 = vpack.c.bf16 %v40_v57, %v39_v56 }
   0xf   :  { %952 = vmatmul.mubr.msk.bf16.gmra.mxu1 %vm118_vm1, %v104_v29  ;;  %923 = vmatprep.mubr.msk.bf16.mxu0 %vm118_vm1, %v89_v30  ;;  %v42_v61 = vld [vmem:[%s1827_s0 + $0xa8] sm:$0xff]  ;;  %v73_v62 = vld [vmem:[%s1827_s0 + $0x1a0] sm:$0xff]  ;;  %v110_v1 = vpack.c.bf16 %v72_v59, %v71_v58  ;;  %v43_v4 = vld [vmem:[%s1827_s0 + $0xb0] sm:$0xff] }
  0x10   :  { %955 = vmatprep.mubr.msk.bf16.mxu1 %vm118_vm1, %v105_v31  ;;  %v74_v63 = vld [vmem:[%s1827_s0 + $0x1a8] sm:$0xff]  ;;  %v95_v2 = vpack.c.bf16 %v42_v61, %v41_v60  ;;  %v44_v5 = vld [vmem:[%s1827_s0 + $0xb8] sm:$0xff]  ;;  %v75_v6 = vld [vmem:[%s1827_s0 + $0x1b0] sm:$0xff] }
  0x11   :  { %v111_v3 = vpack.c.bf16 %v74_v63, %v73_v62  ;;  %v76_v7 = vld [vmem:[%s1827_s0 + $0x1b8] sm:$0xff]  ;;  %v45_v8 = vld [vmem:[%s1827_s0 + $0xc0] sm:$0xff]  ;;  %v46_v9 = vld [vmem:[%s1827_s0 + $0xc8] sm:$0xff]  ;;  %v96_v12 = vpack.c.bf16 %v44_v5, %v43_v4 }
  0x12   :  { %v77_v10 = vld [vmem:[%s1827_s0 + $0x1c0] sm:$0xff]  ;;  %v78_v11 = vld [vmem:[%s1827_s0 + $0x1c8] sm:$0xff]  ;;  %v112_v13 = vpack.c.bf16 %v76_v7, %v75_v6  ;;  %v97_v14 = vpack.c.bf16 %v46_v9, %v45_v8  ;;  %v47_v16 = vld [vmem:[%s1827_s0 + $0xd0] sm:$0xff] }
  0x13   :  { %v113_v15 = vpack.c.bf16 %v78_v11, %v77_v10  ;;  %v48_v17 = vld [vmem:[%s1827_s0 + $0xd8] sm:$0xff]  ;;  %v79_v18 = vld [vmem:[%s1827_s0 + $0x1d0] sm:$0xff]  ;;  %v49_v20 = vld [vmem:[%s1827_s0 + $0xe0] sm:$0xff] }
  0x14   :  { %v80_v19 = vld [vmem:[%s1827_s0 + $0x1d8] sm:$0xff]  ;;  %v50_v21 = vld [vmem:[%s1827_s0 + $0xe8] sm:$0xff]  ;;  %v81_v22 = vld [vmem:[%s1827_s0 + $0x1e0] sm:$0xff]  ;;  %v98_v24 = vpack.c.bf16 %v48_v17, %v47_v16 }
  0x15   :  { %v82_v23 = vld [vmem:[%s1827_s0 + $0x1e8] sm:$0xff]  ;;  %v114_v25 = vpack.c.bf16 %v80_v19, %v79_v18  ;;  %v99_v26 = vpack.c.bf16 %v50_v21, %v49_v20  ;;  %v51_v28 = vld [vmem:[%s1827_s0 + $0xf0] sm:$0xff]  ;;  %v52_v29 = vld [vmem:[%s1827_s0 + $0xf8] sm:$0xff] }
  0x16   :  { %924 = vmatmul.mubr.msk.bf16.gmra.mxu0 %vm118_vm1, %v90_v40  ;;  %v115_v27 = vpack.c.bf16 %v82_v23, %v81_v22  ;;  %v83_v30 = vld [vmem:[%s1827_s0 + $0x1f0] sm:$0xff]  ;;  %v84_v31 = vld [vmem:[%s1827_s0 + $0x1f8] sm:$0xff]  ;;  %v100_v32 = vpack.c.bf16 %v52_v29, %v51_v28  ;;  %v1243_v34 = vld [vmem:[%s1828_s2] ss:$0 sm:$0xff] }
  0x17   :  { %956 = vmatmul.mubr.msk.bf16.gmra.mxu1 %vm118_vm1, %v106_v41  ;;  %927 = vmatprep.mubr.msk.bf16.mxu0 %vm118_vm1, %v91_v42  ;;  %v116_v33 = vpack.c.bf16 %v84_v31, %v83_v30  ;;  %v1248_v36 = vld [vmem:[%s1829_s3] ss:$0 sm:$0xff]  ;;  %v652_v40 = vld [vmem:[%s1830_s4 + $0x10] sm:$0xff]  ;;  %v653_v62 = vld [vmem:[%s1830_s4 + $0x18] sm:$0xff] }
  0x18   :  { %959 = vmatprep.mubr.msk.bf16.mxu1 %vm118_vm1, %v107_v43  ;;  %v684_v41 = vld [vmem:[%s1830_s4 + $0x110] sm:$0xff]  ;;  %v650_v48 = vld [vmem:[%s1830_s4] sm:$0xff]  ;;  %v685_v63 = vld [vmem:[%s1830_s4 + $0x118] sm:$0xff] }
  0x19   :  { %v682_v49 = vld [vmem:[%s1830_s4 + $0x100] sm:$0xff]  ;;  %v651_v4 = vld [vmem:[%s1830_s4 + $0x8] sm:$0xff] }
  0x1a   :  { %v683_v5 = vld [vmem:[%s1830_s4 + $0x108] sm:$0xff]  ;;  %v654_v28 = vld [vmem:[%s1830_s4 + $0x20] sm:$0xff] }
  0x1b   :  { %v686_v29 = vld [vmem:[%s1830_s4 + $0x120] sm:$0xff] }
  0x1e   :  { %928 = vmatmul.mubr.msk.bf16.gmra.mxu0 %vm118_vm1, %v92_v52 }
  0x1f   :  { %960 = vmatmul.mubr.msk.bf16.gmra.mxu1 %vm118_vm1, %v108_v53  ;;  %931 = vmatprep.mubr.msk.bf16.mxu0 %vm118_vm1, %v93_v54 }
  0x20   :  { %963 = vmatprep.mubr.msk.bf16.mxu1 %vm118_vm1, %v109_v55 }
  0x26   :  { %932 = vmatmul.mubr.msk.bf16.gmra.mxu0 %vm118_vm1, %v94_v0 }
  0x27   :  { %964 = vmatmul.mubr.msk.bf16.gmra.mxu1 %vm118_vm1, %v110_v1  ;;  %935 = vmatprep.mubr.msk.bf16.mxu0 %vm118_vm1, %v95_v2 }
  0x28   :  { %967 = vmatprep.mubr.msk.bf16.mxu1 %vm118_vm1, %v111_v3 }
  0x2e   :  { %936 = vmatmul.mubr.msk.bf16.gmra.mxu0 %vm118_vm1, %v96_v12 }
  0x2f   :  { %968 = vmatmul.mubr.msk.bf16.gmra.mxu1 %vm118_vm1, %v112_v13  ;;  %939 = vmatprep.mubr.msk.bf16.mxu0 %vm118_vm1, %v97_v14  ;;  %v656_v14 = vld [vmem:[%s1830_s4 + $0x30] sm:$0xff] }
  0x30   :  { %971 = vmatprep.mubr.msk.bf16.mxu1 %vm118_vm1, %v113_v15  ;;  %v688_v15 = vld [vmem:[%s1830_s4 + $0x130] sm:$0xff] }
  0x36   :  { %940 = vmatmul.mubr.msk.bf16.gmra.mxu0 %vm118_vm1, %v98_v24 }
  0x37   :  { %972 = vmatmul.mubr.msk.bf16.gmra.mxu1 %vm118_vm1, %v114_v25  ;;  %943 = vmatprep.mubr.msk.bf16.mxu0 %vm118_vm1, %v99_v26 }
  0x38   :  { %975 = vmatprep.mubr.msk.bf16.mxu1 %vm118_vm1, %v115_v27 }
  0x3e   :  { %944 = vmatmul.mubr.msk.bf16.gmra.mxu0 %vm118_vm1, %v100_v32 }
  0x3f   :  { %976 = vmatmul.mubr.msk.bf16.gmra.mxu1 %vm118_vm1, %v116_v33 }
  0xc6   :  { %v917_v35 = vpop.f32.mrf.mxu0 }
  0xc7   :  { %v949_v37 = vpop.f32.mrf.mxu1  ;;  %v517_v38 = vmul.f32 %v917_v35, %v1243_v34  ;;  %v657_v35 = vld [vmem:[%s1830_s4 + $0x38] sm:$0xff] }
  0xc8   :  { %v549_v39 = vmul.f32 %v949_v37, %v1243_v34  ;;  %v253_v42 = vpop.f32.mrf.mxu0  ;;  %v689_v37 = vld [vmem:[%s1830_s4 + $0x138] sm:$0xff] }
  0xc9   :  { %v381_v43 = vpop.f32.mrf.mxu1  ;;  %v588_v44 = vadd.f32 %v1248_v36, %v517_v38  ;;  %v515_v46 = vmul.f32 %v1243_v34, %v253_v42 }
  0xca   :  { %v620_v45 = vadd.f32 %v1248_v36, %v549_v39  ;;  %v547_v47 = vmul.f32 %v1243_v34, %v381_v43  ;;  %v918_v50 = vpop.f32.mrf.mxu0 }
  0xcb   :  { %v950_v51 = vpop.f32.mrf.mxu1  ;;  %v716_v52 = vadd.f32 %v652_v40, %v588_v44  ;;  %v586_v54 = vadd.f32 %v1248_v36, %v515_v46  ;;  %v518_v56 = vmul.f32 %v918_v50, %v1243_v34  ;;  %v655_v46 = vld [vmem:[%s1830_s4 + $0x28] sm:$0xff] }
  0xcc   :  { %v748_v53 = vadd.f32 %v684_v41, %v620_v45  ;;  %v618_v55 = vadd.f32 %v1248_v36, %v547_v47  ;;  %v550_v57 = vmul.f32 %v950_v51, %v1243_v34  ;;  %v256_v58 = vpop.f32.mrf.mxu0  ;;  %v687_v47 = vld [vmem:[%s1830_s4 + $0x128] sm:$0xff] }
  0xcd   :  { %v384_v59 = vpop.f32.mrf.mxu1  ;;  %780 = vst.msk [vmem:[%s1831_s5 + $0x10] sm:$0xff] %vm118_vm1, %v716_v52  ;;  %v714_v60 = vadd.f32 %v650_v48, %v586_v54  ;;  %v516_v0 = vmul.f32 %v1243_v34, %v256_v58  ;;  %v589_v2 = vadd.f32 %v1248_v36, %v518_v56 }
  0xce   :  { %812 = vst.msk [vmem:[%s1831_s5 + $0x110] sm:$0xff] %vm118_vm1, %v748_v53  ;;  %v746_v61 = vadd.f32 %v682_v49, %v618_v55  ;;  %v548_v1 = vmul.f32 %v1243_v34, %v384_v59  ;;  %v621_v3 = vadd.f32 %v1248_v36, %v550_v57  ;;  %v921_v6 = vpop.f32.mrf.mxu0 }
  0xcf   :  { %v953_v7 = vpop.f32.mrf.mxu1  ;;  %778 = vst.msk [vmem:[%s1831_s5] sm:$0xff] %vm118_vm1, %v714_v60  ;;  %v587_v8 = vadd.f32 %v1248_v36, %v516_v0  ;;  %v521_v10 = vmul.f32 %v921_v6, %v1243_v34  ;;  %v717_v12 = vadd.f32 %v653_v62, %v589_v2  ;;  %v660_v60 = vld [vmem:[%s1830_s4 + $0x50] sm:$0xff]  ;;  %v658_v2 = vld [vmem:[%s1830_s4 + $0x40] sm:$0xff] }
  0xd0   :  { %810 = vst.msk [vmem:[%s1831_s5 + $0x100] sm:$0xff] %vm118_vm1, %v746_v61  ;;  %v619_v9 = vadd.f32 %v1248_v36, %v548_v1  ;;  %v553_v11 = vmul.f32 %v953_v7, %v1243_v34  ;;  %v749_v13 = vadd.f32 %v685_v63, %v621_v3  ;;  %v269_v16 = vpop.f32.mrf.mxu0  ;;  %v692_v61 = vld [vmem:[%s1830_s4 + $0x150] sm:$0xff]  ;;  %v690_v3 = vld [vmem:[%s1830_s4 + $0x140] sm:$0xff] }
  0xd1   :  { %v397_v17 = vpop.f32.mrf.mxu1  ;;  %v715_v18 = vadd.f32 %v651_v4, %v587_v8  ;;  %v592_v20 = vadd.f32 %v1248_v36, %v521_v10  ;;  %781 = vst.msk [vmem:[%s1831_s5 + $0x18] sm:$0xff] %vm118_vm1, %v717_v12  ;;  %v519_v22 = vmul.f32 %v1243_v34, %v269_v16  ;;  %v661_v12 = vld [vmem:[%s1830_s4 + $0x58] sm:$0xff] }
  0xd2   :  { %v747_v19 = vadd.f32 %v683_v5, %v619_v9  ;;  %v624_v21 = vadd.f32 %v1248_v36, %v553_v11  ;;  %813 = vst.msk [vmem:[%s1831_s5 + $0x118] sm:$0xff] %vm118_vm1, %v749_v13  ;;  %v551_v23 = vmul.f32 %v1243_v34, %v397_v17  ;;  %v922_v24 = vpop.f32.mrf.mxu0  ;;  %v693_v13 = vld [vmem:[%s1830_s4 + $0x158] sm:$0xff] }
  0xd3   :  { %v954_v25 = vpop.f32.mrf.mxu1  ;;  %779 = vst.msk [vmem:[%s1831_s5 + $0x8] sm:$0xff] %vm118_vm1, %v715_v18  ;;  %v720_v26 = vadd.f32 %v656_v14, %v592_v20  ;;  %v522_v30 = vmul.f32 %v922_v24, %v1243_v34  ;;  %v590_v32 = vadd.f32 %v1248_v36, %v519_v22 }
  0xd4   :  { %811 = vst.msk [vmem:[%s1831_s5 + $0x108] sm:$0xff] %vm118_vm1, %v747_v19  ;;  %v752_v27 = vadd.f32 %v688_v15, %v624_v21  ;;  %v554_v31 = vmul.f32 %v954_v25, %v1243_v34  ;;  %v622_v33 = vadd.f32 %v1248_v36, %v551_v23  ;;  %v272_v38 = vpop.f32.mrf.mxu0 }
  0xd5   :  { %v400_v39 = vpop.f32.mrf.mxu1  ;;  %784 = vst.msk [vmem:[%s1831_s5 + $0x30] sm:$0xff] %vm118_vm1, %v720_v26  ;;  %v593_v40 = vadd.f32 %v1248_v36, %v522_v30  ;;  %v520_v42 = vmul.f32 %v1243_v34, %v272_v38  ;;  %v718_v44 = vadd.f32 %v654_v28, %v590_v32  ;;  %v659_v26 = vld [vmem:[%s1830_s4 + $0x48] sm:$0xff]  ;;  %v664_v32 = vld [vmem:[%s1830_s4 + $0x70] sm:$0xff] }
  0xd6   :  { %816 = vst.msk [vmem:[%s1831_s5 + $0x130] sm:$0xff] %vm118_vm1, %v752_v27  ;;  %v625_v41 = vadd.f32 %v1248_v36, %v554_v31  ;;  %v552_v43 = vmul.f32 %v1243_v34, %v400_v39  ;;  %v750_v45 = vadd.f32 %v686_v29, %v622_v33  ;;  %v925_v48 = vpop.f32.mrf.mxu0  ;;  %v691_v27 = vld [vmem:[%s1830_s4 + $0x148] sm:$0xff]  ;;  %v696_v33 = vld [vmem:[%s1830_s4 + $0x170] sm:$0xff] }
  0xd7   :  { %v957_v49 = vpop.f32.mrf.mxu1  ;;  %v721_v50 = vadd.f32 %v657_v35, %v593_v40  ;;  %v591_v52 = vadd.f32 %v1248_v36, %v520_v42  ;;  %782 = vst.msk [vmem:[%s1831_s5 + $0x20] sm:$0xff] %vm118_vm1, %v718_v44  ;;  %v525_v54 = vmul.f32 %v925_v48, %v1243_v34  ;;  %v662_v44 = vld [vmem:[%s1830_s4 + $0x60] sm:$0xff] }
  0xd8   :  { %v753_v51 = vadd.f32 %v689_v37, %v625_v41  ;;  %v623_v53 = vadd.f32 %v1248_v36, %v552_v43  ;;  %814 = vst.msk [vmem:[%s1831_s5 + $0x120] sm:$0xff] %vm118_vm1, %v750_v45  ;;  %v557_v55 = vmul.f32 %v957_v49, %v1243_v34  ;;  %v285_v56 = vpop.f32.mrf.mxu0  ;;  %v694_v45 = vld [vmem:[%s1830_s4 + $0x160] sm:$0xff] }
  0xd9   :  { %v413_v57 = vpop.f32.mrf.mxu1  ;;  %785 = vst.msk [vmem:[%s1831_s5 + $0x38] sm:$0xff] %vm118_vm1, %v721_v50  ;;  %v719_v58 = vadd.f32 %v655_v46, %v591_v52  ;;  %v523_v62 = vmul.f32 %v1243_v34, %v285_v56  ;;  %v596_v0 = vadd.f32 %v1248_v36, %v525_v54 }
  0xda   :  { %817 = vst.msk [vmem:[%s1831_s5 + $0x138] sm:$0xff] %vm118_vm1, %v753_v51  ;;  %v751_v59 = vadd.f32 %v687_v47, %v623_v53  ;;  %v555_v63 = vmul.f32 %v1243_v34, %v413_v57  ;;  %v628_v1 = vadd.f32 %v1248_v36, %v557_v55  ;;  %v926_v4 = vpop.f32.mrf.mxu0 }
  0xdb   :  { %v958_v5 = vpop.f32.mrf.mxu1  ;;  %783 = vst.msk [vmem:[%s1831_s5 + $0x28] sm:$0xff] %vm118_vm1, %v719_v58  ;;  %v594_v6 = vadd.f32 %v1248_v36, %v523_v62  ;;  %v526_v8 = vmul.f32 %v926_v4, %v1243_v34  ;;  %v724_v10 = vadd.f32 %v660_v60, %v596_v0  ;;  %v665_v58 = vld [vmem:[%s1830_s4 + $0x78] sm:$0xff]  ;;  %v663_v0 = vld [vmem:[%s1830_s4 + $0x68] sm:$0xff] }
  0xdc   :  { %815 = vst.msk [vmem:[%s1831_s5 + $0x128] sm:$0xff] %vm118_vm1, %v751_v59  ;;  %v626_v7 = vadd.f32 %v1248_v36, %v555_v63  ;;  %v558_v9 = vmul.f32 %v958_v5, %v1243_v34  ;;  %v756_v11 = vadd.f32 %v692_v61, %v628_v1  ;;  %v288_v14 = vpop.f32.mrf.mxu0  ;;  %v697_v59 = vld [vmem:[%s1830_s4 + $0x178] sm:$0xff]  ;;  %v695_v1 = vld [vmem:[%s1830_s4 + $0x168] sm:$0xff] }
  0xdd   :  { %v416_v15 = vpop.f32.mrf.mxu1  ;;  %v722_v16 = vadd.f32 %v658_v2, %v594_v6  ;;  %v597_v18 = vadd.f32 %v1248_v36, %v526_v8  ;;  %788 = vst.msk [vmem:[%s1831_s5 + $0x50] sm:$0xff] %vm118_vm1, %v724_v10  ;;  %v524_v20 = vmul.f32 %v1243_v34, %v288_v14  ;;  %v668_v10 = vld [vmem:[%s1830_s4 + $0x90] sm:$0xff] }
  0xde   :  { %v754_v17 = vadd.f32 %v690_v3, %v626_v7  ;;  %v629_v19 = vadd.f32 %v1248_v36, %v558_v9  ;;  %820 = vst.msk [vmem:[%s1831_s5 + $0x150] sm:$0xff] %vm118_vm1, %v756_v11  ;;  %v556_v21 = vmul.f32 %v1243_v34, %v416_v15  ;;  %v929_v22 = vpop.f32.mrf.mxu0  ;;  %v700_v11 = vld [vmem:[%s1830_s4 + $0x190] sm:$0xff] }
  0xdf   :  { %v961_v23 = vpop.f32.mrf.mxu1  ;;  %786 = vst.msk [vmem:[%s1831_s5 + $0x40] sm:$0xff] %vm118_vm1, %v722_v16  ;;  %v725_v24 = vadd.f32 %v661_v12, %v597_v18  ;;  %v529_v28 = vmul.f32 %v929_v22, %v1243_v34  ;;  %v595_v30 = vadd.f32 %v1248_v36, %v524_v20 }
  0xe0   :  { %818 = vst.msk [vmem:[%s1831_s5 + $0x140] sm:$0xff] %vm118_vm1, %v754_v17  ;;  %v757_v25 = vadd.f32 %v693_v13, %v629_v19  ;;  %v561_v29 = vmul.f32 %v961_v23, %v1243_v34  ;;  %v627_v31 = vadd.f32 %v1248_v36, %v556_v21  ;;  %v301_v35 = vpop.f32.mrf.mxu0 }
  0xe1   :  { %v429_v37 = vpop.f32.mrf.mxu1  ;;  %789 = vst.msk [vmem:[%s1831_s5 + $0x58] sm:$0xff] %vm118_vm1, %v725_v24  ;;  %v600_v38 = vadd.f32 %v1248_v36, %v529_v28  ;;  %v527_v40 = vmul.f32 %v1243_v34, %v301_v35  ;;  %v723_v42 = vadd.f32 %v659_v26, %v595_v30  ;;  %v666_v24 = vld [vmem:[%s1830_s4 + $0x80] sm:$0xff]  ;;  %v669_v30 = vld [vmem:[%s1830_s4 + $0x98] sm:$0xff] }
  0xe2   :  { %821 = vst.msk [vmem:[%s1831_s5 + $0x158] sm:$0xff] %vm118_vm1, %v757_v25  ;;  %v632_v39 = vadd.f32 %v1248_v36, %v561_v29  ;;  %v559_v41 = vmul.f32 %v1243_v34, %v429_v37  ;;  %v755_v43 = vadd.f32 %v691_v27, %v627_v31  ;;  %v930_v46 = vpop.f32.mrf.mxu0  ;;  %v698_v25 = vld [vmem:[%s1830_s4 + $0x180] sm:$0xff]  ;;  %v701_v31 = vld [vmem:[%s1830_s4 + $0x198] sm:$0xff] }
  0xe3   :  { %v962_v47 = vpop.f32.mrf.mxu1  ;;  %v728_v48 = vadd.f32 %v664_v32, %v600_v38  ;;  %v598_v50 = vadd.f32 %v1248_v36, %v527_v40  ;;  %787 = vst.msk [vmem:[%s1831_s5 + $0x48] sm:$0xff] %vm118_vm1, %v723_v42  ;;  %v530_v52 = vmul.f32 %v930_v46, %v1243_v34  ;;  %v667_v42 = vld [vmem:[%s1830_s4 + $0x88] sm:$0xff] }
  0xe4   :  { %v760_v49 = vadd.f32 %v696_v33, %v632_v39  ;;  %v630_v51 = vadd.f32 %v1248_v36, %v559_v41  ;;  %819 = vst.msk [vmem:[%s1831_s5 + $0x148] sm:$0xff] %vm118_vm1, %v755_v43  ;;  %v562_v53 = vmul.f32 %v962_v47, %v1243_v34  ;;  %v304_v54 = vpop.f32.mrf.mxu0  ;;  %v699_v43 = vld [vmem:[%s1830_s4 + $0x188] sm:$0xff] }
  0xe5   :  { %v432_v55 = vpop.f32.mrf.mxu1  ;;  %792 = vst.msk [vmem:[%s1831_s5 + $0x70] sm:$0xff] %vm118_vm1, %v728_v48  ;;  %v726_v56 = vadd.f32 %v662_v44, %v598_v50  ;;  %v528_v60 = vmul.f32 %v1243_v34, %v304_v54  ;;  %v601_v62 = vadd.f32 %v1248_v36, %v530_v52 }
  0xe6   :  { %824 = vst.msk [vmem:[%s1831_s5 + $0x170] sm:$0xff] %vm118_vm1, %v760_v49  ;;  %v758_v57 = vadd.f32 %v694_v45, %v630_v51  ;;  %v560_v61 = vmul.f32 %v1243_v34, %v432_v55  ;;  %v633_v63 = vadd.f32 %v1248_v36, %v562_v53  ;;  %v933_v2 = vpop.f32.mrf.mxu0 }
  0xe7   :  { %v965_v3 = vpop.f32.mrf.mxu1  ;;  %790 = vst.msk [vmem:[%s1831_s5 + $0x60] sm:$0xff] %vm118_vm1, %v726_v56  ;;  %v599_v4 = vadd.f32 %v1248_v36, %v528_v60  ;;  %v533_v6 = vmul.f32 %v933_v2, %v1243_v34  ;;  %v729_v8 = vadd.f32 %v665_v58, %v601_v62  ;;  %v672_v56 = vld [vmem:[%s1830_s4 + $0xb0] sm:$0xff]  ;;  %v670_v62 = vld [vmem:[%s1830_s4 + $0xa0] sm:$0xff] }
  0xe8   :  { %822 = vst.msk [vmem:[%s1831_s5 + $0x160] sm:$0xff] %vm118_vm1, %v758_v57  ;;  %v631_v5 = vadd.f32 %v1248_v36, %v560_v61  ;;  %v565_v7 = vmul.f32 %v965_v3, %v1243_v34  ;;  %v761_v9 = vadd.f32 %v697_v59, %v633_v63  ;;  %v317_v12 = vpop.f32.mrf.mxu0  ;;  %v704_v57 = vld [vmem:[%s1830_s4 + $0x1b0] sm:$0xff]  ;;  %v702_v63 = vld [vmem:[%s1830_s4 + $0x1a0] sm:$0xff] }
  0xe9   :  { %v445_v13 = vpop.f32.mrf.mxu1  ;;  %v727_v14 = vadd.f32 %v663_v0, %v599_v4  ;;  %v604_v16 = vadd.f32 %v1248_v36, %v533_v6  ;;  %793 = vst.msk [vmem:[%s1831_s5 + $0x78] sm:$0xff] %vm118_vm1, %v729_v8  ;;  %v531_v18 = vmul.f32 %v1243_v34, %v317_v12  ;;  %v673_v8 = vld [vmem:[%s1830_s4 + $0xb8] sm:$0xff] }
  0xea   :  { %v759_v15 = vadd.f32 %v695_v1, %v631_v5  ;;  %v636_v17 = vadd.f32 %v1248_v36, %v565_v7  ;;  %825 = vst.msk [vmem:[%s1831_s5 + $0x178] sm:$0xff] %vm118_vm1, %v761_v9  ;;  %v563_v19 = vmul.f32 %v1243_v34, %v445_v13  ;;  %v934_v20 = vpop.f32.mrf.mxu0  ;;  %v705_v9 = vld [vmem:[%s1830_s4 + $0x1b8] sm:$0xff] }
  0xeb   :  { %v966_v21 = vpop.f32.mrf.mxu1  ;;  %791 = vst.msk [vmem:[%s1831_s5 + $0x68] sm:$0xff] %vm118_vm1, %v727_v14  ;;  %v732_v22 = vadd.f32 %v668_v10, %v604_v16  ;;  %v534_v26 = vmul.f32 %v934_v20, %v1243_v34  ;;  %v602_v28 = vadd.f32 %v1248_v36, %v531_v18 }
  0xec   :  { %823 = vst.msk [vmem:[%s1831_s5 + $0x168] sm:$0xff] %vm118_vm1, %v759_v15  ;;  %v764_v23 = vadd.f32 %v700_v11, %v636_v17  ;;  %v566_v27 = vmul.f32 %v966_v21, %v1243_v34  ;;  %v634_v29 = vadd.f32 %v1248_v36, %v563_v19  ;;  %v320_v32 = vpop.f32.mrf.mxu0 }
  0xed   :  { %v448_v33 = vpop.f32.mrf.mxu1  ;;  %796 = vst.msk [vmem:[%s1831_s5 + $0x90] sm:$0xff] %vm118_vm1, %v732_v22  ;;  %v605_v35 = vadd.f32 %v1248_v36, %v534_v26  ;;  %v532_v38 = vmul.f32 %v1243_v34, %v320_v32  ;;  %v730_v40 = vadd.f32 %v666_v24, %v602_v28  ;;  %v671_v22 = vld [vmem:[%s1830_s4 + $0xa8] sm:$0xff]  ;;  %v676_v28 = vld [vmem:[%s1830_s4 + $0xd0] sm:$0xff] }
  0xee   :  { %828 = vst.msk [vmem:[%s1831_s5 + $0x190] sm:$0xff] %vm118_vm1, %v764_v23  ;;  %v637_v37 = vadd.f32 %v1248_v36, %v566_v27  ;;  %v564_v39 = vmul.f32 %v1243_v34, %v448_v33  ;;  %v762_v41 = vadd.f32 %v698_v25, %v634_v29  ;;  %v937_v44 = vpop.f32.mrf.mxu0  ;;  %v703_v23 = vld [vmem:[%s1830_s4 + $0x1a8] sm:$0xff]  ;;  %v708_v29 = vld [vmem:[%s1830_s4 + $0x1d0] sm:$0xff] }
  0xef   :  { %v969_v45 = vpop.f32.mrf.mxu1  ;;  %v733_v46 = vadd.f32 %v669_v30, %v605_v35  ;;  %v603_v48 = vadd.f32 %v1248_v36, %v532_v38  ;;  %794 = vst.msk [vmem:[%s1831_s5 + $0x80] sm:$0xff] %vm118_vm1, %v730_v40  ;;  %v537_v50 = vmul.f32 %v937_v44, %v1243_v34  ;;  %v674_v40 = vld [vmem:[%s1830_s4 + $0xc0] sm:$0xff] }
  0xf0   :  { %v765_v47 = vadd.f32 %v701_v31, %v637_v37  ;;  %v635_v49 = vadd.f32 %v1248_v36, %v564_v39  ;;  %826 = vst.msk [vmem:[%s1831_s5 + $0x180] sm:$0xff] %vm118_vm1, %v762_v41  ;;  %v569_v51 = vmul.f32 %v969_v45, %v1243_v34  ;;  %v333_v52 = vpop.f32.mrf.mxu0  ;;  %v706_v41 = vld [vmem:[%s1830_s4 + $0x1c0] sm:$0xff] }
  0xf1   :  { %v461_v53 = vpop.f32.mrf.mxu1  ;;  %797 = vst.msk [vmem:[%s1831_s5 + $0x98] sm:$0xff] %vm118_vm1, %v733_v46  ;;  %v731_v54 = vadd.f32 %v667_v42, %v603_v48  ;;  %v535_v58 = vmul.f32 %v1243_v34, %v333_v52  ;;  %v608_v60 = vadd.f32 %v1248_v36, %v537_v50 }
  0xf2   :  { %829 = vst.msk [vmem:[%s1831_s5 + $0x198] sm:$0xff] %vm118_vm1, %v765_v47  ;;  %v763_v55 = vadd.f32 %v699_v43, %v635_v49  ;;  %v567_v59 = vmul.f32 %v1243_v34, %v461_v53  ;;  %v640_v61 = vadd.f32 %v1248_v36, %v569_v51  ;;  %v938_v0 = vpop.f32.mrf.mxu0 }
  0xf3   :  { %v970_v1 = vpop.f32.mrf.mxu1  ;;  %795 = vst.msk [vmem:[%s1831_s5 + $0x88] sm:$0xff] %vm118_vm1, %v731_v54  ;;  %v606_v2 = vadd.f32 %v1248_v36, %v535_v58  ;;  %v538_v4 = vmul.f32 %v938_v0, %v1243_v34  ;;  %v736_v6 = vadd.f32 %v672_v56, %v608_v60  ;;  %v677_v54 = vld [vmem:[%s1830_s4 + $0xd8] sm:$0xff]  ;;  %v675_v60 = vld [vmem:[%s1830_s4 + $0xc8] sm:$0xff] }
  0xf4   :  { %827 = vst.msk [vmem:[%s1831_s5 + $0x188] sm:$0xff] %vm118_vm1, %v763_v55  ;;  %v638_v3 = vadd.f32 %v1248_v36, %v567_v59  ;;  %v570_v5 = vmul.f32 %v970_v1, %v1243_v34  ;;  %v768_v7 = vadd.f32 %v704_v57, %v640_v61  ;;  %v336_v10 = vpop.f32.mrf.mxu0  ;;  %v709_v55 = vld [vmem:[%s1830_s4 + $0x1d8] sm:$0xff]  ;;  %v707_v61 = vld [vmem:[%s1830_s4 + $0x1c8] sm:$0xff] }
  0xf5   :  { %v464_v11 = vpop.f32.mrf.mxu1  ;;  %v734_v12 = vadd.f32 %v670_v62, %v606_v2  ;;  %v609_v14 = vadd.f32 %v1248_v36, %v538_v4  ;;  %800 = vst.msk [vmem:[%s1831_s5 + $0xb0] sm:$0xff] %vm118_vm1, %v736_v6  ;;  %v536_v16 = vmul.f32 %v1243_v34, %v336_v10  ;;  %v680_v6 = vld [vmem:[%s1830_s4 + $0xf0] sm:$0xff] }
  0xf6   :  { %v766_v13 = vadd.f32 %v702_v63, %v638_v3  ;;  %v641_v15 = vadd.f32 %v1248_v36, %v570_v5  ;;  %832 = vst.msk [vmem:[%s1831_s5 + $0x1b0] sm:$0xff] %vm118_vm1, %v768_v7  ;;  %v568_v17 = vmul.f32 %v1243_v34, %v464_v11  ;;  %v941_v18 = vpop.f32.mrf.mxu0  ;;  %v712_v7 = vld [vmem:[%s1830_s4 + $0x1f0] sm:$0xff] }
  0xf7   :  { %v973_v19 = vpop.f32.mrf.mxu1  ;;  %798 = vst.msk [vmem:[%s1831_s5 + $0xa0] sm:$0xff] %vm118_vm1, %v734_v12  ;;  %v737_v20 = vadd.f32 %v673_v8, %v609_v14  ;;  %v541_v24 = vmul.f32 %v941_v18, %v1243_v34  ;;  %v607_v26 = vadd.f32 %v1248_v36, %v536_v16 }
  0xf8   :  { %830 = vst.msk [vmem:[%s1831_s5 + $0x1a0] sm:$0xff] %vm118_vm1, %v766_v13  ;;  %v769_v21 = vadd.f32 %v705_v9, %v641_v15  ;;  %v573_v25 = vmul.f32 %v973_v19, %v1243_v34  ;;  %v639_v27 = vadd.f32 %v1248_v36, %v568_v17  ;;  %v349_v30 = vpop.f32.mrf.mxu0 }
  0xf9   :  { %v477_v31 = vpop.f32.mrf.mxu1  ;;  %801 = vst.msk [vmem:[%s1831_s5 + $0xb8] sm:$0xff] %vm118_vm1, %v737_v20  ;;  %v612_v32 = vadd.f32 %v1248_v36, %v541_v24  ;;  %v539_v35 = vmul.f32 %v1243_v34, %v349_v30  ;;  %v735_v38 = vadd.f32 %v671_v22, %v607_v26  ;;  %v678_v20 = vld [vmem:[%s1830_s4 + $0xe0] sm:$0xff]  ;;  %v681_v26 = vld [vmem:[%s1830_s4 + $0xf8] sm:$0xff] }
  0xfa   :  { %833 = vst.msk [vmem:[%s1831_s5 + $0x1b8] sm:$0xff] %vm118_vm1, %v769_v21  ;;  %v644_v33 = vadd.f32 %v1248_v36, %v573_v25  ;;  %v571_v37 = vmul.f32 %v1243_v34, %v477_v31  ;;  %v767_v39 = vadd.f32 %v703_v23, %v639_v27  ;;  %v942_v42 = vpop.f32.mrf.mxu0  ;;  %v710_v21 = vld [vmem:[%s1830_s4 + $0x1e0] sm:$0xff]  ;;  %v713_v27 = vld [vmem:[%s1830_s4 + $0x1f8] sm:$0xff] }
  0xfb   :  { %v974_v43 = vpop.f32.mrf.mxu1  ;;  %v740_v44 = vadd.f32 %v676_v28, %v612_v32  ;;  %v610_v46 = vadd.f32 %v1248_v36, %v539_v35  ;;  %799 = vst.msk [vmem:[%s1831_s5 + $0xa8] sm:$0xff] %vm118_vm1, %v735_v38  ;;  %v542_v48 = vmul.f32 %v942_v42, %v1243_v34  ;;  %v679_v38 = vld [vmem:[%s1830_s4 + $0xe8] sm:$0xff] }
  0xfc   :  { %v772_v45 = vadd.f32 %v708_v29, %v644_v33  ;;  %v642_v47 = vadd.f32 %v1248_v36, %v571_v37  ;;  %831 = vst.msk [vmem:[%s1831_s5 + $0x1a8] sm:$0xff] %vm118_vm1, %v767_v39  ;;  %v574_v49 = vmul.f32 %v974_v43, %v1243_v34  ;;  %v352_v50 = vpop.f32.mrf.mxu0  ;;  %v711_v39 = vld [vmem:[%s1830_s4 + $0x1e8] sm:$0xff] }
  0xfd   :  { %v480_v51 = vpop.f32.mrf.mxu1  ;;  %804 = vst.msk [vmem:[%s1831_s5 + $0xd0] sm:$0xff] %vm118_vm1, %v740_v44  ;;  %v738_v52 = vadd.f32 %v674_v40, %v610_v46  ;;  %v540_v56 = vmul.f32 %v1243_v34, %v352_v50  ;;  %v613_v58 = vadd.f32 %v1248_v36, %v542_v48 }
  0xfe   :  { %836 = vst.msk [vmem:[%s1831_s5 + $0x1d0] sm:$0xff] %vm118_vm1, %v772_v45  ;;  %v770_v53 = vadd.f32 %v706_v41, %v642_v47  ;;  %v572_v57 = vmul.f32 %v1243_v34, %v480_v51  ;;  %v645_v59 = vadd.f32 %v1248_v36, %v574_v49  ;;  %v945_v62 = vpop.f32.mrf.mxu0 }
  0xff   :  { %v977_v63 = vpop.f32.mrf.mxu1  ;;  %802 = vst.msk [vmem:[%s1831_s5 + $0xc0] sm:$0xff] %vm118_vm1, %v738_v52  ;;  %v611_v0 = vadd.f32 %v1248_v36, %v540_v56  ;;  %v545_v2 = vmul.f32 %v945_v62, %v1243_v34  ;;  %v741_v4 = vadd.f32 %v677_v54, %v613_v58 }
 0x100   :  { %834 = vst.msk [vmem:[%s1831_s5 + $0x1c0] sm:$0xff] %vm118_vm1, %v770_v53  ;;  %v643_v1 = vadd.f32 %v1248_v36, %v572_v57  ;;  %v577_v3 = vmul.f32 %v977_v63, %v1243_v34  ;;  %v773_v5 = vadd.f32 %v709_v55, %v645_v59  ;;  %v365_v8 = vpop.f32.mrf.mxu0 }
 0x101   :  { %v493_v9 = vpop.f32.mrf.mxu1  ;;  %v739_v10 = vadd.f32 %v675_v60, %v611_v0  ;;  %v616_v12 = vadd.f32 %v1248_v36, %v545_v2  ;;  %805 = vst.msk [vmem:[%s1831_s5 + $0xd8] sm:$0xff] %vm118_vm1, %v741_v4  ;;  %v543_v14 = vmul.f32 %v1243_v34, %v365_v8 }
 0x102   :  { %v771_v11 = vadd.f32 %v707_v61, %v643_v1  ;;  %v648_v13 = vadd.f32 %v1248_v36, %v577_v3  ;;  %837 = vst.msk [vmem:[%s1831_s5 + $0x1d8] sm:$0xff] %vm118_vm1, %v773_v5  ;;  %v575_v15 = vmul.f32 %v1243_v34, %v493_v9  ;;  %v946_v16 = vpop.f32.mrf.mxu0 }
 0x103   :  { %v978_v17 = vpop.f32.mrf.mxu1  ;;  %803 = vst.msk [vmem:[%s1831_s5 + $0xc8] sm:$0xff] %vm118_vm1, %v739_v10  ;;  %v744_v18 = vadd.f32 %v680_v6, %v616_v12  ;;  %v546_v22 = vmul.f32 %v946_v16, %v1243_v34  ;;  %v614_v24 = vadd.f32 %v1248_v36, %v543_v14 }
 0x104   :  { %835 = vst.msk [vmem:[%s1831_s5 + $0x1c8] sm:$0xff] %vm118_vm1, %v771_v11  ;;  %v776_v19 = vadd.f32 %v712_v7, %v648_v13  ;;  %v578_v23 = vmul.f32 %v978_v17, %v1243_v34  ;;  %v646_v25 = vadd.f32 %v1248_v36, %v575_v15  ;;  %v368_v28 = vpop.f32.mrf.mxu0 }
 0x105   :  { %v496_v29 = vpop.f32.mrf.mxu1  ;;  %808 = vst.msk [vmem:[%s1831_s5 + $0xf0] sm:$0xff] %vm118_vm1, %v744_v18  ;;  %v617_v30 = vadd.f32 %v1248_v36, %v546_v22  ;;  %v544_v32 = vmul.f32 %v1243_v34, %v368_v28  ;;  %v742_v35 = vadd.f32 %v678_v20, %v614_v24 }
 0x106   :  { %840 = vst.msk [vmem:[%s1831_s5 + $0x1f0] sm:$0xff] %vm118_vm1, %v776_v19  ;;  %v649_v31 = vadd.f32 %v1248_v36, %v578_v23  ;;  %v576_v33 = vmul.f32 %v1243_v34, %v496_v29  ;;  %v774_v37 = vadd.f32 %v710_v21, %v646_v25 }
 0x107   :  { %v745_v40 = vadd.f32 %v681_v26, %v617_v30  ;;  %v615_v42 = vadd.f32 %v1248_v36, %v544_v32  ;;  %806 = vst.msk [vmem:[%s1831_s5 + $0xe0] sm:$0xff] %vm118_vm1, %v742_v35 }
 0x108   :  { %v777_v41 = vadd.f32 %v713_v27, %v649_v31  ;;  %v647_v43 = vadd.f32 %v1248_v36, %v576_v33  ;;  %838 = vst.msk [vmem:[%s1831_s5 + $0x1e0] sm:$0xff] %vm118_vm1, %v774_v37 }
 0x109   :  { %809 = vst.msk [vmem:[%s1831_s5 + $0xf8] sm:$0xff] %vm118_vm1, %v745_v40  ;;  %v743_v34 = vadd.f32 %v679_v38, %v615_v42 }
 0x10a   :  { %841 = vst.msk [vmem:[%s1831_s5 + $0x1f8] sm:$0xff] %vm118_vm1, %v777_v41  ;;  %v775_v36 = vadd.f32 %v711_v39, %v647_v43 }
 0x10b   :  { %807 = vst.msk [vmem:[%s1831_s5 + $0xe8] sm:$0xff] %vm118_vm1, %v743_v34 }
 0x10c   :  { %839 = vst.msk [vmem:[%s1831_s5 + $0x1e8] sm:$0xff] %vm118_vm1, %v775_v36 }

// kernel: replk_stage_forward.10
= control target key start
LH: loop header
LB: loop body
LE: loop exit
PB: predicated region body
PF: predicated region fallthrough
CT: control target
= control target key end

     0   :  { %vm360_vm0 = vcmask 1043456   ;;  %vm263_vm1 = vcmask 64512   ;;  %s1860_s1 = inlined_call_operand.vmem [shape: bf16[8,8], index: 1, kind: input, shape index: {}]   ;;  %s1861_s0 = inlined_call_operand.vmem [shape: f32[512,8], index: 0, kind: input, shape index: {}]   ;;  %s1862_s2 = inlined_call_operand.vmem [shape: f32[1,8], index: 2, kind: input, shape index: {}]   ;;  %s1863_s3 = inlined_call_operand.vmem [shape: f32[1,8], index: 3, kind: input, shape index: {}]   ;;  %s1864_s4 = inlined_call_operand.vmem [shape: f32[1,8], index: 4, kind: input, shape index: {}]   ;;  %s1865_s5 = inlined_call_operand.vmem [shape: f32[1,8], index: 5, kind: input, shape index: {}]   ;;  %s1866_s6 = inlined_call_operand.vmem [shape: f32[512,8], index: 6, kind: output, shape index: {}]  }
   0x1   :  { %v262_v0 = vld [vmem:[%s1860_s1] sm:$0xf]  ;;  %v25_v2 = vld [vmem:[%s1861_s0 + $0x8] sm:$0xff]  ;;  %v26_v11 = vld [vmem:[%s1861_s0 + $0x10] sm:$0xff] }
   0x2   :  { %v24_v1 = vld [vmem:[%s1861_s0] sm:$0xff]  ;;  %1064 = vmatprep.subr.msk.bf16.mxu0 %vm360_vm0, %v262_v0  ;;  %1065 = vmatprep.subr.msk.bf16.mxu1 %vm360_vm0, %v262_v0  ;;  %v362_v3 = vsel %vm360_vm0, %v262_v0, 0  ;;  %v57_v9 = vld [vmem:[%s1861_s0 + $0x108] sm:$0xff]  ;;  %v27_v12 = vld [vmem:[%s1861_s0 + $0x18] sm:$0xff] }
   0x3   :  { %v1113_v4 = vld [vmem:[%s1862_s2] ss:$0 sm:$0xff]  ;;  %997 = vmatpush3.bf16.msra.mxu0 %v362_v3  ;;  %1063 = vmatpush3.bf16.msra.mxu1 %v362_v3  ;;  %v58_v16 = vld [vmem:[%s1861_s0 + $0x110] sm:$0xff]  ;;  %v59_v17 = vld [vmem:[%s1861_s0 + $0x118] sm:$0xff] }
   0x4   :  { %v1118_v5 = vld [vmem:[%s1863_s3] ss:$0 sm:$0xff]  ;;  %v95_v7 = vmul.f32 %v1113_v4, %v24_v1  ;;  %v96_v8 = vmul.f32 %v1113_v4, %v25_v2  ;;  %v128_v13 = vmul.f32 %v1113_v4, %v57_v9  ;;  %v97_v14 = vmul.f32 %v1113_v4, %v26_v11  ;;  %v29_v23 = vld [vmem:[%s1861_s0 + $0x28] sm:$0xff]  ;;  %v30_v30 = vld [vmem:[%s1861_s0 + $0x30] sm:$0xff] }
   0x5   :  { %v56_v6 = vld [vmem:[%s1861_s0 + $0x100] sm:$0xff]  ;;  %v98_v15 = vmul.f32 %v1113_v4, %v27_v12  ;;  %v129_v22 = vmul.f32 %v1113_v4, %v58_v16  ;;  %v130_v28 = vmul.f32 %v1113_v4, %v59_v17  ;;  %v61_v29 = vld [vmem:[%s1861_s0 + $0x128] sm:$0xff]  ;;  %v100_v34 = vmul.f32 %v1113_v4, %v29_v23  ;;  %v31_v35 = vld [vmem:[%s1861_s0 + $0x38] sm:$0xff] }
   0x6   :  { %v127_v10 = vmul.f32 %v1113_v4, %v56_v6  ;;  %v28_v18 = vld [vmem:[%s1861_s0 + $0x20] sm:$0xff]  ;;  %v166_v19 = vadd.f32 %v1118_v5, %v95_v7  ;;  %v167_v20 = vadd.f32 %v1118_v5, %v96_v8  ;;  %v199_v25 = vadd.f32 %v1118_v5, %v128_v13  ;;  %v62_v40 = vld [vmem:[%s1861_s0 + $0x130] sm:$0xff]  ;;  %v63_v45 = vld [vmem:[%s1861_s0 + $0x138] sm:$0xff] }
   0x7   :  { %v60_v24 = vld [vmem:[%s1861_s0 + $0x120] sm:$0xff]  ;;  %v168_v26 = vadd.f32 %v1118_v5, %v97_v14  ;;  %v169_v27 = vadd.f32 %v1118_v5, %v98_v15  ;;  %v200_v32 = vadd.f32 %v1118_v5, %v129_v22  ;;  %v99_v33 = vmul.f32 %v1113_v4, %v28_v18  ;;  %v33_v47 = vld [vmem:[%s1861_s0 + $0x48] sm:$0xff]  ;;  %v34_v61 = vld [vmem:[%s1861_s0 + $0x50] sm:$0xff] }
   0x8   :  { %v198_v21 = vadd.f32 %v1118_v5, %v127_v10  ;;  %v230_v31 = vpack.c.bf16 %v167_v20, %v166_v19  ;;  %v201_v38 = vadd.f32 %v1118_v5, %v130_v28  ;;  %v131_v39 = vmul.f32 %v1113_v4, %v60_v24  ;;  %v32_v46 = vld [vmem:[%s1861_s0 + $0x40] sm:$0xff]  ;;  %v65_v52 = vld [vmem:[%s1861_s0 + $0x148] sm:$0xff]  ;;  %v35_v62 = vld [vmem:[%s1861_s0 + $0x58] sm:$0xff] }
   0x9   :  { %v231_v37 = vpack.c.bf16 %v169_v27, %v168_v26  ;;  %v170_v41 = vadd.f32 %v1118_v5, %v99_v33  ;;  %v171_v42 = vadd.f32 %v1118_v5, %v100_v34  ;;  %v132_v43 = vmul.f32 %v1113_v4, %v61_v29  ;;  %v64_v51 = vld [vmem:[%s1861_s0 + $0x140] sm:$0xff]  ;;  %v66_v3 = vld [vmem:[%s1861_s0 + $0x150] sm:$0xff]  ;;  %v67_v6 = vld [vmem:[%s1861_s0 + $0x158] sm:$0xff] }
   0xa   :  { %v246_v36 = vpack.c.bf16 %v199_v25, %v198_v21  ;;  %998 = vmatprep.mubr.msk.bf16.mxu0 %vm263_vm1, %v230_v31  ;;  %v101_v44 = vmul.f32 %v1113_v4, %v30_v30  ;;  %v247_v48 = vpack.c.bf16 %v201_v38, %v200_v32  ;;  %v202_v49 = vadd.f32 %v1118_v5, %v131_v39  ;;  %v36_v11 = vld [vmem:[%s1861_s0 + $0x60] sm:$0xff]  ;;  %v37_v16 = vld [vmem:[%s1861_s0 + $0x68] sm:$0xff]  ;;  %v38_v31 = vld [vmem:[%s1861_s0 + $0x70] sm:$0xff] }
   0xb   :  { %999 = vmatmul.mubr.msk.bf16.vlgmr.msra.gmra.mxu0 %vm263_vm1, %v231_v37  ;;  %v102_v50 = vmul.f32 %v1113_v4, %v31_v35  ;;  %v232_v53 = vpack.c.bf16 %v171_v42, %v170_v41  ;;  %v203_v54 = vadd.f32 %v1118_v5, %v132_v43  ;;  %v133_v56 = vmul.f32 %v1113_v4, %v62_v40  ;;  %v68_v17 = vld [vmem:[%s1861_s0 + $0x160] sm:$0xff]  ;;  %v69_v22 = vld [vmem:[%s1861_s0 + $0x168] sm:$0xff]  ;;  %v39_v32 = vld [vmem:[%s1861_s0 + $0x78] sm:$0xff] }
   0xc   :  { %1030 = vmatprep.mubr.msk.bf16.mxu1 %vm263_vm1, %v246_v36  ;;  %v172_v55 = vadd.f32 %v1118_v5, %v101_v44  ;;  %v134_v58 = vmul.f32 %v1113_v4, %v63_v45  ;;  %v103_v59 = vmul.f32 %v1113_v4, %v32_v46  ;;  %v104_v60 = vmul.f32 %v1113_v4, %v33_v47  ;;  %v40_v36 = vld [vmem:[%s1861_s0 + $0x80] sm:$0xff]  ;;  %v41_v37 = vld [vmem:[%s1861_s0 + $0x88] sm:$0xff]  ;;  %v70_v40 = vld [vmem:[%s1861_s0 + $0x170] sm:$0xff] }
   0xd   :  { %1031 = vmatmul.mubr.msk.bf16.vlgmr.msra.gmra.mxu1 %vm263_vm1, %v247_v48  ;;  %v173_v57 = vadd.f32 %v1118_v5, %v102_v50  ;;  %1002 = vmatprep.mubr.msk.bf16.mxu0 %vm263_vm1, %v232_v53  ;;  %v248_v63 = vpack.c.bf16 %v203_v54, %v202_v49  ;;  %v204_v0 = vadd.f32 %v1118_v5, %v133_v56  ;;  %v71_v41 = vld [vmem:[%s1861_s0 + $0x178] sm:$0xff]  ;;  %v72_v45 = vld [vmem:[%s1861_s0 + $0x180] sm:$0xff]  ;;  %v73_v46 = vld [vmem:[%s1861_s0 + $0x188] sm:$0xff] }
   0xe   :  { %v135_v1 = vmul.f32 %v1113_v4, %v64_v51  ;;  %v136_v2 = vmul.f32 %v1113_v4, %v65_v52  ;;  %v205_v8 = vadd.f32 %v1118_v5, %v134_v58  ;;  %v174_v9 = vadd.f32 %v1118_v5, %v103_v59 }
   0xf   :  { %v233_v7 = vpack.c.bf16 %v173_v57, %v172_v55  ;;  %v175_v10 = vadd.f32 %v1118_v5, %v104_v60  ;;  %1034 = vmatprep.mubr.msk.bf16.mxu1 %vm263_vm1, %v248_v63  ;;  %v105_v14 = vmul.f32 %v1113_v4, %v34_v61  ;;  %v106_v15 = vmul.f32 %v1113_v4, %v35_v62  ;;  %v42_v60 = vld [vmem:[%s1861_s0 + $0x90] sm:$0xff]  ;;  %v43_v61 = vld [vmem:[%s1861_s0 + $0x98] sm:$0xff] }
  0x10   :  { %v206_v12 = vadd.f32 %v1118_v5, %v135_v1  ;;  %v207_v13 = vadd.f32 %v1118_v5, %v136_v2  ;;  %v249_v18 = vpack.c.bf16 %v205_v8, %v204_v0  ;;  %v137_v20 = vmul.f32 %v1113_v4, %v66_v3  ;;  %v44_v0 = vld [vmem:[%s1861_s0 + $0xa0] sm:$0xff]  ;;  %v45_v1 = vld [vmem:[%s1861_s0 + $0xa8] sm:$0xff] }
  0x11   :  { %v234_v19 = vpack.c.bf16 %v175_v10, %v174_v9  ;;  %v138_v21 = vmul.f32 %v1113_v4, %v67_v6  ;;  %v107_v24 = vmul.f32 %v1113_v4, %v36_v11  ;;  %v176_v25 = vadd.f32 %v1118_v5, %v105_v14  ;;  %v74_v6 = vld [vmem:[%s1861_s0 + $0x190] sm:$0xff]  ;;  %v76_v11 = vld [vmem:[%s1861_s0 + $0x1a0] sm:$0xff] }
  0x12   :  { %v250_v23 = vpack.c.bf16 %v207_v13, %v206_v12  ;;  %v177_v26 = vadd.f32 %v1118_v5, %v106_v15  ;;  %v108_v27 = vmul.f32 %v1113_v4, %v37_v16  ;;  %v139_v28 = vmul.f32 %v1113_v4, %v68_v17  ;;  %v77_v12 = vld [vmem:[%s1861_s0 + $0x1a8] sm:$0xff] }
  0x13   :  { %1003 = vmatmul.mubr.msk.bf16.gmra.mxu0 %vm263_vm1, %v233_v7  ;;  %v178_v29 = vadd.f32 %v1118_v5, %v107_v24  ;;  %v140_v30 = vmul.f32 %v1113_v4, %v69_v22  ;;  %v208_v33 = vadd.f32 %v1118_v5, %v137_v20  ;;  %v209_v34 = vadd.f32 %v1118_v5, %v138_v21  ;;  %v75_v7 = vld [vmem:[%s1861_s0 + $0x198] sm:$0xff] }
  0x14   :  { %1006 = vmatprep.mubr.msk.bf16.mxu0 %vm263_vm1, %v234_v19  ;;  %v179_v35 = vadd.f32 %v1118_v5, %v108_v27  ;;  %v210_v38 = vadd.f32 %v1118_v5, %v139_v28  ;;  %v235_v42 = vpack.c.bf16 %v177_v26, %v176_v25  ;;  %v109_v43 = vmul.f32 %v1113_v4, %v38_v31  ;;  %v46_v26 = vld [vmem:[%s1861_s0 + $0xb0] sm:$0xff]  ;;  %v47_v27 = vld [vmem:[%s1861_s0 + $0xb8] sm:$0xff]  ;;  %v49_v31 = vld [vmem:[%s1861_s0 + $0xc8] sm:$0xff] }
  0x15   :  { %1035 = vmatmul.mubr.msk.bf16.gmra.mxu1 %vm263_vm1, %v249_v18  ;;  %v211_v39 = vadd.f32 %v1118_v5, %v140_v30  ;;  %v110_v44 = vmul.f32 %v1113_v4, %v39_v32  ;;  %v111_v48 = vmul.f32 %v1113_v4, %v40_v36  ;;  %v112_v49 = vmul.f32 %v1113_v4, %v41_v37  ;;  %v48_v30 = vld [vmem:[%s1861_s0 + $0xc0] sm:$0xff] }
  0x16   :  { %1038 = vmatprep.mubr.msk.bf16.mxu1 %vm263_vm1, %v250_v23  ;;  %v236_v47 = vpack.c.bf16 %v179_v35, %v178_v29  ;;  %v251_v50 = vpack.c.bf16 %v209_v34, %v208_v33  ;;  %v141_v51 = vmul.f32 %v1113_v4, %v70_v40  ;;  %v142_v52 = vmul.f32 %v1113_v4, %v71_v41  ;;  %v78_v34 = vld [vmem:[%s1861_s0 + $0x1b0] sm:$0xff]  ;;  %v79_v35 = vld [vmem:[%s1861_s0 + $0x1b8] sm:$0xff]  ;;  %v81_v40 = vld [vmem:[%s1861_s0 + $0x1c8] sm:$0xff] }
  0x17   :  { %v252_v53 = vpack.c.bf16 %v211_v39, %v210_v38  ;;  %v143_v54 = vmul.f32 %v1113_v4, %v72_v45  ;;  %v144_v55 = vmul.f32 %v1113_v4, %v73_v46  ;;  %v180_v56 = vadd.f32 %v1118_v5, %v109_v43  ;;  %v80_v39 = vld [vmem:[%s1861_s0 + $0x1c0] sm:$0xff] }
  0x18   :  { %v181_v57 = vadd.f32 %v1118_v5, %v110_v44  ;;  %v182_v58 = vadd.f32 %v1118_v5, %v111_v48  ;;  %v183_v59 = vadd.f32 %v1118_v5, %v112_v49  ;;  %v212_v62 = vadd.f32 %v1118_v5, %v141_v51 }
  0x19   :  { %v213_v63 = vadd.f32 %v1118_v5, %v142_v52  ;;  %v214_v2 = vadd.f32 %v1118_v5, %v143_v54  ;;  %v215_v3 = vadd.f32 %v1118_v5, %v144_v55  ;;  %v113_v9 = vmul.f32 %v1113_v4, %v42_v60  ;;  %v50_v54 = vld [vmem:[%s1861_s0 + $0xd0] sm:$0xff]  ;;  %v51_v55 = vld [vmem:[%s1861_s0 + $0xd8] sm:$0xff] }
  0x1a   :  { %v237_v8 = vpack.c.bf16 %v181_v57, %v180_v56  ;;  %v114_v10 = vmul.f32 %v1113_v4, %v43_v61  ;;  %v238_v13 = vpack.c.bf16 %v183_v59, %v182_v58  ;;  %v115_v14 = vmul.f32 %v1113_v4, %v44_v0  ;;  %v52_v58 = vld [vmem:[%s1861_s0 + $0xe0] sm:$0xff]  ;;  %v53_v59 = vld [vmem:[%s1861_s0 + $0xe8] sm:$0xff] }
  0x1b   :  { %1007 = vmatmul.mubr.msk.bf16.gmra.mxu0 %vm263_vm1, %v235_v42  ;;  %v116_v15 = vmul.f32 %v1113_v4, %v45_v1  ;;  %v253_v16 = vpack.c.bf16 %v213_v63, %v212_v62  ;;  %v145_v17 = vmul.f32 %v1113_v4, %v74_v6  ;;  %v146_v18 = vmul.f32 %v1113_v4, %v75_v7  ;;  %v82_v62 = vld [vmem:[%s1861_s0 + $0x1d0] sm:$0xff]  ;;  %v83_v63 = vld [vmem:[%s1861_s0 + $0x1d8] sm:$0xff]  ;;  %v85_v6 = vld [vmem:[%s1861_s0 + $0x1e8] sm:$0xff] }
  0x1c   :  { %1010 = vmatprep.mubr.msk.bf16.mxu0 %vm263_vm1, %v236_v47  ;;  %v254_v19 = vpack.c.bf16 %v215_v3, %v214_v2  ;;  %v147_v20 = vmul.f32 %v1113_v4, %v76_v11  ;;  %v148_v21 = vmul.f32 %v1113_v4, %v77_v12  ;;  %v184_v22 = vadd.f32 %v1118_v5, %v113_v9  ;;  %v84_v3 = vld [vmem:[%s1861_s0 + $0x1e0] sm:$0xff] }
  0x1d   :  { %1039 = vmatmul.mubr.msk.bf16.gmra.mxu1 %vm263_vm1, %v251_v50  ;;  %v185_v23 = vadd.f32 %v1118_v5, %v114_v10  ;;  %v186_v24 = vadd.f32 %v1118_v5, %v115_v14  ;;  %v187_v25 = vadd.f32 %v1118_v5, %v116_v15  ;;  %v216_v28 = vadd.f32 %v1118_v5, %v145_v17 }
  0x1e   :  { %1042 = vmatprep.mubr.msk.bf16.mxu1 %vm263_vm1, %v252_v53  ;;  %v217_v29 = vadd.f32 %v1118_v5, %v146_v18  ;;  %v218_v32 = vadd.f32 %v1118_v5, %v147_v20  ;;  %v219_v33 = vadd.f32 %v1118_v5, %v148_v21  ;;  %v117_v37 = vmul.f32 %v1113_v4, %v46_v26  ;;  %v54_v20 = vld [vmem:[%s1861_s0 + $0xf0] sm:$0xff]  ;;  %v55_v21 = vld [vmem:[%s1861_s0 + $0xf8] sm:$0xff] }
  0x1f   :  { %v239_v36 = vpack.c.bf16 %v185_v23, %v184_v22  ;;  %v118_v38 = vmul.f32 %v1113_v4, %v47_v27  ;;  %v240_v41 = vpack.c.bf16 %v187_v25, %v186_v24  ;;  %v119_v42 = vmul.f32 %v1113_v4, %v48_v30  ;;  %v86_v26 = vld [vmem:[%s1861_s0 + $0x1f0] sm:$0xff]  ;;  %v87_v27 = vld [vmem:[%s1861_s0 + $0x1f8] sm:$0xff] }
  0x20   :  { %v120_v43 = vmul.f32 %v1113_v4, %v49_v31  ;;  %v255_v44 = vpack.c.bf16 %v217_v29, %v216_v28  ;;  %v149_v45 = vmul.f32 %v1113_v4, %v78_v34  ;;  %v150_v46 = vmul.f32 %v1113_v4, %v79_v35 }
  0x21   :  { %v256_v47 = vpack.c.bf16 %v219_v33, %v218_v32  ;;  %v151_v48 = vmul.f32 %v1113_v4, %v80_v39  ;;  %v152_v49 = vmul.f32 %v1113_v4, %v81_v40  ;;  %v188_v50 = vadd.f32 %v1118_v5, %v117_v37 }
  0x22   :  { %v189_v51 = vadd.f32 %v1118_v5, %v118_v38  ;;  %v190_v52 = vadd.f32 %v1118_v5, %v119_v42  ;;  %v191_v53 = vadd.f32 %v1118_v5, %v120_v43  ;;  %v220_v56 = vadd.f32 %v1118_v5, %v149_v45  ;;  %v1474_v43 = vld [vmem:[%s1865_s5] ss:$0 sm:$0xff] }
  0x23   :  { %1011 = vmatmul.mubr.msk.bf16.gmra.mxu0 %vm263_vm1, %v237_v8  ;;  %v221_v57 = vadd.f32 %v1118_v5, %v150_v46  ;;  %v222_v60 = vadd.f32 %v1118_v5, %v151_v48  ;;  %v223_v61 = vadd.f32 %v1118_v5, %v152_v49  ;;  %v121_v1 = vmul.f32 %v1113_v4, %v50_v54 }
  0x24   :  { %1014 = vmatprep.mubr.msk.bf16.mxu0 %vm263_vm1, %v238_v13  ;;  %v241_v0 = vpack.c.bf16 %v189_v51, %v188_v50  ;;  %v122_v2 = vmul.f32 %v1113_v4, %v51_v55  ;;  %v242_v7 = vpack.c.bf16 %v191_v53, %v190_v52  ;;  %v123_v8 = vmul.f32 %v1113_v4, %v52_v58 }
  0x25   :  { %1043 = vmatmul.mubr.msk.bf16.gmra.mxu1 %vm263_vm1, %v253_v16  ;;  %v124_v9 = vmul.f32 %v1113_v4, %v53_v59  ;;  %v257_v10 = vpack.c.bf16 %v221_v57, %v220_v56  ;;  %v153_v11 = vmul.f32 %v1113_v4, %v82_v62  ;;  %v154_v12 = vmul.f32 %v1113_v4, %v83_v63 }
  0x26   :  { %1046 = vmatprep.mubr.msk.bf16.mxu1 %vm263_vm1, %v254_v19  ;;  %v258_v13 = vpack.c.bf16 %v223_v61, %v222_v60  ;;  %v155_v14 = vmul.f32 %v1113_v4, %v84_v3  ;;  %v156_v15 = vmul.f32 %v1113_v4, %v85_v6  ;;  %v192_v16 = vadd.f32 %v1118_v5, %v121_v1 }
  0x27   :  { %v193_v17 = vadd.f32 %v1118_v5, %v122_v2  ;;  %v194_v18 = vadd.f32 %v1118_v5, %v123_v8  ;;  %v195_v19 = vadd.f32 %v1118_v5, %v124_v9  ;;  %v224_v22 = vadd.f32 %v1118_v5, %v153_v11 }
  0x28   :  { %v225_v23 = vadd.f32 %v1118_v5, %v154_v12  ;;  %v226_v24 = vadd.f32 %v1118_v5, %v155_v14  ;;  %v227_v25 = vadd.f32 %v1118_v5, %v156_v15  ;;  %v125_v29 = vmul.f32 %v1113_v4, %v54_v20 }
  0x29   :  { %v243_v28 = vpack.c.bf16 %v193_v17, %v192_v16  ;;  %v126_v30 = vmul.f32 %v1113_v4, %v55_v21  ;;  %v244_v31 = vpack.c.bf16 %v195_v19, %v194_v18  ;;  %v157_v33 = vmul.f32 %v1113_v4, %v86_v26 }
  0x2a   :  { %v259_v32 = vpack.c.bf16 %v225_v23, %v224_v22  ;;  %v158_v34 = vmul.f32 %v1113_v4, %v87_v27  ;;  %v260_v35 = vpack.c.bf16 %v227_v25, %v226_v24  ;;  %v1469_v4 = vld [vmem:[%s1864_s4] ss:$0 sm:$0xff] }
  0x2b   :  { %1015 = vmatmul.mubr.msk.bf16.gmra.mxu0 %vm263_vm1, %v239_v36  ;;  %v196_v36 = vadd.f32 %v1118_v5, %v125_v29  ;;  %v197_v37 = vadd.f32 %v1118_v5, %v126_v30  ;;  %v228_v38 = vadd.f32 %v1118_v5, %v157_v33 }
  0x2c   :  { %1018 = vmatprep.mubr.msk.bf16.mxu0 %vm263_vm1, %v240_v41  ;;  %v229_v39 = vadd.f32 %v1118_v5, %v158_v34 }
  0x2d   :  { %1047 = vmatmul.mubr.msk.bf16.gmra.mxu1 %vm263_vm1, %v255_v44  ;;  %v245_v40 = vpack.c.bf16 %v197_v37, %v196_v36 }
  0x2e   :  { %1050 = vmatprep.mubr.msk.bf16.mxu1 %vm263_vm1, %v256_v47  ;;  %v261_v41 = vpack.c.bf16 %v229_v39, %v228_v38 }
  0x33   :  { %1019 = vmatmul.mubr.msk.bf16.gmra.mxu0 %vm263_vm1, %v241_v0 }
  0x34   :  { %1022 = vmatprep.mubr.msk.bf16.mxu0 %vm263_vm1, %v242_v7 }
  0x35   :  { %1051 = vmatmul.mubr.msk.bf16.gmra.mxu1 %vm263_vm1, %v257_v10 }
  0x36   :  { %1054 = vmatprep.mubr.msk.bf16.mxu1 %vm263_vm1, %v258_v13 }
  0x3b   :  { %1023 = vmatmul.mubr.msk.bf16.gmra.mxu0 %vm263_vm1, %v243_v28 }
  0x3c   :  { %1026 = vmatprep.mubr.msk.bf16.mxu0 %vm263_vm1, %v244_v31 }
  0x3d   :  { %1055 = vmatmul.mubr.msk.bf16.gmra.mxu1 %vm263_vm1, %v259_v32 }
  0x3e   :  { %1058 = vmatprep.mubr.msk.bf16.mxu1 %vm263_vm1, %v260_v35 }
  0x43   :  { %1027 = vmatmul.mubr.msk.bf16.gmra.mxu0 %vm263_vm1, %v245_v40 }
  0x45   :  { %1059 = vmatmul.mubr.msk.bf16.gmra.mxu1 %vm263_vm1, %v261_v41 }
  0xcb   :  { %v1000_v42 = vpop.f32.mrf.mxu0 }
  0xcc   :  { %v662_v5 = vmul.f32 %v1000_v42, %v1469_v4 }
  0xcd   :  { %v1032_v44 = vpop.f32.mrf.mxu1  ;;  %v398_v45 = vpop.f32.mrf.mxu0 }
  0xce   :  { %v733_v46 = vadd.f32 %v1474_v43, %v662_v5  ;;  %v694_v47 = vmul.f32 %v1032_v44, %v1469_v4  ;;  %v660_v48 = vmul.f32 %v1469_v4, %v398_v45 }
  0xcf   :  { %v526_v49 = vpop.f32.mrf.mxu1  ;;  %v1001_v50 = vpop.f32.mrf.mxu0 }
  0xd0   :  { %v797_v51 = vmax.f32 %v733_v46, 0.0  ;;  %v765_v52 = vadd.f32 %v1474_v43, %v694_v47  ;;  %v731_v53 = vadd.f32 %v1474_v43, %v660_v48  ;;  %v692_v54 = vmul.f32 %v1469_v4, %v526_v49 }
  0xd1   :  { %v663_v55 = vmul.f32 %v1001_v50, %v1469_v4  ;;  %v1033_v56 = vpop.f32.mrf.mxu1  ;;  %v401_v57 = vpop.f32.mrf.mxu0 }
  0xd2   :  { %861 = vst.msk [vmem:[%s1866_s6 + $0x10] sm:$0xff] %vm263_vm1, %v797_v51  ;;  %v829_v58 = vmax.f32 %v765_v52, 0.0  ;;  %v795_v59 = vmax.f32 %v731_v53, 0.0  ;;  %v763_v60 = vadd.f32 %v1474_v43, %v692_v54  ;;  %v695_v61 = vmul.f32 %v1033_v56, %v1469_v4 }
  0xd3   :  { %v734_v62 = vadd.f32 %v1474_v43, %v663_v55  ;;  %v661_v63 = vmul.f32 %v1469_v4, %v401_v57  ;;  %v529_v0 = vpop.f32.mrf.mxu1  ;;  %v1004_v1 = vpop.f32.mrf.mxu0 }
  0xd4   :  { %893 = vst.msk [vmem:[%s1866_s6 + $0x110] sm:$0xff] %vm263_vm1, %v829_v58  ;;  %859 = vst.msk [vmem:[%s1866_s6] sm:$0xff] %vm263_vm1, %v795_v59  ;;  %v827_v2 = vmax.f32 %v763_v60, 0.0  ;;  %v766_v3 = vadd.f32 %v1474_v43, %v695_v61  ;;  %v693_v6 = vmul.f32 %v1469_v4, %v529_v0  ;;  %v666_v7 = vmul.f32 %v1004_v1, %v1469_v4 }
  0xd5   :  { %v798_v8 = vmax.f32 %v734_v62, 0.0  ;;  %v732_v9 = vadd.f32 %v1474_v43, %v661_v63  ;;  %v1036_v10 = vpop.f32.mrf.mxu1  ;;  %v414_v11 = vpop.f32.mrf.mxu0 }
  0xd6   :  { %891 = vst.msk [vmem:[%s1866_s6 + $0x100] sm:$0xff] %vm263_vm1, %v827_v2  ;;  %v830_v12 = vmax.f32 %v766_v3, 0.0  ;;  %v764_v13 = vadd.f32 %v1474_v43, %v693_v6  ;;  %v737_v14 = vadd.f32 %v1474_v43, %v666_v7  ;;  %v698_v15 = vmul.f32 %v1036_v10, %v1469_v4 }
  0xd7   :  { %862 = vst.msk [vmem:[%s1866_s6 + $0x18] sm:$0xff] %vm263_vm1, %v798_v8  ;;  %v796_v16 = vmax.f32 %v732_v9, 0.0  ;;  %v664_v17 = vmul.f32 %v1469_v4, %v414_v11  ;;  %v542_v18 = vpop.f32.mrf.mxu1  ;;  %v1005_v19 = vpop.f32.mrf.mxu0 }
  0xd8   :  { %894 = vst.msk [vmem:[%s1866_s6 + $0x118] sm:$0xff] %vm263_vm1, %v830_v12  ;;  %v828_v20 = vmax.f32 %v764_v13, 0.0  ;;  %v801_v21 = vmax.f32 %v737_v14, 0.0  ;;  %v769_v22 = vadd.f32 %v1474_v43, %v698_v15  ;;  %v696_v23 = vmul.f32 %v1469_v4, %v542_v18 }
  0xd9   :  { %860 = vst.msk [vmem:[%s1866_s6 + $0x8] sm:$0xff] %vm263_vm1, %v796_v16  ;;  %v735_v24 = vadd.f32 %v1474_v43, %v664_v17  ;;  %v667_v25 = vmul.f32 %v1005_v19, %v1469_v4  ;;  %v1037_v26 = vpop.f32.mrf.mxu1  ;;  %v417_v27 = vpop.f32.mrf.mxu0 }
  0xda   :  { %892 = vst.msk [vmem:[%s1866_s6 + $0x108] sm:$0xff] %vm263_vm1, %v828_v20  ;;  %865 = vst.msk [vmem:[%s1866_s6 + $0x30] sm:$0xff] %vm263_vm1, %v801_v21  ;;  %v833_v28 = vmax.f32 %v769_v22, 0.0  ;;  %v767_v29 = vadd.f32 %v1474_v43, %v696_v23  ;;  %v699_v30 = vmul.f32 %v1037_v26, %v1469_v4  ;;  %v665_v31 = vmul.f32 %v1469_v4, %v417_v27 }
  0xdb   :  { %v799_v32 = vmax.f32 %v735_v24, 0.0  ;;  %v738_v33 = vadd.f32 %v1474_v43, %v667_v25  ;;  %v545_v34 = vpop.f32.mrf.mxu1  ;;  %v1008_v35 = vpop.f32.mrf.mxu0 }
  0xdc   :  { %897 = vst.msk [vmem:[%s1866_s6 + $0x130] sm:$0xff] %vm263_vm1, %v833_v28  ;;  %v831_v36 = vmax.f32 %v767_v29, 0.0  ;;  %v770_v37 = vadd.f32 %v1474_v43, %v699_v30  ;;  %v736_v38 = vadd.f32 %v1474_v43, %v665_v31  ;;  %v697_v39 = vmul.f32 %v1469_v4, %v545_v34 }
  0xdd   :  { %863 = vst.msk [vmem:[%s1866_s6 + $0x20] sm:$0xff] %vm263_vm1, %v799_v32  ;;  %v802_v40 = vmax.f32 %v738_v33, 0.0  ;;  %v670_v41 = vmul.f32 %v1008_v35, %v1469_v4  ;;  %v1040_v42 = vpop.f32.mrf.mxu1  ;;  %v430_v5 = vpop.f32.mrf.mxu0 }
  0xde   :  { %895 = vst.msk [vmem:[%s1866_s6 + $0x120] sm:$0xff] %vm263_vm1, %v831_v36  ;;  %v834_v44 = vmax.f32 %v770_v37, 0.0  ;;  %v800_v45 = vmax.f32 %v736_v38, 0.0  ;;  %v768_v46 = vadd.f32 %v1474_v43, %v697_v39  ;;  %v702_v47 = vmul.f32 %v1040_v42, %v1469_v4 }
  0xdf   :  { %866 = vst.msk [vmem:[%s1866_s6 + $0x38] sm:$0xff] %vm263_vm1, %v802_v40  ;;  %v741_v48 = vadd.f32 %v1474_v43, %v670_v41  ;;  %v668_v49 = vmul.f32 %v1469_v4, %v430_v5  ;;  %v558_v50 = vpop.f32.mrf.mxu1  ;;  %v1009_v51 = vpop.f32.mrf.mxu0 }
  0xe0   :  { %898 = vst.msk [vmem:[%s1866_s6 + $0x138] sm:$0xff] %vm263_vm1, %v834_v44  ;;  %864 = vst.msk [vmem:[%s1866_s6 + $0x28] sm:$0xff] %vm263_vm1, %v800_v45  ;;  %v832_v52 = vmax.f32 %v768_v46, 0.0  ;;  %v773_v53 = vadd.f32 %v1474_v43, %v702_v47  ;;  %v700_v54 = vmul.f32 %v1469_v4, %v558_v50  ;;  %v671_v55 = vmul.f32 %v1009_v51, %v1469_v4 }
  0xe1   :  { %v805_v56 = vmax.f32 %v741_v48, 0.0  ;;  %v739_v57 = vadd.f32 %v1474_v43, %v668_v49  ;;  %v1041_v58 = vpop.f32.mrf.mxu1  ;;  %v433_v59 = vpop.f32.mrf.mxu0 }
  0xe2   :  { %896 = vst.msk [vmem:[%s1866_s6 + $0x128] sm:$0xff] %vm263_vm1, %v832_v52  ;;  %v837_v60 = vmax.f32 %v773_v53, 0.0  ;;  %v771_v61 = vadd.f32 %v1474_v43, %v700_v54  ;;  %v742_v62 = vadd.f32 %v1474_v43, %v671_v55  ;;  %v703_v63 = vmul.f32 %v1041_v58, %v1469_v4 }
  0xe3   :  { %869 = vst.msk [vmem:[%s1866_s6 + $0x50] sm:$0xff] %vm263_vm1, %v805_v56  ;;  %v803_v0 = vmax.f32 %v739_v57, 0.0  ;;  %v669_v1 = vmul.f32 %v1469_v4, %v433_v59  ;;  %v561_v2 = vpop.f32.mrf.mxu1  ;;  %v1012_v3 = vpop.f32.mrf.mxu0 }
  0xe4   :  { %901 = vst.msk [vmem:[%s1866_s6 + $0x150] sm:$0xff] %vm263_vm1, %v837_v60  ;;  %v835_v6 = vmax.f32 %v771_v61, 0.0  ;;  %v806_v7 = vmax.f32 %v742_v62, 0.0  ;;  %v774_v8 = vadd.f32 %v1474_v43, %v703_v63  ;;  %v701_v9 = vmul.f32 %v1469_v4, %v561_v2 }
  0xe5   :  { %867 = vst.msk [vmem:[%s1866_s6 + $0x40] sm:$0xff] %vm263_vm1, %v803_v0  ;;  %v740_v10 = vadd.f32 %v1474_v43, %v669_v1  ;;  %v674_v11 = vmul.f32 %v1012_v3, %v1469_v4  ;;  %v1044_v12 = vpop.f32.mrf.mxu1  ;;  %v446_v13 = vpop.f32.mrf.mxu0 }
  0xe6   :  { %899 = vst.msk [vmem:[%s1866_s6 + $0x140] sm:$0xff] %vm263_vm1, %v835_v6  ;;  %870 = vst.msk [vmem:[%s1866_s6 + $0x58] sm:$0xff] %vm263_vm1, %v806_v7  ;;  %v838_v14 = vmax.f32 %v774_v8, 0.0  ;;  %v772_v15 = vadd.f32 %v1474_v43, %v701_v9  ;;  %v706_v16 = vmul.f32 %v1044_v12, %v1469_v4  ;;  %v672_v17 = vmul.f32 %v1469_v4, %v446_v13 }
  0xe7   :  { %v804_v18 = vmax.f32 %v740_v10, 0.0  ;;  %v745_v19 = vadd.f32 %v1474_v43, %v674_v11  ;;  %v574_v20 = vpop.f32.mrf.mxu1  ;;  %v1013_v21 = vpop.f32.mrf.mxu0 }
  0xe8   :  { %902 = vst.msk [vmem:[%s1866_s6 + $0x158] sm:$0xff] %vm263_vm1, %v838_v14  ;;  %v836_v22 = vmax.f32 %v772_v15, 0.0  ;;  %v777_v23 = vadd.f32 %v1474_v43, %v706_v16  ;;  %v743_v24 = vadd.f32 %v1474_v43, %v672_v17  ;;  %v704_v25 = vmul.f32 %v1469_v4, %v574_v20 }
  0xe9   :  { %868 = vst.msk [vmem:[%s1866_s6 + $0x48] sm:$0xff] %vm263_vm1, %v804_v18  ;;  %v809_v26 = vmax.f32 %v745_v19, 0.0  ;;  %v675_v27 = vmul.f32 %v1013_v21, %v1469_v4  ;;  %v1045_v28 = vpop.f32.mrf.mxu1  ;;  %v449_v29 = vpop.f32.mrf.mxu0 }
  0xea   :  { %900 = vst.msk [vmem:[%s1866_s6 + $0x148] sm:$0xff] %vm263_vm1, %v836_v22  ;;  %v841_v30 = vmax.f32 %v777_v23, 0.0  ;;  %v807_v31 = vmax.f32 %v743_v24, 0.0  ;;  %v775_v32 = vadd.f32 %v1474_v43, %v704_v25  ;;  %v707_v33 = vmul.f32 %v1045_v28, %v1469_v4 }
  0xeb   :  { %873 = vst.msk [vmem:[%s1866_s6 + $0x70] sm:$0xff] %vm263_vm1, %v809_v26  ;;  %v746_v34 = vadd.f32 %v1474_v43, %v675_v27  ;;  %v673_v35 = vmul.f32 %v1469_v4, %v449_v29  ;;  %v577_v36 = vpop.f32.mrf.mxu1  ;;  %v1016_v37 = vpop.f32.mrf.mxu0 }
  0xec   :  { %905 = vst.msk [vmem:[%s1866_s6 + $0x170] sm:$0xff] %vm263_vm1, %v841_v30  ;;  %871 = vst.msk [vmem:[%s1866_s6 + $0x60] sm:$0xff] %vm263_vm1, %v807_v31  ;;  %v839_v38 = vmax.f32 %v775_v32, 0.0  ;;  %v778_v39 = vadd.f32 %v1474_v43, %v707_v33  ;;  %v705_v40 = vmul.f32 %v1469_v4, %v577_v36  ;;  %v678_v41 = vmul.f32 %v1016_v37, %v1469_v4 }
  0xed   :  { %v810_v42 = vmax.f32 %v746_v34, 0.0  ;;  %v744_v5 = vadd.f32 %v1474_v43, %v673_v35  ;;  %v1048_v44 = vpop.f32.mrf.mxu1  ;;  %v462_v45 = vpop.f32.mrf.mxu0 }
  0xee   :  { %903 = vst.msk [vmem:[%s1866_s6 + $0x160] sm:$0xff] %vm263_vm1, %v839_v38  ;;  %v842_v46 = vmax.f32 %v778_v39, 0.0  ;;  %v776_v47 = vadd.f32 %v1474_v43, %v705_v40  ;;  %v749_v48 = vadd.f32 %v1474_v43, %v678_v41  ;;  %v710_v49 = vmul.f32 %v1048_v44, %v1469_v4 }
  0xef   :  { %874 = vst.msk [vmem:[%s1866_s6 + $0x78] sm:$0xff] %vm263_vm1, %v810_v42  ;;  %v808_v50 = vmax.f32 %v744_v5, 0.0  ;;  %v676_v51 = vmul.f32 %v1469_v4, %v462_v45  ;;  %v590_v52 = vpop.f32.mrf.mxu1  ;;  %v1017_v53 = vpop.f32.mrf.mxu0 }
  0xf0   :  { %906 = vst.msk [vmem:[%s1866_s6 + $0x178] sm:$0xff] %vm263_vm1, %v842_v46  ;;  %v840_v54 = vmax.f32 %v776_v47, 0.0  ;;  %v813_v55 = vmax.f32 %v749_v48, 0.0  ;;  %v781_v56 = vadd.f32 %v1474_v43, %v710_v49  ;;  %v708_v57 = vmul.f32 %v1469_v4, %v590_v52 }
  0xf1   :  { %872 = vst.msk [vmem:[%s1866_s6 + $0x68] sm:$0xff] %vm263_vm1, %v808_v50  ;;  %v747_v58 = vadd.f32 %v1474_v43, %v676_v51  ;;  %v679_v59 = vmul.f32 %v1017_v53, %v1469_v4  ;;  %v1049_v60 = vpop.f32.mrf.mxu1  ;;  %v465_v61 = vpop.f32.mrf.mxu0 }
  0xf2   :  { %904 = vst.msk [vmem:[%s1866_s6 + $0x168] sm:$0xff] %vm263_vm1, %v840_v54  ;;  %877 = vst.msk [vmem:[%s1866_s6 + $0x90] sm:$0xff] %vm263_vm1, %v813_v55  ;;  %v845_v62 = vmax.f32 %v781_v56, 0.0  ;;  %v779_v63 = vadd.f32 %v1474_v43, %v708_v57  ;;  %v711_v0 = vmul.f32 %v1049_v60, %v1469_v4  ;;  %v677_v1 = vmul.f32 %v1469_v4, %v465_v61 }
  0xf3   :  { %v811_v2 = vmax.f32 %v747_v58, 0.0  ;;  %v750_v3 = vadd.f32 %v1474_v43, %v679_v59  ;;  %v593_v6 = vpop.f32.mrf.mxu1  ;;  %v1020_v7 = vpop.f32.mrf.mxu0 }
  0xf4   :  { %909 = vst.msk [vmem:[%s1866_s6 + $0x190] sm:$0xff] %vm263_vm1, %v845_v62  ;;  %v843_v8 = vmax.f32 %v779_v63, 0.0  ;;  %v782_v9 = vadd.f32 %v1474_v43, %v711_v0  ;;  %v748_v10 = vadd.f32 %v1474_v43, %v677_v1  ;;  %v709_v11 = vmul.f32 %v1469_v4, %v593_v6 }
  0xf5   :  { %875 = vst.msk [vmem:[%s1866_s6 + $0x80] sm:$0xff] %vm263_vm1, %v811_v2  ;;  %v814_v12 = vmax.f32 %v750_v3, 0.0  ;;  %v682_v13 = vmul.f32 %v1020_v7, %v1469_v4  ;;  %v1052_v14 = vpop.f32.mrf.mxu1  ;;  %v478_v15 = vpop.f32.mrf.mxu0 }
  0xf6   :  { %907 = vst.msk [vmem:[%s1866_s6 + $0x180] sm:$0xff] %vm263_vm1, %v843_v8  ;;  %v846_v16 = vmax.f32 %v782_v9, 0.0  ;;  %v812_v17 = vmax.f32 %v748_v10, 0.0  ;;  %v780_v18 = vadd.f32 %v1474_v43, %v709_v11  ;;  %v714_v19 = vmul.f32 %v1052_v14, %v1469_v4 }
  0xf7   :  { %878 = vst.msk [vmem:[%s1866_s6 + $0x98] sm:$0xff] %vm263_vm1, %v814_v12  ;;  %v753_v20 = vadd.f32 %v1474_v43, %v682_v13  ;;  %v680_v21 = vmul.f32 %v1469_v4, %v478_v15  ;;  %v606_v22 = vpop.f32.mrf.mxu1  ;;  %v1021_v23 = vpop.f32.mrf.mxu0 }
  0xf8   :  { %910 = vst.msk [vmem:[%s1866_s6 + $0x198] sm:$0xff] %vm263_vm1, %v846_v16  ;;  %876 = vst.msk [vmem:[%s1866_s6 + $0x88] sm:$0xff] %vm263_vm1, %v812_v17  ;;  %v844_v24 = vmax.f32 %v780_v18, 0.0  ;;  %v785_v25 = vadd.f32 %v1474_v43, %v714_v19  ;;  %v712_v26 = vmul.f32 %v1469_v4, %v606_v22  ;;  %v683_v27 = vmul.f32 %v1021_v23, %v1469_v4 }
  0xf9   :  { %v817_v28 = vmax.f32 %v753_v20, 0.0  ;;  %v751_v29 = vadd.f32 %v1474_v43, %v680_v21  ;;  %v1053_v30 = vpop.f32.mrf.mxu1  ;;  %v481_v31 = vpop.f32.mrf.mxu0 }
  0xfa   :  { %908 = vst.msk [vmem:[%s1866_s6 + $0x188] sm:$0xff] %vm263_vm1, %v844_v24  ;;  %v849_v32 = vmax.f32 %v785_v25, 0.0  ;;  %v783_v33 = vadd.f32 %v1474_v43, %v712_v26  ;;  %v754_v34 = vadd.f32 %v1474_v43, %v683_v27  ;;  %v715_v35 = vmul.f32 %v1053_v30, %v1469_v4 }
  0xfb   :  { %881 = vst.msk [vmem:[%s1866_s6 + $0xb0] sm:$0xff] %vm263_vm1, %v817_v28  ;;  %v815_v36 = vmax.f32 %v751_v29, 0.0  ;;  %v681_v37 = vmul.f32 %v1469_v4, %v481_v31  ;;  %v609_v38 = vpop.f32.mrf.mxu1  ;;  %v1024_v39 = vpop.f32.mrf.mxu0 }
  0xfc   :  { %913 = vst.msk [vmem:[%s1866_s6 + $0x1b0] sm:$0xff] %vm263_vm1, %v849_v32  ;;  %v847_v40 = vmax.f32 %v783_v33, 0.0  ;;  %v818_v41 = vmax.f32 %v754_v34, 0.0  ;;  %v786_v42 = vadd.f32 %v1474_v43, %v715_v35  ;;  %v713_v5 = vmul.f32 %v1469_v4, %v609_v38 }
  0xfd   :  { %879 = vst.msk [vmem:[%s1866_s6 + $0xa0] sm:$0xff] %vm263_vm1, %v815_v36  ;;  %v752_v44 = vadd.f32 %v1474_v43, %v681_v37  ;;  %v686_v45 = vmul.f32 %v1024_v39, %v1469_v4  ;;  %v1056_v46 = vpop.f32.mrf.mxu1  ;;  %v494_v47 = vpop.f32.mrf.mxu0 }
  0xfe   :  { %911 = vst.msk [vmem:[%s1866_s6 + $0x1a0] sm:$0xff] %vm263_vm1, %v847_v40  ;;  %882 = vst.msk [vmem:[%s1866_s6 + $0xb8] sm:$0xff] %vm263_vm1, %v818_v41  ;;  %v850_v48 = vmax.f32 %v786_v42, 0.0  ;;  %v784_v49 = vadd.f32 %v1474_v43, %v713_v5  ;;  %v718_v50 = vmul.f32 %v1056_v46, %v1469_v4  ;;  %v684_v51 = vmul.f32 %v1469_v4, %v494_v47 }
  0xff   :  { %v816_v52 = vmax.f32 %v752_v44, 0.0  ;;  %v757_v53 = vadd.f32 %v1474_v43, %v686_v45  ;;  %v622_v54 = vpop.f32.mrf.mxu1  ;;  %v1025_v55 = vpop.f32.mrf.mxu0 }
 0x100   :  { %914 = vst.msk [vmem:[%s1866_s6 + $0x1b8] sm:$0xff] %vm263_vm1, %v850_v48  ;;  %v848_v56 = vmax.f32 %v784_v49, 0.0  ;;  %v789_v57 = vadd.f32 %v1474_v43, %v718_v50  ;;  %v755_v58 = vadd.f32 %v1474_v43, %v684_v51  ;;  %v716_v59 = vmul.f32 %v1469_v4, %v622_v54 }
 0x101   :  { %880 = vst.msk [vmem:[%s1866_s6 + $0xa8] sm:$0xff] %vm263_vm1, %v816_v52  ;;  %v821_v60 = vmax.f32 %v757_v53, 0.0  ;;  %v687_v61 = vmul.f32 %v1025_v55, %v1469_v4  ;;  %v1057_v62 = vpop.f32.mrf.mxu1  ;;  %v497_v63 = vpop.f32.mrf.mxu0 }
 0x102   :  { %912 = vst.msk [vmem:[%s1866_s6 + $0x1a8] sm:$0xff] %vm263_vm1, %v848_v56  ;;  %v853_v0 = vmax.f32 %v789_v57, 0.0  ;;  %v819_v1 = vmax.f32 %v755_v58, 0.0  ;;  %v787_v2 = vadd.f32 %v1474_v43, %v716_v59  ;;  %v719_v3 = vmul.f32 %v1057_v62, %v1469_v4 }
 0x103   :  { %885 = vst.msk [vmem:[%s1866_s6 + $0xd0] sm:$0xff] %vm263_vm1, %v821_v60  ;;  %v758_v6 = vadd.f32 %v1474_v43, %v687_v61  ;;  %v685_v7 = vmul.f32 %v1469_v4, %v497_v63  ;;  %v625_v8 = vpop.f32.mrf.mxu1  ;;  %v1028_v9 = vpop.f32.mrf.mxu0 }
 0x104   :  { %917 = vst.msk [vmem:[%s1866_s6 + $0x1d0] sm:$0xff] %vm263_vm1, %v853_v0  ;;  %883 = vst.msk [vmem:[%s1866_s6 + $0xc0] sm:$0xff] %vm263_vm1, %v819_v1  ;;  %v851_v10 = vmax.f32 %v787_v2, 0.0  ;;  %v790_v11 = vadd.f32 %v1474_v43, %v719_v3  ;;  %v717_v12 = vmul.f32 %v1469_v4, %v625_v8  ;;  %v690_v13 = vmul.f32 %v1028_v9, %v1469_v4 }
 0x105   :  { %v822_v14 = vmax.f32 %v758_v6, 0.0  ;;  %v756_v15 = vadd.f32 %v1474_v43, %v685_v7  ;;  %v1060_v16 = vpop.f32.mrf.mxu1  ;;  %v510_v17 = vpop.f32.mrf.mxu0 }
 0x106   :  { %915 = vst.msk [vmem:[%s1866_s6 + $0x1c0] sm:$0xff] %vm263_vm1, %v851_v10  ;;  %v854_v18 = vmax.f32 %v790_v11, 0.0  ;;  %v788_v19 = vadd.f32 %v1474_v43, %v717_v12  ;;  %v761_v20 = vadd.f32 %v1474_v43, %v690_v13  ;;  %v722_v21 = vmul.f32 %v1060_v16, %v1469_v4 }
 0x107   :  { %886 = vst.msk [vmem:[%s1866_s6 + $0xd8] sm:$0xff] %vm263_vm1, %v822_v14  ;;  %v820_v22 = vmax.f32 %v756_v15, 0.0  ;;  %v688_v23 = vmul.f32 %v1469_v4, %v510_v17  ;;  %v638_v24 = vpop.f32.mrf.mxu1  ;;  %v1029_v25 = vpop.f32.mrf.mxu0 }
 0x108   :  { %918 = vst.msk [vmem:[%s1866_s6 + $0x1d8] sm:$0xff] %vm263_vm1, %v854_v18  ;;  %v852_v26 = vmax.f32 %v788_v19, 0.0  ;;  %v825_v27 = vmax.f32 %v761_v20, 0.0  ;;  %v793_v28 = vadd.f32 %v1474_v43, %v722_v21  ;;  %v720_v29 = vmul.f32 %v1469_v4, %v638_v24 }
 0x109   :  { %884 = vst.msk [vmem:[%s1866_s6 + $0xc8] sm:$0xff] %vm263_vm1, %v820_v22  ;;  %v759_v30 = vadd.f32 %v1474_v43, %v688_v23  ;;  %v691_v31 = vmul.f32 %v1029_v25, %v1469_v4  ;;  %v1061_v32 = vpop.f32.mrf.mxu1  ;;  %v513_v33 = vpop.f32.mrf.mxu0 }
 0x10a   :  { %916 = vst.msk [vmem:[%s1866_s6 + $0x1c8] sm:$0xff] %vm263_vm1, %v852_v26  ;;  %889 = vst.msk [vmem:[%s1866_s6 + $0xf0] sm:$0xff] %vm263_vm1, %v825_v27  ;;  %v857_v34 = vmax.f32 %v793_v28, 0.0  ;;  %v791_v35 = vadd.f32 %v1474_v43, %v720_v29  ;;  %v723_v36 = vmul.f32 %v1061_v32, %v1469_v4  ;;  %v689_v37 = vmul.f32 %v1469_v4, %v513_v33 }
 0x10b   :  { %v823_v38 = vmax.f32 %v759_v30, 0.0  ;;  %v762_v39 = vadd.f32 %v1474_v43, %v691_v31  ;;  %v641_v40 = vpop.f32.mrf.mxu1 }
 0x10c   :  { %921 = vst.msk [vmem:[%s1866_s6 + $0x1f0] sm:$0xff] %vm263_vm1, %v857_v34  ;;  %v855_v41 = vmax.f32 %v791_v35, 0.0  ;;  %v794_v42 = vadd.f32 %v1474_v43, %v723_v36  ;;  %v760_v5 = vadd.f32 %v1474_v43, %v689_v37  ;;  %v721_v44 = vmul.f32 %v1469_v4, %v641_v40 }
 0x10d   :  { %887 = vst.msk [vmem:[%s1866_s6 + $0xe0] sm:$0xff] %vm263_vm1, %v823_v38  ;;  %v826_v45 = vmax.f32 %v762_v39, 0.0 }
 0x10e   :  { %919 = vst.msk [vmem:[%s1866_s6 + $0x1e0] sm:$0xff] %vm263_vm1, %v855_v41  ;;  %v858_v46 = vmax.f32 %v794_v42, 0.0  ;;  %v824_v47 = vmax.f32 %v760_v5, 0.0  ;;  %v792_v48 = vadd.f32 %v1474_v43, %v721_v44 }
 0x10f   :  { %890 = vst.msk [vmem:[%s1866_s6 + $0xf8] sm:$0xff] %vm263_vm1, %v826_v45 }
 0x110   :  { %922 = vst.msk [vmem:[%s1866_s6 + $0x1f8] sm:$0xff] %vm263_vm1, %v858_v46  ;;  %888 = vst.msk [vmem:[%s1866_s6 + $0xe8] sm:$0xff] %vm263_vm1, %v824_v47  ;;  %v856_v4 = vmax.f32 %v792_v48, 0.0 }
 0x112   :  { %920 = vst.msk [vmem:[%s1866_s6 + $0x1e8] sm:$0xff] %vm263_vm1, %v856_v4 }

// kernel: replk_stage_forward.13
= control target key start
LH: loop header
LB: loop body
LE: loop exit
PB: predicated region body
PF: predicated region fallthrough
CT: control target
= control target key end

     0   :  { %vm360_vm0 = vcmask 1043456   ;;  %vm263_vm1 = vcmask 64512   ;;  %vm1115_vm2 = vcmask 261120   ;;  %s2511_s1 = inlined_call_operand.vmem [shape: bf16[8,32], index: 1, kind: input, shape index: {}]   ;;  %s2512_s0 = inlined_call_operand.vmem [shape: f32[512,8], index: 0, kind: input, shape index: {}]   ;;  %s2513_s2 = inlined_call_operand.vmem [shape: f32[1,8], index: 2, kind: input, shape index: {}]   ;;  %s2514_s3 = inlined_call_operand.vmem [shape: f32[1,8], index: 3, kind: input, shape index: {}]   ;;  %s2515_s4 = inlined_call_operand.vmem [shape: f32[1,32], index: 4, kind: input, shape index: {}]   ;;  %s2516_s5 = inlined_call_operand.vmem [shape: f32[1,32], index: 5, kind: input, shape index: {}]   ;;  %s2517_s6 = inlined_call_operand.vmem [shape: f32[512,32], index: 6, kind: output, shape index: {}]  }
   0x1   :  { %v262_v0 = vld [vmem:[%s2511_s1] sm:$0xf]  ;;  %v25_v2 = vld [vmem:[%s2512_s0 + $0x8] sm:$0xff]  ;;  %v26_v11 = vld [vmem:[%s2512_s0 + $0x10] sm:$0xff] }
   0x2   :  { %v24_v1 = vld [vmem:[%s2512_s0] sm:$0xff]  ;;  %1321 = vmatprep.subr.msk.bf16.mxu0 %vm360_vm0, %v262_v0  ;;  %1322 = vmatprep.subr.msk.bf16.mxu1 %vm360_vm0, %v262_v0  ;;  %v362_v3 = vsel %vm360_vm0, %v262_v0, 0  ;;  %v57_v9 = vld [vmem:[%s2512_s0 + $0x108] sm:$0xff]  ;;  %v27_v12 = vld [vmem:[%s2512_s0 + $0x18] sm:$0xff] }
   0x3   :  { %v1500_v4 = vld [vmem:[%s2513_s2] ss:$0 sm:$0xff]  ;;  %1254 = vmatpush3.bf16.msra.mxu0 %v362_v3  ;;  %1320 = vmatpush3.bf16.msra.mxu1 %v362_v3  ;;  %v58_v16 = vld [vmem:[%s2512_s0 + $0x110] sm:$0xff]  ;;  %v59_v17 = vld [vmem:[%s2512_s0 + $0x118] sm:$0xff] }
   0x4   :  { %v1505_v5 = vld [vmem:[%s2514_s3] ss:$0 sm:$0xff]  ;;  %v95_v7 = vmul.f32 %v1500_v4, %v24_v1  ;;  %v96_v8 = vmul.f32 %v1500_v4, %v25_v2  ;;  %v128_v13 = vmul.f32 %v1500_v4, %v57_v9  ;;  %v97_v14 = vmul.f32 %v1500_v4, %v26_v11  ;;  %v29_v23 = vld [vmem:[%s2512_s0 + $0x28] sm:$0xff]  ;;  %v30_v30 = vld [vmem:[%s2512_s0 + $0x30] sm:$0xff] }
   0x5   :  { %v56_v6 = vld [vmem:[%s2512_s0 + $0x100] sm:$0xff]  ;;  %v98_v15 = vmul.f32 %v1500_v4, %v27_v12  ;;  %v129_v22 = vmul.f32 %v1500_v4, %v58_v16  ;;  %v130_v28 = vmul.f32 %v1500_v4, %v59_v17  ;;  %v61_v29 = vld [vmem:[%s2512_s0 + $0x128] sm:$0xff]  ;;  %v100_v34 = vmul.f32 %v1500_v4, %v29_v23  ;;  %v31_v35 = vld [vmem:[%s2512_s0 + $0x38] sm:$0xff] }
   0x6   :  { %v127_v10 = vmul.f32 %v1500_v4, %v56_v6  ;;  %v28_v18 = vld [vmem:[%s2512_s0 + $0x20] sm:$0xff]  ;;  %v166_v19 = vadd.f32 %v1505_v5, %v95_v7  ;;  %v167_v20 = vadd.f32 %v1505_v5, %v96_v8  ;;  %v199_v25 = vadd.f32 %v1505_v5, %v128_v13  ;;  %v62_v40 = vld [vmem:[%s2512_s0 + $0x130] sm:$0xff]  ;;  %v63_v45 = vld [vmem:[%s2512_s0 + $0x138] sm:$0xff] }
   0x7   :  { %v60_v24 = vld [vmem:[%s2512_s0 + $0x120] sm:$0xff]  ;;  %v168_v26 = vadd.f32 %v1505_v5, %v97_v14  ;;  %v169_v27 = vadd.f32 %v1505_v5, %v98_v15  ;;  %v200_v32 = vadd.f32 %v1505_v5, %v129_v22  ;;  %v99_v33 = vmul.f32 %v1500_v4, %v28_v18  ;;  %v33_v47 = vld [vmem:[%s2512_s0 + $0x48] sm:$0xff]  ;;  %v34_v61 = vld [vmem:[%s2512_s0 + $0x50] sm:$0xff] }
   0x8   :  { %v198_v21 = vadd.f32 %v1505_v5, %v127_v10  ;;  %v230_v31 = vpack.c.bf16 %v167_v20, %v166_v19  ;;  %v201_v38 = vadd.f32 %v1505_v5, %v130_v28  ;;  %v131_v39 = vmul.f32 %v1500_v4, %v60_v24  ;;  %v32_v46 = vld [vmem:[%s2512_s0 + $0x40] sm:$0xff]  ;;  %v65_v52 = vld [vmem:[%s2512_s0 + $0x148] sm:$0xff]  ;;  %v35_v62 = vld [vmem:[%s2512_s0 + $0x58] sm:$0xff] }
   0x9   :  { %v231_v37 = vpack.c.bf16 %v169_v27, %v168_v26  ;;  %v170_v41 = vadd.f32 %v1505_v5, %v99_v33  ;;  %v171_v42 = vadd.f32 %v1505_v5, %v100_v34  ;;  %v132_v43 = vmul.f32 %v1500_v4, %v61_v29  ;;  %v64_v51 = vld [vmem:[%s2512_s0 + $0x140] sm:$0xff]  ;;  %v66_v3 = vld [vmem:[%s2512_s0 + $0x150] sm:$0xff]  ;;  %v67_v6 = vld [vmem:[%s2512_s0 + $0x158] sm:$0xff] }
   0xa   :  { %v246_v36 = vpack.c.bf16 %v199_v25, %v198_v21  ;;  %1255 = vmatprep.mubr.msk.bf16.mxu0 %vm263_vm1, %v230_v31  ;;  %v101_v44 = vmul.f32 %v1500_v4, %v30_v30  ;;  %v247_v48 = vpack.c.bf16 %v201_v38, %v200_v32  ;;  %v202_v49 = vadd.f32 %v1505_v5, %v131_v39  ;;  %v36_v11 = vld [vmem:[%s2512_s0 + $0x60] sm:$0xff]  ;;  %v37_v16 = vld [vmem:[%s2512_s0 + $0x68] sm:$0xff]  ;;  %v38_v31 = vld [vmem:[%s2512_s0 + $0x70] sm:$0xff] }
   0xb   :  { %1256 = vmatmul.mubr.msk.bf16.vlgmr.msra.gmra.mxu0 %vm263_vm1, %v231_v37  ;;  %v102_v50 = vmul.f32 %v1500_v4, %v31_v35  ;;  %v232_v53 = vpack.c.bf16 %v171_v42, %v170_v41  ;;  %v203_v54 = vadd.f32 %v1505_v5, %v132_v43  ;;  %v133_v56 = vmul.f32 %v1500_v4, %v62_v40  ;;  %v68_v17 = vld [vmem:[%s2512_s0 + $0x160] sm:$0xff]  ;;  %v69_v22 = vld [vmem:[%s2512_s0 + $0x168] sm:$0xff]  ;;  %v39_v32 = vld [vmem:[%s2512_s0 + $0x78] sm:$0xff] }
   0xc   :  { %1287 = vmatprep.mubr.msk.bf16.mxu1 %vm263_vm1, %v246_v36  ;;  %v172_v55 = vadd.f32 %v1505_v5, %v101_v44  ;;  %v134_v58 = vmul.f32 %v1500_v4, %v63_v45  ;;  %v103_v59 = vmul.f32 %v1500_v4, %v32_v46  ;;  %v104_v60 = vmul.f32 %v1500_v4, %v33_v47  ;;  %v40_v36 = vld [vmem:[%s2512_s0 + $0x80] sm:$0xff]  ;;  %v41_v37 = vld [vmem:[%s2512_s0 + $0x88] sm:$0xff]  ;;  %v70_v40 = vld [vmem:[%s2512_s0 + $0x170] sm:$0xff] }
   0xd   :  { %1288 = vmatmul.mubr.msk.bf16.vlgmr.msra.gmra.mxu1 %vm263_vm1, %v247_v48  ;;  %v173_v57 = vadd.f32 %v1505_v5, %v102_v50  ;;  %1259 = vmatprep.mubr.msk.bf16.mxu0 %vm263_vm1, %v232_v53  ;;  %v248_v63 = vpack.c.bf16 %v203_v54, %v202_v49  ;;  %v204_v0 = vadd.f32 %v1505_v5, %v133_v56  ;;  %v71_v41 = vld [vmem:[%s2512_s0 + $0x178] sm:$0xff]  ;;  %v72_v45 = vld [vmem:[%s2512_s0 + $0x180] sm:$0xff]  ;;  %v73_v46 = vld [vmem:[%s2512_s0 + $0x188] sm:$0xff] }
   0xe   :  { %v135_v1 = vmul.f32 %v1500_v4, %v64_v51  ;;  %v136_v2 = vmul.f32 %v1500_v4, %v65_v52  ;;  %v205_v8 = vadd.f32 %v1505_v5, %v134_v58  ;;  %v174_v9 = vadd.f32 %v1505_v5, %v103_v59 }
   0xf   :  { %v233_v7 = vpack.c.bf16 %v173_v57, %v172_v55  ;;  %v175_v10 = vadd.f32 %v1505_v5, %v104_v60  ;;  %1291 = vmatprep.mubr.msk.bf16.mxu1 %vm263_vm1, %v248_v63  ;;  %v105_v14 = vmul.f32 %v1500_v4, %v34_v61  ;;  %v106_v15 = vmul.f32 %v1500_v4, %v35_v62  ;;  %v42_v60 = vld [vmem:[%s2512_s0 + $0x90] sm:$0xff]  ;;  %v43_v61 = vld [vmem:[%s2512_s0 + $0x98] sm:$0xff] }
  0x10   :  { %v206_v12 = vadd.f32 %v1505_v5, %v135_v1  ;;  %v207_v13 = vadd.f32 %v1505_v5, %v136_v2  ;;  %v249_v18 = vpack.c.bf16 %v205_v8, %v204_v0  ;;  %v137_v20 = vmul.f32 %v1500_v4, %v66_v3  ;;  %v44_v0 = vld [vmem:[%s2512_s0 + $0xa0] sm:$0xff]  ;;  %v45_v1 = vld [vmem:[%s2512_s0 + $0xa8] sm:$0xff] }
  0x11   :  { %v234_v19 = vpack.c.bf16 %v175_v10, %v174_v9  ;;  %v138_v21 = vmul.f32 %v1500_v4, %v67_v6  ;;  %v107_v24 = vmul.f32 %v1500_v4, %v36_v11  ;;  %v176_v25 = vadd.f32 %v1505_v5, %v105_v14  ;;  %v74_v6 = vld [vmem:[%s2512_s0 + $0x190] sm:$0xff]  ;;  %v76_v11 = vld [vmem:[%s2512_s0 + $0x1a0] sm:$0xff] }
  0x12   :  { %v250_v23 = vpack.c.bf16 %v207_v13, %v206_v12  ;;  %v177_v26 = vadd.f32 %v1505_v5, %v106_v15  ;;  %v108_v27 = vmul.f32 %v1500_v4, %v37_v16  ;;  %v139_v28 = vmul.f32 %v1500_v4, %v68_v17  ;;  %v77_v12 = vld [vmem:[%s2512_s0 + $0x1a8] sm:$0xff] }
  0x13   :  { %1260 = vmatmul.mubr.msk.bf16.gmra.mxu0 %vm263_vm1, %v233_v7  ;;  %v178_v29 = vadd.f32 %v1505_v5, %v107_v24  ;;  %v140_v30 = vmul.f32 %v1500_v4, %v69_v22  ;;  %v208_v33 = vadd.f32 %v1505_v5, %v137_v20  ;;  %v209_v34 = vadd.f32 %v1505_v5, %v138_v21  ;;  %v75_v7 = vld [vmem:[%s2512_s0 + $0x198] sm:$0xff] }
  0x14   :  { %1263 = vmatprep.mubr.msk.bf16.mxu0 %vm263_vm1, %v234_v19  ;;  %v179_v35 = vadd.f32 %v1505_v5, %v108_v27  ;;  %v210_v38 = vadd.f32 %v1505_v5, %v139_v28  ;;  %v235_v42 = vpack.c.bf16 %v177_v26, %v176_v25  ;;  %v109_v43 = vmul.f32 %v1500_v4, %v38_v31  ;;  %v46_v26 = vld [vmem:[%s2512_s0 + $0xb0] sm:$0xff]  ;;  %v47_v27 = vld [vmem:[%s2512_s0 + $0xb8] sm:$0xff]  ;;  %v49_v31 = vld [vmem:[%s2512_s0 + $0xc8] sm:$0xff] }
  0x15   :  { %1292 = vmatmul.mubr.msk.bf16.gmra.mxu1 %vm263_vm1, %v249_v18  ;;  %v211_v39 = vadd.f32 %v1505_v5, %v140_v30  ;;  %v110_v44 = vmul.f32 %v1500_v4, %v39_v32  ;;  %v111_v48 = vmul.f32 %v1500_v4, %v40_v36  ;;  %v112_v49 = vmul.f32 %v1500_v4, %v41_v37  ;;  %v48_v30 = vld [vmem:[%s2512_s0 + $0xc0] sm:$0xff] }
  0x16   :  { %1295 = vmatprep.mubr.msk.bf16.mxu1 %vm263_vm1, %v250_v23  ;;  %v236_v47 = vpack.c.bf16 %v179_v35, %v178_v29  ;;  %v251_v50 = vpack.c.bf16 %v209_v34, %v208_v33  ;;  %v141_v51 = vmul.f32 %v1500_v4, %v70_v40  ;;  %v142_v52 = vmul.f32 %v1500_v4, %v71_v41  ;;  %v78_v34 = vld [vmem:[%s2512_s0 + $0x1b0] sm:$0xff]  ;;  %v79_v35 = vld [vmem:[%s2512_s0 + $0x1b8] sm:$0xff]  ;;  %v81_v40 = vld [vmem:[%s2512_s0 + $0x1c8] sm:$0xff] }
  0x17   :  { %v252_v53 = vpack.c.bf16 %v211_v39, %v210_v38  ;;  %v143_v54 = vmul.f32 %v1500_v4, %v72_v45  ;;  %v144_v55 = vmul.f32 %v1500_v4, %v73_v46  ;;  %v180_v56 = vadd.f32 %v1505_v5, %v109_v43  ;;  %v80_v39 = vld [vmem:[%s2512_s0 + $0x1c0] sm:$0xff] }
  0x18   :  { %v181_v57 = vadd.f32 %v1505_v5, %v110_v44  ;;  %v182_v58 = vadd.f32 %v1505_v5, %v111_v48  ;;  %v183_v59 = vadd.f32 %v1505_v5, %v112_v49  ;;  %v212_v62 = vadd.f32 %v1505_v5, %v141_v51 }
  0x19   :  { %v213_v63 = vadd.f32 %v1505_v5, %v142_v52  ;;  %v214_v2 = vadd.f32 %v1505_v5, %v143_v54  ;;  %v215_v3 = vadd.f32 %v1505_v5, %v144_v55  ;;  %v113_v9 = vmul.f32 %v1500_v4, %v42_v60  ;;  %v50_v54 = vld [vmem:[%s2512_s0 + $0xd0] sm:$0xff]  ;;  %v51_v55 = vld [vmem:[%s2512_s0 + $0xd8] sm:$0xff] }
  0x1a   :  { %v237_v8 = vpack.c.bf16 %v181_v57, %v180_v56  ;;  %v114_v10 = vmul.f32 %v1500_v4, %v43_v61  ;;  %v238_v13 = vpack.c.bf16 %v183_v59, %v182_v58  ;;  %v115_v14 = vmul.f32 %v1500_v4, %v44_v0  ;;  %v52_v58 = vld [vmem:[%s2512_s0 + $0xe0] sm:$0xff]  ;;  %v53_v59 = vld [vmem:[%s2512_s0 + $0xe8] sm:$0xff] }
  0x1b   :  { %1264 = vmatmul.mubr.msk.bf16.gmra.mxu0 %vm263_vm1, %v235_v42  ;;  %v116_v15 = vmul.f32 %v1500_v4, %v45_v1  ;;  %v253_v16 = vpack.c.bf16 %v213_v63, %v212_v62  ;;  %v145_v17 = vmul.f32 %v1500_v4, %v74_v6  ;;  %v146_v18 = vmul.f32 %v1500_v4, %v75_v7  ;;  %v82_v62 = vld [vmem:[%s2512_s0 + $0x1d0] sm:$0xff]  ;;  %v83_v63 = vld [vmem:[%s2512_s0 + $0x1d8] sm:$0xff]  ;;  %v85_v6 = vld [vmem:[%s2512_s0 + $0x1e8] sm:$0xff] }
  0x1c   :  { %1267 = vmatprep.mubr.msk.bf16.mxu0 %vm263_vm1, %v236_v47  ;;  %v254_v19 = vpack.c.bf16 %v215_v3, %v214_v2  ;;  %v147_v20 = vmul.f32 %v1500_v4, %v76_v11  ;;  %v148_v21 = vmul.f32 %v1500_v4, %v77_v12  ;;  %v184_v22 = vadd.f32 %v1505_v5, %v113_v9  ;;  %v84_v3 = vld [vmem:[%s2512_s0 + $0x1e0] sm:$0xff] }
  0x1d   :  { %1296 = vmatmul.mubr.msk.bf16.gmra.mxu1 %vm263_vm1, %v251_v50  ;;  %v185_v23 = vadd.f32 %v1505_v5, %v114_v10  ;;  %v186_v24 = vadd.f32 %v1505_v5, %v115_v14  ;;  %v187_v25 = vadd.f32 %v1505_v5, %v116_v15  ;;  %v216_v28 = vadd.f32 %v1505_v5, %v145_v17 }
  0x1e   :  { %1299 = vmatprep.mubr.msk.bf16.mxu1 %vm263_vm1, %v252_v53  ;;  %v217_v29 = vadd.f32 %v1505_v5, %v146_v18  ;;  %v218_v32 = vadd.f32 %v1505_v5, %v147_v20  ;;  %v219_v33 = vadd.f32 %v1505_v5, %v148_v21  ;;  %v117_v37 = vmul.f32 %v1500_v4, %v46_v26  ;;  %v54_v20 = vld [vmem:[%s2512_s0 + $0xf0] sm:$0xff]  ;;  %v55_v21 = vld [vmem:[%s2512_s0 + $0xf8] sm:$0xff] }
  0x1f   :  { %v239_v36 = vpack.c.bf16 %v185_v23, %v184_v22  ;;  %v118_v38 = vmul.f32 %v1500_v4, %v47_v27  ;;  %v240_v41 = vpack.c.bf16 %v187_v25, %v186_v24  ;;  %v119_v42 = vmul.f32 %v1500_v4, %v48_v30  ;;  %v86_v26 = vld [vmem:[%s2512_s0 + $0x1f0] sm:$0xff]  ;;  %v87_v27 = vld [vmem:[%s2512_s0 + $0x1f8] sm:$0xff] }
  0x20   :  { %v120_v43 = vmul.f32 %v1500_v4, %v49_v31  ;;  %v255_v44 = vpack.c.bf16 %v217_v29, %v216_v28  ;;  %v149_v45 = vmul.f32 %v1500_v4, %v78_v34  ;;  %v150_v46 = vmul.f32 %v1500_v4, %v79_v35 }
  0x21   :  { %v256_v47 = vpack.c.bf16 %v219_v33, %v218_v32  ;;  %v151_v48 = vmul.f32 %v1500_v4, %v80_v39  ;;  %v152_v49 = vmul.f32 %v1500_v4, %v81_v40  ;;  %v188_v50 = vadd.f32 %v1505_v5, %v117_v37 }
  0x22   :  { %v189_v51 = vadd.f32 %v1505_v5, %v118_v38  ;;  %v190_v52 = vadd.f32 %v1505_v5, %v119_v42  ;;  %v191_v53 = vadd.f32 %v1505_v5, %v120_v43  ;;  %v220_v56 = vadd.f32 %v1505_v5, %v149_v45  ;;  %v1861_v43 = vld [vmem:[%s2516_s5] ss:$0 sm:$0xff] }
  0x23   :  { %1268 = vmatmul.mubr.msk.bf16.gmra.mxu0 %vm263_vm1, %v237_v8  ;;  %v221_v57 = vadd.f32 %v1505_v5, %v150_v46  ;;  %v222_v60 = vadd.f32 %v1505_v5, %v151_v48  ;;  %v223_v61 = vadd.f32 %v1505_v5, %v152_v49  ;;  %v121_v1 = vmul.f32 %v1500_v4, %v50_v54 }
  0x24   :  { %1271 = vmatprep.mubr.msk.bf16.mxu0 %vm263_vm1, %v238_v13  ;;  %v241_v0 = vpack.c.bf16 %v189_v51, %v188_v50  ;;  %v122_v2 = vmul.f32 %v1500_v4, %v51_v55  ;;  %v242_v7 = vpack.c.bf16 %v191_v53, %v190_v52  ;;  %v123_v8 = vmul.f32 %v1500_v4, %v52_v58 }
  0x25   :  { %1300 = vmatmul.mubr.msk.bf16.gmra.mxu1 %vm263_vm1, %v253_v16  ;;  %v124_v9 = vmul.f32 %v1500_v4, %v53_v59  ;;  %v257_v10 = vpack.c.bf16 %v221_v57, %v220_v56  ;;  %v153_v11 = vmul.f32 %v1500_v4, %v82_v62  ;;  %v154_v12 = vmul.f32 %v1500_v4, %v83_v63 }
  0x26   :  { %1303 = vmatprep.mubr.msk.bf16.mxu1 %vm263_vm1, %v254_v19  ;;  %v258_v13 = vpack.c.bf16 %v223_v61, %v222_v60  ;;  %v155_v14 = vmul.f32 %v1500_v4, %v84_v3  ;;  %v156_v15 = vmul.f32 %v1500_v4, %v85_v6  ;;  %v192_v16 = vadd.f32 %v1505_v5, %v121_v1 }
  0x27   :  { %v193_v17 = vadd.f32 %v1505_v5, %v122_v2  ;;  %v194_v18 = vadd.f32 %v1505_v5, %v123_v8  ;;  %v195_v19 = vadd.f32 %v1505_v5, %v124_v9  ;;  %v224_v22 = vadd.f32 %v1505_v5, %v153_v11 }
  0x28   :  { %v225_v23 = vadd.f32 %v1505_v5, %v154_v12  ;;  %v226_v24 = vadd.f32 %v1505_v5, %v155_v14  ;;  %v227_v25 = vadd.f32 %v1505_v5, %v156_v15  ;;  %v125_v29 = vmul.f32 %v1500_v4, %v54_v20 }
  0x29   :  { %v243_v28 = vpack.c.bf16 %v193_v17, %v192_v16  ;;  %v126_v30 = vmul.f32 %v1500_v4, %v55_v21  ;;  %v244_v31 = vpack.c.bf16 %v195_v19, %v194_v18  ;;  %v157_v33 = vmul.f32 %v1500_v4, %v86_v26 }
  0x2a   :  { %v259_v32 = vpack.c.bf16 %v225_v23, %v224_v22  ;;  %v158_v34 = vmul.f32 %v1500_v4, %v87_v27  ;;  %v260_v35 = vpack.c.bf16 %v227_v25, %v226_v24  ;;  %v1856_v4 = vld [vmem:[%s2515_s4] ss:$0 sm:$0xff] }
  0x2b   :  { %1272 = vmatmul.mubr.msk.bf16.gmra.mxu0 %vm263_vm1, %v239_v36  ;;  %v196_v36 = vadd.f32 %v1505_v5, %v125_v29  ;;  %v197_v37 = vadd.f32 %v1505_v5, %v126_v30  ;;  %v228_v38 = vadd.f32 %v1505_v5, %v157_v33 }
  0x2c   :  { %1275 = vmatprep.mubr.msk.bf16.mxu0 %vm263_vm1, %v240_v41  ;;  %v229_v39 = vadd.f32 %v1505_v5, %v158_v34 }
  0x2d   :  { %1304 = vmatmul.mubr.msk.bf16.gmra.mxu1 %vm263_vm1, %v255_v44  ;;  %v245_v40 = vpack.c.bf16 %v197_v37, %v196_v36 }
  0x2e   :  { %1307 = vmatprep.mubr.msk.bf16.mxu1 %vm263_vm1, %v256_v47  ;;  %v261_v41 = vpack.c.bf16 %v229_v39, %v228_v38 }
  0x33   :  { %1276 = vmatmul.mubr.msk.bf16.gmra.mxu0 %vm263_vm1, %v241_v0 }
  0x34   :  { %1279 = vmatprep.mubr.msk.bf16.mxu0 %vm263_vm1, %v242_v7 }
  0x35   :  { %1308 = vmatmul.mubr.msk.bf16.gmra.mxu1 %vm263_vm1, %v257_v10 }
  0x36   :  { %1311 = vmatprep.mubr.msk.bf16.mxu1 %vm263_vm1, %v258_v13 }
  0x3b   :  { %1280 = vmatmul.mubr.msk.bf16.gmra.mxu0 %vm263_vm1, %v243_v28 }
  0x3c   :  { %1283 = vmatprep.mubr.msk.bf16.mxu0 %vm263_vm1, %v244_v31 }
  0x3d   :  { %1312 = vmatmul.mubr.msk.bf16.gmra.mxu1 %vm263_vm1, %v259_v32 }
  0x3e   :  { %1315 = vmatprep.mubr.msk.bf16.mxu1 %vm263_vm1, %v260_v35 }
  0x43   :  { %1284 = vmatmul.mubr.msk.bf16.gmra.mxu0 %vm263_vm1, %v245_v40 }
  0x45   :  { %1316 = vmatmul.mubr.msk.bf16.gmra.mxu1 %vm263_vm1, %v261_v41 }
  0xcb   :  { %v1257_v42 = vpop.f32.mrf.mxu0 }
  0xcc   :  { %v662_v5 = vmul.f32 %v1257_v42, %v1856_v4 }
  0xcd   :  { %v1289_v44 = vpop.f32.mrf.mxu1  ;;  %v398_v45 = vpop.f32.mrf.mxu0 }
  0xce   :  { %v733_v46 = vadd.f32 %v1861_v43, %v662_v5  ;;  %v694_v47 = vmul.f32 %v1289_v44, %v1856_v4  ;;  %v660_v48 = vmul.f32 %v1856_v4, %v398_v45 }
  0xcf   :  { %v526_v49 = vpop.f32.mrf.mxu1  ;;  %v1258_v50 = vpop.f32.mrf.mxu0 }
  0xd0   :  { %v861_v51 = vmul.f32 0.70710677, %v733_v46  ;;  %v765_v52 = vadd.f32 %v1861_v43, %v694_v47  ;;  %v731_v53 = vadd.f32 %v1861_v43, %v660_v48  ;;  %v692_v54 = vmul.f32 %v1856_v4, %v526_v49 }
  0xd1   :  { %v663_v55 = vmul.f32 %v1258_v50, %v1856_v4  ;;  %v1290_v56 = vpop.f32.mrf.mxu1  ;;  %v401_v57 = vpop.f32.mrf.mxu0  ;;  %v797_v19 = vmul.f32 0.5, %v733_v46 }
  0xd2   :  { %1323 = verf.f32 %v861_v51  ;;  %v893_v58 = vmul.f32 0.70710677, %v765_v52  ;;  %v859_v59 = vmul.f32 0.70710677, %v731_v53  ;;  %v763_v60 = vadd.f32 %v1861_v43, %v692_v54 }
  0xd3   :  { %v734_v61 = vadd.f32 %v1861_v43, %v663_v55  ;;  %v695_v62 = vmul.f32 %v1290_v56, %v1856_v4  ;;  %v529_v63 = vpop.f32.mrf.mxu1  ;;  %v1261_v0 = vpop.f32.mrf.mxu0  ;;  %v661_v1 = vmul.f32 %v1856_v4, %v401_v57  ;;  %v829_v20 = vmul.f32 0.5, %v765_v52 }
  0xd4   :  { %1325 = verf.f32 %v893_v58  ;;  %v693_v2 = vmul.f32 %v1856_v4, %v529_v63  ;;  %v666_v3 = vmul.f32 %v1261_v0, %v1856_v4  ;;  %v891_v6 = vmul.f32 0.70710677, %v763_v60 }
  0xd5   :  { %1327 = verf.f32 %v859_v59  ;;  %v1293_v7 = vpop.f32.mrf.mxu1  ;;  %v414_v8 = vpop.f32.mrf.mxu0  ;;  %v862_v9 = vmul.f32 0.70710677, %v734_v61  ;;  %v766_v10 = vadd.f32 %v1861_v43, %v695_v62  ;;  %v732_v11 = vadd.f32 %v1861_v43, %v661_v1 }
  0xd6   :  { %v1880_v12 = vadd.f32 %v1861_v43, %v693_v2  ;;  %1329 = verf.f32 %v891_v6  ;;  %v1883_v13 = vadd.f32 %v1861_v43, %v666_v3  ;;  %v698_v14 = vmul.f32 %v1293_v7, %v1856_v4 }
  0xd7   :  { %v664_v15 = vmul.f32 %v1856_v4, %v414_v8  ;;  %v542_v16 = vpop.f32.mrf.mxu1  ;;  %v1262_v17 = vpop.f32.mrf.mxu0  ;;  %1331 = verf.f32 %v862_v9  ;;  %v894_v18 = vmul.f32 0.70710677, %v766_v10  ;;  %v860_v21 = vmul.f32 0.70710677, %v732_v11 }
  0xd8   :  { %v892_v22 = vmul.f32 0.70710677, %v1880_v12  ;;  %v865_v25 = vmul.f32 0.70710677, %v1883_v13  ;;  %v1890_v26 = vadd.f32 %v1861_v43, %v698_v14  ;;  %v696_v28 = vmul.f32 %v1856_v4, %v542_v16 }
  0xd9   :  { %v1294_v23 = vpop.f32.mrf.mxu1  ;;  %v417_v24 = vpop.f32.mrf.mxu0  ;;  %1333 = verf.f32 %v894_v18  ;;  %v1893_v27 = vadd.f32 %v1861_v43, %v664_v15  ;;  %v667_v29 = vmul.f32 %v1262_v17, %v1856_v4  ;;  %v795_v33 = vmul.f32 0.5, %v731_v53 }
  0xda   :  { %1335 = verf.f32 %v860_v21  ;;  %v699_v30 = vmul.f32 %v1294_v23, %v1856_v4  ;;  %v1898_v34 = vmul.f32 0.5, %v763_v60  ;;  %v897_v35 = vmul.f32 0.70710677, %v1890_v26 }
  0xdb   :  { %v545_v31 = vpop.f32.mrf.mxu1  ;;  %v1265_v32 = vpop.f32.mrf.mxu0  ;;  %1337 = verf.f32 %v892_v22  ;;  %v863_v36 = vmul.f32 0.70710677, %v1893_v27  ;;  %v1903_v37 = vadd.f32 %v1861_v43, %v696_v28  ;;  %v1906_v38 = vadd.f32 %v1861_v43, %v667_v29 }
  0xdc   :  { %1339 = verf.f32 %v865_v25  ;;  %v1909_v41 = vadd.f32 %v1861_v43, %v699_v30  ;;  %v665_v42 = vmul.f32 %v1856_v4, %v417_v24  ;;  %v697_v5 = vmul.f32 %v1856_v4, %v545_v31 }
  0xdd   :  { %v1297_v39 = vpop.f32.mrf.mxu1  ;;  %v430_v40 = vpop.f32.mrf.mxu0  ;;  %1341 = verf.f32 %v897_v35  ;;  %v798_v45 = vmul.f32 0.5, %v734_v61  ;;  %v1913_v46 = vmul.f32 0.5, %v766_v10  ;;  %v895_v47 = vmul.f32 0.70710677, %v1903_v37 }
  0xde   :  { %1343 = verf.f32 %v863_v36  ;;  %v1916_v51 = vmul.f32 0.5, %v732_v11  ;;  %v866_v52 = vmul.f32 0.70710677, %v1906_v38  ;;  %v898_v53 = vmul.f32 0.70710677, %v1909_v41 }
  0xdf   :  { %v1324_v44 = vpop.eup %1323  ;;  %v558_v48 = vpop.f32.mrf.mxu1  ;;  %1345 = verf.f32 %v895_v47  ;;  %v1921_v55 = vadd.f32 %v1861_v43, %v665_v42  ;;  %v1924_v56 = vadd.f32 %v1861_v43, %v697_v5  ;;  %v670_v57 = vmul.f32 %v1265_v32, %v1856_v4 }
  0xe0   :  { %v1266_v49 = vpop.f32.mrf.mxu0  ;;  %v989_v50 = vadd.f32 1.0, %v1324_v44  ;;  %1347 = verf.f32 %v866_v52  ;;  %v702_v63 = vmul.f32 %v1297_v39, %v1856_v4  ;;  %v828_v1 = vmul.f32 0.5, %v1880_v12 }
  0xe1   :  { %v1326_v54 = vpop.eup %1325  ;;  %v1298_v58 = vpop.f32.mrf.mxu1  ;;  %1349 = verf.f32 %v898_v53  ;;  %v864_v2 = vmul.f32 0.70710677, %v1921_v55  ;;  %v801_v9 = vmul.f32 0.5, %v1883_v13  ;;  %v896_v10 = vmul.f32 0.70710677, %v1924_v56 }
  0xe2   :  { %v1927_v59 = vpop.f32.mrf.mxu0  ;;  %v1328_v60 = vpop.eup %1327  ;;  %v1053_v61 = vmul.f32 %v989_v50, %v797_v19  ;;  %v1021_v62 = vadd.f32 1.0, %v1326_v54  ;;  %v1943_v11 = vadd.f32 %v1861_v43, %v670_v57  ;;  %v1946_v16 = vadd.f32 %v1861_v43, %v702_v63 }
  0xe3   :  { %v987_v0 = vadd.f32 1.0, %v1328_v60  ;;  %v1932_v3 = vpop.f32.mrf.mxu1  ;;  %v1330_v7 = vpop.eup %1329  ;;  %1351 = verf.f32 %v864_v2  ;;  %v833_v13 = vmul.f32 0.5, %v1890_v26  ;;  %v799_v23 = vmul.f32 0.5, %v1893_v27 }
  0xe4   :  { %v1934_v6 = vpop.f32.mrf.mxu0  ;;  %1118 = vst.msk [vmem:[%s2517_s6 + $0x10] sm:$0xff] %vm1115_vm2, %v1053_v61  ;;  %v1085_v8 = vmul.f32 %v1021_v62, %v829_v20  ;;  %v1332_v12 = vpop.eup %1331  ;;  %v1019_v15 = vadd.f32 1.0, %v1330_v7  ;;  %1353 = verf.f32 %v896_v10  ;;  %v869_v18 = vmul.f32 0.70710677, %v1943_v11 }
  0xe5   :  { %v1051_v14 = vmul.f32 %v987_v0, %v795_v33  ;;  %v990_v17 = vadd.f32 1.0, %v1332_v12  ;;  %v1954_v19 = vpop.f32.mrf.mxu1  ;;  %v901_v24 = vmul.f32 0.70710677, %v1946_v16  ;;  %v668_v25 = vmul.f32 %v1856_v4, %v430_v40 }
  0xe6   :  { %1150 = vst.msk [vmem:[%s2517_s6 + $0x110] sm:$0xff] %vm1115_vm2, %v1085_v8  ;;  %v1956_v20 = vpop.f32.mrf.mxu0  ;;  %v1334_v21 = vpop.eup %1333  ;;  %v1083_v22 = vmul.f32 %v1019_v15, %v1898_v34  ;;  %1355 = verf.f32 %v869_v18  ;;  %v700_v30 = vmul.f32 %v1856_v4, %v558_v48  ;;  %v671_v33 = vmul.f32 %v1266_v49, %v1856_v4 }
  0xe7   :  { %1116 = vst.msk [vmem:[%s2517_s6] sm:$0xff] %vm1115_vm2, %v1051_v14  ;;  %v1336_v26 = vpop.eup %1335  ;;  %v1054_v28 = vmul.f32 %v990_v17, %v798_v45  ;;  %v1022_v29 = vadd.f32 1.0, %v1334_v21  ;;  %1357 = verf.f32 %v901_v24  ;;  %v1972_v27 = vadd.f32 %v1861_v43, %v668_v25  ;;  %v1984_v42 = vpop.f32.mrf.mxu1 }
  0xe8   :  { %v1338_v31 = vpop.eup %1337  ;;  %1148 = vst.msk [vmem:[%s2517_s6 + $0x100] sm:$0xff] %vm1115_vm2, %v1083_v22  ;;  %v988_v32 = vadd.f32 1.0, %v1336_v26  ;;  %v1981_v39 = vadd.f32 %v1861_v43, %v700_v30  ;;  %v703_v40 = vmul.f32 %v1298_v58, %v1856_v4  ;;  %v1986_v5 = vpop.f32.mrf.mxu0  ;;  %v831_v48 = vmul.f32 0.5, %v1903_v37 }
  0xe9   :  { %v1340_v34 = vpop.eup %1339  ;;  %1119 = vst.msk [vmem:[%s2517_s6 + $0x18] sm:$0xff] %vm1115_vm2, %v1054_v28  ;;  %v1086_v35 = vmul.f32 %v1022_v29, %v1913_v46  ;;  %v1020_v36 = vadd.f32 1.0, %v1338_v31  ;;  %v867_v49 = vmul.f32 0.70710677, %v1972_v27  ;;  %v802_v53 = vmul.f32 0.5, %v1906_v38  ;;  %v2013_v62 = vpop.f32.mrf.mxu1 }
  0xea   :  { %v1342_v44 = vpop.eup %1341  ;;  %v1052_v45 = vmul.f32 %v988_v32, %v1916_v51  ;;  %v993_v47 = vadd.f32 1.0, %v1340_v34  ;;  %v899_v54 = vmul.f32 0.70710677, %v1981_v39  ;;  %v2002_v57 = vadd.f32 %v1861_v43, %v671_v33  ;;  %v2015_v63 = vpop.f32.mrf.mxu0 }
  0xeb   :  { %v1344_v50 = vpop.eup %1343  ;;  %1151 = vst.msk [vmem:[%s2517_s6 + $0x118] sm:$0xff] %vm1115_vm2, %v1086_v35  ;;  %v1084_v46 = vmul.f32 %v1020_v36, %v828_v1  ;;  %v1025_v52 = vadd.f32 1.0, %v1342_v44  ;;  %1359 = verf.f32 %v867_v49  ;;  %v2009_v60 = vadd.f32 %v1861_v43, %v703_v40  ;;  %v577_v22 = vpop.f32.mrf.mxu1 }
  0xec   :  { %1117 = vst.msk [vmem:[%s2517_s6 + $0x8] sm:$0xff] %vm1115_vm2, %v1052_v45  ;;  %v1057_v37 = vmul.f32 %v993_v47, %v801_v9  ;;  %v991_v51 = vadd.f32 1.0, %v1344_v50  ;;  %v1346_v58 = vpop.eup %1345  ;;  %1361 = verf.f32 %v899_v54  ;;  %v669_v61 = vmul.f32 %v1856_v4, %v1927_v59 }
  0xed   :  { %1149 = vst.msk [vmem:[%s2517_s6 + $0x108] sm:$0xff] %vm1115_vm2, %v1084_v46  ;;  %v1089_v38 = vmul.f32 %v1025_v52, %v833_v13  ;;  %v1348_v0 = vpop.eup %1347  ;;  %v1023_v2 = vadd.f32 1.0, %v1346_v58  ;;  %v834_v7 = vmul.f32 0.5, %v1909_v41  ;;  %v870_v8 = vmul.f32 0.70710677, %v2002_v57  ;;  %v2072_v44 = vpop.f32.mrf.mxu1 }
  0xee   :  { %1122 = vst.msk [vmem:[%s2517_s6 + $0x30] sm:$0xff] %vm1115_vm2, %v1057_v37  ;;  %v1055_v1 = vmul.f32 %v991_v51, %v799_v23  ;;  %v1350_v9 = vpop.eup %1349  ;;  %v994_v59 = vadd.f32 1.0, %v1348_v0  ;;  %v800_v10 = vmul.f32 0.5, %v1921_v55  ;;  %v902_v12 = vmul.f32 0.70710677, %v2009_v60  ;;  %v2040_v23 = vpop.f32.mrf.mxu0 }
  0xef   :  { %1154 = vst.msk [vmem:[%s2517_s6 + $0x130] sm:$0xff] %vm1115_vm2, %v1089_v38  ;;  %v2030_v14 = vadd.f32 %v1861_v43, %v669_v61  ;;  %v1087_v41 = vmul.f32 %v1023_v2, %v831_v48  ;;  %v1026_v15 = vadd.f32 1.0, %v1350_v9  ;;  %1363 = verf.f32 %v870_v8  ;;  %v590_v58 = vpop.f32.mrf.mxu1 }
  0xf0   :  { %1120 = vst.msk [vmem:[%s2517_s6 + $0x20] sm:$0xff] %vm1115_vm2, %v1055_v1  ;;  %v701_v17 = vmul.f32 %v1856_v4, %v1932_v3  ;;  %v1352_v13 = vpop.eup %1351  ;;  %v1058_v18 = vmul.f32 %v994_v59, %v802_v53  ;;  %v832_v55 = vmul.f32 0.5, %v1924_v56  ;;  %1365 = verf.f32 %v902_v12  ;;  %v2074_v45 = vpop.f32.mrf.mxu0 }
  0xf1   :  { %v868_v21 = vmul.f32 0.70710677, %v2030_v14  ;;  %v1354_v24 = vpop.eup %1353  ;;  %1152 = vst.msk [vmem:[%s2517_s6 + $0x120] sm:$0xff] %vm1115_vm2, %v1087_v41  ;;  %v1090_v25 = vmul.f32 %v1026_v15, %v834_v7  ;;  %v992_v26 = vadd.f32 1.0, %v1352_v13  ;;  %v674_v56 = vmul.f32 %v1934_v6, %v1856_v4  ;;  %v1306_v13 = vpop.f32.mrf.mxu1 }
  0xf2   :  { %v2047_v3 = vadd.f32 %v1861_v43, %v701_v17  ;;  %1123 = vst.msk [vmem:[%s2517_s6 + $0x38] sm:$0xff] %vm1115_vm2, %v1058_v18  ;;  %v1024_v28 = vadd.f32 1.0, %v1354_v24  ;;  %v706_v29 = vmul.f32 %v1954_v19, %v1856_v4  ;;  %v672_v30 = vmul.f32 %v1856_v4, %v1956_v20  ;;  %v1274_v38 = vpop.f32.mrf.mxu0 }
  0xf3   :  { %1367 = verf.f32 %v868_v21  ;;  %v1356_v31 = vpop.eup %1355  ;;  %1155 = vst.msk [vmem:[%s2517_s6 + $0x138] sm:$0xff] %vm1115_vm2, %v1090_v25  ;;  %v1056_v6 = vmul.f32 %v992_v26, %v800_v10  ;;  %v805_v32 = vmul.f32 0.5, %v1943_v11  ;;  %v745_v34 = vadd.f32 %v1861_v43, %v674_v56 }
  0xf4   :  { %v900_v33 = vmul.f32 0.70710677, %v2047_v3  ;;  %v1358_v35 = vpop.eup %1357  ;;  %v1088_v36 = vmul.f32 %v1024_v28, %v832_v55  ;;  %v997_v40 = vadd.f32 1.0, %v1356_v31  ;;  %v2067_v19 = vadd.f32 %v1861_v43, %v706_v29  ;;  %v2126_v18 = vpop.f32.mrf.mxu0 }
  0xf5   :  { %v2070_v20 = vadd.f32 %v1861_v43, %v672_v30  ;;  %1121 = vst.msk [vmem:[%s2517_s6 + $0x28] sm:$0xff] %vm1115_vm2, %v1056_v6  ;;  %v837_v11 = vmul.f32 0.5, %v1946_v16  ;;  %v1029_v47 = vadd.f32 1.0, %v1358_v35  ;;  %v873_v48 = vmul.f32 0.70710677, %v745_v34  ;;  %v593_v31 = vpop.f32.mrf.mxu1 }
  0xf6   :  { %1369 = verf.f32 %v900_v33  ;;  %1153 = vst.msk [vmem:[%s2517_s6 + $0x128] sm:$0xff] %vm1115_vm2, %v1088_v36  ;;  %v1061_v49 = vmul.f32 %v997_v40, %v805_v32  ;;  %v803_v50 = vmul.f32 0.5, %v1972_v27  ;;  %v835_v46 = vmul.f32 0.5, %v1981_v39  ;;  %v1277_v6 = vpop.f32.mrf.mxu0 }
  0xf7   :  { %v905_v52 = vmul.f32 0.70710677, %v2067_v19  ;;  %v1093_v53 = vmul.f32 %v1029_v47, %v837_v11  ;;  %1371 = verf.f32 %v873_v48  ;;  %v871_v54 = vmul.f32 0.70710677, %v2070_v20 }
  0xf8   :  { %v704_v16 = vmul.f32 %v1856_v4, %v1984_v42  ;;  %v1360_v37 = vpop.eup %1359  ;;  %1126 = vst.msk [vmem:[%s2517_s6 + $0x50] sm:$0xff] %vm1115_vm2, %v1061_v49  ;;  %v675_v27 = vmul.f32 %v1986_v5, %v1856_v4  ;;  %v707_v39 = vmul.f32 %v2013_v62, %v1856_v4  ;;  %v673_v51 = vmul.f32 %v1856_v4, %v2015_v63 }
  0xf9   :  { %1373 = verf.f32 %v905_v52  ;;  %v1362_v61 = vpop.eup %1361  ;;  %1158 = vst.msk [vmem:[%s2517_s6 + $0x150] sm:$0xff] %vm1115_vm2, %v1093_v53  ;;  %v995_v42 = vadd.f32 1.0, %v1360_v37  ;;  %v705_v5 = vmul.f32 %v1856_v4, %v577_v22  ;;  %v806_v8 = vmul.f32 0.5, %v2002_v57  ;;  %v1309_v52 = vpop.f32.mrf.mxu1 }
  0xfa   :  { %1375 = verf.f32 %v871_v54  ;;  %v2106_v0 = vadd.f32 %v1861_v43, %v704_v16  ;;  %v1027_v1 = vadd.f32 1.0, %v1362_v61  ;;  %v2110_v62 = vadd.f32 %v1861_v43, %v675_v27  ;;  %v478_v53 = vpop.f32.mrf.mxu0 }
  0xfb   :  { %v2113_v63 = vadd.f32 %v1861_v43, %v707_v39  ;;  %v2116_v2 = vadd.f32 %v1861_v43, %v673_v51  ;;  %v1059_v7 = vmul.f32 %v995_v42, %v803_v50  ;;  %v2121_v59 = vadd.f32 %v1861_v43, %v705_v5 }
  0xfc   :  { %v903_v9 = vmul.f32 0.70710677, %v2106_v0  ;;  %v1364_v10 = vpop.eup %1363  ;;  %v1091_v12 = vmul.f32 %v1027_v1, %v835_v46  ;;  %v838_v41 = vmul.f32 0.5, %v2009_v60  ;;  %v804_v15 = vmul.f32 0.5, %v2030_v14 }
  0xfd   :  { %v874_v17 = vmul.f32 0.70710677, %v2110_v62  ;;  %v1366_v55 = vpop.eup %1365  ;;  %1124 = vst.msk [vmem:[%s2517_s6 + $0x40] sm:$0xff] %vm1115_vm2, %v1059_v7  ;;  %v998_v57 = vadd.f32 1.0, %v1364_v10  ;;  %v836_v21 = vmul.f32 0.5, %v2047_v3  ;;  %v809_v14 = vmul.f32 0.5, %v745_v34 }
  0xfe   :  { %1377 = verf.f32 %v903_v9  ;;  %v906_v22 = vmul.f32 0.70710677, %v2113_v63  ;;  %1156 = vst.msk [vmem:[%s2517_s6 + $0x140] sm:$0xff] %vm1115_vm2, %v1091_v12  ;;  %v1030_v60 = vadd.f32 1.0, %v1366_v55  ;;  %v872_v24 = vmul.f32 0.70710677, %v2116_v2  ;;  %v1278_v9 = vpop.f32.mrf.mxu0 }
  0xff   :  { %1379 = verf.f32 %v874_v17  ;;  %v1062_v26 = vmul.f32 %v998_v57, %v806_v8  ;;  %v904_v56 = vmul.f32 0.70710677, %v2121_v59  ;;  %v678_v3 = vmul.f32 %v2040_v23, %v1856_v4  ;;  %v606_v8 = vpop.f32.mrf.mxu1 }
 0x100   :  { %v1368_v25 = vpop.eup %1367  ;;  %1381 = verf.f32 %v906_v22  ;;  %v1094_v28 = vmul.f32 %v1030_v60, %v838_v41  ;;  %v710_v30 = vmul.f32 %v2072_v44, %v1856_v4  ;;  %v676_v23 = vmul.f32 %v1856_v4, %v2074_v45 }
 0x101   :  { %v996_v29 = vadd.f32 1.0, %v1368_v25  ;;  %1383 = verf.f32 %v872_v24  ;;  %1127 = vst.msk [vmem:[%s2517_s6 + $0x58] sm:$0xff] %vm1115_vm2, %v1062_v26  ;;  %v2149_v32 = vadd.f32 %v1861_v43, %v678_v3  ;;  %v708_v33 = vmul.f32 %v1856_v4, %v590_v58  ;;  %v1310_v25 = vpop.f32.mrf.mxu1  ;;  %v2222_v26 = vpop.f32.mrf.mxu0 }
 0x102   :  { %1385 = verf.f32 %v904_v56  ;;  %1159 = vst.msk [vmem:[%s2517_s6 + $0x158] sm:$0xff] %vm1115_vm2, %v1094_v28  ;;  %v841_v36 = vmul.f32 0.5, %v2067_v19  ;;  %v2160_v40 = vadd.f32 %v1861_v43, %v710_v30  ;;  %v679_v44 = vmul.f32 %v1274_v38, %v1856_v4 }
 0x103   :  { %v1370_v34 = vpop.eup %1369  ;;  %v1060_v35 = vmul.f32 %v996_v29, %v804_v15  ;;  %v807_v47 = vmul.f32 0.5, %v2070_v20  ;;  %v877_v45 = vmul.f32 0.70710677, %v2149_v32  ;;  %v2166_v48 = vadd.f32 %v1861_v43, %v676_v23 }
 0x104   :  { %v1028_v11 = vadd.f32 1.0, %v1370_v34  ;;  %v1372_v49 = vpop.eup %1371  ;;  %v909_v19 = vmul.f32 0.70710677, %v2160_v40  ;;  %v2174_v50 = vadd.f32 %v1861_v43, %v708_v33  ;;  %v2177_v46 = vadd.f32 %v1861_v43, %v679_v44 }
 0x105   :  { %1125 = vst.msk [vmem:[%s2517_s6 + $0x48] sm:$0xff] %vm1115_vm2, %v1060_v35  ;;  %v711_v20 = vmul.f32 %v1306_v13, %v1856_v4  ;;  %v1001_v37 = vadd.f32 1.0, %v1372_v49  ;;  %v839_v27 = vmul.f32 0.5, %v2106_v0  ;;  %1387 = verf.f32 %v877_v45  ;;  %v1281_v45 = vpop.f32.mrf.mxu0 }
 0x106   :  { %v1374_v54 = vpop.eup %1373  ;;  %v1092_v16 = vmul.f32 %v1028_v11, %v836_v21  ;;  %v810_v58 = vmul.f32 0.5, %v2110_v62  ;;  %1389 = verf.f32 %v909_v19  ;;  %v875_v38 = vmul.f32 0.70710677, %v2166_v48 }
 0x107   :  { %v1376_v39 = vpop.eup %1375  ;;  %v1033_v51 = vadd.f32 1.0, %v1374_v54  ;;  %v1065_v61 = vmul.f32 %v1001_v37, %v809_v14  ;;  %v842_v5 = vmul.f32 0.5, %v2113_v63  ;;  %v907_v1 = vmul.f32 0.70710677, %v2174_v50 }
 0x108   :  { %1157 = vst.msk [vmem:[%s2517_s6 + $0x148] sm:$0xff] %vm1115_vm2, %v1092_v16  ;;  %v999_v42 = vadd.f32 1.0, %v1376_v39  ;;  %1391 = verf.f32 %v875_v38  ;;  %v878_v7 = vmul.f32 0.70710677, %v2177_v46  ;;  %v2191_v62 = vadd.f32 %v1861_v43, %v711_v20 }
 0x109   :  { %v1097_v0 = vmul.f32 %v1033_v51, %v841_v36  ;;  %1130 = vst.msk [vmem:[%s2517_s6 + $0x70] sm:$0xff] %vm1115_vm2, %v1065_v61  ;;  %1393 = verf.f32 %v907_v1  ;;  %v677_v63 = vmul.f32 %v1856_v4, %v2126_v18  ;;  %v709_v12 = vmul.f32 %v1856_v4, %v593_v31 }
 0x10a   :  { %v1063_v10 = vmul.f32 %v999_v42, %v807_v47  ;;  %v808_v15 = vmul.f32 0.5, %v2116_v2  ;;  %1395 = verf.f32 %v878_v7  ;;  %v910_v17 = vmul.f32 0.70710677, %v2191_v62  ;;  %v609_v47 = vpop.f32.mrf.mxu1 }
 0x10b   :  { %v1378_v41 = vpop.eup %1377  ;;  %1162 = vst.msk [vmem:[%s2517_s6 + $0x170] sm:$0xff] %vm1115_vm2, %v1097_v0  ;;  %v682_v13 = vmul.f32 %v1277_v6, %v1856_v4  ;;  %v840_v57 = vmul.f32 0.5, %v2121_v59  ;;  %v2213_v21 = vadd.f32 %v1861_v43, %v677_v63  ;;  %v2216_v22 = vadd.f32 %v1861_v43, %v709_v12 }
 0x10c   :  { %v1380_v55 = vpop.eup %1379  ;;  %1128 = vst.msk [vmem:[%s2517_s6 + $0x60] sm:$0xff] %vm1115_vm2, %v1063_v10  ;;  %v1031_v18 = vadd.f32 1.0, %v1378_v41  ;;  %1397 = verf.f32 %v910_v17  ;;  %v714_v24 = vmul.f32 %v1309_v52, %v1856_v4  ;;  %v680_v29 = vmul.f32 %v1856_v4, %v478_v53  ;;  %v1313_v42 = vpop.f32.mrf.mxu1 }
 0x10d   :  { %v1382_v2 = vpop.eup %1381  ;;  %v1002_v60 = vadd.f32 1.0, %v1380_v55  ;;  %v2219_v14 = vadd.f32 %v1861_v43, %v682_v13  ;;  %v876_v28 = vmul.f32 0.70710677, %v2213_v21  ;;  %v813_v23 = vmul.f32 0.5, %v2149_v32 }
 0x10e   :  { %v1384_v56 = vpop.eup %1383  ;;  %v1095_v3 = vmul.f32 %v1031_v18, %v839_v27  ;;  %v1034_v59 = vadd.f32 1.0, %v1382_v2  ;;  %v908_v33 = vmul.f32 0.70710677, %v2216_v22  ;;  %v845_v36 = vmul.f32 0.5, %v2160_v40  ;;  %v622_v18 = vpop.f32.mrf.mxu1 }
 0x10f   :  { %v1386_v30 = vpop.eup %1385  ;;  %v1066_v31 = vmul.f32 %v1002_v60, %v810_v58  ;;  %v1000_v6 = vadd.f32 1.0, %v1384_v56  ;;  %1399 = verf.f32 %v876_v28  ;;  %v881_v32 = vmul.f32 0.70710677, %v2219_v14 }
 0x110   :  { %1160 = vst.msk [vmem:[%s2517_s6 + $0x160] sm:$0xff] %vm1115_vm2, %v1095_v3  ;;  %v1098_v34 = vmul.f32 %v1034_v59, %v842_v5  ;;  %v1032_v35 = vadd.f32 1.0, %v1386_v30  ;;  %1401 = verf.f32 %v908_v33  ;;  %v2239_v11 = vadd.f32 %v1861_v43, %v714_v24  ;;  %v494_v5 = vpop.f32.mrf.mxu0 }
 0x111   :  { %1131 = vst.msk [vmem:[%s2517_s6 + $0x78] sm:$0xff] %vm1115_vm2, %v1066_v31  ;;  %v1064_v44 = vmul.f32 %v1000_v6, %v808_v15  ;;  %v2246_v49 = vadd.f32 %v1861_v43, %v680_v29  ;;  %v712_v19 = vmul.f32 %v1856_v4, %v606_v8  ;;  %v683_v20 = vmul.f32 %v1278_v9, %v1856_v4 }
 0x112   :  { %1163 = vst.msk [vmem:[%s2517_s6 + $0x178] sm:$0xff] %vm1115_vm2, %v1098_v34  ;;  %v1096_v40 = vmul.f32 %v1032_v35, %v840_v57  ;;  %v1388_v52 = vpop.eup %1387  ;;  %v811_v53 = vmul.f32 0.5, %v2166_v48  ;;  %1403 = verf.f32 %v881_v32  ;;  %v913_v54 = vmul.f32 0.70710677, %v2239_v11  ;;  %v1282_v57 = vpop.f32.mrf.mxu0 }
 0x113   :  { %1129 = vst.msk [vmem:[%s2517_s6 + $0x68] sm:$0xff] %vm1115_vm2, %v1064_v44  ;;  %v715_v16 = vmul.f32 %v1310_v25, %v1856_v4  ;;  %v1390_v37 = vpop.eup %1389  ;;  %v1005_v27 = vadd.f32 1.0, %v1388_v52  ;;  %v843_v39 = vmul.f32 0.5, %v2174_v50  ;;  %v879_v51 = vmul.f32 0.70710677, %v2246_v49  ;;  %v1314_v34 = vpop.f32.mrf.mxu1 }
 0x114   :  { %1161 = vst.msk [vmem:[%s2517_s6 + $0x168] sm:$0xff] %vm1115_vm2, %v1096_v40  ;;  %v2264_v58 = vadd.f32 %v1861_v43, %v712_v19  ;;  %v1037_v48 = vadd.f32 1.0, %v1390_v37  ;;  %1405 = verf.f32 %v913_v54  ;;  %v2267_v38 = vadd.f32 %v1861_v43, %v683_v20  ;;  %v497_v35 = vpop.f32.mrf.mxu0 }
 0x115   :  { %v2270_v61 = vadd.f32 %v1861_v43, %v715_v16  ;;  %v1392_v1 = vpop.eup %1391  ;;  %v1069_v0 = vmul.f32 %v1005_v27, %v813_v23  ;;  %v814_v7 = vmul.f32 0.5, %v2177_v46  ;;  %1407 = verf.f32 %v879_v51  ;;  %v625_v27 = vpop.f32.mrf.mxu1 }
 0x116   :  { %v911_v50 = vmul.f32 0.70710677, %v2264_v58  ;;  %v1394_v8 = vpop.eup %1393  ;;  %v1101_v9 = vmul.f32 %v1037_v48, %v845_v36  ;;  %v1003_v10 = vadd.f32 1.0, %v1392_v1  ;;  %v846_v63 = vmul.f32 0.5, %v2191_v62 }
 0x117   :  { %v882_v12 = vmul.f32 0.70710677, %v2267_v38  ;;  %v1396_v41 = vpop.eup %1395  ;;  %1134 = vst.msk [vmem:[%s2517_s6 + $0x90] sm:$0xff] %vm1115_vm2, %v1069_v0  ;;  %v1035_v15 = vadd.f32 1.0, %v1394_v8  ;;  %v812_v17 = vmul.f32 0.5, %v2213_v21  ;;  %v681_v55 = vmul.f32 %v1856_v4, %v2222_v26 }
 0x118   :  { %1409 = verf.f32 %v911_v50  ;;  %v914_v46 = vmul.f32 0.70710677, %v2270_v61  ;;  %1166 = vst.msk [vmem:[%s2517_s6 + $0x190] sm:$0xff] %vm1115_vm2, %v1101_v9  ;;  %v1067_v62 = vmul.f32 %v1003_v10, %v811_v53  ;;  %v1006_v13 = vadd.f32 1.0, %v1396_v41  ;;  %v1317_v41 = vpop.f32.mrf.mxu1 }
 0x119   :  { %1411 = verf.f32 %v882_v12  ;;  %v1398_v2 = vpop.eup %1397  ;;  %v1099_v60 = vmul.f32 %v1035_v15, %v843_v39  ;;  %v713_v21 = vmul.f32 %v1856_v4, %v609_v47  ;;  %v686_v24 = vmul.f32 %v1281_v45, %v1856_v4  ;;  %v1285_v39 = vpop.f32.mrf.mxu0 }
 0x11a   :  { %1413 = verf.f32 %v914_v46  ;;  %1132 = vst.msk [vmem:[%s2517_s6 + $0x80] sm:$0xff] %vm1115_vm2, %v1067_v62  ;;  %v1070_v25 = vmul.f32 %v1006_v13, %v814_v7  ;;  %v1038_v56 = vadd.f32 1.0, %v1398_v2  ;;  %v2295_v3 = vadd.f32 %v1861_v43, %v681_v55 }
 0x11b   :  { %v718_v26 = vmul.f32 %v1313_v42, %v1856_v4  ;;  %1164 = vst.msk [vmem:[%s2517_s6 + $0x180] sm:$0xff] %vm1115_vm2, %v1099_v60  ;;  %v844_v59 = vmul.f32 0.5, %v2216_v22  ;;  %v2304_v28 = vadd.f32 %v1861_v43, %v713_v21  ;;  %v2307_v29 = vadd.f32 %v1861_v43, %v686_v24  ;;  %v510_v15 = vpop.f32.mrf.mxu0 }
 0x11c   :  { %v684_v30 = vmul.f32 %v1856_v4, %v494_v5  ;;  %v1400_v31 = vpop.eup %1399  ;;  %1135 = vst.msk [vmem:[%s2517_s6 + $0x98] sm:$0xff] %vm1115_vm2, %v1070_v25  ;;  %v1102_v6 = vmul.f32 %v1038_v56, %v846_v63  ;;  %v880_v23 = vmul.f32 0.70710677, %v2295_v3  ;;  %v716_v22 = vmul.f32 %v1856_v4, %v622_v18 }
 0x11d   :  { %v2316_v33 = vadd.f32 %v1861_v43, %v718_v26  ;;  %v1402_v36 = vpop.eup %1401  ;;  %v1004_v44 = vadd.f32 1.0, %v1400_v31  ;;  %v817_v32 = vmul.f32 0.5, %v2219_v14  ;;  %v849_v47 = vmul.f32 0.5, %v2239_v11  ;;  %v1286_v31 = vpop.f32.mrf.mxu0 }
 0x11e   :  { %v912_v45 = vmul.f32 0.70710677, %v2304_v28  ;;  %1167 = vst.msk [vmem:[%s2517_s6 + $0x198] sm:$0xff] %vm1115_vm2, %v1102_v6  ;;  %v1036_v40 = vadd.f32 1.0, %v1402_v36  ;;  %v815_v19 = vmul.f32 0.5, %v2246_v49  ;;  %1415 = verf.f32 %v880_v23 }
 0x11f   :  { %v885_v20 = vmul.f32 0.70710677, %v2307_v29  ;;  %v1404_v52 = vpop.eup %1403  ;;  %v1068_v53 = vmul.f32 %v1004_v44, %v812_v17  ;;  %v917_v14 = vmul.f32 0.70710677, %v2316_v33  ;;  %v2330_v11 = vadd.f32 %v1861_v43, %v684_v30  ;;  %v638_v30 = vpop.f32.mrf.mxu1 }
 0x120   :  { %1417 = verf.f32 %v912_v45  ;;  %v1100_v54 = vmul.f32 %v1036_v40, %v844_v59  ;;  %v1009_v16 = vadd.f32 1.0, %v1404_v52  ;;  %v2333_v37 = vadd.f32 %v1861_v43, %v716_v22 }
 0x121   :  { %1419 = verf.f32 %v885_v20  ;;  %v1406_v49 = vpop.eup %1405  ;;  %1133 = vst.msk [vmem:[%s2517_s6 + $0x88] sm:$0xff] %vm1115_vm2, %v1068_v53  ;;  %v847_v51 = vmul.f32 0.5, %v2264_v58  ;;  %v883_v48 = vmul.f32 0.70710677, %v2330_v11  ;;  %v687_v42 = vmul.f32 %v1282_v57, %v1856_v4  ;;  %v1318_v52 = vpop.f32.mrf.mxu1 }
 0x122   :  { %1421 = verf.f32 %v917_v14  ;;  %v1408_v5 = vpop.eup %1407  ;;  %1165 = vst.msk [vmem:[%s2517_s6 + $0x188] sm:$0xff] %vm1115_vm2, %v1100_v54  ;;  %v1073_v1 = vmul.f32 %v1009_v16, %v817_v32  ;;  %v1041_v0 = vadd.f32 1.0, %v1406_v49  ;;  %v818_v7 = vmul.f32 0.5, %v2267_v38 }
 0x123   :  { %v915_v50 = vmul.f32 0.70710677, %v2333_v37  ;;  %v1007_v8 = vadd.f32 1.0, %v1408_v5  ;;  %1423 = verf.f32 %v883_v48  ;;  %v2349_v58 = vadd.f32 %v1861_v43, %v687_v42 }
 0x124   :  { %v719_v9 = vmul.f32 %v1314_v34, %v1856_v4  ;;  %1138 = vst.msk [vmem:[%s2517_s6 + $0xb0] sm:$0xff] %vm1115_vm2, %v1073_v1  ;;  %v1105_v63 = vmul.f32 %v1041_v0, %v849_v47  ;;  %v685_v12 = vmul.f32 %v1856_v4, %v497_v35  ;;  %v717_v38 = vmul.f32 %v1856_v4, %v625_v27 }
 0x125   :  { %v1410_v10 = vpop.eup %1409  ;;  %1425 = verf.f32 %v915_v50  ;;  %v1071_v46 = vmul.f32 %v1007_v8, %v815_v19  ;;  %v850_v13 = vmul.f32 0.5, %v2270_v61  ;;  %v886_v55 = vmul.f32 0.70710677, %v2349_v58  ;;  %v513_v8 = vpop.f32.mrf.mxu0 }
 0x126   :  { %v1412_v17 = vpop.eup %1411  ;;  %v1039_v62 = vadd.f32 1.0, %v1410_v10  ;;  %1170 = vst.msk [vmem:[%s2517_s6 + $0x1b0] sm:$0xff] %vm1115_vm2, %v1105_v63  ;;  %v2365_v2 = vadd.f32 %v1861_v43, %v719_v9  ;;  %v2368_v60 = vadd.f32 %v1861_v43, %v685_v12  ;;  %v2371_v21 = vadd.f32 %v1861_v43, %v717_v38  ;;  %v641_v38 = vpop.f32.mrf.mxu1 }
 0x127   :  { %v1414_v18 = vpop.eup %1413  ;;  %v1010_v57 = vadd.f32 1.0, %v1412_v17  ;;  %1136 = vst.msk [vmem:[%s2517_s6 + $0xa0] sm:$0xff] %vm1115_vm2, %v1071_v46  ;;  %1427 = verf.f32 %v886_v55  ;;  %v690_v25 = vmul.f32 %v1285_v39, %v1856_v4  ;;  %v816_v26 = vmul.f32 0.5, %v2295_v3  ;;  %v2394_v4 = vld [vmem:[%s2516_s5] ss:$0 sm:$0xff] }
 0x128   :  { %v1103_v61 = vmul.f32 %v1039_v62, %v847_v51  ;;  %v1042_v24 = vadd.f32 1.0, %v1414_v18  ;;  %v918_v59 = vmul.f32 0.70710677, %v2365_v2  ;;  %v848_v6 = vmul.f32 0.5, %v2304_v28  ;;  %v1452_v28 = vld [vmem:[%s2515_s4] ss:$0 sm:$0xff] }
 0x129   :  { %v1074_v56 = vmul.f32 %v1010_v57, %v818_v7  ;;  %v884_v23 = vmul.f32 0.70710677, %v2368_v60  ;;  %v916_v22 = vmul.f32 0.70710677, %v2371_v21  ;;  %v2397_v3 = vadd.f32 %v2394_v4, %v690_v25 }
 0x12a   :  { %1168 = vst.msk [vmem:[%s2517_s6 + $0x1a0] sm:$0xff] %vm1115_vm2, %v1103_v61  ;;  %v1106_v43 = vmul.f32 %v1042_v24, %v850_v13  ;;  %1429 = verf.f32 %v918_v59  ;;  %v722_v34 = vmul.f32 %v1452_v28, %v1317_v41  ;;  %v688_v35 = vmul.f32 %v1452_v28, %v510_v15 }
 0x12b   :  { %1139 = vst.msk [vmem:[%s2517_s6 + $0xb8] sm:$0xff] %vm1115_vm2, %v1074_v56  ;;  %v1416_v36 = vpop.eup %1415  ;;  %v821_v44 = vmul.f32 0.5, %v2307_v29  ;;  %1431 = verf.f32 %v884_v23  ;;  %v720_v32 = vmul.f32 %v1452_v28, %v638_v30  ;;  %v691_v47 = vmul.f32 %v1452_v28, %v1286_v31 }
 0x12c   :  { %1171 = vst.msk [vmem:[%s2517_s6 + $0x1b8] sm:$0xff] %vm1115_vm2, %v1106_v43  ;;  %v1008_v40 = vadd.f32 1.0, %v1416_v36  ;;  %v853_v19 = vmul.f32 0.5, %v2316_v33  ;;  %1433 = verf.f32 %v916_v22  ;;  %v889_v20 = vmul.f32 0.70710677, %v2397_v3 }
 0x12d   :  { %v1418_v45 = vpop.eup %1417  ;;  %v2410_v54 = vadd.f32 %v2394_v4, %v722_v34  ;;  %v2413_v16 = vadd.f32 %v2394_v4, %v688_v35  ;;  %v2416_v29 = vadd.f32 %v2394_v4, %v720_v32  ;;  %v2419_v33 = vadd.f32 %v2394_v4, %v691_v47 }
 0x12e   :  { %v1420_v53 = vpop.eup %1419  ;;  %v1040_v14 = vadd.f32 1.0, %v1418_v45  ;;  %v1072_v39 = vmul.f32 %v1008_v40, %v816_v26  ;;  %1435 = verf.f32 %v889_v20  ;;  %v723_v5 = vmul.f32 %v1452_v28, %v1318_v52 }
 0x12f   :  { %v1422_v27 = vpop.eup %1421  ;;  %v1013_v49 = vadd.f32 1.0, %v1420_v53  ;;  %v921_v42 = vmul.f32 0.70710677, %v2410_v54  ;;  %v819_v7 = vmul.f32 0.5, %v2330_v11  ;;  %v887_v50 = vmul.f32 0.70710677, %v2413_v16 }
 0x130   :  { %v1104_v51 = vmul.f32 %v1040_v14, %v848_v6  ;;  %v1045_v48 = vadd.f32 1.0, %v1422_v27  ;;  %v1424_v1 = vpop.eup %1423  ;;  %1137 = vst.msk [vmem:[%s2517_s6 + $0xa8] sm:$0xff] %vm1115_vm2, %v1072_v39  ;;  %v919_v12 = vmul.f32 0.70710677, %v2416_v29  ;;  %v851_v11 = vmul.f32 0.5, %v2333_v37 }
 0x131   :  { %v1077_v0 = vmul.f32 %v1013_v49, %v821_v44  ;;  %v1011_v63 = vadd.f32 1.0, %v1424_v1  ;;  %1437 = verf.f32 %v921_v42  ;;  %v890_v15 = vmul.f32 0.70710677, %v2419_v33 }
 0x132   :  { %v1426_v9 = vpop.eup %1425  ;;  %1169 = vst.msk [vmem:[%s2517_s6 + $0x1a8] sm:$0xff] %vm1115_vm2, %v1104_v51  ;;  %v1109_v10 = vmul.f32 %v1045_v48, %v853_v19  ;;  %1439 = verf.f32 %v887_v50  ;;  %v794_v46 = vadd.f32 %v2394_v4, %v723_v5  ;;  %v689_v62 = vmul.f32 %v1452_v28, %v513_v8 }
 0x133   :  { %1142 = vst.msk [vmem:[%s2517_s6 + $0xd0] sm:$0xff] %vm1115_vm2, %v1077_v0  ;;  %v1043_v41 = vadd.f32 1.0, %v1426_v9  ;;  %v1075_v17 = vmul.f32 %v1011_v63, %v819_v7  ;;  %1441 = verf.f32 %v919_v12  ;;  %v721_v18 = vmul.f32 %v1452_v28, %v641_v38 }
 0x134   :  { %1174 = vst.msk [vmem:[%s2517_s6 + $0x1d0] sm:$0xff] %vm1115_vm2, %v1109_v10  ;;  %v1428_v13 = vpop.eup %1427  ;;  %1443 = verf.f32 %v890_v15  ;;  %v822_v37 = vmul.f32 0.5, %v2349_v58  ;;  %v922_v61 = vmul.f32 0.70710677, %v794_v46  ;;  %v760_v24 = vadd.f32 %v2394_v4, %v689_v62 }
 0x135   :  { %v1107_v55 = vmul.f32 %v1043_v41, %v851_v11  ;;  %1140 = vst.msk [vmem:[%s2517_s6 + $0xc0] sm:$0xff] %vm1115_vm2, %v1075_v17  ;;  %v1014_v57 = vadd.f32 1.0, %v1428_v13  ;;  %v792_v25 = vadd.f32 %v2394_v4, %v721_v18  ;;  %v854_v31 = vmul.f32 0.5, %v2365_v2 }
 0x136   :  { %1445 = verf.f32 %v922_v61  ;;  %v888_v59 = vmul.f32 0.70710677, %v760_v24  ;;  %v820_v23 = vmul.f32 0.5, %v2368_v60  ;;  %v852_v28 = vmul.f32 0.5, %v2371_v21 }
 0x137   :  { %1172 = vst.msk [vmem:[%s2517_s6 + $0x1c0] sm:$0xff] %vm1115_vm2, %v1107_v55  ;;  %v1430_v56 = vpop.eup %1429  ;;  %v1078_v26 = vmul.f32 %v1014_v57, %v822_v37  ;;  %v920_v58 = vmul.f32 0.70710677, %v792_v25  ;;  %v825_v44 = vmul.f32 0.5, %v2397_v3  ;;  %v857_v45 = vmul.f32 0.5, %v2410_v54 }
 0x138   :  { %v1432_v30 = vpop.eup %1431  ;;  %v1046_v43 = vadd.f32 1.0, %v1430_v56  ;;  %1447 = verf.f32 %v888_v59  ;;  %v823_v3 = vmul.f32 0.5, %v2413_v16  ;;  %v855_v14 = vmul.f32 0.5, %v2416_v29 }
 0x139   :  { %v1434_v6 = vpop.eup %1433  ;;  %1143 = vst.msk [vmem:[%s2517_s6 + $0xd8] sm:$0xff] %vm1115_vm2, %v1078_v26  ;;  %v1012_v22 = vadd.f32 1.0, %v1432_v30  ;;  %1449 = verf.f32 %v920_v58  ;;  %v826_v49 = vmul.f32 0.5, %v2419_v33  ;;  %v858_v29 = vmul.f32 0.5, %v794_v46 }
 0x13a   :  { %v1110_v4 = vmul.f32 %v1046_v43, %v854_v31  ;;  %v1044_v34 = vadd.f32 1.0, %v1434_v6  ;;  %v824_v0 = vmul.f32 0.5, %v760_v24  ;;  %v856_v50 = vmul.f32 0.5, %v792_v25 }
 0x13b   :  { %v1436_v35 = vpop.eup %1435  ;;  %v1076_v36 = vmul.f32 %v1012_v22, %v820_v23 }
 0x13c   :  { %1175 = vst.msk [vmem:[%s2517_s6 + $0x1d8] sm:$0xff] %vm1115_vm2, %v1110_v4  ;;  %v1108_v2 = vmul.f32 %v1044_v34, %v852_v28  ;;  %v1017_v32 = vadd.f32 1.0, %v1436_v35 }
 0x13d   :  { %1141 = vst.msk [vmem:[%s2517_s6 + $0xc8] sm:$0xff] %vm1115_vm2, %v1076_v36 }
 0x13e   :  { %v1438_v60 = vpop.eup %1437  ;;  %1173 = vst.msk [vmem:[%s2517_s6 + $0x1c8] sm:$0xff] %vm1115_vm2, %v1108_v2  ;;  %v1081_v21 = vmul.f32 %v1017_v32, %v825_v44 }
 0x13f   :  { %v1440_v47 = vpop.eup %1439  ;;  %v1049_v40 = vadd.f32 1.0, %v1438_v60 }
 0x140   :  { %v1442_v19 = vpop.eup %1441  ;;  %1146 = vst.msk [vmem:[%s2517_s6 + $0xf0] sm:$0xff] %vm1115_vm2, %v1081_v21  ;;  %v1015_v20 = vadd.f32 1.0, %v1440_v47 }
 0x141   :  { %v1444_v52 = vpop.eup %1443  ;;  %v1113_v53 = vmul.f32 %v1049_v40, %v857_v45  ;;  %v1047_v27 = vadd.f32 1.0, %v1442_v19 }
 0x142   :  { %v1079_v39 = vmul.f32 %v1015_v20, %v823_v3  ;;  %v1018_v51 = vadd.f32 1.0, %v1444_v52 }
 0x143   :  { %1178 = vst.msk [vmem:[%s2517_s6 + $0x1f0] sm:$0xff] %vm1115_vm2, %v1113_v53  ;;  %v1111_v54 = vmul.f32 %v1047_v27, %v855_v14  ;;  %v1446_v48 = vpop.eup %1445 }
 0x144   :  { %1144 = vst.msk [vmem:[%s2517_s6 + $0xe0] sm:$0xff] %vm1115_vm2, %v1079_v39  ;;  %v1082_v16 = vmul.f32 %v1018_v51, %v826_v49  ;;  %v1050_v33 = vadd.f32 1.0, %v1446_v48 }
 0x145   :  { %1176 = vst.msk [vmem:[%s2517_s6 + $0x1e0] sm:$0xff] %vm1115_vm2, %v1111_v54  ;;  %v1448_v42 = vpop.eup %1447 }
 0x146   :  { %1147 = vst.msk [vmem:[%s2517_s6 + $0xf8] sm:$0xff] %vm1115_vm2, %v1082_v16  ;;  %v1450_v5 = vpop.eup %1449  ;;  %v1114_v1 = vmul.f32 %v1050_v33, %v858_v29  ;;  %v1016_v7 = vadd.f32 1.0, %v1448_v42 }
 0x147   :  { %v1048_v8 = vadd.f32 1.0, %v1450_v5 }
 0x148   :  { %1179 = vst.msk [vmem:[%s2517_s6 + $0x1f8] sm:$0xff] %vm1115_vm2, %v1114_v1  ;;  %v1080_v9 = vmul.f32 %v1016_v7, %v824_v0 }
 0x149   :  { %v1112_v10 = vmul.f32 %v1048_v8, %v856_v50 }
 0x14a   :  { %1145 = vst.msk [vmem:[%s2517_s6 + $0xe8] sm:$0xff] %vm1115_vm2, %v1080_v9 }
 0x14b   :  { %1177 = vst.msk [vmem:[%s2517_s6 + $0x1e8] sm:$0xff] %vm1115_vm2, %v1112_v10 }

// kernel: replk_stage_forward.14
= control target key start
LH: loop header
LB: loop body
LE: loop exit
PB: predicated region body
PF: predicated region fallthrough
CT: control target
= control target key end

     0   :  { %vm133_vm0 = vcmask 261120   ;;  %vm789_vm1 = vcmask 64512   ;;  %s1848_s1 = inlined_call_operand.vmem [shape: bf16[32,8], index: 1, kind: input, shape index: {}]   ;;  %s1849_s0 = inlined_call_operand.vmem [shape: f32[512,32], index: 0, kind: input, shape index: {}]   ;;  %s1850_s2 = inlined_call_operand.vmem [shape: f32[1,8], index: 2, kind: input, shape index: {}]   ;;  %s1851_s3 = inlined_call_operand.vmem [shape: f32[1,8], index: 3, kind: input, shape index: {}]   ;;  %s1852_s4 = inlined_call_operand.vmem [shape: f32[512,8], index: 4, kind: input, shape index: {}]   ;;  %s1853_s5 = inlined_call_operand.vmem [shape: f32[512,8], index: 5, kind: output, shape index: {}]  }
   0x1   :  { %v1000_v0 = vld [vmem:[%s1848_s1 + $0x8] sm:$0xff]   ;;  %v1001_v1 = vld [vmem:[%s1848_s1] sm:$0xff]   ;;  %v23_v7 = vld [vmem:[%s1849_s0 + $0x10] sm:$0xff] }
   0x2   :  { %928 = vmatprep.subr.bf16.mxu0 %v1000_v0  ;;  %996 = vmatprep.subr.bf16.mxu1 %v1000_v0  ;;  %v21_v2 = vld [vmem:[%s1849_s0] sm:$0xff]  ;;  %v22_v3 = vld [vmem:[%s1849_s0 + $0x8] sm:$0xff]  ;;  %v24_v8 = vld [vmem:[%s1849_s0 + $0x18] sm:$0xff] }
   0x3   :  { %v53_v4 = vld [vmem:[%s1849_s0 + $0x100] sm:$0xff]  ;;  %929 = vmatpush3.bf16.msra.mxu0 %v1000_v0  ;;  %998 = vmatpush3.bf16.msra.mxu1 %v1000_v0  ;;  %v85_v5 = vpack.c.bf16 %v22_v3, %v21_v2  ;;  %v54_v6 = vld [vmem:[%s1849_s0 + $0x108] sm:$0xff]  ;;  %v55_v10 = vld [vmem:[%s1849_s0 + $0x110] sm:$0xff]  ;;  %v86_v16 = vpack.c.bf16 %v24_v8, %v23_v7 }
   0x4   :  { %930 = vmatprep.subr.bf16.mxu0 %v1001_v1  ;;  %997 = vmatprep.subr.bf16.mxu1 %v1001_v1  ;;  %v101_v9 = vpack.c.bf16 %v54_v6, %v53_v4  ;;  %v56_v11 = vld [vmem:[%s1849_s0 + $0x118] sm:$0xff]  ;;  %v25_v12 = vld [vmem:[%s1849_s0 + $0x20] sm:$0xff]  ;;  %v26_v13 = vld [vmem:[%s1849_s0 + $0x28] sm:$0xff] }
   0x5   :  { %932 = vmatprep.mubr.msk.bf16.mxu0 %vm133_vm0, %v85_v5  ;;  %v57_v14 = vld [vmem:[%s1849_s0 + $0x120] sm:$0xff]  ;;  %v58_v15 = vld [vmem:[%s1849_s0 + $0x128] sm:$0xff]  ;;  %v102_v17 = vpack.c.bf16 %v56_v11, %v55_v10  ;;  %v87_v18 = vpack.c.bf16 %v26_v13, %v25_v12  ;;  %v27_v20 = vld [vmem:[%s1849_s0 + $0x30] sm:$0xff] }
   0x6   :  { %964 = vmatprep.mubr.msk.bf16.mxu1 %vm133_vm0, %v101_v9  ;;  %v103_v19 = vpack.c.bf16 %v58_v15, %v57_v14  ;;  %v28_v21 = vld [vmem:[%s1849_s0 + $0x38] sm:$0xff]  ;;  %v59_v22 = vld [vmem:[%s1849_s0 + $0x130] sm:$0xff]  ;;  %v29_v24 = vld [vmem:[%s1849_s0 + $0x40] sm:$0xff] }
   0x7   :  { %931 = vmatpush3.bf16.msra.mxu0 %v1001_v1  ;;  %999 = vmatpush3.bf16.msra.mxu1 %v1001_v1  ;;  %v60_v23 = vld [vmem:[%s1849_s0 + $0x138] sm:$0xff]  ;;  %v30_v25 = vld [vmem:[%s1849_s0 + $0x48] sm:$0xff]  ;;  %v61_v26 = vld [vmem:[%s1849_s0 + $0x140] sm:$0xff]  ;;  %v88_v28 = vpack.c.bf16 %v28_v21, %v27_v20 }
   0x8   :  { %v62_v27 = vld [vmem:[%s1849_s0 + $0x148] sm:$0xff]  ;;  %v104_v29 = vpack.c.bf16 %v60_v23, %v59_v22  ;;  %v89_v30 = vpack.c.bf16 %v30_v25, %v29_v24  ;;  %v31_v32 = vld [vmem:[%s1849_s0 + $0x50] sm:$0xff]  ;;  %v32_v33 = vld [vmem:[%s1849_s0 + $0x58] sm:$0xff] }
   0x9   :  { %v105_v31 = vpack.c.bf16 %v62_v27, %v61_v26  ;;  %v63_v34 = vld [vmem:[%s1849_s0 + $0x150] sm:$0xff]  ;;  %v64_v35 = vld [vmem:[%s1849_s0 + $0x158] sm:$0xff]  ;;  %v33_v36 = vld [vmem:[%s1849_s0 + $0x60] sm:$0xff]  ;;  %v90_v40 = vpack.c.bf16 %v32_v33, %v31_v32 }
   0xa   :  { %933 = vmatmul.mubr.msk.bf16.vlgmr.msra.gmra.mxu0 %vm133_vm0, %v86_v16  ;;  %965 = vmatmul.mubr.msk.bf16.vlgmr.msra.gmra.mxu1 %vm133_vm0, %v102_v17  ;;  %v34_v37 = vld [vmem:[%s1849_s0 + $0x68] sm:$0xff]  ;;  %v65_v38 = vld [vmem:[%s1849_s0 + $0x160] sm:$0xff]  ;;  %v106_v41 = vpack.c.bf16 %v64_v35, %v63_v34  ;;  %v35_v44 = vld [vmem:[%s1849_s0 + $0x70] sm:$0xff] }
   0xb   :  { %936 = vmatprep.mubr.msk.bf16.mxu0 %vm133_vm0, %v87_v18  ;;  %968 = vmatprep.mubr.msk.bf16.mxu1 %vm133_vm0, %v103_v19  ;;  %v66_v39 = vld [vmem:[%s1849_s0 + $0x168] sm:$0xff]  ;;  %v91_v42 = vpack.c.bf16 %v34_v37, %v33_v36  ;;  %v36_v45 = vld [vmem:[%s1849_s0 + $0x78] sm:$0xff]  ;;  %v67_v46 = vld [vmem:[%s1849_s0 + $0x170] sm:$0xff] }
   0xc   :  { %v107_v43 = vpack.c.bf16 %v66_v39, %v65_v38  ;;  %v68_v47 = vld [vmem:[%s1849_s0 + $0x178] sm:$0xff]  ;;  %v37_v48 = vld [vmem:[%s1849_s0 + $0x80] sm:$0xff]  ;;  %v38_v49 = vld [vmem:[%s1849_s0 + $0x88] sm:$0xff]  ;;  %v92_v52 = vpack.c.bf16 %v36_v45, %v35_v44 }
   0xd   :  { %v69_v50 = vld [vmem:[%s1849_s0 + $0x180] sm:$0xff]  ;;  %v70_v51 = vld [vmem:[%s1849_s0 + $0x188] sm:$0xff]  ;;  %v108_v53 = vpack.c.bf16 %v68_v47, %v67_v46  ;;  %v93_v54 = vpack.c.bf16 %v38_v49, %v37_v48  ;;  %v39_v56 = vld [vmem:[%s1849_s0 + $0x90] sm:$0xff] }
   0xe   :  { %v109_v55 = vpack.c.bf16 %v70_v51, %v69_v50  ;;  %v40_v57 = vld [vmem:[%s1849_s0 + $0x98] sm:$0xff]  ;;  %v71_v58 = vld [vmem:[%s1849_s0 + $0x190] sm:$0xff]  ;;  %v41_v60 = vld [vmem:[%s1849_s0 + $0xa0] sm:$0xff] }
   0xf   :  { %v72_v59 = vld [vmem:[%s1849_s0 + $0x198] sm:$0xff]  ;;  %v42_v61 = vld [vmem:[%s1849_s0 + $0xa8] sm:$0xff]  ;;  %v73_v62 = vld [vmem:[%s1849_s0 + $0x1a0] sm:$0xff]  ;;  %v94_v0 = vpack.c.bf16 %v40_v57, %v39_v56 }
  0x10   :  { %v74_v63 = vld [vmem:[%s1849_s0 + $0x1a8] sm:$0xff]  ;;  %v110_v1 = vpack.c.bf16 %v72_v59, %v71_v58  ;;  %v95_v2 = vpack.c.bf16 %v42_v61, %v41_v60  ;;  %v43_v4 = vld [vmem:[%s1849_s0 + $0xb0] sm:$0xff]  ;;  %v44_v5 = vld [vmem:[%s1849_s0 + $0xb8] sm:$0xff] }
  0x11   :  { %v111_v3 = vpack.c.bf16 %v74_v63, %v73_v62  ;;  %v75_v6 = vld [vmem:[%s1849_s0 + $0x1b0] sm:$0xff]  ;;  %v76_v7 = vld [vmem:[%s1849_s0 + $0x1b8] sm:$0xff]  ;;  %v45_v8 = vld [vmem:[%s1849_s0 + $0xc0] sm:$0xff]  ;;  %v96_v12 = vpack.c.bf16 %v44_v5, %v43_v4 }
  0x12   :  { %937 = vmatmul.mubr.msk.bf16.gmra.mxu0 %vm133_vm0, %v88_v28  ;;  %969 = vmatmul.mubr.msk.bf16.gmra.mxu1 %vm133_vm0, %v104_v29  ;;  %v46_v9 = vld [vmem:[%s1849_s0 + $0xc8] sm:$0xff]  ;;  %v77_v10 = vld [vmem:[%s1849_s0 + $0x1c0] sm:$0xff]  ;;  %v112_v13 = vpack.c.bf16 %v76_v7, %v75_v6  ;;  %v47_v16 = vld [vmem:[%s1849_s0 + $0xd0] sm:$0xff] }
  0x13   :  { %940 = vmatprep.mubr.msk.bf16.mxu0 %vm133_vm0, %v89_v30  ;;  %972 = vmatprep.mubr.msk.bf16.mxu1 %vm133_vm0, %v105_v31  ;;  %v78_v11 = vld [vmem:[%s1849_s0 + $0x1c8] sm:$0xff]  ;;  %v97_v14 = vpack.c.bf16 %v46_v9, %v45_v8  ;;  %v48_v17 = vld [vmem:[%s1849_s0 + $0xd8] sm:$0xff]  ;;  %v79_v18 = vld [vmem:[%s1849_s0 + $0x1d0] sm:$0xff] }
  0x14   :  { %v113_v15 = vpack.c.bf16 %v78_v11, %v77_v10  ;;  %v80_v19 = vld [vmem:[%s1849_s0 + $0x1d8] sm:$0xff]  ;;  %v49_v20 = vld [vmem:[%s1849_s0 + $0xe0] sm:$0xff]  ;;  %v50_v21 = vld [vmem:[%s1849_s0 + $0xe8] sm:$0xff]  ;;  %v98_v24 = vpack.c.bf16 %v48_v17, %v47_v16 }
  0x15   :  { %v81_v22 = vld [vmem:[%s1849_s0 + $0x1e0] sm:$0xff]  ;;  %v82_v23 = vld [vmem:[%s1849_s0 + $0x1e8] sm:$0xff]  ;;  %v114_v25 = vpack.c.bf16 %v80_v19, %v79_v18  ;;  %v99_v26 = vpack.c.bf16 %v50_v21, %v49_v20  ;;  %v51_v28 = vld [vmem:[%s1849_s0 + $0xf0] sm:$0xff] }
  0x16   :  { %v115_v27 = vpack.c.bf16 %v82_v23, %v81_v22  ;;  %v52_v29 = vld [vmem:[%s1849_s0 + $0xf8] sm:$0xff]  ;;  %v83_v30 = vld [vmem:[%s1849_s0 + $0x1f0] sm:$0xff]  ;;  %v1265_v34 = vld [vmem:[%s1850_s2] ss:$0 sm:$0xff] }
  0x17   :  { %v84_v31 = vld [vmem:[%s1849_s0 + $0x1f8] sm:$0xff]  ;;  %v100_v32 = vpack.c.bf16 %v52_v29, %v51_v28  ;;  %v1270_v36 = vld [vmem:[%s1851_s3] ss:$0 sm:$0xff]  ;;  %v662_v4 = vld [vmem:[%s1852_s4 + $0x8] sm:$0xff] }
  0x18   :  { %v116_v33 = vpack.c.bf16 %v84_v31, %v83_v30  ;;  %v661_v48 = vld [vmem:[%s1852_s4] sm:$0xff]  ;;  %v664_v62 = vld [vmem:[%s1852_s4 + $0x18] sm:$0xff]  ;;  %v694_v5 = vld [vmem:[%s1852_s4 + $0x108] sm:$0xff] }
  0x19   :  { %v693_v49 = vld [vmem:[%s1852_s4 + $0x100] sm:$0xff]  ;;  %v696_v63 = vld [vmem:[%s1852_s4 + $0x118] sm:$0xff] }
  0x1a   :  { %941 = vmatmul.mubr.msk.bf16.gmra.mxu0 %vm133_vm0, %v90_v40  ;;  %973 = vmatmul.mubr.msk.bf16.gmra.mxu1 %vm133_vm0, %v106_v41  ;;  %v663_v40 = vld [vmem:[%s1852_s4 + $0x10] sm:$0xff]  ;;  %v665_v28 = vld [vmem:[%s1852_s4 + $0x20] sm:$0xff] }
  0x1b   :  { %944 = vmatprep.mubr.msk.bf16.mxu0 %vm133_vm0, %v91_v42  ;;  %976 = vmatprep.mubr.msk.bf16.mxu1 %vm133_vm0, %v107_v43  ;;  %v695_v41 = vld [vmem:[%s1852_s4 + $0x110] sm:$0xff]  ;;  %v697_v29 = vld [vmem:[%s1852_s4 + $0x120] sm:$0xff] }
  0x22   :  { %945 = vmatmul.mubr.msk.bf16.gmra.mxu0 %vm133_vm0, %v92_v52  ;;  %977 = vmatmul.mubr.msk.bf16.gmra.mxu1 %vm133_vm0, %v108_v53 }
  0x23   :  { %948 = vmatprep.mubr.msk.bf16.mxu0 %vm133_vm0, %v93_v54  ;;  %980 = vmatprep.mubr.msk.bf16.mxu1 %vm133_vm0, %v109_v55 }
  0x2a   :  { %949 = vmatmul.mubr.msk.bf16.gmra.mxu0 %vm133_vm0, %v94_v0  ;;  %981 = vmatmul.mubr.msk.bf16.gmra.mxu1 %vm133_vm0, %v110_v1 }
  0x2b   :  { %952 = vmatprep.mubr.msk.bf16.mxu0 %vm133_vm0, %v95_v2  ;;  %984 = vmatprep.mubr.msk.bf16.mxu1 %vm133_vm0, %v111_v3 }
  0x32   :  { %953 = vmatmul.mubr.msk.bf16.gmra.mxu0 %vm133_vm0, %v96_v12  ;;  %985 = vmatmul.mubr.msk.bf16.gmra.mxu1 %vm133_vm0, %v112_v13 }
  0x33   :  { %956 = vmatprep.mubr.msk.bf16.mxu0 %vm133_vm0, %v97_v14  ;;  %988 = vmatprep.mubr.msk.bf16.mxu1 %vm133_vm0, %v113_v15  ;;  %v667_v14 = vld [vmem:[%s1852_s4 + $0x30] sm:$0xff] }
  0x34   :  { %v699_v15 = vld [vmem:[%s1852_s4 + $0x130] sm:$0xff] }
  0x3a   :  { %957 = vmatmul.mubr.msk.bf16.gmra.mxu0 %vm133_vm0, %v98_v24  ;;  %989 = vmatmul.mubr.msk.bf16.gmra.mxu1 %vm133_vm0, %v114_v25 }
  0x3b   :  { %960 = vmatprep.mubr.msk.bf16.mxu0 %vm133_vm0, %v99_v26  ;;  %992 = vmatprep.mubr.msk.bf16.mxu1 %vm133_vm0, %v115_v27 }
  0x42   :  { %961 = vmatmul.mubr.msk.bf16.gmra.mxu0 %vm133_vm0, %v100_v32  ;;  %993 = vmatmul.mubr.msk.bf16.gmra.mxu1 %vm133_vm0, %v116_v33 }
  0xca   :  { %v934_v35 = vpop.f32.mrf.mxu0  ;;  %v966_v37 = vpop.f32.mrf.mxu1 }
  0xcb   :  { %v528_v38 = vmul.f32 %v934_v35, %v1265_v34  ;;  %v560_v39 = vmul.f32 %v966_v37, %v1265_v34  ;;  %v668_v35 = vld [vmem:[%s1852_s4 + $0x38] sm:$0xff] }
  0xcc   :  { %v264_v42 = vpop.f32.mrf.mxu0  ;;  %v392_v43 = vpop.f32.mrf.mxu1  ;;  %v700_v37 = vld [vmem:[%s1852_s4 + $0x138] sm:$0xff] }
  0xcd   :  { %v599_v44 = vadd.f32 %v1270_v36, %v528_v38  ;;  %v631_v45 = vadd.f32 %v1270_v36, %v560_v39  ;;  %v526_v46 = vmul.f32 %v1265_v34, %v264_v42  ;;  %v558_v47 = vmul.f32 %v1265_v34, %v392_v43 }
  0xce   :  { %v935_v50 = vpop.f32.mrf.mxu0  ;;  %v967_v51 = vpop.f32.mrf.mxu1 }
  0xcf   :  { %v727_v52 = vadd.f32 %v663_v40, %v599_v44  ;;  %v759_v53 = vadd.f32 %v695_v41, %v631_v45  ;;  %v597_v54 = vadd.f32 %v1270_v36, %v526_v46  ;;  %v629_v55 = vadd.f32 %v1270_v36, %v558_v47  ;;  %v666_v46 = vld [vmem:[%s1852_s4 + $0x28] sm:$0xff] }
  0xd0   :  { %v529_v56 = vmul.f32 %v935_v50, %v1265_v34  ;;  %v561_v57 = vmul.f32 %v967_v51, %v1265_v34  ;;  %v267_v58 = vpop.f32.mrf.mxu0  ;;  %v395_v59 = vpop.f32.mrf.mxu1  ;;  %v698_v47 = vld [vmem:[%s1852_s4 + $0x128] sm:$0xff] }
  0xd1   :  { %792 = vst.msk [vmem:[%s1853_s5 + $0x10] sm:$0xff] %vm789_vm1, %v727_v52  ;;  %824 = vst.msk [vmem:[%s1853_s5 + $0x110] sm:$0xff] %vm789_vm1, %v759_v53  ;;  %v725_v60 = vadd.f32 %v661_v48, %v597_v54  ;;  %v757_v61 = vadd.f32 %v693_v49, %v629_v55  ;;  %v527_v0 = vmul.f32 %v1265_v34, %v267_v58 }
  0xd2   :  { %v559_v1 = vmul.f32 %v1265_v34, %v395_v59  ;;  %v600_v2 = vadd.f32 %v1270_v36, %v529_v56  ;;  %v632_v3 = vadd.f32 %v1270_v36, %v561_v57  ;;  %v938_v6 = vpop.f32.mrf.mxu0  ;;  %v970_v7 = vpop.f32.mrf.mxu1 }
  0xd3   :  { %790 = vst.msk [vmem:[%s1853_s5] sm:$0xff] %vm789_vm1, %v725_v60  ;;  %822 = vst.msk [vmem:[%s1853_s5 + $0x100] sm:$0xff] %vm789_vm1, %v757_v61  ;;  %v598_v8 = vadd.f32 %v1270_v36, %v527_v0  ;;  %v532_v10 = vmul.f32 %v938_v6, %v1265_v34  ;;  %v564_v11 = vmul.f32 %v970_v7, %v1265_v34  ;;  %v671_v60 = vld [vmem:[%s1852_s4 + $0x50] sm:$0xff] }
  0xd4   :  { %v630_v9 = vadd.f32 %v1270_v36, %v559_v1  ;;  %v728_v12 = vadd.f32 %v664_v62, %v600_v2  ;;  %v760_v13 = vadd.f32 %v696_v63, %v632_v3  ;;  %v280_v16 = vpop.f32.mrf.mxu0  ;;  %v408_v17 = vpop.f32.mrf.mxu1  ;;  %v703_v61 = vld [vmem:[%s1852_s4 + $0x150] sm:$0xff]  ;;  %v669_v2 = vld [vmem:[%s1852_s4 + $0x40] sm:$0xff] }
  0xd5   :  { %v726_v18 = vadd.f32 %v662_v4, %v598_v8  ;;  %v603_v20 = vadd.f32 %v1270_v36, %v532_v10  ;;  %v635_v21 = vadd.f32 %v1270_v36, %v564_v11  ;;  %v530_v22 = vmul.f32 %v1265_v34, %v280_v16  ;;  %v701_v3 = vld [vmem:[%s1852_s4 + $0x140] sm:$0xff] }
  0xd6   :  { %v758_v19 = vadd.f32 %v694_v5, %v630_v9  ;;  %793 = vst.msk [vmem:[%s1853_s5 + $0x18] sm:$0xff] %vm789_vm1, %v728_v12  ;;  %825 = vst.msk [vmem:[%s1853_s5 + $0x118] sm:$0xff] %vm789_vm1, %v760_v13  ;;  %v562_v23 = vmul.f32 %v1265_v34, %v408_v17  ;;  %v939_v24 = vpop.f32.mrf.mxu0  ;;  %v971_v25 = vpop.f32.mrf.mxu1  ;;  %v672_v12 = vld [vmem:[%s1852_s4 + $0x58] sm:$0xff] }
  0xd7   :  { %791 = vst.msk [vmem:[%s1853_s5 + $0x8] sm:$0xff] %vm789_vm1, %v726_v18  ;;  %v731_v26 = vadd.f32 %v667_v14, %v603_v20  ;;  %v763_v27 = vadd.f32 %v699_v15, %v635_v21  ;;  %v533_v30 = vmul.f32 %v939_v24, %v1265_v34  ;;  %v565_v31 = vmul.f32 %v971_v25, %v1265_v34  ;;  %v704_v13 = vld [vmem:[%s1852_s4 + $0x158] sm:$0xff] }
  0xd8   :  { %823 = vst.msk [vmem:[%s1853_s5 + $0x108] sm:$0xff] %vm789_vm1, %v758_v19  ;;  %v601_v32 = vadd.f32 %v1270_v36, %v530_v22  ;;  %v633_v33 = vadd.f32 %v1270_v36, %v562_v23  ;;  %v283_v38 = vpop.f32.mrf.mxu0  ;;  %v411_v39 = vpop.f32.mrf.mxu1 }
  0xd9   :  { %796 = vst.msk [vmem:[%s1853_s5 + $0x30] sm:$0xff] %vm789_vm1, %v731_v26  ;;  %828 = vst.msk [vmem:[%s1853_s5 + $0x130] sm:$0xff] %vm789_vm1, %v763_v27  ;;  %v604_v40 = vadd.f32 %v1270_v36, %v533_v30  ;;  %v636_v41 = vadd.f32 %v1270_v36, %v565_v31  ;;  %v531_v42 = vmul.f32 %v1265_v34, %v283_v38  ;;  %v670_v26 = vld [vmem:[%s1852_s4 + $0x48] sm:$0xff] }
  0xda   :  { %v563_v43 = vmul.f32 %v1265_v34, %v411_v39  ;;  %v729_v44 = vadd.f32 %v665_v28, %v601_v32  ;;  %v761_v45 = vadd.f32 %v697_v29, %v633_v33  ;;  %v942_v48 = vpop.f32.mrf.mxu0  ;;  %v974_v49 = vpop.f32.mrf.mxu1  ;;  %v702_v27 = vld [vmem:[%s1852_s4 + $0x148] sm:$0xff]  ;;  %v675_v32 = vld [vmem:[%s1852_s4 + $0x70] sm:$0xff] }
  0xdb   :  { %v732_v50 = vadd.f32 %v668_v35, %v604_v40  ;;  %v764_v51 = vadd.f32 %v700_v37, %v636_v41  ;;  %v602_v52 = vadd.f32 %v1270_v36, %v531_v42  ;;  %v536_v54 = vmul.f32 %v942_v48, %v1265_v34  ;;  %v707_v33 = vld [vmem:[%s1852_s4 + $0x170] sm:$0xff] }
  0xdc   :  { %v634_v53 = vadd.f32 %v1270_v36, %v563_v43  ;;  %794 = vst.msk [vmem:[%s1853_s5 + $0x20] sm:$0xff] %vm789_vm1, %v729_v44  ;;  %826 = vst.msk [vmem:[%s1853_s5 + $0x120] sm:$0xff] %vm789_vm1, %v761_v45  ;;  %v568_v55 = vmul.f32 %v974_v49, %v1265_v34  ;;  %v296_v56 = vpop.f32.mrf.mxu0  ;;  %v424_v57 = vpop.f32.mrf.mxu1  ;;  %v673_v44 = vld [vmem:[%s1852_s4 + $0x60] sm:$0xff] }
  0xdd   :  { %797 = vst.msk [vmem:[%s1853_s5 + $0x38] sm:$0xff] %vm789_vm1, %v732_v50  ;;  %829 = vst.msk [vmem:[%s1853_s5 + $0x138] sm:$0xff] %vm789_vm1, %v764_v51  ;;  %v730_v58 = vadd.f32 %v666_v46, %v602_v52  ;;  %v534_v62 = vmul.f32 %v1265_v34, %v296_v56  ;;  %v566_v63 = vmul.f32 %v1265_v34, %v424_v57  ;;  %v705_v45 = vld [vmem:[%s1852_s4 + $0x160] sm:$0xff] }
  0xde   :  { %v762_v59 = vadd.f32 %v698_v47, %v634_v53  ;;  %v607_v0 = vadd.f32 %v1270_v36, %v536_v54  ;;  %v639_v1 = vadd.f32 %v1270_v36, %v568_v55  ;;  %v943_v4 = vpop.f32.mrf.mxu0  ;;  %v975_v5 = vpop.f32.mrf.mxu1 }
  0xdf   :  { %795 = vst.msk [vmem:[%s1853_s5 + $0x28] sm:$0xff] %vm789_vm1, %v730_v58  ;;  %v605_v6 = vadd.f32 %v1270_v36, %v534_v62  ;;  %v637_v7 = vadd.f32 %v1270_v36, %v566_v63  ;;  %v537_v8 = vmul.f32 %v943_v4, %v1265_v34  ;;  %v569_v9 = vmul.f32 %v975_v5, %v1265_v34  ;;  %v676_v58 = vld [vmem:[%s1852_s4 + $0x78] sm:$0xff] }
  0xe0   :  { %827 = vst.msk [vmem:[%s1853_s5 + $0x128] sm:$0xff] %vm789_vm1, %v762_v59  ;;  %v735_v10 = vadd.f32 %v671_v60, %v607_v0  ;;  %v767_v11 = vadd.f32 %v703_v61, %v639_v1  ;;  %v299_v14 = vpop.f32.mrf.mxu0  ;;  %v427_v15 = vpop.f32.mrf.mxu1  ;;  %v708_v59 = vld [vmem:[%s1852_s4 + $0x178] sm:$0xff]  ;;  %v674_v0 = vld [vmem:[%s1852_s4 + $0x68] sm:$0xff] }
  0xe1   :  { %v733_v16 = vadd.f32 %v669_v2, %v605_v6  ;;  %v765_v17 = vadd.f32 %v701_v3, %v637_v7  ;;  %v608_v18 = vadd.f32 %v1270_v36, %v537_v8  ;;  %v640_v19 = vadd.f32 %v1270_v36, %v569_v9  ;;  %v706_v1 = vld [vmem:[%s1852_s4 + $0x168] sm:$0xff] }
  0xe2   :  { %800 = vst.msk [vmem:[%s1853_s5 + $0x50] sm:$0xff] %vm789_vm1, %v735_v10  ;;  %832 = vst.msk [vmem:[%s1853_s5 + $0x150] sm:$0xff] %vm789_vm1, %v767_v11  ;;  %v535_v20 = vmul.f32 %v1265_v34, %v299_v14  ;;  %v567_v21 = vmul.f32 %v1265_v34, %v427_v15  ;;  %v946_v22 = vpop.f32.mrf.mxu0  ;;  %v978_v23 = vpop.f32.mrf.mxu1  ;;  %v679_v10 = vld [vmem:[%s1852_s4 + $0x90] sm:$0xff] }
  0xe3   :  { %798 = vst.msk [vmem:[%s1853_s5 + $0x40] sm:$0xff] %vm789_vm1, %v733_v16  ;;  %830 = vst.msk [vmem:[%s1853_s5 + $0x140] sm:$0xff] %vm789_vm1, %v765_v17  ;;  %v736_v24 = vadd.f32 %v672_v12, %v608_v18  ;;  %v768_v25 = vadd.f32 %v704_v13, %v640_v19  ;;  %v540_v28 = vmul.f32 %v946_v22, %v1265_v34  ;;  %v711_v11 = vld [vmem:[%s1852_s4 + $0x190] sm:$0xff] }
  0xe4   :  { %v572_v29 = vmul.f32 %v978_v23, %v1265_v34  ;;  %v606_v30 = vadd.f32 %v1270_v36, %v535_v20  ;;  %v638_v31 = vadd.f32 %v1270_v36, %v567_v21  ;;  %v312_v35 = vpop.f32.mrf.mxu0  ;;  %v440_v37 = vpop.f32.mrf.mxu1 }
  0xe5   :  { %801 = vst.msk [vmem:[%s1853_s5 + $0x58] sm:$0xff] %vm789_vm1, %v736_v24  ;;  %833 = vst.msk [vmem:[%s1853_s5 + $0x158] sm:$0xff] %vm789_vm1, %v768_v25  ;;  %v611_v38 = vadd.f32 %v1270_v36, %v540_v28  ;;  %v538_v40 = vmul.f32 %v1265_v34, %v312_v35  ;;  %v570_v41 = vmul.f32 %v1265_v34, %v440_v37  ;;  %v677_v24 = vld [vmem:[%s1852_s4 + $0x80] sm:$0xff] }
  0xe6   :  { %v643_v39 = vadd.f32 %v1270_v36, %v572_v29  ;;  %v734_v42 = vadd.f32 %v670_v26, %v606_v30  ;;  %v766_v43 = vadd.f32 %v702_v27, %v638_v31  ;;  %v947_v46 = vpop.f32.mrf.mxu0  ;;  %v979_v47 = vpop.f32.mrf.mxu1  ;;  %v709_v25 = vld [vmem:[%s1852_s4 + $0x180] sm:$0xff]  ;;  %v680_v30 = vld [vmem:[%s1852_s4 + $0x98] sm:$0xff] }
  0xe7   :  { %v739_v48 = vadd.f32 %v675_v32, %v611_v38  ;;  %v609_v50 = vadd.f32 %v1270_v36, %v538_v40  ;;  %v641_v51 = vadd.f32 %v1270_v36, %v570_v41  ;;  %v541_v52 = vmul.f32 %v947_v46, %v1265_v34  ;;  %v712_v31 = vld [vmem:[%s1852_s4 + $0x198] sm:$0xff] }
  0xe8   :  { %v771_v49 = vadd.f32 %v707_v33, %v643_v39  ;;  %799 = vst.msk [vmem:[%s1853_s5 + $0x48] sm:$0xff] %vm789_vm1, %v734_v42  ;;  %831 = vst.msk [vmem:[%s1853_s5 + $0x148] sm:$0xff] %vm789_vm1, %v766_v43  ;;  %v573_v53 = vmul.f32 %v979_v47, %v1265_v34  ;;  %v315_v54 = vpop.f32.mrf.mxu0  ;;  %v443_v55 = vpop.f32.mrf.mxu1  ;;  %v678_v42 = vld [vmem:[%s1852_s4 + $0x88] sm:$0xff] }
  0xe9   :  { %804 = vst.msk [vmem:[%s1853_s5 + $0x70] sm:$0xff] %vm789_vm1, %v739_v48  ;;  %v737_v56 = vadd.f32 %v673_v44, %v609_v50  ;;  %v769_v57 = vadd.f32 %v705_v45, %v641_v51  ;;  %v539_v60 = vmul.f32 %v1265_v34, %v315_v54  ;;  %v571_v61 = vmul.f32 %v1265_v34, %v443_v55  ;;  %v710_v43 = vld [vmem:[%s1852_s4 + $0x188] sm:$0xff] }
  0xea   :  { %836 = vst.msk [vmem:[%s1853_s5 + $0x170] sm:$0xff] %vm789_vm1, %v771_v49  ;;  %v612_v62 = vadd.f32 %v1270_v36, %v541_v52  ;;  %v644_v63 = vadd.f32 %v1270_v36, %v573_v53  ;;  %v950_v2 = vpop.f32.mrf.mxu0  ;;  %v982_v3 = vpop.f32.mrf.mxu1 }
  0xeb   :  { %802 = vst.msk [vmem:[%s1853_s5 + $0x60] sm:$0xff] %vm789_vm1, %v737_v56  ;;  %834 = vst.msk [vmem:[%s1853_s5 + $0x160] sm:$0xff] %vm789_vm1, %v769_v57  ;;  %v610_v4 = vadd.f32 %v1270_v36, %v539_v60  ;;  %v642_v5 = vadd.f32 %v1270_v36, %v571_v61  ;;  %v544_v6 = vmul.f32 %v950_v2, %v1265_v34  ;;  %v683_v56 = vld [vmem:[%s1852_s4 + $0xb0] sm:$0xff] }
  0xec   :  { %v576_v7 = vmul.f32 %v982_v3, %v1265_v34  ;;  %v740_v8 = vadd.f32 %v676_v58, %v612_v62  ;;  %v772_v9 = vadd.f32 %v708_v59, %v644_v63  ;;  %v328_v12 = vpop.f32.mrf.mxu0  ;;  %v456_v13 = vpop.f32.mrf.mxu1  ;;  %v715_v57 = vld [vmem:[%s1852_s4 + $0x1b0] sm:$0xff]  ;;  %v681_v62 = vld [vmem:[%s1852_s4 + $0xa0] sm:$0xff] }
  0xed   :  { %v738_v14 = vadd.f32 %v674_v0, %v610_v4  ;;  %v770_v15 = vadd.f32 %v706_v1, %v642_v5  ;;  %v615_v16 = vadd.f32 %v1270_v36, %v544_v6  ;;  %v542_v18 = vmul.f32 %v1265_v34, %v328_v12  ;;  %v713_v63 = vld [vmem:[%s1852_s4 + $0x1a0] sm:$0xff] }
  0xee   :  { %v647_v17 = vadd.f32 %v1270_v36, %v576_v7  ;;  %805 = vst.msk [vmem:[%s1853_s5 + $0x78] sm:$0xff] %vm789_vm1, %v740_v8  ;;  %837 = vst.msk [vmem:[%s1853_s5 + $0x178] sm:$0xff] %vm789_vm1, %v772_v9  ;;  %v574_v19 = vmul.f32 %v1265_v34, %v456_v13  ;;  %v951_v20 = vpop.f32.mrf.mxu0  ;;  %v983_v21 = vpop.f32.mrf.mxu1  ;;  %v684_v8 = vld [vmem:[%s1852_s4 + $0xb8] sm:$0xff] }
  0xef   :  { %803 = vst.msk [vmem:[%s1853_s5 + $0x68] sm:$0xff] %vm789_vm1, %v738_v14  ;;  %835 = vst.msk [vmem:[%s1853_s5 + $0x168] sm:$0xff] %vm789_vm1, %v770_v15  ;;  %v743_v22 = vadd.f32 %v679_v10, %v615_v16  ;;  %v545_v26 = vmul.f32 %v951_v20, %v1265_v34  ;;  %v577_v27 = vmul.f32 %v983_v21, %v1265_v34  ;;  %v716_v9 = vld [vmem:[%s1852_s4 + $0x1b8] sm:$0xff] }
  0xf0   :  { %v775_v23 = vadd.f32 %v711_v11, %v647_v17  ;;  %v613_v28 = vadd.f32 %v1270_v36, %v542_v18  ;;  %v645_v29 = vadd.f32 %v1270_v36, %v574_v19  ;;  %v331_v32 = vpop.f32.mrf.mxu0  ;;  %v459_v33 = vpop.f32.mrf.mxu1 }
  0xf1   :  { %808 = vst.msk [vmem:[%s1853_s5 + $0x90] sm:$0xff] %vm789_vm1, %v743_v22  ;;  %v616_v35 = vadd.f32 %v1270_v36, %v545_v26  ;;  %v648_v37 = vadd.f32 %v1270_v36, %v577_v27  ;;  %v543_v38 = vmul.f32 %v1265_v34, %v331_v32  ;;  %v575_v39 = vmul.f32 %v1265_v34, %v459_v33  ;;  %v682_v22 = vld [vmem:[%s1852_s4 + $0xa8] sm:$0xff] }
  0xf2   :  { %840 = vst.msk [vmem:[%s1853_s5 + $0x190] sm:$0xff] %vm789_vm1, %v775_v23  ;;  %v741_v40 = vadd.f32 %v677_v24, %v613_v28  ;;  %v773_v41 = vadd.f32 %v709_v25, %v645_v29  ;;  %v954_v44 = vpop.f32.mrf.mxu0  ;;  %v986_v45 = vpop.f32.mrf.mxu1  ;;  %v714_v23 = vld [vmem:[%s1852_s4 + $0x1a8] sm:$0xff]  ;;  %v687_v28 = vld [vmem:[%s1852_s4 + $0xd0] sm:$0xff] }
  0xf3   :  { %v744_v46 = vadd.f32 %v680_v30, %v616_v35  ;;  %v776_v47 = vadd.f32 %v712_v31, %v648_v37  ;;  %v614_v48 = vadd.f32 %v1270_v36, %v543_v38  ;;  %v646_v49 = vadd.f32 %v1270_v36, %v575_v39  ;;  %v719_v29 = vld [vmem:[%s1852_s4 + $0x1d0] sm:$0xff] }
  0xf4   :  { %806 = vst.msk [vmem:[%s1853_s5 + $0x80] sm:$0xff] %vm789_vm1, %v741_v40  ;;  %838 = vst.msk [vmem:[%s1853_s5 + $0x180] sm:$0xff] %vm789_vm1, %v773_v41  ;;  %v548_v50 = vmul.f32 %v954_v44, %v1265_v34  ;;  %v580_v51 = vmul.f32 %v986_v45, %v1265_v34  ;;  %v344_v52 = vpop.f32.mrf.mxu0  ;;  %v472_v53 = vpop.f32.mrf.mxu1  ;;  %v685_v40 = vld [vmem:[%s1852_s4 + $0xc0] sm:$0xff] }
  0xf5   :  { %809 = vst.msk [vmem:[%s1853_s5 + $0x98] sm:$0xff] %vm789_vm1, %v744_v46  ;;  %841 = vst.msk [vmem:[%s1853_s5 + $0x198] sm:$0xff] %vm789_vm1, %v776_v47  ;;  %v742_v54 = vadd.f32 %v678_v42, %v614_v48  ;;  %v774_v55 = vadd.f32 %v710_v43, %v646_v49  ;;  %v546_v58 = vmul.f32 %v1265_v34, %v344_v52  ;;  %v717_v41 = vld [vmem:[%s1852_s4 + $0x1c0] sm:$0xff] }
  0xf6   :  { %v578_v59 = vmul.f32 %v1265_v34, %v472_v53  ;;  %v619_v60 = vadd.f32 %v1270_v36, %v548_v50  ;;  %v651_v61 = vadd.f32 %v1270_v36, %v580_v51  ;;  %v955_v0 = vpop.f32.mrf.mxu0  ;;  %v987_v1 = vpop.f32.mrf.mxu1 }
  0xf7   :  { %807 = vst.msk [vmem:[%s1853_s5 + $0x88] sm:$0xff] %vm789_vm1, %v742_v54  ;;  %839 = vst.msk [vmem:[%s1853_s5 + $0x188] sm:$0xff] %vm789_vm1, %v774_v55  ;;  %v617_v2 = vadd.f32 %v1270_v36, %v546_v58  ;;  %v549_v4 = vmul.f32 %v955_v0, %v1265_v34  ;;  %v581_v5 = vmul.f32 %v987_v1, %v1265_v34  ;;  %v688_v54 = vld [vmem:[%s1852_s4 + $0xd8] sm:$0xff] }
  0xf8   :  { %v649_v3 = vadd.f32 %v1270_v36, %v578_v59  ;;  %v747_v6 = vadd.f32 %v683_v56, %v619_v60  ;;  %v779_v7 = vadd.f32 %v715_v57, %v651_v61  ;;  %v347_v10 = vpop.f32.mrf.mxu0  ;;  %v475_v11 = vpop.f32.mrf.mxu1  ;;  %v720_v55 = vld [vmem:[%s1852_s4 + $0x1d8] sm:$0xff]  ;;  %v686_v60 = vld [vmem:[%s1852_s4 + $0xc8] sm:$0xff] }
  0xf9   :  { %v745_v12 = vadd.f32 %v681_v62, %v617_v2  ;;  %v620_v14 = vadd.f32 %v1270_v36, %v549_v4  ;;  %v652_v15 = vadd.f32 %v1270_v36, %v581_v5  ;;  %v547_v16 = vmul.f32 %v1265_v34, %v347_v10  ;;  %v718_v61 = vld [vmem:[%s1852_s4 + $0x1c8] sm:$0xff] }
  0xfa   :  { %v777_v13 = vadd.f32 %v713_v63, %v649_v3  ;;  %812 = vst.msk [vmem:[%s1853_s5 + $0xb0] sm:$0xff] %vm789_vm1, %v747_v6  ;;  %844 = vst.msk [vmem:[%s1853_s5 + $0x1b0] sm:$0xff] %vm789_vm1, %v779_v7  ;;  %v579_v17 = vmul.f32 %v1265_v34, %v475_v11  ;;  %v958_v18 = vpop.f32.mrf.mxu0  ;;  %v990_v19 = vpop.f32.mrf.mxu1  ;;  %v691_v6 = vld [vmem:[%s1852_s4 + $0xf0] sm:$0xff] }
  0xfb   :  { %810 = vst.msk [vmem:[%s1853_s5 + $0xa0] sm:$0xff] %vm789_vm1, %v745_v12  ;;  %v748_v20 = vadd.f32 %v684_v8, %v620_v14  ;;  %v780_v21 = vadd.f32 %v716_v9, %v652_v15  ;;  %v552_v24 = vmul.f32 %v958_v18, %v1265_v34  ;;  %v584_v25 = vmul.f32 %v990_v19, %v1265_v34  ;;  %v723_v7 = vld [vmem:[%s1852_s4 + $0x1f0] sm:$0xff] }
  0xfc   :  { %842 = vst.msk [vmem:[%s1853_s5 + $0x1a0] sm:$0xff] %vm789_vm1, %v777_v13  ;;  %v618_v26 = vadd.f32 %v1270_v36, %v547_v16  ;;  %v650_v27 = vadd.f32 %v1270_v36, %v579_v17  ;;  %v360_v30 = vpop.f32.mrf.mxu0  ;;  %v488_v31 = vpop.f32.mrf.mxu1 }
  0xfd   :  { %813 = vst.msk [vmem:[%s1853_s5 + $0xb8] sm:$0xff] %vm789_vm1, %v748_v20  ;;  %845 = vst.msk [vmem:[%s1853_s5 + $0x1b8] sm:$0xff] %vm789_vm1, %v780_v21  ;;  %v623_v32 = vadd.f32 %v1270_v36, %v552_v24  ;;  %v655_v33 = vadd.f32 %v1270_v36, %v584_v25  ;;  %v550_v35 = vmul.f32 %v1265_v34, %v360_v30  ;;  %v689_v20 = vld [vmem:[%s1852_s4 + $0xe0] sm:$0xff] }
  0xfe   :  { %v582_v37 = vmul.f32 %v1265_v34, %v488_v31  ;;  %v746_v38 = vadd.f32 %v682_v22, %v618_v26  ;;  %v778_v39 = vadd.f32 %v714_v23, %v650_v27  ;;  %v959_v42 = vpop.f32.mrf.mxu0  ;;  %v991_v43 = vpop.f32.mrf.mxu1  ;;  %v721_v21 = vld [vmem:[%s1852_s4 + $0x1e0] sm:$0xff]  ;;  %v692_v26 = vld [vmem:[%s1852_s4 + $0xf8] sm:$0xff] }
  0xff   :  { %v751_v44 = vadd.f32 %v687_v28, %v623_v32  ;;  %v783_v45 = vadd.f32 %v719_v29, %v655_v33  ;;  %v621_v46 = vadd.f32 %v1270_v36, %v550_v35  ;;  %v553_v48 = vmul.f32 %v959_v42, %v1265_v34  ;;  %v724_v27 = vld [vmem:[%s1852_s4 + $0x1f8] sm:$0xff] }
 0x100   :  { %v653_v47 = vadd.f32 %v1270_v36, %v582_v37  ;;  %811 = vst.msk [vmem:[%s1853_s5 + $0xa8] sm:$0xff] %vm789_vm1, %v746_v38  ;;  %843 = vst.msk [vmem:[%s1853_s5 + $0x1a8] sm:$0xff] %vm789_vm1, %v778_v39  ;;  %v585_v49 = vmul.f32 %v991_v43, %v1265_v34  ;;  %v363_v50 = vpop.f32.mrf.mxu0  ;;  %v491_v51 = vpop.f32.mrf.mxu1  ;;  %v690_v38 = vld [vmem:[%s1852_s4 + $0xe8] sm:$0xff] }
 0x101   :  { %816 = vst.msk [vmem:[%s1853_s5 + $0xd0] sm:$0xff] %vm789_vm1, %v751_v44  ;;  %848 = vst.msk [vmem:[%s1853_s5 + $0x1d0] sm:$0xff] %vm789_vm1, %v783_v45  ;;  %v749_v52 = vadd.f32 %v685_v40, %v621_v46  ;;  %v551_v56 = vmul.f32 %v1265_v34, %v363_v50  ;;  %v583_v57 = vmul.f32 %v1265_v34, %v491_v51  ;;  %v722_v39 = vld [vmem:[%s1852_s4 + $0x1e8] sm:$0xff] }
 0x102   :  { %v781_v53 = vadd.f32 %v717_v41, %v653_v47  ;;  %v624_v58 = vadd.f32 %v1270_v36, %v553_v48  ;;  %v656_v59 = vadd.f32 %v1270_v36, %v585_v49  ;;  %v962_v62 = vpop.f32.mrf.mxu0  ;;  %v994_v63 = vpop.f32.mrf.mxu1 }
 0x103   :  { %814 = vst.msk [vmem:[%s1853_s5 + $0xc0] sm:$0xff] %vm789_vm1, %v749_v52  ;;  %v622_v0 = vadd.f32 %v1270_v36, %v551_v56  ;;  %v654_v1 = vadd.f32 %v1270_v36, %v583_v57  ;;  %v556_v2 = vmul.f32 %v962_v62, %v1265_v34  ;;  %v588_v3 = vmul.f32 %v994_v63, %v1265_v34 }
 0x104   :  { %846 = vst.msk [vmem:[%s1853_s5 + $0x1c0] sm:$0xff] %vm789_vm1, %v781_v53  ;;  %v752_v4 = vadd.f32 %v688_v54, %v624_v58  ;;  %v784_v5 = vadd.f32 %v720_v55, %v656_v59  ;;  %v376_v8 = vpop.f32.mrf.mxu0  ;;  %v504_v9 = vpop.f32.mrf.mxu1 }
 0x105   :  { %v750_v10 = vadd.f32 %v686_v60, %v622_v0  ;;  %v782_v11 = vadd.f32 %v718_v61, %v654_v1  ;;  %v627_v12 = vadd.f32 %v1270_v36, %v556_v2  ;;  %v659_v13 = vadd.f32 %v1270_v36, %v588_v3 }
 0x106   :  { %817 = vst.msk [vmem:[%s1853_s5 + $0xd8] sm:$0xff] %vm789_vm1, %v752_v4  ;;  %849 = vst.msk [vmem:[%s1853_s5 + $0x1d8] sm:$0xff] %vm789_vm1, %v784_v5  ;;  %v554_v14 = vmul.f32 %v1265_v34, %v376_v8  ;;  %v586_v15 = vmul.f32 %v1265_v34, %v504_v9  ;;  %v963_v16 = vpop.f32.mrf.mxu0  ;;  %v995_v17 = vpop.f32.mrf.mxu1 }
 0x107   :  { %815 = vst.msk [vmem:[%s1853_s5 + $0xc8] sm:$0xff] %vm789_vm1, %v750_v10  ;;  %847 = vst.msk [vmem:[%s1853_s5 + $0x1c8] sm:$0xff] %vm789_vm1, %v782_v11  ;;  %v755_v18 = vadd.f32 %v691_v6, %v627_v12  ;;  %v787_v19 = vadd.f32 %v723_v7, %v659_v13  ;;  %v557_v22 = vmul.f32 %v963_v16, %v1265_v34 }
 0x108   :  { %v589_v23 = vmul.f32 %v995_v17, %v1265_v34  ;;  %v625_v24 = vadd.f32 %v1270_v36, %v554_v14  ;;  %v657_v25 = vadd.f32 %v1270_v36, %v586_v15  ;;  %v379_v28 = vpop.f32.mrf.mxu0  ;;  %v507_v29 = vpop.f32.mrf.mxu1 }
 0x109   :  { %820 = vst.msk [vmem:[%s1853_s5 + $0xf0] sm:$0xff] %vm789_vm1, %v755_v18  ;;  %852 = vst.msk [vmem:[%s1853_s5 + $0x1f0] sm:$0xff] %vm789_vm1, %v787_v19  ;;  %v628_v30 = vadd.f32 %v1270_v36, %v557_v22  ;;  %v555_v32 = vmul.f32 %v1265_v34, %v379_v28  ;;  %v587_v33 = vmul.f32 %v1265_v34, %v507_v29 }
 0x10a   :  { %v660_v31 = vadd.f32 %v1270_v36, %v589_v23  ;;  %v753_v35 = vadd.f32 %v689_v20, %v625_v24  ;;  %v785_v37 = vadd.f32 %v721_v21, %v657_v25 }
 0x10b   :  { %v756_v40 = vadd.f32 %v692_v26, %v628_v30  ;;  %v626_v42 = vadd.f32 %v1270_v36, %v555_v32  ;;  %v658_v43 = vadd.f32 %v1270_v36, %v587_v33 }
 0x10c   :  { %v788_v41 = vadd.f32 %v724_v27, %v660_v31  ;;  %818 = vst.msk [vmem:[%s1853_s5 + $0xe0] sm:$0xff] %vm789_vm1, %v753_v35  ;;  %850 = vst.msk [vmem:[%s1853_s5 + $0x1e0] sm:$0xff] %vm789_vm1, %v785_v37 }
 0x10d   :  { %821 = vst.msk [vmem:[%s1853_s5 + $0xf8] sm:$0xff] %vm789_vm1, %v756_v40  ;;  %v754_v34 = vadd.f32 %v690_v38, %v626_v42  ;;  %v786_v36 = vadd.f32 %v722_v39, %v658_v43 }
 0x10e   :  { %853 = vst.msk [vmem:[%s1853_s5 + $0x1f8] sm:$0xff] %vm789_vm1, %v788_v41 }
 0x10f   :  { %819 = vst.msk [vmem:[%s1853_s5 + $0xe8] sm:$0xff] %vm789_vm1, %v754_v34  ;;  %851 = vst.msk [vmem:[%s1853_s5 + $0x1e8] sm:$0xff] %vm789_vm1, %v786_v36 }

// kernel: replk_stage_forward.11
= control target key start
LH: loop header
LB: loop body
LE: loop exit
PB: predicated region body
PF: predicated region fallthrough
CT: control target
= control target key end

     0   :  { %s5633_s12 = smov 0   ;;  %s5635_s13 = smov 0   ;;  %s9744_s0 = inlined_call_operand.vmem [shape: f32[2,16,16,8], index: 0, kind: input, shape index: {}]   ;;  %s9745_s1 = inlined_call_operand.vmem [shape: f32[7,7,8], index: 1, kind: input, shape index: {}]   ;;  %s9746_s2 = inlined_call_operand.vmem [shape: f32[1,1,8], index: 2, kind: input, shape index: {}]   ;;  %s9747_s3 = inlined_call_operand.vmem [shape: f32[2,16,16,8], index: 3, kind: output, shape index: {}]  }
   0x1   :  { %s5637_s14 = smov 0  }
   0x2 LB: > { %s25_s15 = sadd.s32 1, %s5606_s13  ;;  %p5520_p0 = scmp.ge.s32.totalorder %s5610_s14, 1  ;;  %s5610_s14 = sphi %s5637_s14, %s13_s14   ;;  %s5606_s13 = sphi %s5635_s13, %s10307_s13   ;;  %s5602_s12 = sphi %s5633_s12, %s10306_s12  }
   0x3   : > { %p27_p1 = scmp.ge.s32.totalorder %s25_s15, 2  ;;  %p173_p2 = scmp.lt.s32.totalorder %s5610_s14, 3 }
   0x5   : > { %s10309_s15 = smov (%p27_p1, %s25_s15), 0  ;;  %p174_p3 = pnand %p5520_p0, %p173_p2 }
   0x7   : > { %177 = sbr.rel (%p174_p3) target bundleno = 875 (0x36b), region = 32 }
   0xc   : > { %vm233_vm0 = vcmask 64512   ;;  %v427_v0 = vlaneseq  ;;  %v5612_v1 = vmov 0.0   ;;  %vm237_vm1 = vcmask 59392   ;;  %p210_p4 = scmp.lt.s32.totalorder %s5602_s12, 1  ;;  %v388_v3 = vld [vmem:[%s9745_s1] sm:$0x7f] }
   0xd   : > { %234 = vst.msk [vmem:[#allocation2] sm:$0xff] %vm233_vm0, %v5612_v1  ;;  %235 = vst.msk [vmem:[#allocation2 + $0x8] sm:$0xff] %vm233_vm0, %v5612_v1  ;;  %v5890_v25 = vld [vmem:[%s9745_s1 + $0x8] sm:$0x7f] }
   0xe   : > { %236 = vst.msk [vmem:[#allocation2 + $0x10] sm:$0xff] %vm233_vm0, %v5612_v1  ;;  %239 = vst.msk [vmem:[#allocation2 + $0x20] sm:$0xff] %vm233_vm0, %v5612_v1  ;;  %v428_v2 = vshrl.u32 %v427_v0, 7  ;;  %s10311_s12 = smov (!%p210_p4, %s5602_s12), 1 }
   0xf   : > { %240 = vst.msk [vmem:[#allocation2 + $0x28] sm:$0xff] %vm233_vm0, %v5612_v1  ;;  %241 = vst.msk [vmem:[#allocation2 + $0x30] sm:$0xff] %vm233_vm0, %v5612_v1  ;;  %s5528_s18 = sshll.u32 %s10311_s12, 8 }
  0x10   : > { %243 = vst.msk [vmem:[#allocation2 + $0x40] sm:$0xff] %vm233_vm0, %v5612_v1  ;;  %244 = vst.msk [vmem:[#allocation2 + $0x48] sm:$0xff] %vm233_vm0, %v5612_v1  ;;  %v5839_v4 = vsub.s32 0, %v428_v2  ;;  %v5841_v5 = vsub.s32 1, %v428_v2  ;;  %v5843_v6 = vsub.s32 2, %v428_v2  ;;  %s5854_s21 = scalar_lea.vmem %s9744_s0, %s5528_s18  ;;  %v5864_v14 = vsub.s32 3, %v428_v2  ;;  %s9168_s17 = scalar_lea.vmem %s9747_s3, %s5528_s18 }
  0x11   : > { %245 = vst.msk [vmem:[#allocation2 + $0x50] sm:$0xff] %vm233_vm0, %v5612_v1  ;;  %247 = vst.msk [vmem:[#allocation2 + $0x60] sm:$0xff] %vm233_vm0, %v5612_v1  ;;  %v323_v9 = vld [vmem:[%s5854_s21] sm:$0xff]  ;;  %v324_v10 = vld [vmem:[%s5854_s21 + $0x8] sm:$0xff]  ;;  %v5866_v15 = vsub.s32 4, %v428_v2  ;;  %v5868_v16 = vsub.s32 5, %v428_v2 }
  0x12   : > { %248 = vst.msk [vmem:[#allocation2 + $0x68] sm:$0xff] %vm233_vm0, %v5612_v1  ;;  %249 = vst.msk [vmem:[#allocation2 + $0x70] sm:$0xff] %vm233_vm0, %v5612_v1  ;;  %v5847_v7 = vrot.slane %v388_v3, %v5839_v4  ;;  %v5857_v8 = vrot.slane %v388_v3, %v5841_v5  ;;  %v325_v11 = vld [vmem:[%s5854_s21 + $0x10] sm:$0xff]  ;;  %v5879_v20 = vrot.slane %v388_v3, %v5843_v6  ;;  %v5881_v21 = vsub.s32 6, %v428_v2 }
  0x13   : > { %251 = vst.msk [vmem:[#allocation2 + $0x80] sm:$0xff] %vm233_vm0, %v5612_v1  ;;  %252 = vst.msk [vmem:[#allocation2 + $0x88] sm:$0xff] %vm233_vm0, %v5612_v1  ;;  %v5902_v34 = vrot.slane %v388_v3, %v5864_v14  ;;  %v5905_v35 = vrot.slane %v388_v3, %v5866_v15  ;;  %v5908_v36 = vrot.slane %v388_v3, %v5868_v16 }
  0x14   : > { %253 = vst.msk [vmem:[#allocation2 + $0x90] sm:$0xff] %vm233_vm0, %v5612_v1  ;;  %255 = vst.msk [vmem:[#allocation2 + $0xa0] sm:$0xff] %vm233_vm0, %v5612_v1  ;;  %v395_v12 = vld [vmem:[#allocation2 + $0x5] sm:$0xff]  ;;  %v5918_v43 = vrot.slane %v388_v3, %v5881_v21  ;;  %v5928_v50 = vrot.slane %v5890_v25, %v5839_v4  ;;  %v5940_v55 = vrot.slane %v5890_v25, %v5841_v5 }
  0x15   : > { %256 = vst.msk [vmem:[#allocation2 + $0xa8] sm:$0xff] %vm233_vm0, %v5612_v1  ;;  %257 = vst.msk [vmem:[#allocation2 + $0xb0] sm:$0xff] %vm233_vm0, %v5612_v1  ;;  %v431_v18 = vmul.f32 %v5847_v7, %v395_v12  ;;  %v495_v23 = vld [vmem:[#allocation2 + $0x6] sm:$0xff]  ;;  %v496_v27 = vld [vmem:[#allocation2 + $0xe] sm:$0xff]  ;;  %v5944_v56 = vrot.slane %v5890_v25, %v5843_v6 }
  0x16   : > { %259 = vst.msk [vmem:[#allocation2 + $0xc0] sm:$0xff] %vm233_vm0, %v5612_v1  ;;  %260 = vst.msk [vmem:[#allocation2 + $0xc8] sm:$0xff] %vm233_vm0, %v5612_v1  ;;  %v5862_v13 = vld [vmem:[#allocation2 + $0x25] sm:$0xff]  ;;  %v396_v26 = vld [vmem:[#allocation2 + $0xd] sm:$0xff]  ;;  %v531_v29 = vmul.f32 %v5857_v8, %v495_v23  ;;  %v532_v47 = vmul.f32 %v5857_v8, %v496_v27 }
  0x17   : > { %261 = vst.msk [vmem:[#allocation2 + $0xd0] sm:$0xff] %vm233_vm0, %v5612_v1  ;;  %263 = vst.msk [vmem:[#allocation2 + $0xe0] sm:$0xff] %vm233_vm0, %v5612_v1  ;;  %v5873_v17 = vld [vmem:[#allocation2 + $0x45] sm:$0xff]  ;;  %v433_v19 = vmul.f32 %v5847_v7, %v5862_v13  ;;  %v5910_v37 = vld [vmem:[#allocation2 + $0x2d] sm:$0xff]  ;;  %v432_v45 = vmul.f32 %v5847_v7, %v396_v26 }
  0x18   : > { %264 = vst.msk [vmem:[#allocation2 + $0xe8] sm:$0xff] %vm233_vm0, %v5612_v1  ;;  %265 = vst.msk [vmem:[#allocation2 + $0xf0] sm:$0xff] %vm233_vm0, %v5612_v1  ;;  %v435_v22 = vmul.f32 %v5847_v7, %v5873_v17  ;;  %v5885_v24 = vld [vmem:[#allocation2 + $0x26] sm:$0xff]  ;;  %v5912_v38 = vld [vmem:[#allocation2 + $0x2e] sm:$0xff]  ;;  %v563_v39 = vadd.f32 %v531_v29, %v431_v18  ;;  %v434_v57 = vmul.f32 %v5847_v7, %v5910_v37 }
  0x19   : > { %267 = vst.msk [vmem:[#allocation2 + $0x100] sm:$0xff] %vm233_vm0, %v5612_v1  ;;  %268 = vst.msk [vmem:[#allocation2 + $0x108] sm:$0xff] %vm233_vm0, %v5612_v1  ;;  %v5892_v28 = vld [vmem:[#allocation2 + $0x46] sm:$0xff]  ;;  %v533_v30 = vmul.f32 %v5857_v8, %v5885_v24  ;;  %v5923_v46 = vld [vmem:[#allocation2 + $0x4e] sm:$0xff]  ;;  %v534_v58 = vmul.f32 %v5857_v8, %v5912_v38 }
  0x1a   : > { %269 = vst.msk [vmem:[#allocation2 + $0x110] sm:$0xff] %vm233_vm0, %v5612_v1  ;;  %271 = vst.msk [vmem:[#allocation2 + $0x120] sm:$0xff] %vm233_vm0, %v5612_v1  ;;  %v535_v31 = vmul.f32 %v5857_v8, %v5892_v28  ;;  %v595_v32 = vld [vmem:[#allocation2 + $0x7] sm:$0xff]  ;;  %v596_v59 = vld [vmem:[#allocation2 + $0xf] sm:$0xff] }
  0x1b   : > { %272 = vst.msk [vmem:[#allocation2 + $0x128] sm:$0xff] %vm233_vm0, %v5612_v1  ;;  %273 = vst.msk [vmem:[#allocation2 + $0x130] sm:$0xff] %vm233_vm0, %v5612_v1  ;;  %v5899_v33 = vld [vmem:[#allocation2 + $0x27] sm:$0xff]  ;;  %v565_v40 = vadd.f32 %v533_v30, %v433_v19  ;;  %v631_v42 = vmul.f32 %v5879_v20, %v595_v32  ;;  %v5957_v2 = vld [vmem:[#allocation2 + $0x2f] sm:$0xff]  ;;  %v632_v23 = vmul.f32 %v5879_v20, %v596_v59 }
  0x1c   : > { %275 = vst.msk [vmem:[#allocation2 + $0x140] sm:$0xff] %vm233_vm0, %v5612_v1  ;;  %276 = vst.msk [vmem:[#allocation2 + $0x148] sm:$0xff] %vm233_vm0, %v5612_v1  ;;  %v5914_v41 = vld [vmem:[#allocation2 + $0x47] sm:$0xff]  ;;  %v567_v48 = vadd.f32 %v535_v31, %v435_v22  ;;  %v633_v51 = vmul.f32 %v5879_v20, %v5899_v33  ;;  %v566_v32 = vadd.f32 %v534_v58, %v434_v57  ;;  %v5988_v58 = vld [vmem:[#allocation2 + $0x50] sm:$0xff] }
  0x1d   : > { %277 = vst.msk [vmem:[#allocation2 + $0x150] sm:$0xff] %vm233_vm0, %v5612_v1  ;;  %279 = vst.msk [vmem:[#allocation2 + $0x160] sm:$0xff] %vm233_vm0, %v5612_v1  ;;  %v5920_v44 = vld [vmem:[#allocation2 + $0x4d] sm:$0xff]  ;;  %v635_v52 = vmul.f32 %v5879_v20, %v5914_v41  ;;  %v663_v60 = vadd.f32 %v631_v42, %v563_v39  ;;  %v634_v39 = vmul.f32 %v5879_v20, %v5957_v2 }
  0x1e   : > { %280 = vst.msk [vmem:[#allocation2 + $0x168] sm:$0xff] %vm233_vm0, %v5612_v1  ;;  %281 = vst.msk [vmem:[#allocation2 + $0x170] sm:$0xff] %vm233_vm0, %v5612_v1  ;;  %v695_v49 = vld [vmem:[#allocation2 + $0x8] sm:$0xff]  ;;  %v436_v0 = vmul.f32 %v5847_v7, %v5920_v44  ;;  %v665_v3 = vadd.f32 %v633_v51, %v565_v40  ;;  %v696_v40 = vld [vmem:[#allocation2 + $0x10] sm:$0xff] }
  0x1f   : > { %283 = vst.msk [vmem:[#allocation2 + $0x180] sm:$0xff] %vm233_vm0, %v5612_v1  ;;  %284 = vst.msk [vmem:[#allocation2 + $0x188] sm:$0xff] %vm233_vm0, %v5612_v1  ;;  %v5934_v53 = vld [vmem:[#allocation2 + $0x28] sm:$0xff]  ;;  %v731_v61 = vmul.f32 %v5902_v34, %v695_v49  ;;  %v667_v12 = vadd.f32 %v635_v52, %v567_v48  ;;  %v698_v51 = vld [vmem:[#allocation2 + $0x30] sm:$0xff] }
  0x20   : > { %285 = vst.msk [vmem:[#allocation2 + $0x190] sm:$0xff] %vm233_vm0, %v5612_v1  ;;  %287 = vst.msk [vmem:[#allocation2 + $0x1a0] sm:$0xff] %vm233_vm0, %v5612_v1  ;;  %v5936_v54 = vld [vmem:[#allocation2 + $0x48] sm:$0xff]  ;;  %v733_v18 = vmul.f32 %v5902_v34, %v5934_v53 }
  0x21   : > { %288 = vst.msk [vmem:[#allocation2 + $0x1a8] sm:$0xff] %vm233_vm0, %v5612_v1  ;;  %289 = vst.msk [vmem:[#allocation2 + $0x1b0] sm:$0xff] %vm233_vm0, %v5612_v1  ;;  %v795_v62 = vld [vmem:[#allocation2 + $0x9] sm:$0xff]  ;;  %v735_v19 = vmul.f32 %v5902_v34, %v5936_v54  ;;  %v763_v26 = vadd.f32 %v731_v61, %v663_v60 }
  0x22   : > { %291 = vst.msk [vmem:[#allocation2 + $0x1c0] sm:$0xff] %vm233_vm0, %v5612_v1  ;;  %292 = vst.msk [vmem:[#allocation2 + $0x1c8] sm:$0xff] %vm233_vm0, %v5612_v1  ;;  %v5951_v63 = vld [vmem:[#allocation2 + $0x29] sm:$0xff]  ;;  %v831_v30 = vmul.f32 %v5905_v35, %v795_v62  ;;  %v765_v42 = vadd.f32 %v733_v18, %v665_v3 }
  0x23   : > { %293 = vst.msk [vmem:[#allocation2 + $0x1d0] sm:$0xff] %vm233_vm0, %v5612_v1  ;;  %295 = vst.msk [vmem:[#allocation2 + $0x1e0] sm:$0xff] %vm233_vm0, %v5612_v1  ;;  %v895_v22 = vld [vmem:[#allocation2 + $0xa] sm:$0xff]  ;;  %v833_v31 = vmul.f32 %v5905_v35, %v5951_v63  ;;  %v767_v60 = vadd.f32 %v735_v19, %v667_v12 }
  0x24   : > { %296 = vst.msk [vmem:[#allocation2 + $0x1e8] sm:$0xff] %vm233_vm0, %v5612_v1  ;;  %297 = vst.msk [vmem:[#allocation2 + $0x1f0] sm:$0xff] %vm233_vm0, %v5612_v1  ;;  %v5970_v27 = vld [vmem:[#allocation2 + $0x49] sm:$0xff]  ;;  %v863_v59 = vadd.f32 %v831_v30, %v763_v26  ;;  %v931_v57 = vmul.f32 %v5908_v36, %v895_v22  ;;  %v734_v26 = vmul.f32 %v5902_v34, %v698_v51 }
  0x25   : > { %299 = vst.msk [vmem:[#allocation2 + $0x200] sm:$0xff] %vm233_vm0, %v5612_v1  ;;  %300 = vst.msk [vmem:[#allocation2 + $0x208] sm:$0xff] %vm233_vm0, %v5612_v1  ;;  %v5972_v29 = vld [vmem:[#allocation2 + $0x2a] sm:$0xff]  ;;  %v835_v61 = vmul.f32 %v5905_v35, %v5970_v27  ;;  %v865_v62 = vadd.f32 %v833_v31, %v765_v42  ;;  %v736_v30 = vmul.f32 %v5902_v34, %v5988_v58 }
  0x26   : > { %301 = vst.msk [vmem:[#allocation2 + $0x210] sm:$0xff] %vm233_vm0, %v5612_v1  ;;  %303 = vst.msk [vmem:[#allocation2 + $0x220] sm:$0xff] %vm233_vm0, %v5612_v1  ;;  %v5985_v52 = vld [vmem:[#allocation2 + $0x2b] sm:$0xff]  ;;  %v933_v3 = vmul.f32 %v5908_v36, %v5972_v29  ;;  %v963_v18 = vadd.f32 %v931_v57, %v863_v59 }
  0x27   : > { %304 = vst.msk [vmem:[#allocation2 + $0x228] sm:$0xff] %vm233_vm0, %v5612_v1  ;;  %305 = vst.msk [vmem:[#allocation2 + $0x230] sm:$0xff] %vm233_vm0, %v5612_v1  ;;  %v1033_v12 = vmul.f32 %v5918_v43, %v5985_v52  ;;  %v6001_v31 = vld [vmem:[#allocation2 + $0x4a] sm:$0xff] }
  0x28   : > { %307 = vst.msk [vmem:[#allocation2 + $0x240] sm:$0xff] %vm233_vm0, %v5612_v1  ;;  %308 = vst.msk [vmem:[#allocation2 + $0x248] sm:$0xff] %vm233_vm0, %v5612_v1  ;;  %v965_v22 = vadd.f32 %v933_v3, %v865_v62  ;;  %v935_v57 = vmul.f32 %v5908_v36, %v6001_v31 }
  0x29   : > { %309 = vst.msk [vmem:[#allocation2 + $0x250] sm:$0xff] %vm233_vm0, %v5612_v1  ;;  %311 = vst.msk [vmem:[#allocation2 + $0x260] sm:$0xff] %vm233_vm0, %v5612_v1 }
  0x2a   : > { %312 = vst.msk [vmem:[#allocation2 + $0x268] sm:$0xff] %vm233_vm0, %v5612_v1  ;;  %313 = vst.msk [vmem:[#allocation2 + $0x270] sm:$0xff] %vm233_vm0, %v5612_v1 }
  0x2b   : > { %315 = vst.msk [vmem:[#allocation2 + $0x280] sm:$0xff] %vm233_vm0, %v5612_v1  ;;  %316 = vst.msk [vmem:[#allocation2 + $0x288] sm:$0xff] %vm233_vm0, %v5612_v1 }
  0x2c   : > { %317 = vst.msk [vmem:[#allocation2 + $0x290] sm:$0xff] %vm233_vm0, %v5612_v1  ;;  %319 = vst.msk [vmem:[#allocation2 + $0x2a0] sm:$0xff] %vm233_vm0, %v5612_v1 }
  0x2d   : > { %320 = vst.msk [vmem:[#allocation2 + $0x2a8] sm:$0xff] %vm233_vm0, %v5612_v1  ;;  %321 = vst.msk [vmem:[#allocation2 + $0x2b0] sm:$0xff] %vm233_vm0, %v5612_v1 }
  0x2e   : > { %238 = vst.msk [vmem:[#allocation2 + $0x18] sm:$0x7] %vm237_vm1, %v5612_v1  ;;  %242 = vst.msk [vmem:[#allocation2 + $0x38] sm:$0x7] %vm237_vm1, %v5612_v1 }
  0x2f   : > { %246 = vst.msk [vmem:[#allocation2 + $0x58] sm:$0x7] %vm237_vm1, %v5612_v1  ;;  %250 = vst.msk [vmem:[#allocation2 + $0x78] sm:$0x7] %vm237_vm1, %v5612_v1 }
  0x30   : > { %254 = vst.msk [vmem:[#allocation2 + $0x98] sm:$0x7] %vm237_vm1, %v5612_v1  ;;  %258 = vst.msk [vmem:[#allocation2 + $0xb8] sm:$0x7] %vm237_vm1, %v5612_v1 }
  0x31   : > { %262 = vst.msk [vmem:[#allocation2 + $0xd8] sm:$0x7] %vm237_vm1, %v5612_v1  ;;  %266 = vst.msk [vmem:[#allocation2 + $0xf8] sm:$0x7] %vm237_vm1, %v5612_v1 }
  0x32   : > { %270 = vst.msk [vmem:[#allocation2 + $0x118] sm:$0x7] %vm237_vm1, %v5612_v1  ;;  %274 = vst.msk [vmem:[#allocation2 + $0x138] sm:$0x7] %vm237_vm1, %v5612_v1 }
  0x33   : > { %278 = vst.msk [vmem:[#allocation2 + $0x158] sm:$0x7] %vm237_vm1, %v5612_v1  ;;  %282 = vst.msk [vmem:[#allocation2 + $0x178] sm:$0x7] %vm237_vm1, %v5612_v1 }
  0x34   : > { %286 = vst.msk [vmem:[#allocation2 + $0x198] sm:$0x7] %vm237_vm1, %v5612_v1  ;;  %290 = vst.msk [vmem:[#allocation2 + $0x1b8] sm:$0x7] %vm237_vm1, %v5612_v1 }
  0x35   : > { %294 = vst.msk [vmem:[#allocation2 + $0x1d8] sm:$0x7] %vm237_vm1, %v5612_v1  ;;  %298 = vst.msk [vmem:[#allocation2 + $0x1f8] sm:$0x7] %vm237_vm1, %v5612_v1 }
  0x36   : > { %302 = vst.msk [vmem:[#allocation2 + $0x218] sm:$0x7] %vm237_vm1, %v5612_v1  ;;  %306 = vst.msk [vmem:[#allocation2 + $0x238] sm:$0x7] %vm237_vm1, %v5612_v1 }
  0x37   : > { %310 = vst.msk [vmem:[#allocation2 + $0x258] sm:$0x7] %vm237_vm1, %v5612_v1  ;;  %314 = vst.msk [vmem:[#allocation2 + $0x278] sm:$0x7] %vm237_vm1, %v5612_v1 }
  0x38   : > { %318 = vst.msk [vmem:[#allocation2 + $0x298] sm:$0x7] %vm237_vm1, %v5612_v1  ;;  %322 = vst.msk [vmem:[#allocation2 + $0x2b8] sm:$0x7] %vm237_vm1, %v5612_v1  ;;  %v536_v1 = vmul.f32 %v5857_v8, %v5923_v46 }
  0x39   : > { %9925 = vst [vmem:[#allocation3_spill] sm:$0xff] %v5839_v4  ;;  %9926 = vst [vmem:[#allocation4_spill] sm:$0xff] %v5841_v5 }
  0x3a   : > { %9927 = vst [vmem:[#allocation5_spill] sm:$0xff] %v5843_v6  ;;  %9928 = vst [vmem:[#allocation6_spill] sm:$0xff] %v5847_v7  ;;  %v568_v48 = vadd.f32 %v536_v1, %v436_v0  ;;  %v732_v1 = vmul.f32 %v5902_v34, %v696_v40  ;;  %v867_v40 = vadd.f32 %v835_v61, %v767_v60 }
  0x3b   : > { %9929 = vst [vmem:[#allocation7_spill] sm:$0xff] %v5857_v8  ;;  %9930 = vst [vmem:[#allocation8_spill] sm:$0xff] %v5864_v14  ;;  %v666_v8 = vadd.f32 %v634_v39, %v566_v32  ;;  %v1065_v32 = vadd.f32 %v1033_v12, %v965_v22  ;;  %v6009_v39 = vmul.f32 %v5928_v50, %v5910_v37 }
  0x3c   : > { %9931 = vst [vmem:[#allocation9_spill] sm:$0xff] %v5866_v15  ;;  %9932 = vst [vmem:[#allocation10_spill] sm:$0xff] %v5868_v16  ;;  %v1234_v37 = vmul.f32 %v5940_v55, %v5892_v28  ;;  %v6042_v22 = vmul.f32 %v5940_v55, %v5923_v46 }
  0x3d   : > { %356 = vst.msk [vmem:[#allocation2 + $0x68] sm:$0xff] %vm233_vm0, %v323_v9  ;;  %357 = vst.msk [vmem:[#allocation2 + $0x70] sm:$0xff] %vm233_vm0, %v324_v10  ;;  %v5961_v9 = vrot.slane %v5890_v25, %v5864_v14  ;;  %v564_v10 = vadd.f32 %v532_v47, %v432_v45  ;;  %v995_v45 = vld [vmem:[#allocation2 + $0xb] sm:$0xff]  ;;  %v5981_v47 = vrot.slane %v5890_v25, %v5866_v15 }
  0x3e   : > { %358 = vst.msk [vmem:[#allocation2 + $0x88] sm:$0xff] %vm233_vm0, %v325_v11  ;;  %9933 = vst [vmem:[#allocation11_spill] sm:$0xff] %v5879_v20  ;;  %v5963_v11 = vld [vmem:[#allocation2 + $0x4f] sm:$0xff]  ;;  %v6019_v59 = vadd.f32 %v734_v26, %v666_v8  ;;  %v6033_v8 = vmul.f32 %v5940_v55, %v5912_v38  ;;  %v6048_v38 = vrot.slane %v5890_v25, %v5868_v16 }
  0x3f   : > { %9934 = vst [vmem:[#allocation12_spill] sm:$0xff] %v5881_v21  ;;  %9935 = vst [vmem:[#allocation13_spill] sm:$0xff] %v5902_v34  ;;  %v636_v49 = vmul.f32 %v5879_v20, %v5963_v11  ;;  %v664_v0 = vadd.f32 %v632_v23, %v564_v10  ;;  %v1031_v20 = vmul.f32 %v5918_v43, %v995_v45  ;;  %v6005_v23 = vld [vmem:[#allocation2 + $0x4b] sm:$0xff] }
  0x40   : > { %9936 = vst [vmem:[#allocation14_spill] sm:$0xff] %v5905_v35  ;;  %9937 = vst [vmem:[#allocation15_spill] sm:$0xff] %v5908_v36  ;;  %v1132_v10 = vmul.f32 %v5928_v50, %v5862_v13  ;;  %v1134_v45 = vmul.f32 %v5928_v50, %v5873_v17  ;;  %v1232_v13 = vmul.f32 %v5940_v55, %v5885_v24  ;;  %v390_v26 = vld [vmem:[%s9745_s1 + $0x10] sm:$0x7f] }
  0x41   : > { %9938 = vst [vmem:[#allocation16_spill] sm:$0xff] %v5918_v43  ;;  %9939 = vst [vmem:[#allocation17_spill] sm:$0xff] %v5940_v55  ;;  %v668_v19 = vadd.f32 %v636_v49, %v568_v48  ;;  %v1063_v42 = vadd.f32 %v1031_v20, %v963_v18  ;;  %v764_v48 = vadd.f32 %v732_v1, %v664_v0 }
  0x42   : > { %9940 = vst [vmem:[#allocation18_spill] sm:$0xff] %v5944_v56  ;;  %9941 = vst [vmem:[#allocation19_spill] sm:$0xff] %v5961_v9  ;;  %v6015_v49 = vmul.f32 %v5928_v50, %v5920_v44  ;;  %v1166_v60 = vadd.f32 %v1134_v45, %v1065_v32  ;;  %v1035_v62 = vmul.f32 %v5918_v43, %v6005_v23  ;;  %v796_v45 = vld [vmem:[#allocation2 + $0x11] sm:$0xff] }
  0x43   : > { %9942 = vst [vmem:[#allocation20_spill] sm:$0xff] %v5981_v47  ;;  %v1164_v20 = vadd.f32 %v1132_v10, %v1063_v42  ;;  %v6025_v61 = vadd.f32 %v736_v30, %v668_v19  ;;  %v1332_v0 = vmul.f32 %v5944_v56, %v5899_v33  ;;  %v967_v1 = vadd.f32 %v935_v57, %v867_v40 }
  0x44   : > { %v1266_v24 = vadd.f32 %v1234_v37, %v1166_v60  ;;  %v1334_v18 = vmul.f32 %v5944_v56, %v5914_v41  ;;  %v1432_v33 = vmul.f32 %v5961_v9, %v5934_v53  ;;  %9943 = vst [vmem:[#allocation21_spill] sm:$0xff] %v6048_v38  ;;  %v6052_v19 = vmul.f32 %v5944_v56, %v5957_v2  ;;  %v327_v37 = vld [vmem:[%s5854_s21 + $0x20] sm:$0xff] }
  0x45   : > { %v1264_v3 = vadd.f32 %v1232_v13, %v1164_v20  ;;  %v6056_v30 = vmul.f32 %v5944_v56, %v5963_v11  ;;  %v1434_v10 = vmul.f32 %v5961_v9, %v5936_v54  ;;  %v1532_v40 = vmul.f32 %v5981_v47, %v5951_v63  ;;  %v896_v20 = vld [vmem:[#allocation2 + $0x12] sm:$0xff]  ;;  %360 = vst.msk [vmem:[#allocation2 + $0xa8] sm:$0xff] %vm233_vm0, %v327_v37 }
  0x46   : > { %v1366_v42 = vadd.f32 %v1334_v18, %v1266_v24  ;;  %v6064_v32 = vrot.slane %v5890_v25, %v5881_v21  ;;  %v6067_v2 = vrot.slane %v390_v26, %v5839_v4  ;;  %v6069_v13 = vadd.f32 %v1035_v62, %v967_v1  ;;  %v326_v63 = vld [vmem:[%s5854_s21 + $0x18] sm:$0xff]  ;;  %v329_v18 = vld [vmem:[%s5854_s21 + $0x30] sm:$0xff] }
  0x47   : > { %v1364_v12 = vadd.f32 %v1332_v0, %v1264_v3  ;;  %v6072_v57 = vmul.f32 %v5961_v9, %v698_v51  ;;  %v6076_v60 = vmul.f32 %v5961_v9, %v5988_v58  ;;  %v1534_v25 = vmul.f32 %v5981_v47, %v5970_v27  ;;  %v328_v3 = vld [vmem:[%s5854_s21 + $0x28] sm:$0xff]  ;;  %v6088_v51 = vld [vmem:[#allocation2 + $0x31] sm:$0xff]  ;;  %359 = vst.msk [vmem:[#allocation2 + $0x90] sm:$0xff] %vm233_vm0, %v326_v63 }
  0x48   : > { %9944 = vst [vmem:[#allocation22_spill] sm:$0xff] %v6064_v32  ;;  %v1466_v0 = vadd.f32 %v1434_v10, %v1366_v42  ;;  %v1632_v62 = vmul.f32 %v6048_v38, %v5972_v29  ;;  %v6086_v1 = vrot.slane %v390_v26, %v5841_v5  ;;  %361 = vst.msk [vmem:[#allocation2 + $0xb0] sm:$0xff] %vm233_vm0, %v328_v3  ;;  %v996_v3 = vld [vmem:[#allocation2 + $0x13] sm:$0xff] }
  0x49   : > { %v1464_v53 = vadd.f32 %v1432_v33, %v1364_v12  ;;  %v330_v12 = vld [vmem:[%s5854_s21 + $0x38] sm:$0xff]  ;;  %v1634_v33 = vmul.f32 %v6048_v38, %v6001_v31  ;;  %v6098_v42 = vrot.slane %v390_v26, %v5843_v6  ;;  %v6101_v29 = vrot.slane %v390_v26, %v5864_v14  ;;  %362 = vst.msk [vmem:[#allocation2 + $0xc8] sm:$0xff] %vm233_vm0, %v329_v18 }
  0x4a   : > { %v832_v10 = vmul.f32 %v5905_v35, %v796_v45  ;;  %363 = vst.msk [vmem:[#allocation2 + $0xd0] sm:$0xff] %vm233_vm0, %v330_v12  ;;  %v1734_v63 = vmul.f32 %v6064_v32, %v6005_v23  ;;  %v1833_v37 = vmul.f32 %v6067_v2, %v5873_v17  ;;  %v898_v6 = vld [vmem:[#allocation2 + $0x32] sm:$0xff]  ;;  %v6114_v14 = vmul.f32 %v6067_v2, %v5920_v44 }
  0x4b   : > { %v1564_v24 = vadd.f32 %v1532_v40, %v1464_v53  ;;  %9945 = vst [vmem:[#allocation23_spill] sm:$0xff] %v6098_v42  ;;  %9946 = vst [vmem:[#allocation24_spill] sm:$0xff] %v6101_v29  ;;  %v1732_v40 = vmul.f32 %v6064_v32, %v5985_v52  ;;  %v932_v18 = vmul.f32 %v5908_v36, %v896_v20  ;;  %v6117_v12 = vld [vmem:[#allocation2 + $0x51] sm:$0xff] }
  0x4c   : > { %9947 = vst [vmem:[#allocation25_spill] sm:$0xff] %v6114_v14  ;;  %v864_v45 = vadd.f32 %v832_v10, %v764_v48  ;;  %v834_v52 = vmul.f32 %v5905_v35, %v6088_v51  ;;  %v1933_v9 = vmul.f32 %v6086_v1, %v5892_v28  ;;  %v6125_v17 = vmul.f32 %v6086_v1, %v5923_v46  ;;  %v998_v5 = vld [vmem:[#allocation2 + $0x33] sm:$0xff] }
  0x4d   : > { %v1664_v53 = vadd.f32 %v1632_v62, %v1564_v24  ;;  %v1566_v24 = vadd.f32 %v1534_v25, %v1466_v0  ;;  %v1032_v48 = vmul.f32 %v5918_v43, %v996_v3  ;;  %v934_v10 = vmul.f32 %v5908_v36, %v898_v6 }
  0x4e   : > { %v964_v44 = vadd.f32 %v932_v18, %v864_v45  ;;  %v866_v20 = vadd.f32 %v834_v52, %v6019_v59  ;;  %v6131_v56 = vrot.slane %v390_v26, %v5866_v15  ;;  %v6134_v25 = vrot.slane %v390_v26, %v5868_v16  ;;  %v900_v18 = vld [vmem:[#allocation2 + $0x52] sm:$0xff] }
  0x4f   : > { %v1764_v62 = vadd.f32 %v1732_v40, %v1664_v53  ;;  %v836_v28 = vmul.f32 %v5905_v35, %v6117_v12  ;;  %v6139_v46 = vrot.slane %v390_v26, %v5881_v21  ;;  %v1034_v40 = vmul.f32 %v5918_v43, %v998_v5  ;;  %v332_v21 = vld [vmem:[%s5854_s21 + $0x48] sm:$0xff] }
  0x50   : > { %9948 = vst [vmem:[#allocation26_spill] sm:$0xff] %v6131_v56  ;;  %v1064_v0 = vadd.f32 %v1032_v48, %v964_v44  ;;  %v966_v53 = vadd.f32 %v934_v10, %v866_v20  ;;  %v1666_v59 = vadd.f32 %v1634_v33, %v1566_v24  ;;  %v6146_v45 = vmul.f32 %v6098_v42, %v5963_v11  ;;  %v401_v33 = vld [vmem:[#allocation2 + $0x65] sm:$0xff] }
  0x51   : > { %v1865_v14 = vadd.f32 %v1833_v37, %v1764_v62  ;;  %9949 = vst [vmem:[#allocation27_spill] sm:$0xff] %v6139_v46  ;;  %v2033_v37 = vmul.f32 %v6098_v42, %v5914_v41  ;;  %v2133_v52 = vmul.f32 %v6101_v29, %v5936_v54  ;;  %v6152_v26 = vmul.f32 %v6101_v29, %v5988_v58  ;;  %v1000_v54 = vld [vmem:[#allocation2 + $0x53] sm:$0xff] }
  0x52   : > { %v1165_v62 = vadd.f32 %v6009_v39, %v1064_v0  ;;  %v1066_v44 = vadd.f32 %v1034_v40, %v966_v53  ;;  %v2233_v41 = vmul.f32 %v6131_v56, %v5970_v27  ;;  %v2333_v11 = vmul.f32 %v6134_v25, %v6001_v31  ;;  %v9950_v27 = vld [vmem:[#allocation7_spill] sm:$0xff]  ;;  %365 = vst.msk [vmem:[#allocation2 + $0xf0] sm:$0xff] %vm233_vm0, %v332_v21 }
  0x53   : > { %v1965_v3 = vadd.f32 %v1933_v9, %v1865_v14  ;;  %v6155_v14 = vld [vmem:[#allocation2 + $0x66] sm:$0xff]  ;;  %v868_v24 = vadd.f32 %v836_v28, %v6025_v61  ;;  %v2433_v58 = vmul.f32 %v6139_v46, %v6005_v23  ;;  %v936_v39 = vmul.f32 %v5908_v36, %v900_v18 }
  0x54   : > { %v1265_v48 = vadd.f32 %v6033_v8, %v1165_v62  ;;  %v1167_v20 = vadd.f32 %v6015_v49, %v1066_v44  ;;  %v1766_v10 = vadd.f32 %v1734_v63, %v1666_v59  ;;  %v437_v53 = vmul.f32 %v5847_v7, %v401_v33 }
  0x55   : > { %v2065_v9 = vadd.f32 %v2033_v37, %v1965_v3  ;;  %v537_v40 = vmul.f32 %v9950_v27, %v6155_v14  ;;  %v1036_v31 = vmul.f32 %v5918_v43, %v1000_v54  ;;  %v1533_v23 = vmul.f32 %v5981_v47, %v6088_v51 }
  0x56   : > { %v1267_v61 = vadd.f32 %v6042_v22, %v1167_v20  ;;  %v1365_v28 = vadd.f32 %v6052_v19, %v1265_v48  ;;  %v968_v3 = vadd.f32 %v936_v39, %v868_v24  ;;  %v1535_v49 = vmul.f32 %v5981_v47, %v6117_v12  ;;  %v6184_v22 = vld [vmem:[%s9745_s1 + $0x18] sm:$0x7f]  ;;  %v6186_v19 = vld [vmem:[#allocation2 + $0x67] sm:$0xff] }
  0x57   : > { %v2165_v0 = vadd.f32 %v2133_v52, %v2065_v9  ;;  %v1136_v63 = vmul.f32 %v5928_v50, %v401_v33  ;;  %v1633_v52 = vmul.f32 %v6048_v38, %v898_v6  ;;  %v1835_v51 = vmul.f32 %v6067_v2, %v401_v33  ;;  %v9951_v39 = vld [vmem:[#allocation11_spill] sm:$0xff] }
  0x58   : > { %v1367_v59 = vadd.f32 %v6056_v30, %v1267_v61  ;;  %v1465_v37 = vadd.f32 %v6072_v57, %v1365_v28  ;;  %v1635_v44 = vmul.f32 %v6048_v38, %v900_v18  ;;  %v569_v9 = vadd.f32 %v537_v40, %v437_v53  ;;  %v331_v61 = vld [vmem:[%s5854_s21 + $0x40] sm:$0xff] }
  0x59   : > { %v2265_v8 = vadd.f32 %v2233_v41, %v2165_v0  ;;  %v1168_v30 = vadd.f32 %v1136_v63, %v6069_v13  ;;  %v1733_v57 = vmul.f32 %v6064_v32, %v998_v5  ;;  %v1735_v6 = vmul.f32 %v6064_v32, %v1000_v54  ;;  %v6196_v0 = vld [vmem:[#allocation2 + $0x68] sm:$0xff]  ;;  %364 = vst.msk [vmem:[#allocation2 + $0xe8] sm:$0xff] %vm233_vm0, %v331_v61 }
  0x5a   : > { %v1565_v41 = vadd.f32 %v1533_v23, %v1465_v37  ;;  %v1867_v24 = vadd.f32 %v1835_v51, %v1766_v10  ;;  %v1467_v48 = vadd.f32 %v6076_v60, %v1367_v59  ;;  %v637_v20 = vmul.f32 %v9951_v39, %v6186_v19  ;;  %v6208_v10 = vld [vmem:[#allocation2 + $0x6d] sm:$0xff] }
  0x5b   : > { %v2365_v62 = vadd.f32 %v2333_v11, %v2265_v8  ;;  %v1236_v11 = vmul.f32 %v5940_v55, %v6155_v14  ;;  %v6202_v53 = vrot.slane %v6184_v22, %v5839_v4  ;;  %v1068_v13 = vadd.f32 %v1036_v31, %v968_v3  ;;  %v6214_v59 = vld [vmem:[#allocation2 + $0x6e] sm:$0xff]  ;;  %v9952_v3 = vld [vmem:[#allocation18_spill] sm:$0xff] }
  0x5c   : > { %v1665_v40 = vadd.f32 %v1633_v52, %v1565_v41  ;;  %v2234_v5 = vmul.f32 %v6131_v56, %v6117_v12  ;;  %v1935_v60 = vmul.f32 %v6086_v1, %v6155_v14  ;;  %v6212_v23 = vmul.f32 %v6134_v25, %v900_v18  ;;  %v9954_v41 = vld [vmem:[#allocation25_spill] sm:$0xff] }
  0x5d   : > { %v2465_v28 = vadd.f32 %v2433_v58, %v2365_v62  ;;  %v669_v8 = vadd.f32 %v637_v20, %v569_v9  ;;  %v1268_v63 = vadd.f32 %v1236_v11, %v1168_v30  ;;  %v737_v12 = vmul.f32 %v5902_v34, %v6196_v0  ;;  %v9953_v62 = vld [vmem:[#allocation4_spill] sm:$0xff]  ;;  %v9955_v11 = vld [vmem:[#allocation19_spill] sm:$0xff]  ;;  %v6245_v4 = vld [vmem:[#allocation2 + $0x70] sm:$0xff] }
  0x5e   : > { %v1765_v31 = vadd.f32 %v1733_v57, %v1665_v40  ;;  %v1336_v37 = vmul.f32 %v9952_v3, %v6186_v19  ;;  %v1967_v52 = vadd.f32 %v1935_v60, %v1867_v24  ;;  %v1567_v51 = vadd.f32 %v1535_v49, %v1467_v48  ;;  %v6228_v30 = vld [vmem:[#allocation2 + $0x6f] sm:$0xff] }
  0x5f   : > { %v2533_v58 = vmul.f32 %v6202_v53, %v401_v33  ;;  %v6224_v18 = vrot.slane %v6184_v22, %v9953_v62  ;;  %v438_v9 = vmul.f32 %v5847_v7, %v6208_v10  ;;  %v2434_v20 = vmul.f32 %v6139_v46, %v1000_v54  ;;  %v6238_v61 = vld [vmem:[#allocation2 + $0x69] sm:$0xff] }
  0x60   : > { %v1866_v57 = vadd.f32 %v9954_v41, %v1765_v31  ;;  %v1436_v24 = vmul.f32 %v9955_v11, %v6196_v0  ;;  %v538_v33 = vmul.f32 %v9950_v27, %v6214_v59  ;;  %v769_v49 = vadd.f32 %v737_v12, %v669_v8 }
  0x61   : > { %v1368_v48 = vadd.f32 %v1336_v37, %v1268_v63  ;;  %v2035_v40 = vmul.f32 %v6098_v42, %v6186_v19  ;;  %v2565_v60 = vadd.f32 %v2533_v58, %v2465_v28  ;;  %v2135_v31 = vmul.f32 %v6101_v29, %v6196_v0  ;;  %v9956_v28 = vld [vmem:[#allocation5_spill] sm:$0xff] }
  0x62   : > { %v1966_v62 = vadd.f32 %v6125_v17, %v1866_v57  ;;  %v570_v54 = vadd.f32 %v538_v33, %v438_v9  ;;  %v638_v41 = vmul.f32 %v9951_v39, %v6228_v30  ;;  %v1667_v8 = vadd.f32 %v1635_v44, %v1567_v51  ;;  %v6258_v57 = vld [vmem:[#allocation2 + $0x6a] sm:$0xff] }
  0x63   : > { %v2067_v63 = vadd.f32 %v2035_v40, %v1967_v52  ;;  %v2633_v12 = vmul.f32 %v6224_v18, %v6155_v14  ;;  %v6252_v37 = vrot.slane %v6184_v22, %v9956_v28  ;;  %v837_v9 = vmul.f32 %v5905_v35, %v6238_v61  ;;  %v9957_v14 = vld [vmem:[#allocation8_spill] sm:$0xff] }
  0x64   : > { %v2066_v17 = vadd.f32 %v6146_v45, %v1966_v62  ;;  %v670_v58 = vadd.f32 %v638_v41, %v570_v54  ;;  %v1137_v44 = vmul.f32 %v5928_v50, %v6208_v10  ;;  %v1468_v52 = vadd.f32 %v1436_v24, %v1368_v48  ;;  %v6269_v62 = vld [vmem:[#allocation2 + $0x71] sm:$0xff] }
  0x65   : > { %v2665_v51 = vadd.f32 %v2633_v12, %v2565_v60  ;;  %v6264_v33 = vrot.slane %v6184_v22, %v9957_v14  ;;  %v738_v21 = vmul.f32 %v5902_v34, %v6245_v4  ;;  %v869_v40 = vadd.f32 %v837_v9, %v769_v49  ;;  %v6277_v14 = vld [vmem:[#allocation2 + $0x72] sm:$0xff] }
  0x66   : > { %v2166_v45 = vadd.f32 %v6152_v26, %v2066_v17  ;;  %v1169_v54 = vadd.f32 %v1137_v44, %v1068_v13  ;;  %v1237_v41 = vmul.f32 %v5940_v55, %v6214_v59  ;;  %v1767_v28 = vadd.f32 %v1735_v6, %v1667_v8 }
  0x67   : > { %v2167_v39 = vadd.f32 %v2135_v31, %v2067_v63  ;;  %v2733_v24 = vmul.f32 %v6252_v37, %v6186_v19  ;;  %v937_v48 = vmul.f32 %v5908_v36, %v6258_v57  ;;  %v770_v12 = vadd.f32 %v738_v21, %v670_v58  ;;  %v6285_v31 = vld [vmem:[#allocation2 + $0x6b] sm:$0xff]  ;;  %v6287_v19 = vld [vmem:[#allocation2 + $0x73] sm:$0xff] }
  0x68   : > { %v2266_v60 = vadd.f32 %v2234_v5, %v2166_v45  ;;  %v1269_v26 = vadd.f32 %v1237_v41, %v1169_v54  ;;  %v1337_v49 = vmul.f32 %v9952_v3, %v6228_v30  ;;  %v2833_v17 = vmul.f32 %v6264_v33, %v6196_v0 }
  0x69   : > { %v2765_v13 = vadd.f32 %v2733_v24, %v2665_v51  ;;  %v838_v6 = vmul.f32 %v5905_v35, %v6269_v62  ;;  %v1836_v5 = vmul.f32 %v6067_v2, %v6208_v10  ;;  %v969_v63 = vadd.f32 %v937_v48, %v869_v40 }
  0x6a   : > { %v2366_v8 = vadd.f32 %v6212_v23, %v2266_v60  ;;  %v1369_v58 = vadd.f32 %v1337_v49, %v1269_v26  ;;  %v1536_v9 = vmul.f32 %v5981_v47, %v6238_v61  ;;  %v938_v0 = vmul.f32 %v5908_v36, %v6277_v14 }
  0x6b   : > { %v1437_v44 = vmul.f32 %v9955_v11, %v6245_v4  ;;  %v1868_v51 = vadd.f32 %v1836_v5, %v1767_v28  ;;  %v1936_v21 = vmul.f32 %v6086_v1, %v6214_v59  ;;  %v870_v45 = vadd.f32 %v838_v6, %v770_v12 }
  0x6c   : > { %v1037_v54 = vmul.f32 %v5918_v43, %v6285_v31  ;;  %v1038_v23 = vmul.f32 %v5918_v43, %v6287_v19  ;;  %v1568_v40 = vadd.f32 %v1536_v9, %v1468_v52  ;;  %v2466_v41 = vadd.f32 %v2434_v20, %v2366_v8 }
  0x6d   : > { %v1469_v24 = vadd.f32 %v1437_v44, %v1369_v58  ;;  %v1968_v48 = vadd.f32 %v1936_v21, %v1868_v51  ;;  %v2036_v60 = vmul.f32 %v6098_v42, %v6228_v30  ;;  %v2865_v26 = vadd.f32 %v2833_v17, %v2765_v13 }
  0x6e   : > { %v1069_v49 = vadd.f32 %v1037_v54, %v969_v63  ;;  %v1636_v28 = vmul.f32 %v6048_v38, %v6258_v57  ;;  %v2235_v12 = vmul.f32 %v6131_v56, %v6238_v61  ;;  %v1537_v6 = vmul.f32 %v5981_v47, %v6269_v62 }
  0x6f   : > { %v1637_v52 = vmul.f32 %v6048_v38, %v6277_v14  ;;  %v2068_v20 = vadd.f32 %v2036_v60, %v1968_v48  ;;  %v2534_v5 = vmul.f32 %v6202_v53, %v6208_v10  ;;  %v970_v8 = vadd.f32 %v938_v0, %v870_v45 }
  0x70   : > { %v1668_v58 = vadd.f32 %v1636_v28, %v1568_v40  ;;  %v2267_v13 = vadd.f32 %v2235_v12, %v2167_v39  ;;  %v6318_v17 = vrot.slane %v6184_v22, %v5866_v15  ;;  %v1569_v63 = vadd.f32 %v1537_v6, %v1469_v24  ;;  %v6338_v24 = vld [vmem:[#allocation2 + $0x86] sm:$0xff] }
  0x71   : > { %v2136_v9 = vmul.f32 %v6101_v29, %v6245_v4  ;;  %v2566_v44 = vadd.f32 %v2534_v5, %v2466_v41  ;;  %v2634_v51 = vmul.f32 %v6224_v18, %v6214_v59  ;;  %v1736_v21 = vmul.f32 %v6064_v32, %v6285_v31  ;;  %v403_v41 = vld [vmem:[#allocation2 + $0x85] sm:$0xff] }
  0x72   : > { %v1737_v10 = vmul.f32 %v6064_v32, %v6287_v19  ;;  %v2335_v39 = vmul.f32 %v6134_v25, %v6258_v57  ;;  %v2734_v0 = vmul.f32 %v6252_v37, %v6228_v30  ;;  %v2933_v40 = vmul.f32 %v6318_v17, %v6238_v61 }
  0x73   : > { %v2168_v45 = vadd.f32 %v2136_v9, %v2068_v20  ;;  %v2666_v54 = vadd.f32 %v2634_v51, %v2566_v44  ;;  %v6336_v59 = vrot.slane %v6184_v22, %v5868_v16  ;;  %v6340_v48 = vadd.f32 %v1038_v23, %v970_v8 }
  0x74   : > { %v1768_v60 = vadd.f32 %v1736_v21, %v1668_v58  ;;  %v2236_v28 = vmul.f32 %v6131_v56, %v6269_v62  ;;  %v2367_v12 = vadd.f32 %v2335_v39, %v2267_v13  ;;  %v1669_v30 = vadd.f32 %v1637_v52, %v1569_v63 }
  0x75   : > { %9958 = vst [vmem:[#allocation25_spill] sm:$0xff] %v6336_v59  ;;  %v2766_v6 = vadd.f32 %v2734_v0, %v2666_v54  ;;  %v2834_v20 = vmul.f32 %v6264_v33, %v6245_v4  ;;  %v2965_v61 = vadd.f32 %v2933_v40, %v2865_v26  ;;  %v2435_v5 = vmul.f32 %v6139_v46, %v6285_v31  ;;  %v9959_v26 = vld [vmem:[#allocation12_spill] sm:$0xff] }
  0x76   : > { %v439_v9 = vmul.f32 %v5847_v7, %v403_v41  ;;  %v539_v23 = vmul.f32 %v9950_v27, %v6338_v24  ;;  %v1138_v8 = vmul.f32 %v5928_v50, %v403_v41  ;;  %v2268_v58 = vadd.f32 %v2236_v28, %v2168_v45  ;;  %v603_v40 = vld [vmem:[#allocation2 + $0x87] sm:$0xff] }
  0x77   : > { %v2336_v13 = vmul.f32 %v6134_v25, %v6277_v14  ;;  %v2866_v52 = vadd.f32 %v2834_v20, %v2766_v6  ;;  %v3033_v63 = vmul.f32 %v6336_v59, %v6258_v57  ;;  %v2467_v4 = vadd.f32 %v2435_v5, %v2367_v12  ;;  %v6370_v57 = vld [vmem:[%s9745_s1 + $0x20] sm:$0x7f]  ;;  %v703_v6 = vld [vmem:[#allocation2 + $0x88] sm:$0xff] }
  0x78   : > { %v6358_v44 = vrot.slane %v6184_v22, %v9959_v26  ;;  %v1170_v51 = vadd.f32 %v1138_v8, %v1069_v49  ;;  %v1837_v21 = vmul.f32 %v6067_v2, %v403_v41  ;;  %v6361_v39 = vadd.f32 %v1737_v10, %v1669_v30  ;;  %9961 = vst [vmem:[#allocation29_spill] sm:$0xff] %v6370_v57  ;;  %v9962_v5 = vld [vmem:[#allocation11_spill] sm:$0xff]  ;;  %v9964_v26 = vld [vmem:[#allocation4_spill] sm:$0xff] }
  0x79   : > { %v2436_v0 = vmul.f32 %v6139_v46, %v6287_v19  ;;  %v2934_v45 = vmul.f32 %v6318_v17, %v6269_v62  ;;  %v3065_v54 = vadd.f32 %v3033_v63, %v2965_v61  ;;  %v571_v22 = vadd.f32 %v539_v23, %v439_v9  ;;  %v333_v63 = vld [vmem:[%s5854_s21 + $0x50] sm:$0xff] }
  0x7a   : > { %9960 = vst [vmem:[#allocation28_spill] sm:$0xff] %v6358_v44  ;;  %v1238_v49 = vmul.f32 %v5940_v55, %v6338_v24  ;;  %v1869_v10 = vadd.f32 %v1837_v21, %v1768_v60  ;;  %v2535_v28 = vmul.f32 %v6202_v53, %v403_v41  ;;  %v2368_v12 = vadd.f32 %v2336_v13, %v2268_v58 }
  0x7b   : > { %v2966_v30 = vadd.f32 %v2934_v45, %v2866_v52  ;;  %v3034_v62 = vmul.f32 %v6336_v59, %v6277_v14  ;;  %v1937_v20 = vmul.f32 %v6086_v1, %v6338_v24  ;;  %v3133_v61 = vmul.f32 %v6358_v44, %v6285_v31  ;;  %v9963_v14 = vld [vmem:[#allocation3_spill] sm:$0xff]  ;;  %366 = vst.msk [vmem:[#allocation2 + $0x108] sm:$0xff] %vm233_vm0, %v333_v63  ;;  %v9965_v63 = vld [vmem:[#allocation5_spill] sm:$0xff] }
  0x7c   : > { %v639_v9 = vmul.f32 %v9962_v5, %v603_v40  ;;  %v1270_v23 = vadd.f32 %v1238_v49, %v1170_v51  ;;  %v2567_v8 = vadd.f32 %v2535_v28, %v2467_v4  ;;  %v3134_v60 = vmul.f32 %v6358_v44, %v6287_v19 }
  0x7d   : > { %v1969_v58 = vadd.f32 %v1937_v20, %v1869_v10  ;;  %v2635_v13 = vmul.f32 %v6224_v18, %v6338_v24  ;;  %v6389_v52 = vrot.slane %v6370_v57, %v9963_v14  ;;  %v3165_v21 = vadd.f32 %v3133_v61, %v3065_v54  ;;  %v6408_v61 = vld [vmem:[#allocation2 + $0x8e] sm:$0xff] }
  0x7e   : > { %v671_v31 = vadd.f32 %v639_v9, %v571_v22  ;;  %v739_v45 = vmul.f32 %v5902_v34, %v703_v6  ;;  %v1338_v4 = vmul.f32 %v9952_v3, %v603_v40  ;;  %v6394_v51 = vadd.f32 %v2436_v0, %v2368_v12  ;;  %v6406_v22 = vld [vmem:[#allocation2 + $0x8d] sm:$0xff]  ;;  %v6410_v0 = vld [vmem:[#allocation2 + $0x265] sm:$0xff] }
  0x7f   : > { %v3066_v49 = vadd.f32 %v3034_v62, %v2966_v30  ;;  %v2037_v19 = vmul.f32 %v6098_v42, %v603_v40  ;;  %v2667_v10 = vadd.f32 %v2635_v13, %v2567_v8  ;;  %v3234_v20 = vmul.f32 %v6389_v52, %v403_v41  ;;  %9966 = vst [vmem:[#allocation30_spill] sm:$0xff] %v6410_v0  ;;  %v9967_v41 = vld [vmem:[#allocation8_spill] sm:$0xff] }
  0x80   : > { %v1370_v28 = vadd.f32 %v1338_v4, %v1270_v23  ;;  %v6400_v14 = vrot.slane %v6370_v57, %v9964_v26  ;;  %v6404_v54 = vrot.slane %v6370_v57, %v9965_v63  ;;  %v1438_v12 = vmul.f32 %v9955_v11, %v703_v6  ;;  %v6418_v23 = vld [vmem:[#allocation2 + $0x26d] sm:$0xff] }
  0x81   : > { %v2069_v30 = vadd.f32 %v2037_v19, %v1969_v58  ;;  %v2735_v62 = vmul.f32 %v6252_v37, %v603_v40  ;;  %v6416_v9 = vrot.slane %v6370_v57, %v9967_v41  ;;  %9968 = vst [vmem:[#allocation31_spill] sm:$0xff] %v6418_v23  ;;  %v771_v8 = vadd.f32 %v739_v45, %v671_v31  ;;  %v3328_v26 = vld [vmem:[#allocation2 + $0x266] sm:$0xff]  ;;  %v6428_v41 = vld [vmem:[#allocation2 + $0x8f] sm:$0xff] }
  0x82   : > { %v2137_v13 = vmul.f32 %v6101_v29, %v703_v6  ;;  %v2835_v4 = vmul.f32 %v6264_v33, %v703_v6  ;;  %v3266_v63 = vadd.f32 %v3234_v20, %v3165_v21  ;;  %v6422_v16 = vadd.f32 %v3134_v60, %v3066_v49  ;;  %v3329_v57 = vld [vmem:[#allocation2 + $0x26e] sm:$0xff] }
  0x83   : > { %v2767_v44 = vadd.f32 %v2735_v62, %v2667_v10  ;;  %v440_v58 = vmul.f32 %v5847_v7, %v6406_v22  ;;  %v540_v19 = vmul.f32 %v9950_v27, %v6408_v61  ;;  %v3428_v31 = vld [vmem:[#allocation2 + $0x267] sm:$0xff]  ;;  %v1470_v45 = vadd.f32 %v1438_v12, %v1370_v28  ;;  %v3429_v10 = vld [vmem:[#allocation2 + $0x26f] sm:$0xff]  ;;  %v334_v12 = vld [vmem:[%s5854_s21 + $0x58] sm:$0xff] }
  0x84   : > { %v3334_v15 = vmul.f32 %v6400_v14, %v6338_v24  ;;  %v3434_v21 = vmul.f32 %v6404_v54, %v603_v40  ;;  %v6435_v60 = vmul.f32 %v6389_v52, %v6410_v0  ;;  %v6437_v49 = vld [vmem:[#allocation2 + $0x89] sm:$0xff]  ;;  %v6439_v20 = vadd.f32 %v2137_v13, %v2069_v30  ;;  %367 = vst.msk [vmem:[#allocation2 + $0x110] sm:$0xff] %vm233_vm0, %v334_v12  ;;  %v6474_v12 = vld [vmem:[#allocation2 + $0x92] sm:$0xff] }
  0x85   : > { %v3534_v62 = vmul.f32 %v6416_v9, %v703_v6  ;;  %v6444_v27 = vmul.f32 %v6389_v52, %v6418_v23  ;;  %v572_v28 = vadd.f32 %v540_v19, %v440_v58  ;;  %v3528_v24 = vld [vmem:[#allocation2 + $0x268] sm:$0xff]  ;;  %v3529_v7 = vld [vmem:[#allocation2 + $0x270] sm:$0xff]  ;;  %v6448_v46 = vmul.f32 %v6400_v14, %v3328_v26 }
  0x86   : > { %9969 = vst [vmem:[#allocation32_spill] sm:$0xff] %v6435_v60  ;;  %v3366_v40 = vadd.f32 %v3334_v15, %v3266_v63  ;;  %v640_v60 = vmul.f32 %v9962_v5, %v6428_v41  ;;  %v6452_v0 = vld [vmem:[#allocation2 + $0x90] sm:$0xff]  ;;  %v1139_v6 = vmul.f32 %v5928_v50, %v6406_v22  ;;  %v6457_v30 = vadd.f32 %v2835_v4, %v2767_v44 }
  0x87   : > { %9970 = vst [vmem:[#allocation33_spill] sm:$0xff] %v6444_v27  ;;  %9971 = vst [vmem:[#allocation34_spill] sm:$0xff] %v6448_v46  ;;  %v6460_v13 = vmul.f32 %v6400_v14, %v3329_v57  ;;  %v6463_v15 = vmul.f32 %v6404_v54, %v3428_v31  ;;  %v6465_v26 = vld [vmem:[#allocation2 + $0x91] sm:$0xff]  ;;  %v839_v63 = vmul.f32 %v5905_v35, %v6437_v49 }
  0x88   : > { %v6470_v58 = vmul.f32 %v6404_v54, %v3429_v10  ;;  %v672_v19 = vadd.f32 %v640_v60, %v572_v28  ;;  %v6472_v27 = vld [vmem:[#allocation2 + $0x8a] sm:$0xff]  ;;  %v1171_v44 = vadd.f32 %v1139_v6, %v6340_v48  ;;  %v1239_v57 = vmul.f32 %v5940_v55, %v6408_v61 }
  0x89   : > { %9972 = vst [vmem:[#allocation35_spill] sm:$0xff] %v6460_v13  ;;  %9973 = vst [vmem:[#allocation36_spill] sm:$0xff] %v6463_v15  ;;  %v6480_v4 = vmul.f32 %v6416_v9, %v3528_v24  ;;  %v6483_v31 = vmul.f32 %v6416_v9, %v3529_v7  ;;  %v740_v10 = vmul.f32 %v5902_v34, %v6452_v0  ;;  %v6487_v60 = vld [vmem:[#allocation2 + $0x8b] sm:$0xff] }
  0x8a   : > { %9974 = vst [vmem:[#allocation37_spill] sm:$0xff] %v6470_v58  ;;  %v871_v58 = vadd.f32 %v839_v63, %v771_v8  ;;  %v3466_v28 = vadd.f32 %v3434_v21, %v3366_v40  ;;  %v840_v13 = vmul.f32 %v5905_v35, %v6465_v26  ;;  %v1271_v48 = vadd.f32 %v1239_v57, %v1171_v44 }
  0x8b   : > { %9975 = vst [vmem:[#allocation38_spill] sm:$0xff] %v6480_v4  ;;  %9976 = vst [vmem:[#allocation39_spill] sm:$0xff] %v6483_v31  ;;  %v1339_v6 = vmul.f32 %v9952_v3, %v6428_v41  ;;  %v939_v24 = vmul.f32 %v5908_v36, %v6472_v27  ;;  %v940_v7 = vmul.f32 %v5908_v36, %v6474_v12  ;;  %v6497_v31 = vld [vmem:[#allocation2 + $0x93] sm:$0xff] }
  0x8c   : > { %v1538_v8 = vmul.f32 %v5981_v47, %v6437_v49  ;;  %v1838_v21 = vmul.f32 %v6067_v2, %v6406_v22  ;;  %v772_v40 = vadd.f32 %v740_v10, %v672_v19  ;;  %v1039_v63 = vmul.f32 %v5918_v43, %v6487_v60 }
  0x8d   : > { %v1371_v44 = vadd.f32 %v1339_v6, %v1271_v48  ;;  %v1439_v57 = vmul.f32 %v9955_v11, %v6452_v0  ;;  %v971_v4 = vadd.f32 %v939_v24, %v871_v58  ;;  %v1938_v36 = vmul.f32 %v6086_v1, %v6408_v61 }
  0x8e   : > { %v1570_v15 = vadd.f32 %v1538_v8, %v1470_v45  ;;  %v1870_v46 = vadd.f32 %v1838_v21, %v6361_v39  ;;  %v6510_v35 = vadd.f32 %v3534_v62, %v3466_v28  ;;  %v1040_v23 = vmul.f32 %v5918_v43, %v6497_v31 }
  0x8f   : > { %v1539_v19 = vmul.f32 %v5981_v47, %v6465_v26  ;;  %v1638_v10 = vmul.f32 %v6048_v38, %v6472_v27  ;;  %v1471_v48 = vadd.f32 %v1439_v57, %v1371_v44  ;;  %v1639_v45 = vmul.f32 %v6048_v38, %v6474_v12 }
  0x90   : > { %v1970_v58 = vadd.f32 %v1938_v36, %v1870_v46  ;;  %v2038_v39 = vmul.f32 %v6098_v42, %v6428_v41  ;;  %v872_v6 = vadd.f32 %v840_v13, %v772_v40  ;;  %v1738_v62 = vmul.f32 %v6064_v32, %v6487_v60 }
  0x91   : > { %v2237_v28 = vmul.f32 %v6131_v56, %v6437_v49  ;;  %v2536_v24 = vmul.f32 %v6202_v53, %v6406_v22  ;;  %v6528_v8 = vadd.f32 %v1039_v63, %v971_v4  ;;  %v1670_v21 = vadd.f32 %v1638_v10, %v1570_v15 }
  0x92   : > { %v2070_v44 = vadd.f32 %v2038_v39, %v1970_v58  ;;  %v2138_v36 = vmul.f32 %v6101_v29, %v6452_v0  ;;  %v1739_v46 = vmul.f32 %v6064_v32, %v6497_v31  ;;  %v2636_v57 = vmul.f32 %v6224_v18, %v6408_v61 }
  0x93   : > { %v2269_v13 = vadd.f32 %v2237_v28, %v6439_v20  ;;  %v2568_v40 = vadd.f32 %v2536_v24, %v6394_v51  ;;  %v1571_v38 = vadd.f32 %v1539_v19, %v1471_v48  ;;  %v2238_v4 = vmul.f32 %v6131_v56, %v6465_v26 }
  0x94   : > { %v2170_v43 = vadd.f32 %v2138_v36, %v2070_v44  ;;  %v2935_v15 = vmul.f32 %v6318_v17, %v6437_v49  ;;  %v972_v63 = vadd.f32 %v940_v7, %v872_v6  ;;  %v2337_v10 = vmul.f32 %v6134_v25, %v6472_v27 }
  0x95   : > { %v2668_v58 = vadd.f32 %v2636_v57, %v2568_v40  ;;  %v2736_v20 = vmul.f32 %v6252_v37, %v6428_v41  ;;  %v6546_v51 = vadd.f32 %v1738_v62, %v1670_v21  ;;  %v3235_v48 = vmul.f32 %v6389_v52, %v6406_v22  ;;  %v9977_v22 = vld [vmem:[#allocation27_spill] sm:$0xff]  ;;  %v9978_v40 = vld [vmem:[#allocation9_spill] sm:$0xff] }
  0x96   : > { %v2270_v39 = vadd.f32 %v2238_v4, %v2170_v43  ;;  %v2967_v19 = vadd.f32 %v2935_v15, %v6457_v30  ;;  %v2338_v28 = vmul.f32 %v6134_v25, %v6474_v12  ;;  %v2369_v24 = vadd.f32 %v2337_v10, %v2269_v13  ;;  %v9979_v57 = vld [vmem:[#allocation29_spill] sm:$0xff] }
  0x97   : > { %v2768_v7 = vadd.f32 %v2736_v20, %v2668_v58  ;;  %v2836_v6 = vmul.f32 %v6264_v33, %v6452_v0  ;;  %v1671_v44 = vadd.f32 %v1639_v45, %v1571_v38  ;;  %v3035_v36 = vmul.f32 %v6336_v59, %v6472_v27  ;;  %v9981_v20 = vld [vmem:[#allocation28_spill] sm:$0xff] }
  0x98   : > { %v3267_v62 = vadd.f32 %v3235_v48, %v6422_v16  ;;  %v3335_v43 = vmul.f32 %v6400_v14, %v6408_v61  ;;  %v6560_v30 = vadd.f32 %v1040_v23, %v972_v63  ;;  %v2437_v21 = vmul.f32 %v9977_v22, %v6487_v60 }
  0x99   : > { %v2438_v13 = vmul.f32 %v9977_v22, %v6497_v31  ;;  %v6568_v4 = vrot.slane %v9979_v57, %v9978_v40  ;;  %v2370_v38 = vadd.f32 %v2338_v28, %v2270_v39  ;;  %v2868_v45 = vadd.f32 %v2836_v6, %v2768_v7  ;;  %v9982_v40 = vld [vmem:[#allocation10_spill] sm:$0xff]  ;;  %v505_v7 = vld [vmem:[#allocation2 + $0xa6] sm:$0xff] }
  0x9a   : > { %v3067_v15 = vadd.f32 %v3035_v36, %v2967_v19  ;;  %v3367_v10 = vadd.f32 %v3335_v43, %v3267_v62  ;;  %v2469_v16 = vadd.f32 %v2437_v21, %v2369_v24  ;;  %v2936_v61 = vmul.f32 %v6318_v17, %v6465_v26  ;;  %v9984_v19 = vld [vmem:[#allocation12_spill] sm:$0xff]  ;;  %v335_v22 = vld [vmem:[%s5854_s21 + $0x60] sm:$0xff] }
  0x9b   : > { %9980 = vst [vmem:[#allocation29_spill] sm:$0xff] %v6568_v4  ;;  %v3036_v23 = vmul.f32 %v6336_v59, %v6474_v12  ;;  %v3435_v63 = vmul.f32 %v6404_v54, %v6428_v41  ;;  %v6576_v58 = vadd.f32 %v1739_v46, %v1671_v44  ;;  %v3135_v48 = vmul.f32 %v9981_v20, %v6487_v60  ;;  %v6588_v24 = vld [vmem:[#allocation2 + $0xa5] sm:$0xff] }
  0x9c   : > { %v6582_v39 = vrot.slane %v9979_v57, %v9982_v40  ;;  %v6586_v28 = vrot.slane %v9979_v57, %v9984_v19  ;;  %v3136_v41 = vmul.f32 %v9981_v20, %v6497_v31  ;;  %v3535_v6 = vmul.f32 %v6416_v9, %v6452_v0  ;;  %v3628_v36 = vld [vmem:[#allocation2 + $0x269] sm:$0xff]  ;;  %v3629_v40 = vld [vmem:[#allocation2 + $0x271] sm:$0xff]  ;;  %v9987_v20 = vld [vmem:[#allocation7_spill] sm:$0xff]  ;;  %368 = vst.msk [vmem:[#allocation2 + $0x128] sm:$0xff] %vm233_vm0, %v335_v22 }
  0x9d   : > { %v3467_v46 = vadd.f32 %v3435_v63, %v3367_v10  ;;  %v3634_v44 = vmul.f32 %v6568_v4, %v6437_v49  ;;  %v6596_v62 = vadd.f32 %v2438_v13, %v2370_v38  ;;  %v2968_v43 = vadd.f32 %v2936_v61, %v2868_v45  ;;  %v3728_v19 = vld [vmem:[#allocation2 + $0x26a] sm:$0xff]  ;;  %v9986_v10 = vld [vmem:[#allocation6_spill] sm:$0xff] }
  0x9e   : > { %9983 = vst [vmem:[#allocation40_spill] sm:$0xff] %v6582_v39  ;;  %9985 = vst [vmem:[#allocation41_spill] sm:$0xff] %v6586_v28  ;;  %v3167_v21 = vadd.f32 %v3135_v48, %v3067_v15  ;;  %v3635_v57 = vmul.f32 %v6568_v4, %v6465_v26  ;;  %v441_v63 = vmul.f32 %v9986_v10, %v6588_v24  ;;  %v3729_v45 = vld [vmem:[#allocation2 + $0x272] sm:$0xff] }
  0x9f   : > { %v3666_v59 = vadd.f32 %v3634_v44, %v6510_v35  ;;  %v541_v0 = vmul.f32 %v9987_v20, %v505_v7  ;;  %v1140_v49 = vmul.f32 %v5928_v50, %v6588_v24  ;;  %v3734_v13 = vmul.f32 %v6582_v39, %v6472_v27  ;;  %v3828_v48 = vld [vmem:[#allocation2 + $0x26b] sm:$0xff] }
  0xa0   : > { %v3735_v38 = vmul.f32 %v6582_v39, %v6474_v12  ;;  %v6613_v26 = vmul.f32 %v6586_v28, %v6487_v60  ;;  %v6617_v35 = vmul.f32 %v6586_v28, %v6497_v31  ;;  %v3567_v15 = vadd.f32 %v3535_v6, %v3467_v46 }
  0xa1   : > { %v6621_v61 = vmul.f32 %v6568_v4, %v3628_v36  ;;  %v1172_v27 = vadd.f32 %v1140_v49, %v6528_v8  ;;  %v1839_v12 = vmul.f32 %v6067_v2, %v6588_v24  ;;  %v3068_v44 = vadd.f32 %v3036_v23, %v2968_v43  ;;  %v3829_v49 = vld [vmem:[#allocation2 + $0x273] sm:$0xff] }
  0xa2   : > { %9988 = vst [vmem:[#allocation42_spill] sm:$0xff] %v6613_v26  ;;  %9989 = vst [vmem:[#allocation43_spill] sm:$0xff] %v6617_v35  ;;  %v6627_v60 = vmul.f32 %v6568_v4, %v3629_v40  ;;  %v6630_v31 = vmul.f32 %v6582_v39, %v3728_v19  ;;  %v605_v35 = vld [vmem:[#allocation2 + $0xa7] sm:$0xff]  ;;  %v1240_v22 = vmul.f32 %v5940_v55, %v505_v7 }
  0xa3   : > { %9990 = vst [vmem:[#allocation44_spill] sm:$0xff] %v6621_v61  ;;  %v6633_v46 = vadd.f32 %v3734_v13, %v3666_v59  ;;  %v573_v6 = vadd.f32 %v541_v0, %v441_v63  ;;  %v1871_v36 = vadd.f32 %v1839_v12, %v6546_v51  ;;  %v2537_v8 = vmul.f32 %v6202_v53, %v6588_v24  ;;  %v6648_v0 = vld [vmem:[#allocation2 + $0xad] sm:$0xff] }
  0xa4   : > { %9991 = vst [vmem:[#allocation45_spill] sm:$0xff] %v6627_v60  ;;  %9992 = vst [vmem:[#allocation46_spill] sm:$0xff] %v6630_v31  ;;  %v6639_v23 = vmul.f32 %v6582_v39, %v3729_v45  ;;  %v1272_v40 = vadd.f32 %v1240_v22, %v1172_v27  ;;  %v1939_v43 = vmul.f32 %v6086_v1, %v505_v7  ;;  %v393_v13 = vld [vmem:[%s9745_s1 + $0x28] sm:$0x7f] }
  0xa5   : > { %9993 = vst [vmem:[#allocation47_spill] sm:$0xff] %v6633_v46  ;;  %v3236_v19 = vmul.f32 %v6389_v52, %v6588_v24  ;;  %v3667_v60 = vadd.f32 %v3635_v57, %v3567_v15  ;;  %v6645_v59 = vmul.f32 %v6586_v28, %v3828_v48  ;;  %v641_v63 = vmul.f32 %v9962_v5, %v605_v35  ;;  %v705_v45 = vld [vmem:[#allocation2 + $0xa8] sm:$0xff] }
  0xa6   : > { %9994 = vst [vmem:[#allocation48_spill] sm:$0xff] %v6639_v23  ;;  %v2569_v51 = vadd.f32 %v2537_v8, %v2469_v16  ;;  %v1340_v27 = vmul.f32 %v9952_v3, %v605_v35  ;;  %v1971_v12 = vadd.f32 %v1939_v43, %v1871_v36  ;;  %v2637_v22 = vmul.f32 %v6224_v18, %v505_v7  ;;  %v336_v43 = vld [vmem:[%s5854_s21 + $0x68] sm:$0xff] }
  0xa7   : > { %9995 = vst [vmem:[#allocation49_spill] sm:$0xff] %v6645_v59  ;;  %v3268_v57 = vadd.f32 %v3236_v19, %v3167_v21  ;;  %v6655_v15 = vadd.f32 %v3136_v41, %v3068_v44  ;;  %v6658_v48 = vmul.f32 %v6586_v28, %v3829_v49  ;;  %v673_v16 = vadd.f32 %v641_v63, %v573_v6  ;;  %v6661_v59 = vld [vmem:[#allocation2 + $0xae] sm:$0xff]  ;;  %v9998_v44 = vld [vmem:[#allocation3_spill] sm:$0xff] }
  0xa8   : > { %v2039_v8 = vmul.f32 %v6098_v42, %v605_v35  ;;  %v1372_v23 = vadd.f32 %v1340_v27, %v1272_v40  ;;  %v2669_v31 = vadd.f32 %v2637_v22, %v2569_v51  ;;  %v3336_v61 = vmul.f32 %v6400_v14, %v505_v7  ;;  %369 = vst.msk [vmem:[#allocation2 + $0x130] sm:$0xff] %vm233_vm0, %v336_v43  ;;  %v6678_v63 = vld [vmem:[#allocation2 + $0xaf] sm:$0xff]  ;;  %v3929_v22 = vld [vmem:[#allocation2 + $0x285] sm:$0xff] }
  0xa9   : > { %9996 = vst [vmem:[#allocation50_spill] sm:$0xff] %v6658_v48  ;;  %v442_v36 = vmul.f32 %v9986_v10, %v6648_v0  ;;  %v6667_v26 = vadd.f32 %v3735_v38, %v3667_v60  ;;  %v741_v41 = vmul.f32 %v5902_v34, %v705_v45  ;;  %v1440_v21 = vmul.f32 %v9955_v11, %v705_v45 }
  0xaa   : > { %v6672_v6 = vrot.slane %v393_v13, %v9998_v44  ;;  %v2071_v49 = vadd.f32 %v2039_v8, %v1971_v12  ;;  %v2737_v40 = vmul.f32 %v6252_v37, %v605_v35  ;;  %v3368_v19 = vadd.f32 %v3336_v61, %v3268_v57  ;;  %v6683_v13 = vld [vmem:[#allocation2 + $0xa9] sm:$0xff] }
  0xab   : > { %9997 = vst [vmem:[#allocation51_spill] sm:$0xff] %v6667_v26  ;;  %v542_v7 = vmul.f32 %v9987_v20, %v6661_v59  ;;  %v773_v38 = vadd.f32 %v741_v41, %v673_v16  ;;  %v2139_v60 = vmul.f32 %v6101_v29, %v705_v45  ;;  %v2837_v51 = vmul.f32 %v6264_v33, %v705_v45  ;;  %v3930_v57 = vld [vmem:[#allocation2 + $0x28d] sm:$0xff]  ;;  %v10000_v16 = vld [vmem:[#allocation30_spill] sm:$0xff] }
  0xac   : > { %v3436_v27 = vmul.f32 %v6404_v54, %v605_v35  ;;  %v1472_v43 = vadd.f32 %v1440_v21, %v1372_v23  ;;  %v2769_v12 = vadd.f32 %v2737_v40, %v2669_v31  ;;  %v3536_v8 = vmul.f32 %v6416_v9, %v705_v45  ;;  %v6696_v26 = vld [vmem:[#allocation2 + $0xb0] sm:$0xff]  ;;  %v10004_v40 = vld [vmem:[#allocation14_spill] sm:$0xff] }
  0xad   : > { %v574_v61 = vadd.f32 %v542_v7, %v442_v36  ;;  %v6688_v48 = vmul.f32 %v6672_v6, %v6588_v24  ;;  %v6692_v41 = vmul.f32 %v6672_v6, %v10000_v16  ;;  %v642_v35 = vmul.f32 %v9962_v5, %v6678_v63  ;;  %v10002_v36 = vld [vmem:[#allocation31_spill] sm:$0xff]  ;;  %v6704_v24 = vld [vmem:[#allocation2 + $0xb1] sm:$0xff] }
  0xae   : > { %v1141_v31 = vmul.f32 %v5928_v50, %v6648_v0  ;;  %v2171_v23 = vadd.f32 %v2139_v60, %v2071_v49  ;;  %v3468_v45 = vadd.f32 %v3436_v27, %v3368_v19  ;;  %v6702_v21 = vmul.f32 %v6672_v6, %v10002_v36  ;;  %v6711_v44 = vld [vmem:[#allocation2 + $0xaa] sm:$0xff] }
  0xaf   : > { %9999 = vst [vmem:[#allocation52_spill] sm:$0xff] %v6688_v48  ;;  %10001 = vst [vmem:[#allocation30_spill] sm:$0xff] %v6692_v41  ;;  %v841_v7 = vmul.f32 %v10004_v40, %v6683_v13  ;;  %v6709_v16 = vmul.f32 %v6672_v6, %v3929_v22  ;;  %v674_v41 = vadd.f32 %v642_v35, %v574_v61  ;;  %v6713_v48 = vld [vmem:[#allocation2 + $0xb2] sm:$0xff] }
  0xb0   : > { %10003 = vst [vmem:[#allocation31_spill] sm:$0xff] %v6702_v21  ;;  %v1173_v49 = vadd.f32 %v1141_v31, %v6560_v30  ;;  %v1241_v19 = vmul.f32 %v5940_v55, %v6661_v59  ;;  %v2869_v60 = vadd.f32 %v2837_v51, %v2769_v12  ;;  %v6719_v27 = vmul.f32 %v6672_v6, %v3930_v57  ;;  %v6725_v61 = vld [vmem:[#allocation2 + $0xab] sm:$0xff]  ;;  %v6727_v35 = vld [vmem:[#allocation2 + $0xb3] sm:$0xff]  ;;  %v10007_v57 = vld [vmem:[#allocation15_spill] sm:$0xff] }
  0xb1   : > { %10005 = vst [vmem:[#allocation53_spill] sm:$0xff] %v6709_v16  ;;  %v742_v36 = vmul.f32 %v5902_v34, %v6696_v26  ;;  %v873_v21 = vadd.f32 %v841_v7, %v773_v38  ;;  %v842_v22 = vmul.f32 %v10004_v40, %v6704_v24  ;;  %v1341_v30 = vmul.f32 %v9952_v3, %v6678_v63 }
  0xb2   : > { %10006 = vst [vmem:[#allocation54_spill] sm:$0xff] %v6719_v27  ;;  %v1273_v16 = vadd.f32 %v1241_v19, %v1173_v49  ;;  %v1840_v51 = vmul.f32 %v6067_v2, %v6648_v0  ;;  %v6733_v12 = vadd.f32 %v3536_v8, %v3468_v45  ;;  %v941_v31 = vmul.f32 %v10007_v57, %v6711_v44  ;;  %v10008_v8 = vld [vmem:[#allocation16_spill] sm:$0xff] }
  0xb3   : > { %v942_v38 = vmul.f32 %v10007_v57, %v6713_v48  ;;  %v1540_v7 = vmul.f32 %v5981_v47, %v6683_v13  ;;  %v774_v27 = vadd.f32 %v742_v36, %v674_v41  ;;  %v1940_v19 = vmul.f32 %v6086_v1, %v6661_v59  ;;  %v10009_v36 = vld [vmem:[#allocation21_spill] sm:$0xff] }
  0xb4   : > { %v1373_v46 = vadd.f32 %v1341_v30, %v1273_v16  ;;  %v1872_v49 = vadd.f32 %v1840_v51, %v6576_v58  ;;  %v973_v40 = vadd.f32 %v941_v31, %v873_v21  ;;  %v1041_v45 = vmul.f32 %v10008_v8, %v6725_v61 }
  0xb5   : > { %v1042_v3 = vmul.f32 %v10008_v8, %v6727_v35  ;;  %v1441_v57 = vmul.f32 %v9955_v11, %v6696_v26  ;;  %v1572_v34 = vadd.f32 %v1540_v7, %v1472_v43  ;;  %v2040_v41 = vmul.f32 %v6098_v42, %v6678_v63 }
  0xb6   : > { %v1972_v55 = vadd.f32 %v1940_v19, %v1872_v49  ;;  %v2239_v58 = vmul.f32 %v6131_v56, %v6683_v13  ;;  %v1541_v21 = vmul.f32 %v5981_v47, %v6704_v24  ;;  %v1640_v30 = vmul.f32 %v10009_v36, %v6711_v44 }
  0xb7   : > { %v1473_v16 = vadd.f32 %v1441_v57, %v1373_v46  ;;  %v2538_v51 = vmul.f32 %v6202_v53, %v6648_v0  ;;  %v874_v31 = vadd.f32 %v842_v22, %v774_v27  ;;  %v2140_v43 = vmul.f32 %v6101_v29, %v6696_v26 }
  0xb8   : > { %v2072_v8 = vadd.f32 %v2040_v41, %v1972_v55  ;;  %v2271_v7 = vadd.f32 %v2239_v58, %v2171_v23  ;;  %v1641_v49 = vmul.f32 %v10009_v36, %v6713_v48  ;;  %v1740_v46 = vmul.f32 %v6064_v32, %v6725_v61 }
  0xb9   : > { %v2570_v57 = vadd.f32 %v2538_v51, %v6596_v62  ;;  %v2638_v19 = vmul.f32 %v6224_v18, %v6661_v59  ;;  %v1672_v47 = vadd.f32 %v1640_v30, %v1572_v34  ;;  %v2339_v55 = vmul.f32 %v6134_v25, %v6711_v44 }
  0xba   : > { %v2172_v42 = vadd.f32 %v2140_v43, %v2072_v8  ;;  %v2937_v27 = vmul.f32 %v6318_v17, %v6683_v13  ;;  %v1573_v23 = vadd.f32 %v1541_v21, %v1473_v16  ;;  %v2240_v22 = vmul.f32 %v6131_v56, %v6704_v24 }
  0xbb   : > { %v2670_v41 = vadd.f32 %v2638_v19, %v2570_v57  ;;  %v2738_v58 = vmul.f32 %v6252_v37, %v6678_v63  ;;  %v974_v62 = vadd.f32 %v942_v38, %v874_v31  ;;  %v1073_v51 = vadd.f32 %v1041_v45, %v973_v40  ;;  %v10010_v57 = vld [vmem:[#allocation27_spill] sm:$0xff]  ;;  %v10011_v38 = vld [vmem:[#allocation25_spill] sm:$0xff] }
  0xbc   : > { %v2371_v36 = vadd.f32 %v2339_v55, %v2271_v7  ;;  %v2969_v29 = vadd.f32 %v2937_v27, %v2869_v60  ;;  %v1741_v34 = vmul.f32 %v6064_v32, %v6727_v35  ;;  %v2272_v8 = vadd.f32 %v2240_v22, %v2172_v42  ;;  %v6792_v7 = vld [vmem:[#allocation2 + $0xc5] sm:$0xff] }
  0xbd   : > { %v2770_v30 = vadd.f32 %v2738_v58, %v2670_v41  ;;  %v3237_v43 = vmul.f32 %v6389_v52, %v6648_v0  ;;  %v1772_v16 = vadd.f32 %v1740_v46, %v1672_v47  ;;  %v2340_v21 = vmul.f32 %v6134_v25, %v6713_v48  ;;  %v6794_v47 = vld [vmem:[#allocation2 + $0xc6] sm:$0xff] }
  0xbe   : > { %v2439_v19 = vmul.f32 %v10010_v57, %v6725_v61  ;;  %v3037_v40 = vmul.f32 %v10011_v38, %v6711_v44  ;;  %v1673_v45 = vadd.f32 %v1641_v49, %v1573_v23  ;;  %v2838_v60 = vmul.f32 %v6264_v33, %v6696_v26 }
  0xbf   : > { %v3269_v42 = vadd.f32 %v3237_v43, %v6655_v15  ;;  %v3337_v31 = vmul.f32 %v6400_v14, %v6661_v59  ;;  %v6796_v46 = vadd.f32 %v1042_v3, %v974_v62  ;;  %v2440_v55 = vmul.f32 %v10010_v57, %v6727_v35  ;;  %v10012_v59 = vld [vmem:[#allocation28_spill] sm:$0xff] }
  0xc0   : > { %v2471_v27 = vadd.f32 %v2439_v19, %v2371_v36  ;;  %v3069_v49 = vadd.f32 %v3037_v40, %v2969_v29  ;;  %v2372_v23 = vadd.f32 %v2340_v21, %v2272_v8  ;;  %v2870_v22 = vadd.f32 %v2838_v60, %v2770_v30  ;;  %v337_v30 = vld [vmem:[%s5854_s21 + $0x70] sm:$0xff] }
  0xc1   : > { %v3369_v41 = vadd.f32 %v3337_v31, %v3269_v42  ;;  %v3437_v15 = vmul.f32 %v6404_v54, %v6678_v63  ;;  %v3137_v58 = vmul.f32 %v10012_v59, %v6725_v61  ;;  %v3636_v43 = vmul.f32 %v6568_v4, %v6683_v13  ;;  %370 = vst.msk [vmem:[#allocation2 + $0x148] sm:$0xff] %vm233_vm0, %v337_v30  ;;  %v607_v42 = vld [vmem:[#allocation2 + $0xc7] sm:$0xff] }
  0xc2   : > { %v443_v3 = vmul.f32 %v9986_v10, %v6792_v7  ;;  %v543_v62 = vmul.f32 %v9987_v20, %v6794_v47  ;;  %v6810_v36 = vadd.f32 %v1741_v34, %v1673_v45  ;;  %v2938_v29 = vmul.f32 %v6318_v17, %v6704_v24  ;;  %v6856_v30 = vld [vmem:[#allocation2 + $0xce] sm:$0xff] }
  0xc3   : > { %v3038_v63 = vmul.f32 %v10011_v38, %v6713_v48  ;;  %v3469_v8 = vadd.f32 %v3437_v15, %v3369_v41  ;;  %v3138_v21 = vmul.f32 %v10012_v59, %v6727_v35  ;;  %v3169_v13 = vadd.f32 %v3137_v58, %v3069_v49 }
  0xc4   : > { %v3537_v19 = vmul.f32 %v6416_v9, %v6696_v26  ;;  %v3668_v40 = vadd.f32 %v3636_v43, %v6733_v12  ;;  %v6823_v34 = vadd.f32 %v2440_v55, %v2372_v23  ;;  %v2970_v45 = vadd.f32 %v2938_v29, %v2870_v22 }
  0xc5   : > { %v3637_v60 = vmul.f32 %v6568_v4, %v6704_v24  ;;  %v1142_v31 = vmul.f32 %v5928_v50, %v6792_v7  ;;  %v3736_v49 = vmul.f32 %v6582_v39, %v6711_v44  ;;  %v3737_v26 = vmul.f32 %v6582_v39, %v6713_v48  ;;  %v707_v24 = vld [vmem:[#allocation2 + $0xc8] sm:$0xff] }
  0xc6   : > { %v575_v41 = vadd.f32 %v543_v62, %v443_v3  ;;  %v1841_v12 = vmul.f32 %v6067_v2, %v6792_v7  ;;  %v3569_v55 = vadd.f32 %v3537_v19, %v3469_v8  ;;  %v6837_v23 = vmul.f32 %v6586_v28, %v6725_v61  ;;  %v10017_v61 = vld [vmem:[#allocation17_spill] sm:$0xff]  ;;  %v10022_v39 = vld [vmem:[#allocation24_spill] sm:$0xff] }
  0xc7   : > { %v1174_v22 = vadd.f32 %v1142_v31, %v1073_v51  ;;  %v2539_v15 = vmul.f32 %v6202_v53, %v6792_v7  ;;  %v6841_v58 = vadd.f32 %v3736_v49, %v3668_v40  ;;  %v6845_v44 = vmul.f32 %v6586_v28, %v6727_v35  ;;  %v6854_v8 = vld [vmem:[#allocation2 + $0xcd] sm:$0xff]  ;;  %v10019_v31 = vld [vmem:[#allocation18_spill] sm:$0xff] }
  0xc8   : > { %10013 = vst [vmem:[#allocation55_spill] sm:$0xff] %v6837_v23  ;;  %v643_v48 = vmul.f32 %v9962_v5, %v607_v42  ;;  %v1873_v43 = vadd.f32 %v1841_v12, %v1772_v16  ;;  %v3070_v3 = vadd.f32 %v3038_v63, %v2970_v45  ;;  %v6850_v62 = vmul.f32 %v6672_v6, %v6648_v0  ;;  %v10018_v35 = vld [vmem:[#allocation13_spill] sm:$0xff]  ;;  %v338_v23 = vld [vmem:[%s5854_s21 + $0x78] sm:$0xff] }
  0xc9   : > { %10014 = vst [vmem:[#allocation56_spill] sm:$0xff] %v6841_v58  ;;  %10015 = vst [vmem:[#allocation57_spill] sm:$0xff] %v6845_v44  ;;  %v1242_v51 = vmul.f32 %v10017_v61, %v6794_v47  ;;  %v2571_v29 = vadd.f32 %v2539_v15, %v2471_v27  ;;  %v743_v40 = vmul.f32 %v10018_v35, %v707_v24  ;;  %v6866_v12 = vld [vmem:[#allocation2 + $0xcf] sm:$0xff] }
  0xca   : > { %10016 = vst [vmem:[#allocation58_spill] sm:$0xff] %v6850_v62  ;;  %v675_v19 = vadd.f32 %v643_v48, %v575_v41  ;;  %v1941_v16 = vmul.f32 %v6086_v1, %v6794_v47  ;;  %v3238_v63 = vmul.f32 %v6389_v52, %v6792_v7  ;;  %v3669_v0 = vadd.f32 %v3637_v60, %v3569_v55  ;;  %v10020_v55 = vld [vmem:[#allocation23_spill] sm:$0xff]  ;;  %v6877_v62 = vld [vmem:[#allocation2 + $0xc9] sm:$0xff] }
  0xcb   : > { %v1274_v45 = vadd.f32 %v1242_v51, %v1174_v22  ;;  %v1342_v49 = vmul.f32 %v10019_v31, %v607_v42  ;;  %v2639_v27 = vmul.f32 %v6224_v18, %v6794_v47  ;;  %v444_v41 = vmul.f32 %v9986_v10, %v6854_v8  ;;  %371 = vst.msk [vmem:[#allocation2 + $0x150] sm:$0xff] %vm233_vm0, %v338_v23  ;;  %v6884_v28 = vld [vmem:[#allocation2 + $0xd0] sm:$0xff] }
  0xcc   : > { %v1973_v15 = vadd.f32 %v1941_v16, %v1873_v43  ;;  %v3270_v44 = vadd.f32 %v3238_v63, %v3169_v13  ;;  %v544_v48 = vmul.f32 %v9987_v20, %v6856_v30  ;;  %v6873_v58 = vadd.f32 %v3138_v21, %v3070_v3 }
  0xcd   : > { %v1442_v60 = vmul.f32 %v9955_v11, %v707_v24  ;;  %v2041_v22 = vmul.f32 %v10020_v55, %v607_v42  ;;  %v2671_v51 = vadd.f32 %v2639_v27, %v2571_v29  ;;  %v775_v43 = vadd.f32 %v743_v40, %v675_v19  ;;  %v10023_v19 = vld [vmem:[#allocation14_spill] sm:$0xff] }
  0xce   : > { %v3338_v13 = vmul.f32 %v6400_v14, %v6794_v47  ;;  %v576_v16 = vadd.f32 %v544_v48, %v444_v41  ;;  %v644_v63 = vmul.f32 %v9962_v5, %v6866_v12  ;;  %v6886_v21 = vadd.f32 %v3737_v26, %v3669_v0  ;;  %v6895_v5 = vld [vmem:[#allocation2 + $0xd1] sm:$0xff] }
  0xcf   : > { %v1374_v3 = vadd.f32 %v1342_v49, %v1274_v45  ;;  %v2141_v4 = vmul.f32 %v10022_v39, %v707_v24  ;;  %v2739_v29 = vmul.f32 %v6252_v37, %v607_v42  ;;  %v2073_v27 = vadd.f32 %v2041_v22, %v1973_v15  ;;  %v6897_v26 = vld [vmem:[#allocation2 + $0xca] sm:$0xff] }
  0xd0   : > { %10021 = vst [vmem:[#allocation59_spill] sm:$0xff] %v6886_v21  ;;  %v3370_v20 = vadd.f32 %v3338_v13, %v3270_v44  ;;  %v676_v23 = vadd.f32 %v644_v63, %v576_v16  ;;  %v843_v40 = vmul.f32 %v10023_v19, %v6877_v62  ;;  %v2839_v41 = vmul.f32 %v6264_v33, %v707_v24  ;;  %v6907_v13 = vld [vmem:[#allocation2 + $0xd2] sm:$0xff] }
  0xd1   : > { %v2771_v47 = vadd.f32 %v2739_v29, %v2671_v51  ;;  %v744_v48 = vmul.f32 %v10018_v35, %v6884_v28  ;;  %v1143_v0 = vmul.f32 %v5928_v50, %v6854_v8  ;;  %v3438_v45 = vmul.f32 %v6404_v54, %v607_v42  ;;  %v6909_v16 = vld [vmem:[#allocation2 + $0xcb] sm:$0xff] }
  0xd2   : > { %v3538_v44 = vmul.f32 %v6416_v9, %v707_v24  ;;  %v6905_v49 = vmul.f32 %v6672_v6, %v6792_v7  ;;  %v875_v15 = vadd.f32 %v843_v40, %v775_v43  ;;  %v1474_v22 = vadd.f32 %v1442_v60, %v1374_v3  ;;  %v10025_v7 = vld [vmem:[#allocation15_spill] sm:$0xff]  ;;  %v6918_v60 = vld [vmem:[#allocation2 + $0xd3] sm:$0xff] }
  0xd3   : > { %v776_v51 = vadd.f32 %v744_v48, %v676_v23  ;;  %v1175_v63 = vadd.f32 %v1143_v0, %v6796_v46  ;;  %v1243_v29 = vmul.f32 %v10017_v61, %v6856_v30  ;;  %v2173_v21 = vadd.f32 %v2141_v4, %v2073_v27  ;;  %v10026_v27 = vld [vmem:[#allocation16_spill] sm:$0xff] }
  0xd4   : > { %10024 = vst [vmem:[#allocation60_spill] sm:$0xff] %v6905_v49  ;;  %v3470_v42 = vadd.f32 %v3438_v45, %v3370_v20  ;;  %v844_v24 = vmul.f32 %v10023_v19, %v6895_v5  ;;  %v943_v49 = vmul.f32 %v10025_v7, %v6897_v26  ;;  %v2871_v43 = vadd.f32 %v2839_v41, %v2771_v47  ;;  %v10027_v48 = vld [vmem:[#allocation20_spill] sm:$0xff] }
  0xd5   : > { %v1275_v3 = vadd.f32 %v1243_v29, %v1175_v63  ;;  %v1343_v23 = vmul.f32 %v10019_v31, %v6866_v12  ;;  %v1842_v46 = vmul.f32 %v6067_v2, %v6854_v8  ;;  %v944_v4 = vmul.f32 %v10025_v7, %v6907_v13 }
  0xd6   : > { %v975_v20 = vadd.f32 %v943_v49, %v875_v15  ;;  %v1043_v40 = vmul.f32 %v10026_v27, %v6909_v16  ;;  %v1542_v0 = vmul.f32 %v10027_v48, %v6877_v62  ;;  %v876_v47 = vadd.f32 %v844_v24, %v776_v51  ;;  %v10028_v51 = vld [vmem:[#allocation21_spill] sm:$0xff] }
  0xd7   : > { %v1375_v41 = vadd.f32 %v1343_v23, %v1275_v3  ;;  %v1874_v45 = vadd.f32 %v1842_v46, %v6810_v36  ;;  %v1942_v63 = vmul.f32 %v6086_v1, %v6856_v30  ;;  %v6933_v29 = vadd.f32 %v3538_v44, %v3470_v42 }
  0xd8   : > { %v1044_v19 = vmul.f32 %v10026_v27, %v6918_v60  ;;  %v1443_v49 = vmul.f32 %v9955_v11, %v6884_v28  ;;  %v1574_v15 = vadd.f32 %v1542_v0, %v1474_v22  ;;  %v1543_v7 = vmul.f32 %v10027_v48, %v6895_v5 }
  0xd9   : > { %v1642_v24 = vmul.f32 %v10028_v51, %v6897_v26  ;;  %v1974_v3 = vadd.f32 %v1942_v63, %v1874_v45  ;;  %v2042_v36 = vmul.f32 %v10020_v55, %v6866_v12  ;;  %v1643_v44 = vmul.f32 %v10028_v51, %v6907_v13 }
  0xda   : > { %v1475_v23 = vadd.f32 %v1443_v49, %v1375_v41  ;;  %v2241_v42 = vmul.f32 %v6131_v56, %v6877_v62  ;;  %v2540_v22 = vmul.f32 %v6202_v53, %v6854_v8  ;;  %v976_v46 = vadd.f32 %v944_v4, %v876_v47 }
  0xdb   : > { %v6951_v0 = vadd.f32 %v1043_v40, %v975_v20  ;;  %v2074_v48 = vadd.f32 %v2042_v36, %v1974_v3  ;;  %v2142_v45 = vmul.f32 %v10022_v39, %v6884_v28  ;;  %v1674_v63 = vadd.f32 %v1642_v24, %v1574_v15 }
  0xdc   : > { %v2273_v27 = vadd.f32 %v2241_v42, %v2173_v21  ;;  %v2572_v41 = vadd.f32 %v2540_v22, %v6823_v34  ;;  %v2640_v49 = vmul.f32 %v6224_v18, %v6856_v30  ;;  %v1742_v51 = vmul.f32 %v6064_v32, %v6909_v16 }
  0xdd   : > { %v1743_v55 = vmul.f32 %v6064_v32, %v6918_v60  ;;  %v2174_v4 = vadd.f32 %v2142_v45, %v2074_v48  ;;  %v2939_v20 = vmul.f32 %v6318_v17, %v6877_v62  ;;  %v1575_v40 = vadd.f32 %v1543_v7, %v1475_v23 }
  0xde   : > { %v2341_v47 = vmul.f32 %v6134_v25, %v6897_v26  ;;  %v2672_v21 = vadd.f32 %v2640_v49, %v2572_v41  ;;  %v2740_v34 = vmul.f32 %v6252_v37, %v6866_v12  ;;  %v6968_v15 = vadd.f32 %v1044_v19, %v976_v46  ;;  %v6981_v41 = vld [vmem:[#allocation2 + $0xe5] sm:$0xff] }
  0xdf   : > { %v2242_v24 = vmul.f32 %v6131_v56, %v6895_v5  ;;  %v2971_v3 = vadd.f32 %v2939_v20, %v2871_v43  ;;  %v3239_v48 = vmul.f32 %v6389_v52, %v6854_v8  ;;  %v1774_v36 = vadd.f32 %v1742_v51, %v1674_v63  ;;  %v6989_v49 = vld [vmem:[#allocation2 + $0xe6] sm:$0xff] }
  0xe0   : > { %v2373_v42 = vadd.f32 %v2341_v47, %v2273_v27  ;;  %v2772_v22 = vadd.f32 %v2740_v34, %v2672_v21  ;;  %v2840_v7 = vmul.f32 %v6264_v33, %v6884_v28  ;;  %v3039_v45 = vmul.f32 %v10011_v38, %v6897_v26 }
  0xe1   : > { %v2274_v23 = vadd.f32 %v2242_v24, %v2174_v4  ;;  %v3271_v19 = vadd.f32 %v3239_v48, %v6873_v58  ;;  %v3339_v46 = vmul.f32 %v6400_v14, %v6856_v30  ;;  %v1675_v43 = vadd.f32 %v1643_v44, %v1575_v40 }
  0xe2   : > { %v2342_v51 = vmul.f32 %v6134_v25, %v6907_v13  ;;  %v2441_v27 = vmul.f32 %v10010_v57, %v6909_v16  ;;  %v2442_v63 = vmul.f32 %v10010_v57, %v6918_v60  ;;  %v2872_v4 = vadd.f32 %v2840_v7, %v2772_v22  ;;  %v609_v57 = vld [vmem:[#allocation2 + $0xe7] sm:$0xff] }
  0xe3   : > { %v2940_v58 = vmul.f32 %v6318_v17, %v6895_v5  ;;  %v3071_v30 = vadd.f32 %v3039_v45, %v2971_v3  ;;  %v3371_v20 = vadd.f32 %v3339_v46, %v3271_v19  ;;  %v3040_v44 = vmul.f32 %v10011_v38, %v6907_v13  ;;  %v10029_v3 = vld [vmem:[#allocation7_spill] sm:$0xff]  ;;  %v10030_v19 = vld [vmem:[#allocation29_spill] sm:$0xff] }
  0xe4   : > { %v2473_v47 = vadd.f32 %v2441_v27, %v2373_v42  ;;  %v3139_v40 = vmul.f32 %v10012_v59, %v6909_v16  ;;  %v445_v21 = vmul.f32 %v9986_v10, %v6981_v41  ;;  %v2374_v34 = vadd.f32 %v2342_v51, %v2274_v23  ;;  %v339_v42 = vld [vmem:[%s5854_s21 + $0x80] sm:$0xff] }
  0xe5   : > { %v3140_v24 = vmul.f32 %v10012_v59, %v6918_v60  ;;  %v3439_v48 = vmul.f32 %v6404_v54, %v6866_v12  ;;  %v545_v22 = vmul.f32 %v10029_v3, %v6989_v49  ;;  %v7006_v7 = vadd.f32 %v1743_v55, %v1675_v43  ;;  %372 = vst.msk [vmem:[#allocation2 + $0x168] sm:$0xff] %vm233_vm0, %v339_v42  ;;  %v10031_v59 = vld [vmem:[#allocation40_spill] sm:$0xff] }
  0xe6   : > { %v3539_v45 = vmul.f32 %v6416_v9, %v6884_v28  ;;  %v3638_v46 = vmul.f32 %v10030_v19, %v6877_v62  ;;  %v3639_v23 = vmul.f32 %v10030_v19, %v6895_v5  ;;  %v2972_v51 = vadd.f32 %v2940_v58, %v2872_v4  ;;  %v10032_v58 = vld [vmem:[#allocation41_spill] sm:$0xff] }
  0xe7   : > { %v3171_v27 = vadd.f32 %v3139_v40, %v3071_v30  ;;  %v3471_v12 = vadd.f32 %v3439_v48, %v3371_v20  ;;  %v3738_v38 = vmul.f32 %v10031_v59, %v6897_v26  ;;  %v3739_v55 = vmul.f32 %v10031_v59, %v6907_v13  ;;  %v10035_v13 = vld [vmem:[#allocation11_spill] sm:$0xff]  ;;  %v709_v40 = vld [vmem:[#allocation2 + $0xe8] sm:$0xff]  ;;  %v7078_v59 = vld [vmem:[#allocation2 + $0xf0] sm:$0xff] }
  0xe8   : > { %v577_v43 = vadd.f32 %v545_v22, %v445_v21  ;;  %v1144_v28 = vmul.f32 %v5928_v50, %v6981_v41  ;;  %v1843_v62 = vmul.f32 %v6067_v2, %v6981_v41  ;;  %v7023_v5 = vadd.f32 %v2442_v63, %v2374_v34 }
  0xe9   : > { %v3670_v4 = vadd.f32 %v3638_v46, %v6933_v29  ;;  %v7028_v30 = vmul.f32 %v10032_v58, %v6909_v16  ;;  %v7032_v26 = vmul.f32 %v10032_v58, %v6918_v60  ;;  %v645_v20 = vmul.f32 %v10035_v13, %v609_v57 }
  0xea   : > { %v1176_v21 = vadd.f32 %v1144_v28, %v6951_v0  ;;  %v1875_v48 = vadd.f32 %v1843_v62, %v1774_v36  ;;  %v2541_v63 = vmul.f32 %v6202_v53, %v6981_v41  ;;  %v3072_v34 = vadd.f32 %v3040_v44, %v2972_v51  ;;  %v7048_v36 = vld [vmem:[#allocation2 + $0xed] sm:$0xff] }
  0xeb   : > { %10033 = vst [vmem:[#allocation61_spill] sm:$0xff] %v7028_v30  ;;  %10034 = vst [vmem:[#allocation62_spill] sm:$0xff] %v7032_v26  ;;  %v3571_v22 = vadd.f32 %v3539_v45, %v3471_v12  ;;  %v7040_v29 = vmul.f32 %v6672_v6, %v6854_v8  ;;  %v1244_v16 = vmul.f32 %v10017_v61, %v6989_v49  ;;  %v7050_v44 = vld [vmem:[#allocation2 + $0xee] sm:$0xff] }
  0xec   : > { %v677_v60 = vadd.f32 %v645_v20, %v577_v43  ;;  %v1943_v42 = vmul.f32 %v6086_v1, %v6989_v49  ;;  %v2573_v46 = vadd.f32 %v2541_v63, %v2473_v47  ;;  %v3240_v0 = vmul.f32 %v6389_v52, %v6981_v41  ;;  %v7059_v20 = vld [vmem:[#allocation2 + $0xef] sm:$0xff] }
  0xed   : > { %10036 = vst [vmem:[#allocation63_spill] sm:$0xff] %v7040_v29  ;;  %v7052_v45 = vadd.f32 %v3738_v38, %v3670_v4  ;;  %v745_v8 = vmul.f32 %v10018_v35, %v709_v40  ;;  %v1344_v51 = vmul.f32 %v10019_v31, %v609_v57  ;;  %v1444_v12 = vmul.f32 %v9955_v11, %v709_v40  ;;  %v340_v63 = vld [vmem:[%s5854_s21 + $0x88] sm:$0xff] }
  0xee   : > { %v1276_v43 = vadd.f32 %v1244_v16, %v1176_v21  ;;  %v1975_v28 = vadd.f32 %v1943_v42, %v1875_v48  ;;  %v2641_v47 = vmul.f32 %v6224_v18, %v6989_v49  ;;  %v3272_v62 = vadd.f32 %v3240_v0, %v3171_v27  ;;  %373 = vst.msk [vmem:[#allocation2 + $0x170] sm:$0xff] %vm233_vm0, %v340_v63  ;;  %v10038_v48 = vld [vmem:[#allocation23_spill] sm:$0xff]  ;;  %v7085_v63 = vld [vmem:[#allocation2 + $0xea] sm:$0xff] }
  0xef   : > { %10037 = vst [vmem:[#allocation64_spill] sm:$0xff] %v7052_v45  ;;  %v7062_v26 = vadd.f32 %v3140_v24, %v3072_v34  ;;  %v3671_v30 = vadd.f32 %v3639_v23, %v3571_v22  ;;  %v446_v38 = vmul.f32 %v9986_v10, %v7048_v36  ;;  %v546_v4 = vmul.f32 %v10029_v3, %v7050_v44  ;;  %v7068_v45 = vld [vmem:[#allocation2 + $0xe9] sm:$0xff] }
  0xf0   : > { %v777_v21 = vadd.f32 %v745_v8, %v677_v60  ;;  %v2043_v16 = vmul.f32 %v10038_v48, %v609_v57  ;;  %v2673_v27 = vadd.f32 %v2641_v47, %v2573_v46  ;;  %v3340_v42 = vmul.f32 %v6400_v14, %v6989_v49  ;;  %v10039_v60 = vld [vmem:[#allocation14_spill] sm:$0xff] }
  0xf1   : > { %v2143_v24 = vmul.f32 %v10022_v39, %v709_v40  ;;  %v2741_v23 = vmul.f32 %v6252_v37, %v609_v57  ;;  %v578_v34 = vadd.f32 %v546_v4, %v446_v38  ;;  %v646_v22 = vmul.f32 %v10035_v13, %v7059_v20 }
  0xf2   : > { %v1376_v0 = vadd.f32 %v1344_v51, %v1276_v43  ;;  %v2075_v29 = vadd.f32 %v2043_v16, %v1975_v28  ;;  %v3372_v58 = vadd.f32 %v3340_v42, %v3272_v62  ;;  %v845_v8 = vmul.f32 %v10039_v60, %v7068_v45  ;;  %v7091_v28 = vld [vmem:[#allocation2 + $0xf1] sm:$0xff] }
  0xf3   : > { %v7082_v46 = vadd.f32 %v3739_v55, %v3671_v30  ;;  %v2841_v49 = vmul.f32 %v6264_v33, %v709_v40  ;;  %v678_v47 = vadd.f32 %v646_v22, %v578_v34  ;;  %v1145_v38 = vmul.f32 %v5928_v50, %v7048_v36  ;;  %v7099_v16 = vld [vmem:[#allocation2 + $0xf2] sm:$0xff]  ;;  %v10042_v34 = vld [vmem:[#allocation15_spill] sm:$0xff] }
  0xf4   : > { %v2773_v4 = vadd.f32 %v2741_v23, %v2673_v27  ;;  %v3440_v51 = vmul.f32 %v6404_v54, %v609_v57  ;;  %v3540_v43 = vmul.f32 %v6416_v9, %v709_v40  ;;  %v877_v62 = vadd.f32 %v845_v8, %v777_v21  ;;  %v7106_v22 = vld [vmem:[#allocation2 + $0xeb] sm:$0xff] }
  0xf5   : > { %10040 = vst [vmem:[#allocation65_spill] sm:$0xff] %v7082_v46  ;;  %v7095_v55 = vmul.f32 %v6672_v6, %v6981_v41  ;;  %v746_v30 = vmul.f32 %v10018_v35, %v7078_v59  ;;  %v1177_v42 = vadd.f32 %v1145_v38, %v6968_v15  ;;  %v1245_v27 = vmul.f32 %v10017_v61, %v7050_v44  ;;  %v7108_v41 = vld [vmem:[#allocation2 + $0xf3] sm:$0xff] }
  0xf6   : > { %v1476_v57 = vadd.f32 %v1444_v12, %v1376_v0  ;;  %v2175_v23 = vadd.f32 %v2143_v24, %v2075_v29  ;;  %v3472_v40 = vadd.f32 %v3440_v51, %v3372_v58  ;;  %v945_v21 = vmul.f32 %v10042_v34, %v7085_v63  ;;  %v10043_v24 = vld [vmem:[#allocation16_spill] sm:$0xff] }
  0xf7   : > { %10041 = vst [vmem:[#allocation66_spill] sm:$0xff] %v7095_v55  ;;  %v778_v8 = vadd.f32 %v746_v30, %v678_v47  ;;  %v846_v46 = vmul.f32 %v10039_v60, %v7091_v28  ;;  %v1277_v55 = vadd.f32 %v1245_v27, %v1177_v42  ;;  %v1345_v15 = vmul.f32 %v10019_v31, %v7059_v20 }
  0xf8   : > { %v2873_v38 = vadd.f32 %v2841_v49, %v2773_v4  ;;  %v946_v29 = vmul.f32 %v10042_v34, %v7099_v16  ;;  %v977_v58 = vadd.f32 %v945_v21, %v877_v62  ;;  %v1844_v12 = vmul.f32 %v6067_v2, %v7048_v36  ;;  %v10044_v49 = vld [vmem:[#allocation20_spill] sm:$0xff] }
  0xf9   : > { %v1045_v0 = vmul.f32 %v10043_v24, %v7106_v22  ;;  %v1046_v47 = vmul.f32 %v10043_v24, %v7108_v41  ;;  %v1377_v51 = vadd.f32 %v1345_v15, %v1277_v55  ;;  %v1445_v30 = vmul.f32 %v9955_v11, %v7078_v59  ;;  %v10045_v24 = vld [vmem:[#allocation21_spill] sm:$0xff] }
  0xfa   : > { %v7124_v42 = vadd.f32 %v3540_v43, %v3472_v40  ;;  %v1544_v4 = vmul.f32 %v10044_v49, %v7068_v45  ;;  %v1876_v62 = vadd.f32 %v1844_v12, %v7006_v7  ;;  %v1944_v27 = vmul.f32 %v6086_v1, %v7050_v44 }
  0xfb   : > { %v878_v21 = vadd.f32 %v846_v46, %v778_v8  ;;  %v1477_v34 = vadd.f32 %v1445_v30, %v1377_v51  ;;  %v1545_v60 = vmul.f32 %v10044_v49, %v7091_v28  ;;  %v2243_v55 = vmul.f32 %v6131_v56, %v7068_v45 }
  0xfc   : > { %v7135_v15 = vadd.f32 %v1045_v0, %v977_v58  ;;  %v1976_v43 = vadd.f32 %v1944_v27, %v1876_v62  ;;  %v2044_v40 = vmul.f32 %v10038_v48, %v7059_v20  ;;  %v2542_v7 = vmul.f32 %v6202_v53, %v7048_v36 }
  0xfd   : > { %v1576_v12 = vadd.f32 %v1544_v4, %v1476_v57  ;;  %v1644_v46 = vmul.f32 %v10045_v24, %v7085_v63  ;;  %v1645_v8 = vmul.f32 %v10045_v24, %v7099_v16  ;;  %v2275_v51 = vadd.f32 %v2243_v55, %v2175_v23 }
  0xfe   : > { %v2076_v30 = vadd.f32 %v2044_v40, %v1976_v43  ;;  %v2144_v58 = vmul.f32 %v10022_v39, %v7078_v59  ;;  %v2574_v0 = vadd.f32 %v2542_v7, %v7023_v5  ;;  %v2642_v62 = vmul.f32 %v6224_v18, %v7050_v44 }
  0xff   : > { %v978_v27 = vadd.f32 %v946_v29, %v878_v21  ;;  %v1577_v49 = vadd.f32 %v1545_v60, %v1477_v34  ;;  %v1744_v57 = vmul.f32 %v6064_v32, %v7106_v22  ;;  %v2343_v4 = vmul.f32 %v6134_v25, %v7085_v63  ;;  %v10046_v21 = vld [vmem:[#allocation27_spill] sm:$0xff] }
 0x100   : > { %v2176_v11 = vadd.f32 %v2144_v58, %v2076_v30  ;;  %v2674_v24 = vadd.f32 %v2642_v62, %v2574_v0  ;;  %v2742_v23 = vmul.f32 %v6252_v37, %v7059_v20  ;;  %v2941_v55 = vmul.f32 %v6318_v17, %v7068_v45 }
 0x101   : > { %v1676_v5 = vadd.f32 %v1644_v46, %v1576_v12  ;;  %v2244_v43 = vmul.f32 %v6131_v56, %v7091_v28  ;;  %v2375_v29 = vadd.f32 %v2343_v4, %v2275_v51  ;;  %v3241_v60 = vmul.f32 %v6389_v52, %v7048_v36 }
 0x102   : > { %v1745_v34 = vmul.f32 %v6064_v32, %v7108_v41  ;;  %v2443_v40 = vmul.f32 %v10046_v21, %v7106_v22  ;;  %v2774_v7 = vadd.f32 %v2742_v23, %v2674_v24  ;;  %v2973_v30 = vadd.f32 %v2941_v55, %v2873_v38  ;;  %v10047_v32 = vld [vmem:[#allocation25_spill] sm:$0xff] }
 0x103   : > { %v1677_v58 = vadd.f32 %v1645_v8, %v1577_v49  ;;  %v2276_v0 = vadd.f32 %v2244_v43, %v2176_v11  ;;  %v3273_v62 = vadd.f32 %v3241_v60, %v7062_v26  ;;  %v3341_v12 = vmul.f32 %v6400_v14, %v7050_v44  ;;  %v7179_v49 = vld [vmem:[#allocation2 + $0x105] sm:$0xff] }
 0x104   : > { %v7169_v46 = vadd.f32 %v1046_v47, %v978_v27  ;;  %v2344_v51 = vmul.f32 %v6134_v25, %v7099_v16  ;;  %v2842_v4 = vmul.f32 %v6264_v33, %v7078_v59  ;;  %v3041_v56 = vmul.f32 %v10047_v32, %v7085_v63  ;;  %v7181_v44 = vld [vmem:[#allocation2 + $0x106] sm:$0xff] }
 0x105   : > { %v1776_v24 = vadd.f32 %v1744_v57, %v1676_v5  ;;  %v2444_v11 = vmul.f32 %v10046_v21, %v7108_v41  ;;  %v2475_v38 = vadd.f32 %v2443_v40, %v2375_v29  ;;  %v3373_v26 = vadd.f32 %v3341_v12, %v3273_v62  ;;  %v10048_v29 = vld [vmem:[#allocation28_spill] sm:$0xff] }
 0x106   : > { %v2874_v47 = vadd.f32 %v2842_v4, %v2774_v7  ;;  %v2942_v8 = vmul.f32 %v6318_v17, %v7091_v28  ;;  %v3073_v27 = vadd.f32 %v3041_v56, %v2973_v30  ;;  %v3441_v23 = vmul.f32 %v6404_v54, %v7059_v20  ;;  %v341_v20 = vld [vmem:[%s5854_s21 + $0x90] sm:$0xff] }
 0x107   : > { %v7187_v55 = vadd.f32 %v1745_v34, %v1677_v58  ;;  %v2376_v57 = vadd.f32 %v2344_v51, %v2276_v0  ;;  %v3042_v5 = vmul.f32 %v10047_v32, %v7099_v16  ;;  %v3640_v43 = vmul.f32 %v10030_v19, %v7068_v45  ;;  %374 = vst.msk [vmem:[#allocation2 + $0x188] sm:$0xff] %vm233_vm0, %v341_v20 }
 0x108   : > { %v3141_v60 = vmul.f32 %v10048_v29, %v7106_v22  ;;  %v3473_v40 = vadd.f32 %v3441_v23, %v3373_v26  ;;  %v447_v7 = vmul.f32 %v9986_v10, %v7179_v49  ;;  %v547_v56 = vmul.f32 %v10029_v3, %v7181_v44  ;;  %v10049_v26 = vld [vmem:[#allocation40_spill] sm:$0xff] }
 0x109   : > { %v3142_v34 = vmul.f32 %v10048_v29, %v7108_v41  ;;  %v3541_v30 = vmul.f32 %v6416_v9, %v7078_v59  ;;  %v3672_v58 = vadd.f32 %v3640_v43, %v7124_v42  ;;  %v1146_v45 = vmul.f32 %v5928_v50, %v7179_v49  ;;  %v611_v23 = vld [vmem:[#allocation2 + $0x107] sm:$0xff] }
 0x10a   : > { %v2974_v0 = vadd.f32 %v2942_v8, %v2874_v47  ;;  %v3173_v62 = vadd.f32 %v3141_v60, %v3073_v27  ;;  %v3641_v12 = vmul.f32 %v10030_v19, %v7091_v28  ;;  %v1845_v51 = vmul.f32 %v6067_v2, %v7179_v49 }
 0x10b   : > { %v7212_v4 = vadd.f32 %v2444_v11, %v2376_v57  ;;  %v3740_v59 = vmul.f32 %v10049_v26, %v7085_v63  ;;  %v3741_v42 = vmul.f32 %v10049_v26, %v7099_v16  ;;  %v1178_v43 = vadd.f32 %v1146_v45, %v7135_v15  ;;  %v10051_v11 = vld [vmem:[#allocation41_spill] sm:$0xff] }
 0x10c   : > { %v3573_v20 = vadd.f32 %v3541_v30, %v3473_v40  ;;  %v579_v47 = vadd.f32 %v547_v56, %v447_v7  ;;  %v1877_v8 = vadd.f32 %v1845_v51, %v1776_v24  ;;  %v2543_v28 = vmul.f32 %v6202_v53, %v7179_v49  ;;  %v7236_v7 = vld [vmem:[#allocation2 + $0x10d] sm:$0xff] }
 0x10d   : > { %v7221_v27 = vadd.f32 %v3740_v59, %v3672_v58  ;;  %v7225_v57 = vmul.f32 %v10051_v11, %v7106_v22  ;;  %v7229_v63 = vmul.f32 %v10051_v11, %v7108_v41  ;;  %v1246_v16 = vmul.f32 %v10017_v61, %v7181_v44  ;;  %v7238_v56 = vld [vmem:[#allocation2 + $0x10e] sm:$0xff] }
 0x10e   : > { %v3074_v15 = vadd.f32 %v3042_v5, %v2974_v0  ;;  %v647_v60 = vmul.f32 %v10035_v13, %v611_v23  ;;  %v1945_v24 = vmul.f32 %v6086_v1, %v7181_v44  ;;  %v2575_v40 = vadd.f32 %v2543_v28, %v2475_v38  ;;  %v711_v41 = vld [vmem:[#allocation2 + $0x108] sm:$0xff] }
 0x10f   : > { %10050 = vst [vmem:[#allocation67_spill] sm:$0xff] %v7221_v27  ;;  %10052 = vst [vmem:[#allocation68_spill] sm:$0xff] %v7225_v57  ;;  %v7242_v22 = vmul.f32 %v6672_v6, %v7048_v36  ;;  %v1278_v30 = vadd.f32 %v1246_v16, %v1178_v43  ;;  %v2643_v5 = vmul.f32 %v6224_v18, %v7181_v44  ;;  %v7249_v59 = vld [vmem:[#allocation2 + $0x10f] sm:$0xff]  ;;  %v342_v16 = vld [vmem:[%s5854_s21 + $0x98] sm:$0xff] }
 0x110   : > { %10053 = vst [vmem:[#allocation69_spill] sm:$0xff] %v7229_v63  ;;  %v3242_v58 = vmul.f32 %v6389_v52, %v7179_v49  ;;  %v3673_v45 = vadd.f32 %v3641_v12, %v3573_v20  ;;  %v679_v0 = vadd.f32 %v647_v60, %v579_v47  ;;  %v1346_v38 = vmul.f32 %v10019_v31, %v611_v23 }
 0x111   : > { %10054 = vst [vmem:[#allocation70_spill] sm:$0xff] %v7242_v22  ;;  %v1977_v51 = vadd.f32 %v1945_v24, %v1877_v8  ;;  %v2675_v28 = vadd.f32 %v2643_v5, %v2575_v40  ;;  %v448_v36 = vmul.f32 %v9986_v10, %v7236_v7  ;;  %v548_v43 = vmul.f32 %v10029_v3, %v7238_v56  ;;  %v7266_v24 = vld [vmem:[#allocation2 + $0x109] sm:$0xff] }
 0x112   : > { %v3274_v63 = vadd.f32 %v3242_v58, %v3173_v62  ;;  %v7256_v57 = vadd.f32 %v3142_v34, %v3074_v15  ;;  %v747_v27 = vmul.f32 %v10018_v35, %v711_v41  ;;  %v2045_v12 = vmul.f32 %v10038_v48, %v611_v23  ;;  %375 = vst.msk [vmem:[#allocation2 + $0x190] sm:$0xff] %vm233_vm0, %v342_v16  ;;  %v10055_v15 = vld [vmem:[#allocation19_spill] sm:$0xff]  ;;  %v7270_v22 = vld [vmem:[#allocation2 + $0x110] sm:$0xff] }
 0x113   : > { %v2743_v20 = vmul.f32 %v6252_v37, %v611_v23  ;;  %v1378_v47 = vadd.f32 %v1346_v38, %v1278_v30  ;;  %v3342_v62 = vmul.f32 %v6400_v14, %v7181_v44  ;;  %v580_v8 = vadd.f32 %v548_v43, %v448_v36  ;;  %v7276_v43 = vld [vmem:[#allocation2 + $0x111] sm:$0xff] }
 0x114   : > { %v648_v60 = vmul.f32 %v10035_v13, %v7249_v59  ;;  %v779_v34 = vadd.f32 %v747_v27, %v679_v0  ;;  %v1446_v40 = vmul.f32 %v10055_v15, %v711_v41  ;;  %v2077_v5 = vadd.f32 %v2045_v12, %v1977_v51  ;;  %v10057_v27 = vld [vmem:[#allocation14_spill] sm:$0xff] }
 0x115   : > { %v2145_v58 = vmul.f32 %v10022_v39, %v711_v41  ;;  %v7272_v11 = vadd.f32 %v3741_v42, %v3673_v45  ;;  %v2775_v30 = vadd.f32 %v2743_v20, %v2675_v28  ;;  %v3374_v38 = vadd.f32 %v3342_v62, %v3274_v63  ;;  %v7289_v45 = vld [vmem:[#allocation2 + $0x10a] sm:$0xff]  ;;  %v7291_v20 = vld [vmem:[#allocation2 + $0x112] sm:$0xff] }
 0x116   : > { %v680_v16 = vadd.f32 %v648_v60, %v580_v8  ;;  %v2843_v44 = vmul.f32 %v6264_v33, %v711_v41  ;;  %v3442_v36 = vmul.f32 %v6404_v54, %v611_v23  ;;  %v847_v0 = vmul.f32 %v10057_v27, %v7266_v24  ;;  %v7293_v62 = vld [vmem:[#allocation2 + $0x10b] sm:$0xff]  ;;  %v7295_v8 = vld [vmem:[#allocation2 + $0x113] sm:$0xff] }
 0x117   : > { %10056 = vst [vmem:[#allocation71_spill] sm:$0xff] %v7272_v11  ;;  %v1147_v51 = vmul.f32 %v5928_v50, %v7236_v7  ;;  %v1478_v12 = vadd.f32 %v1446_v40, %v1378_v47  ;;  %v3542_v13 = vmul.f32 %v6416_v9, %v711_v41  ;;  %v7285_v42 = vmul.f32 %v6672_v6, %v7179_v49 }
 0x118   : > { %v748_v63 = vmul.f32 %v10018_v35, %v7270_v22  ;;  %v2177_v23 = vadd.f32 %v2145_v58, %v2077_v5  ;;  %v879_v28 = vadd.f32 %v847_v0, %v779_v34  ;;  %v1247_v41 = vmul.f32 %v10017_v61, %v7238_v56  ;;  %v10059_v5 = vld [vmem:[#allocation15_spill] sm:$0xff] }
 0x119   : > { %10058 = vst [vmem:[#allocation72_spill] sm:$0xff] %v7285_v42  ;;  %v1179_v47 = vadd.f32 %v1147_v51, %v7169_v46  ;;  %v2875_v49 = vadd.f32 %v2843_v44, %v2775_v30  ;;  %v3474_v60 = vadd.f32 %v3442_v36, %v3374_v38  ;;  %v848_v11 = vmul.f32 %v10057_v27, %v7276_v43  ;;  %v10060_v30 = vld [vmem:[#allocation16_spill] sm:$0xff] }
 0x11a   : > { %v780_v40 = vadd.f32 %v748_v63, %v680_v16  ;;  %v947_v34 = vmul.f32 %v10059_v5, %v7289_v45  ;;  %v1347_v0 = vmul.f32 %v10019_v31, %v7249_v59  ;;  %v1846_v42 = vmul.f32 %v6067_v2, %v7236_v7 }
 0x11b   : > { %v1279_v58 = vadd.f32 %v1247_v41, %v1179_v47  ;;  %v948_v46 = vmul.f32 %v10059_v5, %v7291_v20  ;;  %v1047_v38 = vmul.f32 %v10060_v30, %v7293_v62  ;;  %v1048_v16 = vmul.f32 %v10060_v30, %v7295_v8  ;;  %v10061_v5 = vld [vmem:[#allocation20_spill] sm:$0xff] }
 0x11c   : > { %v1447_v44 = vmul.f32 %v10055_v15, %v7270_v22  ;;  %v979_v36 = vadd.f32 %v947_v34, %v879_v28  ;;  %v1878_v63 = vadd.f32 %v1846_v42, %v7187_v55  ;;  %v1946_v47 = vmul.f32 %v6086_v1, %v7238_v56  ;;  %v10062_v34 = vld [vmem:[#allocation26_spill] sm:$0xff] }
 0x11d   : > { %v1379_v51 = vadd.f32 %v1347_v0, %v1279_v58  ;;  %v7319_v41 = vadd.f32 %v3542_v13, %v3474_v60  ;;  %v880_v27 = vadd.f32 %v848_v11, %v780_v40  ;;  %v1546_v31 = vmul.f32 %v10061_v5, %v7266_v24  ;;  %v10063_v58 = vld [vmem:[#allocation21_spill] sm:$0xff] }
 0x11e   : > { %v1547_v35 = vmul.f32 %v10061_v5, %v7276_v43  ;;  %v1978_v61 = vadd.f32 %v1946_v47, %v1878_v63  ;;  %v2046_v28 = vmul.f32 %v10038_v48, %v7249_v59  ;;  %v2245_v55 = vmul.f32 %v10062_v34, %v7266_v24  ;;  %v10064_v47 = vld [vmem:[#allocation22_spill] sm:$0xff] }
 0x11f   : > { %v1479_v30 = vadd.f32 %v1447_v44, %v1379_v51  ;;  %v1578_v42 = vadd.f32 %v1546_v31, %v1478_v12  ;;  %v1646_v13 = vmul.f32 %v10063_v58, %v7289_v45  ;;  %v1647_v11 = vmul.f32 %v10063_v58, %v7291_v20 }
 0x120   : > { %v2544_v60 = vmul.f32 %v6202_v53, %v7236_v7  ;;  %v7335_v40 = vadd.f32 %v1047_v38, %v979_v36  ;;  %v2078_v0 = vadd.f32 %v2046_v28, %v1978_v61  ;;  %v2146_v44 = vmul.f32 %v10022_v39, %v7270_v22 }
 0x121   : > { %v2277_v51 = vadd.f32 %v2245_v55, %v2177_v23  ;;  %v980_v63 = vadd.f32 %v948_v46, %v880_v27  ;;  %v1746_v31 = vmul.f32 %v10064_v47, %v7293_v62  ;;  %v2644_v5 = vmul.f32 %v6224_v18, %v7238_v56 }
 0x122   : > { %v2576_v12 = vadd.f32 %v2544_v60, %v7212_v4  ;;  %v1579_v58 = vadd.f32 %v1547_v35, %v1479_v30  ;;  %v2178_v48 = vadd.f32 %v2146_v44, %v2078_v0  ;;  %v2345_v38 = vmul.f32 %v6134_v25, %v7289_v45 }
 0x123   : > { %v2943_v61 = vmul.f32 %v6318_v17, %v7266_v24  ;;  %v1678_v36 = vadd.f32 %v1646_v13, %v1578_v42  ;;  %v1747_v27 = vmul.f32 %v10064_v47, %v7295_v8  ;;  %v2744_v46 = vmul.f32 %v6252_v37, %v7249_v59 }
 0x124   : > { %v2676_v23 = vadd.f32 %v2644_v5, %v2576_v12  ;;  %v2246_v4 = vmul.f32 %v10062_v34, %v7276_v43  ;;  %v2377_v28 = vadd.f32 %v2345_v38, %v2277_v51  ;;  %v3243_v30 = vmul.f32 %v6389_v52, %v7236_v7 }
 0x125   : > { %v2975_v35 = vadd.f32 %v2943_v61, %v2875_v49  ;;  %v7356_v55 = vadd.f32 %v1048_v16, %v980_v63  ;;  %v2445_v42 = vmul.f32 %v10046_v21, %v7293_v62  ;;  %v2844_v5 = vmul.f32 %v6264_v33, %v7270_v22  ;;  %v7365_v49 = vld [vmem:[#allocation2 + $0x125] sm:$0xff] }
 0x126   : > { %v2776_v13 = vadd.f32 %v2744_v46, %v2676_v23  ;;  %v1679_v60 = vadd.f32 %v1647_v11, %v1579_v58  ;;  %v2278_v0 = vadd.f32 %v2246_v4, %v2178_v48  ;;  %v3043_v44 = vmul.f32 %v10047_v32, %v7289_v45  ;;  %v513_v58 = vld [vmem:[#allocation2 + $0x126] sm:$0xff] }
 0x127   : > { %v3275_v51 = vadd.f32 %v3243_v30, %v7256_v57  ;;  %v1778_v12 = vadd.f32 %v1746_v31, %v1678_v36  ;;  %v2346_v16 = vmul.f32 %v6134_v25, %v7291_v20  ;;  %v2446_v63 = vmul.f32 %v10046_v21, %v7295_v8 }
 0x128   : > { %v3343_v38 = vmul.f32 %v6400_v14, %v7238_v56  ;;  %v2477_v48 = vadd.f32 %v2445_v42, %v2377_v28  ;;  %v2876_v11 = vadd.f32 %v2844_v5, %v2776_v13  ;;  %v2944_v61 = vmul.f32 %v6318_v17, %v7276_v43  ;;  %v343_v42 = vld [vmem:[%s5854_s21 + $0xa0] sm:$0xff] }
 0x129   : > { %v3075_v57 = vadd.f32 %v3043_v44, %v2975_v35  ;;  %v3044_v31 = vmul.f32 %v10047_v32, %v7291_v20  ;;  %v3143_v36 = vmul.f32 %v10048_v29, %v7293_v62  ;;  %v449_v46 = vmul.f32 %v9986_v10, %v7365_v49  ;;  %376 = vst.msk [vmem:[#allocation2 + $0x1a8] sm:$0xff] %vm233_vm0, %v343_v42 }
 0x12a   : > { %v3375_v23 = vadd.f32 %v3343_v38, %v3275_v51  ;;  %v7381_v4 = vadd.f32 %v1747_v27, %v1679_v60  ;;  %v2378_v56 = vadd.f32 %v2346_v16, %v2278_v0  ;;  %v3144_v28 = vmul.f32 %v10048_v29, %v7295_v8  ;;  %v613_v60 = vld [vmem:[#allocation2 + $0x127] sm:$0xff] }
 0x12b   : > { %v549_v30 = vmul.f32 %v10029_v3, %v513_v58  ;;  %v3443_v35 = vmul.f32 %v6404_v54, %v7249_v59  ;;  %v3543_v13 = vmul.f32 %v6416_v9, %v7270_v22  ;;  %v3642_v5 = vmul.f32 %v10030_v19, %v7266_v24 }
 0x12c   : > { %v3643_v27 = vmul.f32 %v10030_v19, %v7276_v43  ;;  %v2976_v0 = vadd.f32 %v2944_v61, %v2876_v11  ;;  %v3175_v44 = vadd.f32 %v3143_v36, %v3075_v57  ;;  %v3742_v51 = vmul.f32 %v10049_v26, %v7289_v45  ;;  %v10065_v11 = vld [vmem:[#allocation41_spill] sm:$0xff]  ;;  %v10067_v45 = vld [vmem:[#allocation11_spill] sm:$0xff] }
 0x12d   : > { %v581_v16 = vadd.f32 %v549_v30, %v449_v46  ;;  %v3475_v38 = vadd.f32 %v3443_v35, %v3375_v23  ;;  %v3743_v59 = vmul.f32 %v10049_v26, %v7291_v20  ;;  %v1148_v22 = vmul.f32 %v5928_v50, %v7365_v49  ;;  %v713_v20 = vld [vmem:[#allocation2 + $0x128] sm:$0xff]  ;;  %v10070_v30 = vld [vmem:[#allocation17_spill] sm:$0xff] }
 0x12e   : > { %v1847_v24 = vmul.f32 %v6067_v2, %v7365_v49  ;;  %v7404_v43 = vadd.f32 %v2446_v63, %v2378_v56  ;;  %v3674_v42 = vadd.f32 %v3642_v5, %v7319_v41  ;;  %v7409_v61 = vmul.f32 %v10065_v11, %v7293_v62 }
 0x12f   : > { %v649_v57 = vmul.f32 %v10067_v45, %v613_v60  ;;  %v7414_v36 = vmul.f32 %v10065_v11, %v7295_v8  ;;  %v1180_v23 = vadd.f32 %v1148_v22, %v7335_v40  ;;  %v2545_v63 = vmul.f32 %v6202_v53, %v7365_v49  ;;  %v7429_v22 = vld [vmem:[#allocation2 + $0x12e] sm:$0xff] }
 0x130   : > { %10066 = vst [vmem:[#allocation73_spill] sm:$0xff] %v7409_v61  ;;  %v1879_v46 = vadd.f32 %v1847_v24, %v1778_v12  ;;  %v3076_v56 = vadd.f32 %v3044_v31, %v2976_v0  ;;  %v7421_v41 = vmul.f32 %v6672_v6, %v7236_v7  ;;  %v1248_v35 = vmul.f32 %v10070_v30, %v513_v58  ;;  %v7427_v12 = vld [vmem:[#allocation2 + $0x12d] sm:$0xff]  ;;  %v10073_v24 = vld [vmem:[#allocation18_spill] sm:$0xff] }
 0x131   : > { %10068 = vst [vmem:[#allocation74_spill] sm:$0xff] %v7414_v36  ;;  %v681_v62 = vadd.f32 %v649_v57, %v581_v16  ;;  %v3575_v5 = vadd.f32 %v3543_v13, %v3475_v38  ;;  %v1947_v8 = vmul.f32 %v6086_v1, %v513_v58  ;;  %v2577_v36 = vadd.f32 %v2545_v63, %v2477_v48  ;;  %v10072_v0 = vld [vmem:[#allocation13_spill] sm:$0xff]  ;;  %v344_v11 = vld [vmem:[%s5854_s21 + $0xa8] sm:$0xff] }
 0x132   : > { %10069 = vst [vmem:[#allocation75_spill] sm:$0xff] %v7421_v41  ;;  %v3244_v40 = vmul.f32 %v6389_v52, %v7365_v49  ;;  %v7431_v31 = vadd.f32 %v3742_v51, %v3674_v42  ;;  %v749_v7 = vmul.f32 %v10072_v0, %v713_v20  ;;  %v1348_v16 = vmul.f32 %v10073_v24, %v613_v60  ;;  %v7437_v63 = vld [vmem:[#allocation2 + $0x12f] sm:$0xff] }
 0x133   : > { %v1448_v57 = vmul.f32 %v10055_v15, %v713_v20  ;;  %v1280_v13 = vadd.f32 %v1248_v35, %v1180_v23  ;;  %v1979_v38 = vadd.f32 %v1947_v8, %v1879_v46  ;;  %v2645_v61 = vmul.f32 %v6224_v18, %v513_v58  ;;  %v7439_v41 = vld [vmem:[#allocation2 + $0x129] sm:$0xff]  ;;  %377 = vst.msk [vmem:[#allocation2 + $0x1b0] sm:$0xff] %vm233_vm0, %v344_v11 }
 0x134   : > { %10071 = vst [vmem:[#allocation76_spill] sm:$0xff] %v7431_v31  ;;  %v3276_v48 = vadd.f32 %v3244_v40, %v3175_v44  ;;  %v781_v26 = vadd.f32 %v749_v7, %v681_v62  ;;  %v3344_v51 = vmul.f32 %v6400_v14, %v513_v58  ;;  %v450_v42 = vmul.f32 %v9986_v10, %v7427_v12  ;;  %v10074_v44 = vld [vmem:[#allocation23_spill] sm:$0xff]  ;;  %v7453_v58 = vld [vmem:[#allocation2 + $0x130] sm:$0xff]  ;;  %v10075_v7 = vld [vmem:[#allocation14_spill] sm:$0xff] }
 0x135   : > { %v550_v31 = vmul.f32 %v10029_v3, %v7429_v22  ;;  %v7448_v23 = vadd.f32 %v3144_v28, %v3076_v56  ;;  %v3675_v46 = vadd.f32 %v3643_v27, %v3575_v5  ;;  %v2047_v35 = vmul.f32 %v10074_v44, %v613_v60  ;;  %v7459_v27 = vld [vmem:[#allocation2 + $0x12a] sm:$0xff] }
 0x136   : > { %v2677_v8 = vadd.f32 %v2645_v61, %v2577_v36  ;;  %v3376_v40 = vadd.f32 %v3344_v51, %v3276_v48  ;;  %v650_v62 = vmul.f32 %v10067_v45, %v7437_v63  ;;  %v849_v10 = vmul.f32 %v10075_v7, %v7439_v41 }
 0x137   : > { %v582_v19 = vadd.f32 %v550_v31, %v450_v42  ;;  %v1380_v29 = vadd.f32 %v1348_v16, %v1280_v13  ;;  %v2079_v3 = vadd.f32 %v2047_v35, %v1979_v38  ;;  %v2147_v11 = vmul.f32 %v10022_v39, %v713_v20  ;;  %v7469_v38 = vld [vmem:[#allocation2 + $0x131] sm:$0xff] }
 0x138   : > { %v2745_v28 = vmul.f32 %v6252_v37, %v613_v60  ;;  %v3444_v61 = vmul.f32 %v6404_v54, %v613_v60  ;;  %v881_v56 = vadd.f32 %v849_v10, %v781_v26  ;;  %v1149_v5 = vmul.f32 %v5928_v50, %v7427_v12  ;;  %v7471_v42 = vld [vmem:[#allocation2 + $0x132] sm:$0xff]  ;;  %v10077_v60 = vld [vmem:[#allocation15_spill] sm:$0xff] }
 0x139   : > { %v682_v36 = vadd.f32 %v650_v62, %v582_v19  ;;  %v7464_v31 = vadd.f32 %v3743_v59, %v3675_v46  ;;  %v2845_v51 = vmul.f32 %v6264_v33, %v713_v20  ;;  %v750_v16 = vmul.f32 %v10072_v0, %v7453_v58  ;;  %v7485_v62 = vld [vmem:[#allocation2 + $0x133] sm:$0xff] }
 0x13a   : > { %v2777_v48 = vadd.f32 %v2745_v28, %v2677_v8  ;;  %v3476_v13 = vadd.f32 %v3444_v61, %v3376_v40  ;;  %v949_v19 = vmul.f32 %v10077_v60, %v7459_v27  ;;  %v1181_v10 = vadd.f32 %v1149_v5, %v7356_v55  ;;  %v7483_v40 = vld [vmem:[#allocation2 + $0x12b] sm:$0xff] }
 0x13b   : > { %10076 = vst [vmem:[#allocation77_spill] sm:$0xff] %v7464_v31  ;;  %v1249_v26 = vmul.f32 %v10070_v30, %v7429_v22  ;;  %v1480_v59 = vadd.f32 %v1448_v57, %v1380_v29  ;;  %v2179_v46 = vadd.f32 %v2147_v11, %v2079_v3  ;;  %v3544_v35 = vmul.f32 %v6416_v9, %v713_v20  ;;  %v10079_v57 = vld [vmem:[#allocation16_spill] sm:$0xff] }
 0x13c   : > { %v7481_v8 = vmul.f32 %v6672_v6, %v7365_v49  ;;  %v782_v28 = vadd.f32 %v750_v16, %v682_v36  ;;  %v981_v61 = vadd.f32 %v949_v19, %v881_v56  ;;  %v1349_v55 = vmul.f32 %v10073_v24, %v7437_v63 }
 0x13d   : > { %v1281_v31 = vadd.f32 %v1249_v26, %v1181_v10  ;;  %v2877_v5 = vadd.f32 %v2845_v51, %v2777_v48  ;;  %v850_v3 = vmul.f32 %v10075_v7, %v7469_v38  ;;  %v950_v29 = vmul.f32 %v10077_v60, %v7471_v42  ;;  %v10080_v51 = vld [vmem:[#allocation20_spill] sm:$0xff]  ;;  %v10081_v60 = vld [vmem:[#allocation21_spill] sm:$0xff] }
 0x13e   : > { %10078 = vst [vmem:[#allocation78_spill] sm:$0xff] %v7481_v8  ;;  %v1848_v49 = vmul.f32 %v6067_v2, %v7427_v12  ;;  %v7495_v20 = vadd.f32 %v3544_v35, %v3476_v13  ;;  %v1049_v11 = vmul.f32 %v10079_v57, %v7483_v40  ;;  %v1050_v36 = vmul.f32 %v10079_v57, %v7485_v62 }
 0x13f   : > { %v1381_v56 = vadd.f32 %v1349_v55, %v1281_v31  ;;  %v1449_v48 = vmul.f32 %v10055_v15, %v7453_v58  ;;  %v1548_v16 = vmul.f32 %v10080_v51, %v7439_v41  ;;  %v1948_v10 = vmul.f32 %v6086_v1, %v7429_v22 }
 0x140   : > { %v1880_v19 = vadd.f32 %v1848_v49, %v7381_v4  ;;  %v882_v13 = vadd.f32 %v850_v3, %v782_v28  ;;  %v7508_v26 = vadd.f32 %v1049_v11, %v981_v61  ;;  %v1549_v35 = vmul.f32 %v10080_v51, %v7469_v38 }
 0x141   : > { %v2048_v31 = vmul.f32 %v10074_v44, %v7437_v63  ;;  %v1481_v55 = vadd.f32 %v1449_v48, %v1381_v56  ;;  %v2247_v57 = vmul.f32 %v10062_v34, %v7439_v41  ;;  %v2546_v4 = vmul.f32 %v6202_v53, %v7427_v12 }
 0x142   : > { %v1980_v8 = vadd.f32 %v1948_v10, %v1880_v19  ;;  %v1580_v49 = vadd.f32 %v1548_v16, %v1480_v59  ;;  %v1648_v28 = vmul.f32 %v10081_v60, %v7459_v27  ;;  %v1649_v61 = vmul.f32 %v10081_v60, %v7471_v42 }
 0x143   : > { %v2148_v3 = vmul.f32 %v10022_v39, %v7453_v58  ;;  %v2279_v51 = vadd.f32 %v2247_v57, %v2179_v46  ;;  %v2578_v56 = vadd.f32 %v2546_v4, %v7404_v43  ;;  %v2646_v48 = vmul.f32 %v6224_v18, %v7429_v22 }
 0x144   : > { %v2080_v11 = vadd.f32 %v2048_v31, %v1980_v8  ;;  %v982_v19 = vadd.f32 %v950_v29, %v882_v13  ;;  %v1748_v59 = vmul.f32 %v10064_v47, %v7483_v40  ;;  %v2347_v16 = vmul.f32 %v6134_v25, %v7459_v27 }
 0x145   : > { %v2945_v10 = vmul.f32 %v6318_v17, %v7439_v41  ;;  %v1581_v60 = vadd.f32 %v1549_v35, %v1481_v55  ;;  %v2678_v39 = vadd.f32 %v2646_v48, %v2578_v56  ;;  %v2746_v46 = vmul.f32 %v6252_v37, %v7437_v63 }
 0x146   : > { %v2180_v7 = vadd.f32 %v2148_v3, %v2080_v11  ;;  %v1680_v43 = vadd.f32 %v1648_v28, %v1580_v49  ;;  %v2248_v8 = vmul.f32 %v10062_v34, %v7469_v38  ;;  %v3245_v57 = vmul.f32 %v6389_v52, %v7427_v12 }
 0x147   : > { %v2977_v29 = vadd.f32 %v2945_v10, %v2877_v5  ;;  %v1749_v13 = vmul.f32 %v10064_v47, %v7485_v62  ;;  %v2348_v31 = vmul.f32 %v6134_v25, %v7471_v42  ;;  %v2379_v35 = vadd.f32 %v2347_v16, %v2279_v51  ;;  %v7554_v51 = vld [vmem:[#allocation2 + $0x145] sm:$0xff] }
 0x148   : > { %v2778_v55 = vadd.f32 %v2746_v46, %v2678_v39  ;;  %v2280_v4 = vadd.f32 %v2248_v8, %v2180_v7  ;;  %v3045_v3 = vmul.f32 %v10047_v32, %v7459_v27  ;;  %v3277_v49 = vadd.f32 %v3245_v57, %v7448_v23  ;;  %v7558_v10 = vld [vmem:[#allocation2 + $0x146] sm:$0xff] }
 0x149   : > { %v3345_v5 = vmul.f32 %v6400_v14, %v7429_v22  ;;  %v7548_v28 = vadd.f32 %v1050_v36, %v982_v19  ;;  %v1681_v11 = vadd.f32 %v1649_v61, %v1581_v60  ;;  %v2447_v56 = vmul.f32 %v10046_v21, %v7483_v40  ;;  %v10082_v46 = vld [vmem:[#allocation28_spill] sm:$0xff] }
 0x14a   : > { %v2846_v48 = vmul.f32 %v6264_v33, %v7453_v58  ;;  %v1780_v39 = vadd.f32 %v1748_v59, %v1680_v43  ;;  %v2448_v7 = vmul.f32 %v10046_v21, %v7485_v62  ;;  %v3077_v23 = vadd.f32 %v3045_v3, %v2977_v29  ;;  %v10083_v43 = vld [vmem:[#allocation29_spill] sm:$0xff]  ;;  %v10084_v29 = vld [vmem:[#allocation6_spill] sm:$0xff] }
 0x14b   : > { %v3377_v16 = vadd.f32 %v3345_v5, %v3277_v49  ;;  %v2479_v22 = vadd.f32 %v2447_v56, %v2379_v35  ;;  %v2946_v60 = vmul.f32 %v6318_v17, %v7469_v38  ;;  %v3445_v61 = vmul.f32 %v6404_v54, %v7437_v63  ;;  %v10085_v49 = vld [vmem:[#allocation7_spill] sm:$0xff]  ;;  %v345_v63 = vld [vmem:[%s5854_s21 + $0xb0] sm:$0xff] }
 0x14c   : > { %v2878_v36 = vadd.f32 %v2846_v48, %v2778_v55  ;;  %v2380_v19 = vadd.f32 %v2348_v31, %v2280_v4  ;;  %v3145_v59 = vmul.f32 %v10082_v46, %v7483_v40  ;;  %v3644_v8 = vmul.f32 %v10083_v43, %v7439_v41  ;;  %378 = vst.msk [vmem:[#allocation2 + $0x1c8] sm:$0xff] %vm233_vm0, %v345_v63  ;;  %v10086_v48 = vld [vmem:[#allocation40_spill] sm:$0xff] }
 0x14d   : > { %v451_v57 = vmul.f32 %v10084_v29, %v7554_v51  ;;  %v7570_v3 = vadd.f32 %v1749_v13, %v1681_v11  ;;  %v3046_v35 = vmul.f32 %v10047_v32, %v7471_v42  ;;  %v3477_v55 = vadd.f32 %v3445_v61, %v3377_v16  ;;  %v615_v61 = vld [vmem:[#allocation2 + $0x147] sm:$0xff] }
 0x14e   : > { %v551_v5 = vmul.f32 %v10085_v49, %v7558_v10  ;;  %v3146_v31 = vmul.f32 %v10082_v46, %v7485_v62  ;;  %v3177_v4 = vadd.f32 %v3145_v59, %v3077_v23  ;;  %v3545_v41 = vmul.f32 %v6416_v9, %v7453_v58  ;;  %v715_v59 = vld [vmem:[#allocation2 + $0x148] sm:$0xff] }
 0x14f   : > { %v3676_v56 = vadd.f32 %v3644_v8, %v7495_v20  ;;  %v2978_v13 = vadd.f32 %v2946_v60, %v2878_v36  ;;  %v3645_v11 = vmul.f32 %v10083_v43, %v7469_v38  ;;  %v3744_v16 = vmul.f32 %v10086_v48, %v7459_v27  ;;  %v10087_v60 = vld [vmem:[#allocation41_spill] sm:$0xff] }
 0x150   : > { %v1150_v21 = vmul.f32 %v5928_v50, %v7554_v51  ;;  %v7589_v46 = vadd.f32 %v2448_v7, %v2380_v19  ;;  %v3745_v58 = vmul.f32 %v10086_v48, %v7471_v42  ;;  %v583_v23 = vadd.f32 %v551_v5, %v451_v57  ;;  %v7615_v5 = vld [vmem:[#allocation2 + $0x14d] sm:$0xff] }
 0x151   : > { %v1849_v20 = vmul.f32 %v6067_v2, %v7554_v51  ;;  %v3577_v36 = vadd.f32 %v3545_v41, %v3477_v55  ;;  %v7597_v38 = vmul.f32 %v10087_v60, %v7483_v40  ;;  %v2547_v8 = vmul.f32 %v6202_v53, %v7554_v51  ;;  %v7617_v63 = vld [vmem:[#allocation2 + $0x14e] sm:$0xff] }
 0x152   : > { %v1182_v27 = vadd.f32 %v1150_v21, %v7508_v26  ;;  %v7602_v7 = vadd.f32 %v3744_v16, %v3676_v56  ;;  %v7606_v42 = vmul.f32 %v10087_v60, %v7485_v62  ;;  %v651_v19 = vmul.f32 %v10067_v45, %v615_v61  ;;  %v7627_v16 = vld [vmem:[#allocation2 + $0x14f] sm:$0xff] }
 0x153   : > { %10088 = vst [vmem:[#allocation79_spill] sm:$0xff] %v7597_v38  ;;  %v1881_v57 = vadd.f32 %v1849_v20, %v1780_v39  ;;  %v3078_v55 = vadd.f32 %v3046_v35, %v2978_v13  ;;  %v7611_v40 = vmul.f32 %v6672_v6, %v7427_v12  ;;  %v1250_v21 = vmul.f32 %v10070_v30, %v7558_v10 }
 0x154   : > { %10089 = vst [vmem:[#allocation80_spill] sm:$0xff] %v7602_v7  ;;  %10090 = vst [vmem:[#allocation81_spill] sm:$0xff] %v7606_v42  ;;  %v2579_v26 = vadd.f32 %v2547_v8, %v2479_v22  ;;  %v683_v41 = vadd.f32 %v651_v19, %v583_v23  ;;  %v751_v62 = vmul.f32 %v10072_v0, %v715_v59  ;;  %v346_v42 = vld [vmem:[%s5854_s21 + $0xb8] sm:$0xff]  ;;  %v7645_v7 = vld [vmem:[#allocation2 + $0x150] sm:$0xff] }
 0x155   : > { %10091 = vst [vmem:[#allocation82_spill] sm:$0xff] %v7611_v40  ;;  %v1949_v39 = vmul.f32 %v6086_v1, %v7558_v10  ;;  %v3246_v35 = vmul.f32 %v6389_v52, %v7554_v51  ;;  %v3677_v12 = vadd.f32 %v3645_v11, %v3577_v36  ;;  %v1282_v56 = vadd.f32 %v1250_v21, %v1182_v27  ;;  %v7638_v21 = vld [vmem:[#allocation2 + $0x149] sm:$0xff] }
 0x156   : > { %v1350_v13 = vmul.f32 %v10073_v24, %v615_v61  ;;  %v2647_v22 = vmul.f32 %v6224_v18, %v7558_v10  ;;  %v452_v23 = vmul.f32 %v10084_v29, %v7615_v5  ;;  %v552_v19 = vmul.f32 %v10085_v49, %v7617_v63  ;;  %379 = vst.msk [vmem:[#allocation2 + $0x1d0] sm:$0xff] %vm233_vm0, %v346_v42  ;;  %v10093_v40 = vld [vmem:[#allocation24_spill] sm:$0xff] }
 0x157   : > { %v1981_v20 = vadd.f32 %v1949_v39, %v1881_v57  ;;  %v3278_v8 = vadd.f32 %v3246_v35, %v3177_v4  ;;  %v7634_v38 = vadd.f32 %v3146_v31, %v3078_v55  ;;  %v1450_v11 = vmul.f32 %v10055_v15, %v715_v59 }
 0x158   : > { %v2049_v36 = vmul.f32 %v10074_v44, %v615_v61  ;;  %v2679_v27 = vadd.f32 %v2647_v22, %v2579_v26  ;;  %v783_v57 = vadd.f32 %v751_v62, %v683_v41  ;;  %v3346_v4 = vmul.f32 %v6400_v14, %v7558_v10  ;;  %v10094_v41 = vld [vmem:[#allocation14_spill] sm:$0xff] }
 0x159   : > { %v584_v39 = vadd.f32 %v552_v19, %v452_v23  ;;  %v652_v35 = vmul.f32 %v10067_v45, %v7627_v16  ;;  %v7647_v31 = vadd.f32 %v3745_v58, %v3677_v12  ;;  %v1382_v55 = vadd.f32 %v1350_v13, %v1282_v56  ;;  %v7656_v45 = vld [vmem:[#allocation2 + $0x151] sm:$0xff] }
 0x15a   : > { %v2149_v60 = vmul.f32 %v10093_v40, %v715_v59  ;;  %v2747_v26 = vmul.f32 %v6252_v37, %v615_v61  ;;  %v2081_v22 = vadd.f32 %v2049_v36, %v1981_v20  ;;  %v3378_v48 = vadd.f32 %v3346_v4, %v3278_v8  ;;  %v7658_v58 = vld [vmem:[#allocation2 + $0x14a] sm:$0xff]  ;;  %v7668_v4 = vld [vmem:[#allocation2 + $0x152] sm:$0xff] }
 0x15b   : > { %10092 = vst [vmem:[#allocation83_spill] sm:$0xff] %v7647_v31  ;;  %v684_v42 = vadd.f32 %v652_v35, %v584_v39  ;;  %v851_v62 = vmul.f32 %v10094_v41, %v7638_v21  ;;  %v2847_v23 = vmul.f32 %v6264_v33, %v715_v59  ;;  %v752_v19 = vmul.f32 %v10072_v0, %v7645_v7  ;;  %v7670_v39 = vld [vmem:[#allocation2 + $0x14b] sm:$0xff] }
 0x15c   : > { %v2779_v10 = vadd.f32 %v2747_v26, %v2679_v27  ;;  %v1151_v12 = vmul.f32 %v5928_v50, %v7615_v5  ;;  %v3446_v56 = vmul.f32 %v6404_v54, %v615_v61  ;;  %v3546_v13 = vmul.f32 %v6416_v9, %v715_v59 }
 0x15d   : > { %v7666_v20 = vmul.f32 %v6672_v6, %v7554_v51  ;;  %v883_v8 = vadd.f32 %v851_v62, %v783_v57  ;;  %v1482_v36 = vadd.f32 %v1450_v11, %v1382_v55  ;;  %v784_v27 = vadd.f32 %v752_v19, %v684_v42  ;;  %v10096_v51 = vld [vmem:[#allocation15_spill] sm:$0xff]  ;;  %v7679_v11 = vld [vmem:[#allocation2 + $0x153] sm:$0xff]  ;;  %v10098_v19 = vld [vmem:[#allocation20_spill] sm:$0xff] }
 0x15e   : > { %v1183_v35 = vadd.f32 %v1151_v12, %v7548_v28  ;;  %v1251_v26 = vmul.f32 %v10070_v30, %v7617_v63  ;;  %v2181_v31 = vadd.f32 %v2149_v60, %v2081_v22  ;;  %v3478_v61 = vadd.f32 %v3446_v56, %v3378_v48  ;;  %v10097_v22 = vld [vmem:[#allocation16_spill] sm:$0xff] }
 0x15f   : > { %10095 = vst [vmem:[#allocation84_spill] sm:$0xff] %v7666_v20  ;;  %v852_v59 = vmul.f32 %v10094_v41, %v7656_v45  ;;  %v951_v20 = vmul.f32 %v10096_v51, %v7658_v58  ;;  %v2879_v57 = vadd.f32 %v2847_v23, %v2779_v10  ;;  %v1351_v42 = vmul.f32 %v10073_v24, %v7627_v16 }
 0x160   : > { %v1283_v55 = vadd.f32 %v1251_v26, %v1183_v35  ;;  %v1850_v28 = vmul.f32 %v6067_v2, %v7615_v5  ;;  %v952_v60 = vmul.f32 %v10096_v51, %v7668_v4  ;;  %v1051_v62 = vmul.f32 %v10097_v22, %v7670_v39 }
 0x161   : > { %v983_v48 = vadd.f32 %v951_v20, %v883_v8  ;;  %v1550_v12 = vmul.f32 %v10098_v19, %v7638_v21  ;;  %v884_v10 = vadd.f32 %v852_v59, %v784_v27  ;;  %v1950_v35 = vmul.f32 %v6086_v1, %v7617_v63  ;;  %v10099_v27 = vld [vmem:[#allocation21_spill] sm:$0xff] }
 0x162   : > { %v1383_v23 = vadd.f32 %v1351_v42, %v1283_v55  ;;  %v1882_v56 = vadd.f32 %v1850_v28, %v7570_v3  ;;  %v7694_v26 = vadd.f32 %v3546_v13, %v3478_v61  ;;  %v1052_v41 = vmul.f32 %v10097_v22, %v7679_v11 }
 0x163   : > { %v1451_v20 = vmul.f32 %v10055_v15, %v7645_v7  ;;  %v1582_v8 = vadd.f32 %v1550_v12, %v1482_v36  ;;  %v1551_v51 = vmul.f32 %v10098_v19, %v7656_v45  ;;  %v1650_v59 = vmul.f32 %v10099_v27, %v7658_v58 }
 0x164   : > { %v1982_v55 = vadd.f32 %v1950_v35, %v1882_v56  ;;  %v2050_v3 = vmul.f32 %v10074_v44, %v7627_v16  ;;  %v1651_v13 = vmul.f32 %v10099_v27, %v7668_v4  ;;  %v2249_v61 = vmul.f32 %v10062_v34, %v7638_v21 }
 0x165   : > { %v1483_v42 = vadd.f32 %v1451_v20, %v1383_v23  ;;  %v2548_v36 = vmul.f32 %v6202_v53, %v7615_v5  ;;  %v984_v28 = vadd.f32 %v952_v60, %v884_v10  ;;  %v7712_v12 = vadd.f32 %v1051_v62, %v983_v48 }
 0x166   : > { %v2082_v19 = vadd.f32 %v2050_v3, %v1982_v55  ;;  %v2150_v56 = vmul.f32 %v10093_v40, %v7645_v7  ;;  %v1682_v35 = vadd.f32 %v1650_v59, %v1582_v8  ;;  %v2281_v22 = vadd.f32 %v2249_v61, %v2181_v31 }
 0x167   : > { %v2580_v23 = vadd.f32 %v2548_v36, %v7589_v46  ;;  %v2648_v20 = vmul.f32 %v6224_v18, %v7617_v63  ;;  %v1750_v27 = vmul.f32 %v10064_v47, %v7670_v39  ;;  %v1751_v44 = vmul.f32 %v10064_v47, %v7679_v11 }
 0x168   : > { %v2182_v60 = vadd.f32 %v2150_v56, %v2082_v19  ;;  %v2947_v48 = vmul.f32 %v6318_v17, %v7638_v21  ;;  %v1583_v62 = vadd.f32 %v1551_v51, %v1483_v42  ;;  %v2349_v10 = vmul.f32 %v6134_v25, %v7658_v58 }
 0x169   : > { %v2680_v31 = vadd.f32 %v2648_v20, %v2580_v23  ;;  %v2748_v46 = vmul.f32 %v6252_v37, %v7627_v16  ;;  %v7729_v8 = vadd.f32 %v1052_v41, %v984_v28  ;;  %v2250_v59 = vmul.f32 %v10062_v34, %v7656_v45  ;;  %v7742_v23 = vld [vmem:[#allocation2 + $0x165] sm:$0xff] }
 0x16a   : > { %v2979_v55 = vadd.f32 %v2947_v48, %v2879_v57  ;;  %v3247_v19 = vmul.f32 %v6389_v52, %v7615_v5  ;;  %v1782_v3 = vadd.f32 %v1750_v27, %v1682_v35  ;;  %v2381_v61 = vadd.f32 %v2349_v10, %v2281_v22  ;;  %v10100_v22 = vld [vmem:[#allocation27_spill] sm:$0xff] }
 0x16b   : > { %v2780_v36 = vadd.f32 %v2748_v46, %v2680_v31  ;;  %v2848_v51 = vmul.f32 %v6264_v33, %v7645_v7  ;;  %v2282_v42 = vadd.f32 %v2250_v59, %v2182_v60  ;;  %v3047_v56 = vmul.f32 %v10047_v32, %v7658_v58  ;;  %v7750_v60 = vld [vmem:[#allocation2 + $0x166] sm:$0xff] }
 0x16c   : > { %v3279_v41 = vadd.f32 %v3247_v19, %v7634_v38  ;;  %v3347_v28 = vmul.f32 %v6400_v14, %v7617_v63  ;;  %v1683_v57 = vadd.f32 %v1651_v13, %v1583_v62  ;;  %v2350_v27 = vmul.f32 %v6134_v25, %v7668_v4  ;;  %v10101_v62 = vld [vmem:[#allocation28_spill] sm:$0xff] }
 0x16d   : > { %v2449_v35 = vmul.f32 %v10100_v22, %v7670_v39  ;;  %v2450_v20 = vmul.f32 %v10100_v22, %v7679_v11  ;;  %v2880_v48 = vadd.f32 %v2848_v51, %v2780_v36  ;;  %v2948_v38 = vmul.f32 %v6318_v17, %v7656_v45 }
 0x16e   : > { %v3079_v63 = vadd.f32 %v3047_v56, %v2979_v55  ;;  %v3379_v10 = vadd.f32 %v3347_v28, %v3279_v41  ;;  %v3048_v13 = vmul.f32 %v10047_v32, %v7668_v4  ;;  %v3147_v46 = vmul.f32 %v10101_v62, %v7670_v39  ;;  %v617_v32 = vld [vmem:[#allocation2 + $0x167] sm:$0xff] }
 0x16f   : > { %v2481_v31 = vadd.f32 %v2449_v35, %v2381_v61  ;;  %v453_v59 = vmul.f32 %v10084_v29, %v7742_v23  ;;  %v2382_v19 = vadd.f32 %v2350_v27, %v2282_v42  ;;  %v3148_v22 = vmul.f32 %v10101_v62, %v7679_v11  ;;  %v347_v61 = vld [vmem:[%s5854_s21 + $0xc0] sm:$0xff]  ;;  %v10102_v35 = vld [vmem:[#allocation40_spill] sm:$0xff] }
 0x170   : > { %v3447_v36 = vmul.f32 %v6404_v54, %v7627_v16  ;;  %v553_v55 = vmul.f32 %v10085_v49, %v7750_v60  ;;  %v7767_v51 = vadd.f32 %v1751_v44, %v1683_v57  ;;  %v3547_v56 = vmul.f32 %v6416_v9, %v7645_v7  ;;  %380 = vst.msk [vmem:[#allocation2 + $0x1e8] sm:$0xff] %vm233_vm0, %v347_v61 }
 0x171   : > { %v3646_v41 = vmul.f32 %v10083_v43, %v7638_v21  ;;  %v3647_v42 = vmul.f32 %v10083_v43, %v7656_v45  ;;  %v2980_v28 = vadd.f32 %v2948_v38, %v2880_v48  ;;  %v3179_v27 = vadd.f32 %v3147_v46, %v3079_v63  ;;  %v10103_v38 = vld [vmem:[#allocation41_spill] sm:$0xff]  ;;  %v717_v46 = vld [vmem:[#allocation2 + $0x168] sm:$0xff] }
 0x172   : > { %v3479_v16 = vadd.f32 %v3447_v36, %v3379_v10  ;;  %v3746_v62 = vmul.f32 %v10102_v35, %v7658_v58  ;;  %v3747_v44 = vmul.f32 %v10102_v35, %v7668_v4  ;;  %v585_v57 = vadd.f32 %v553_v55, %v453_v59  ;;  %v10106_v4 = vld [vmem:[#allocation11_spill] sm:$0xff]  ;;  %v7839_v35 = vld [vmem:[#allocation2 + $0x170] sm:$0xff] }
 0x173   : > { %v1152_v7 = vmul.f32 %v5928_v50, %v7742_v23  ;;  %v1851_v21 = vmul.f32 %v6067_v2, %v7742_v23  ;;  %v7784_v45 = vadd.f32 %v2450_v20, %v2382_v19  ;;  %v3678_v48 = vadd.f32 %v3646_v41, %v7694_v26 }
 0x174   : > { %v7789_v63 = vmul.f32 %v10103_v38, %v7670_v39  ;;  %v7793_v58 = vmul.f32 %v10103_v38, %v7679_v11  ;;  %v653_v10 = vmul.f32 %v10106_v4, %v617_v32  ;;  %v2549_v20 = vmul.f32 %v6202_v53, %v7742_v23 }
 0x175   : > { %v1184_v59 = vadd.f32 %v1152_v7, %v7712_v12  ;;  %v1883_v36 = vadd.f32 %v1851_v21, %v1782_v3  ;;  %v3080_v19 = vadd.f32 %v3048_v13, %v2980_v28  ;;  %v3579_v55 = vadd.f32 %v3547_v56, %v3479_v16  ;;  %v7809_v3 = vld [vmem:[#allocation2 + $0x16d] sm:$0xff] }
 0x176   : > { %10104 = vst [vmem:[#allocation85_spill] sm:$0xff] %v7789_v63  ;;  %10105 = vst [vmem:[#allocation86_spill] sm:$0xff] %v7793_v58  ;;  %v7801_v26 = vmul.f32 %v6672_v6, %v7615_v5  ;;  %v1252_v39 = vmul.f32 %v10070_v30, %v7750_v60  ;;  %v685_v11 = vadd.f32 %v653_v10, %v585_v57  ;;  %v7811_v13 = vld [vmem:[#allocation2 + $0x16e] sm:$0xff] }
 0x177   : > { %v1951_v61 = vmul.f32 %v6086_v1, %v7750_v60  ;;  %v2581_v41 = vadd.f32 %v2549_v20, %v2481_v31  ;;  %v3248_v12 = vmul.f32 %v6389_v52, %v7742_v23  ;;  %v7813_v56 = vadd.f32 %v3746_v62, %v3678_v48  ;;  %v7820_v10 = vld [vmem:[#allocation2 + $0x16f] sm:$0xff] }
 0x178   : > { %10107 = vst [vmem:[#allocation87_spill] sm:$0xff] %v7801_v26  ;;  %v753_v5 = vmul.f32 %v10072_v0, %v717_v46  ;;  %v1352_v28 = vmul.f32 %v10073_v24, %v617_v32  ;;  %v1452_v16 = vmul.f32 %v10055_v15, %v717_v46  ;;  %v1284_v57 = vadd.f32 %v1252_v39, %v1184_v59  ;;  %v348_v20 = vld [vmem:[%s5854_s21 + $0xc8] sm:$0xff] }
 0x179   : > { %10108 = vst [vmem:[#allocation88_spill] sm:$0xff] %v7813_v56  ;;  %v1983_v7 = vadd.f32 %v1951_v61, %v1883_v36  ;;  %v2649_v31 = vmul.f32 %v6224_v18, %v7750_v60  ;;  %v3280_v21 = vadd.f32 %v3248_v12, %v3179_v27  ;;  %v7823_v58 = vadd.f32 %v3148_v22, %v3080_v19  ;;  %v7829_v56 = vld [vmem:[#allocation2 + $0x169] sm:$0xff]  ;;  %v10109_v36 = vld [vmem:[#allocation23_spill] sm:$0xff] }
 0x17a   : > { %v3679_v63 = vadd.f32 %v3647_v42, %v3579_v55  ;;  %v454_v62 = vmul.f32 %v10084_v29, %v7809_v3  ;;  %v554_v48 = vmul.f32 %v10085_v49, %v7811_v13  ;;  %381 = vst.msk [vmem:[#allocation2 + $0x1f0] sm:$0xff] %vm233_vm0, %v348_v20  ;;  %v785_v59 = vadd.f32 %v753_v5, %v685_v11  ;;  %v10110_v11 = vld [vmem:[#allocation14_spill] sm:$0xff]  ;;  %v7846_v20 = vld [vmem:[#allocation2 + $0x16a] sm:$0xff] }
 0x17b   : > { %v2051_v39 = vmul.f32 %v10109_v36, %v617_v32  ;;  %v2681_v27 = vadd.f32 %v2649_v31, %v2581_v41  ;;  %v3348_v61 = vmul.f32 %v6400_v14, %v7750_v60  ;;  %v2151_v22 = vmul.f32 %v10093_v40, %v717_v46 }
 0x17c   : > { %v2749_v42 = vmul.f32 %v6252_v37, %v617_v32  ;;  %v586_v19 = vadd.f32 %v554_v48, %v454_v62  ;;  %v654_v55 = vmul.f32 %v10106_v4, %v7820_v10  ;;  %v1384_v12 = vadd.f32 %v1352_v28, %v1284_v57 }
 0x17d   : > { %v2083_v26 = vadd.f32 %v2051_v39, %v1983_v7  ;;  %v3380_v38 = vadd.f32 %v3348_v61, %v3280_v21  ;;  %v853_v5 = vmul.f32 %v10110_v11, %v7829_v56  ;;  %v7843_v41 = vadd.f32 %v3747_v44, %v3679_v63  ;;  %v7852_v7 = vld [vmem:[#allocation2 + $0x171] sm:$0xff] }
 0x17e   : > { %v2849_v60 = vmul.f32 %v6264_v33, %v717_v46  ;;  %v686_v31 = vadd.f32 %v654_v55, %v586_v19  ;;  %v1153_v62 = vmul.f32 %v5928_v50, %v7809_v3  ;;  %v2781_v48 = vadd.f32 %v2749_v42, %v2681_v27  ;;  %v7860_v39 = vld [vmem:[#allocation2 + $0x172] sm:$0xff]  ;;  %v10113_v19 = vld [vmem:[#allocation15_spill] sm:$0xff] }
 0x17f   : > { %10111 = vst [vmem:[#allocation89_spill] sm:$0xff] %v7843_v41  ;;  %v3448_v28 = vmul.f32 %v6404_v54, %v617_v32  ;;  %v3548_v57 = vmul.f32 %v6416_v9, %v717_v46  ;;  %v885_v21 = vadd.f32 %v853_v5, %v785_v59  ;;  %v7856_v44 = vmul.f32 %v6672_v6, %v7742_v23  ;;  %v7867_v55 = vld [vmem:[#allocation2 + $0x16b] sm:$0xff]  ;;  %v7869_v23 = vld [vmem:[#allocation2 + $0x173] sm:$0xff] }
 0x180   : > { %v754_v63 = vmul.f32 %v10072_v0, %v7839_v35  ;;  %v1185_v61 = vadd.f32 %v1153_v62, %v7729_v8  ;;  %v1253_v27 = vmul.f32 %v10070_v30, %v7811_v13  ;;  %v1484_v32 = vadd.f32 %v1452_v16, %v1384_v12 }
 0x181   : > { %10112 = vst [vmem:[#allocation90_spill] sm:$0xff] %v7856_v44  ;;  %v2183_v42 = vadd.f32 %v2151_v22, %v2083_v26  ;;  %v3480_v46 = vadd.f32 %v3448_v28, %v3380_v38  ;;  %v953_v59 = vmul.f32 %v10113_v19, %v7846_v20  ;;  %v854_v41 = vmul.f32 %v10110_v11, %v7852_v7  ;;  %v10114_v22 = vld [vmem:[#allocation16_spill] sm:$0xff] }
 0x182   : > { %v786_v5 = vadd.f32 %v754_v63, %v686_v31  ;;  %v1285_v44 = vadd.f32 %v1253_v27, %v1185_v61  ;;  %v1353_v8 = vmul.f32 %v10073_v24, %v7820_v10  ;;  %v2881_v62 = vadd.f32 %v2849_v60, %v2781_v48  ;;  %v10115_v60 = vld [vmem:[#allocation20_spill] sm:$0xff] }
 0x183   : > { %v954_v26 = vmul.f32 %v10113_v19, %v7860_v39  ;;  %v985_v38 = vadd.f32 %v953_v59, %v885_v21  ;;  %v1852_v16 = vmul.f32 %v6067_v2, %v7809_v3  ;;  %v1053_v12 = vmul.f32 %v10114_v22, %v7867_v55 }
 0x184   : > { %v1054_v31 = vmul.f32 %v10114_v22, %v7869_v23  ;;  %v1385_v28 = vadd.f32 %v1353_v8, %v1285_v44  ;;  %v1453_v63 = vmul.f32 %v10055_v15, %v7839_v35  ;;  %v7885_v61 = vadd.f32 %v3548_v57, %v3480_v46  ;;  %v10116_v22 = vld [vmem:[#allocation21_spill] sm:$0xff] }
 0x185   : > { %v1552_v48 = vmul.f32 %v10115_v60, %v7829_v56  ;;  %v1884_v21 = vadd.f32 %v1852_v16, %v7767_v51  ;;  %v1952_v27 = vmul.f32 %v6086_v1, %v7811_v13  ;;  %v886_v59 = vadd.f32 %v854_v41, %v786_v5 }
 0x186   : > { %v1485_v19 = vadd.f32 %v1453_v63, %v1385_v28  ;;  %v1553_v11 = vmul.f32 %v10115_v60, %v7852_v7  ;;  %v2251_v44 = vmul.f32 %v10062_v34, %v7829_v56  ;;  %v7896_v8 = vadd.f32 %v1053_v12, %v985_v38 }
 0x187   : > { %v1984_v57 = vadd.f32 %v1952_v27, %v1884_v21  ;;  %v2052_v46 = vmul.f32 %v10109_v36, %v7820_v10  ;;  %v2550_v51 = vmul.f32 %v6202_v53, %v7809_v3  ;;  %v1584_v16 = vadd.f32 %v1552_v48, %v1484_v32 }
 0x188   : > { %v1652_v41 = vmul.f32 %v10116_v22, %v7846_v20  ;;  %v1653_v5 = vmul.f32 %v10116_v22, %v7860_v39  ;;  %v2283_v28 = vadd.f32 %v2251_v44, %v2183_v42  ;;  %v2152_v38 = vmul.f32 %v10093_v40, %v7839_v35 }
 0x189   : > { %v2084_v63 = vadd.f32 %v2052_v46, %v1984_v57  ;;  %v2582_v12 = vadd.f32 %v2550_v51, %v7784_v45  ;;  %v2650_v21 = vmul.f32 %v6224_v18, %v7811_v13  ;;  %v986_v27 = vadd.f32 %v954_v26, %v886_v59  ;;  %v10117_v59 = vld [vmem:[#allocation27_spill] sm:$0xff] }
 0x18a   : > { %v1585_v60 = vadd.f32 %v1553_v11, %v1485_v19  ;;  %v1752_v32 = vmul.f32 %v10064_v47, %v7867_v55  ;;  %v2351_v48 = vmul.f32 %v6134_v25, %v7846_v20  ;;  %v2750_v42 = vmul.f32 %v6252_v37, %v7820_v10 }
 0x18b   : > { %v2184_v15 = vadd.f32 %v2152_v38, %v2084_v63  ;;  %v2682_v22 = vadd.f32 %v2650_v21, %v2582_v12  ;;  %v2949_v44 = vmul.f32 %v6318_v17, %v7829_v56  ;;  %v1684_v45 = vadd.f32 %v1652_v41, %v1584_v16 }
 0x18c   : > { %v2252_v57 = vmul.f32 %v10062_v34, %v7852_v7  ;;  %v2383_v26 = vadd.f32 %v2351_v48, %v2283_v28  ;;  %v3249_v11 = vmul.f32 %v6389_v52, %v7809_v3  ;;  %v1753_v19 = vmul.f32 %v10064_v47, %v7869_v23  ;;  %v10118_v47 = vld [vmem:[#allocation25_spill] sm:$0xff] }
 0x18d   : > { %v2451_v46 = vmul.f32 %v10117_v59, %v7867_v55  ;;  %v2782_v51 = vadd.f32 %v2750_v42, %v2682_v22  ;;  %v2981_v63 = vadd.f32 %v2949_v44, %v2881_v62  ;;  %v1685_v38 = vadd.f32 %v1653_v5, %v1585_v60  ;;  %v7940_v60 = vld [vmem:[#allocation2 + $0x185] sm:$0xff] }
 0x18e   : > { %v2284_v12 = vadd.f32 %v2252_v57, %v2184_v15  ;;  %v3281_v21 = vadd.f32 %v3249_v11, %v7823_v58  ;;  %v3349_v16 = vmul.f32 %v6400_v14, %v7811_v13  ;;  %v7930_v41 = vadd.f32 %v1054_v31, %v986_v27  ;;  %v519_v13 = vld [vmem:[#allocation2 + $0x186] sm:$0xff] }
 0x18f   : > { %v2352_v28 = vmul.f32 %v6134_v25, %v7860_v39  ;;  %v2850_v48 = vmul.f32 %v6264_v33, %v7839_v35  ;;  %v3049_v34 = vmul.f32 %v10118_v47, %v7846_v20  ;;  %v1784_v22 = vadd.f32 %v1752_v32, %v1684_v45 }
 0x190   : > { %v2452_v15 = vmul.f32 %v10117_v59, %v7869_v23  ;;  %v2483_v62 = vadd.f32 %v2451_v46, %v2383_v26  ;;  %v3381_v58 = vadd.f32 %v3349_v16, %v3281_v21  ;;  %v2950_v5 = vmul.f32 %v6318_v17, %v7852_v7  ;;  %v10119_v26 = vld [vmem:[#allocation28_spill] sm:$0xff] }
 0x191   : > { %v2882_v31 = vadd.f32 %v2850_v48, %v2782_v51  ;;  %v3081_v27 = vadd.f32 %v3049_v34, %v2981_v63  ;;  %v3449_v42 = vmul.f32 %v6404_v54, %v7820_v10  ;;  %v7946_v44 = vadd.f32 %v1753_v19, %v1685_v38  ;;  %v10120_v48 = vld [vmem:[#allocation40_spill] sm:$0xff] }
 0x192   : > { %v2384_v57 = vadd.f32 %v2352_v28, %v2284_v12  ;;  %v3050_v32 = vmul.f32 %v10118_v47, %v7860_v39  ;;  %v3648_v45 = vmul.f32 %v10083_v43, %v7829_v56  ;;  %v3149_v11 = vmul.f32 %v10119_v26, %v7867_v55 }
 0x193   : > { %v3481_v46 = vadd.f32 %v3449_v42, %v3381_v58  ;;  %v455_v51 = vmul.f32 %v10084_v29, %v7940_v60  ;;  %v555_v34 = vmul.f32 %v10085_v49, %v519_v13  ;;  %v3150_v10 = vmul.f32 %v10119_v26, %v7869_v23 }
 0x194   : > { %v3549_v19 = vmul.f32 %v6416_v9, %v7839_v35  ;;  %v3680_v63 = vadd.f32 %v3648_v45, %v7885_v61  ;;  %v1154_v56 = vmul.f32 %v5928_v50, %v7940_v60  ;;  %v2982_v38 = vadd.f32 %v2950_v5, %v2882_v31  ;;  %v619_v61 = vld [vmem:[#allocation2 + $0x187] sm:$0xff] }
 0x195   : > { %v3181_v12 = vadd.f32 %v3149_v11, %v3081_v27  ;;  %v3649_v21 = vmul.f32 %v10083_v43, %v7852_v7  ;;  %v1853_v16 = vmul.f32 %v6067_v2, %v7940_v60  ;;  %v7968_v28 = vadd.f32 %v2452_v15, %v2384_v57  ;;  %v10122_v15 = vld [vmem:[#allocation41_spill] sm:$0xff] }
 0x196   : > { %v3748_v58 = vmul.f32 %v10120_v48, %v7846_v20  ;;  %v3749_v35 = vmul.f32 %v10120_v48, %v7860_v39  ;;  %v1186_v42 = vadd.f32 %v1154_v56, %v7896_v8  ;;  %v3581_v45 = vadd.f32 %v3549_v19, %v3481_v46  ;;  %v719_v19 = vld [vmem:[#allocation2 + $0x188] sm:$0xff] }
 0x197   : > { %v587_v31 = vadd.f32 %v555_v34, %v455_v51  ;;  %v1885_v5 = vadd.f32 %v1853_v16, %v1784_v22  ;;  %v2551_v7 = vmul.f32 %v6202_v53, %v7940_v60  ;;  %v7981_v57 = vmul.f32 %v10122_v15, %v7867_v55  ;;  %v7990_v51 = vld [vmem:[#allocation2 + $0x18d] sm:$0xff] }
 0x198   : > { %v7977_v27 = vadd.f32 %v3748_v58, %v3680_v63  ;;  %v7985_v20 = vmul.f32 %v10122_v15, %v7869_v23  ;;  %v1254_v39 = vmul.f32 %v10070_v30, %v519_v13  ;;  %v3082_v11 = vadd.f32 %v3050_v32, %v2982_v38  ;;  %v7992_v34 = vld [vmem:[#allocation2 + $0x18e] sm:$0xff]  ;;  %v350_v15 = vld [vmem:[%s5854_s21 + $0xd8] sm:$0xff] }
 0x199   : > { %10123 = vst [vmem:[#allocation91_spill] sm:$0xff] %v7981_v57  ;;  %v655_v8 = vmul.f32 %v10106_v4, %v619_v61  ;;  %v1953_v22 = vmul.f32 %v6086_v1, %v519_v13  ;;  %v2583_v46 = vadd.f32 %v2551_v7, %v2483_v62  ;;  %v7996_v55 = vmul.f32 %v6672_v6, %v7809_v3  ;;  %v8002_v58 = vld [vmem:[#allocation2 + $0x18f] sm:$0xff] }
 0x19a   : > { %10121 = vst [vmem:[#allocation25_spill] sm:$0xff] %v7977_v27  ;;  %10124 = vst [vmem:[#allocation92_spill] sm:$0xff] %v7985_v20  ;;  %v1286_v63 = vadd.f32 %v1254_v39, %v1186_v42  ;;  %v2651_v23 = vmul.f32 %v6224_v18, %v519_v13  ;;  %v3250_v32 = vmul.f32 %v6389_v52, %v7940_v60  ;;  %v8020_v27 = vld [vmem:[#allocation2 + $0x190] sm:$0xff] }
 0x19b   : > { %10125 = vst [vmem:[#allocation93_spill] sm:$0xff] %v7996_v55  ;;  %v3681_v56 = vadd.f32 %v3649_v21, %v3581_v45  ;;  %v687_v38 = vadd.f32 %v655_v8, %v587_v31  ;;  %v1354_v16 = vmul.f32 %v10073_v24, %v619_v61  ;;  %v1985_v62 = vadd.f32 %v1953_v22, %v1885_v5  ;;  %v349_v55 = vld [vmem:[%s5854_s21 + $0xd0] sm:$0xff] }
 0x19c   : > { %v2683_v7 = vadd.f32 %v2651_v23, %v2583_v46  ;;  %v3282_v20 = vadd.f32 %v3250_v32, %v3181_v12  ;;  %v456_v3 = vmul.f32 %v10084_v29, %v7990_v51  ;;  %v556_v42 = vmul.f32 %v10085_v49, %v7992_v34  ;;  %v8016_v46 = vld [vmem:[#allocation2 + $0x189] sm:$0xff]  ;;  %v10126_v32 = vld [vmem:[#allocation19_spill] sm:$0xff]  ;;  %382 = vst.msk [vmem:[#allocation2 + $0x208] sm:$0xff] %vm233_vm0, %v349_v55 }
 0x19d   : > { %v8008_v39 = vadd.f32 %v3150_v10, %v3082_v11  ;;  %v755_v21 = vmul.f32 %v10072_v0, %v719_v19  ;;  %v2053_v45 = vmul.f32 %v10109_v36, %v619_v61  ;;  %v2751_v31 = vmul.f32 %v6252_v37, %v619_v61  ;;  %383 = vst.msk [vmem:[#allocation2 + $0x210] sm:$0xff] %vm233_vm0, %v350_v15 }
 0x19e   : > { %v1386_v5 = vadd.f32 %v1354_v16, %v1286_v63  ;;  %v3350_v8 = vmul.f32 %v6400_v14, %v519_v13  ;;  %v588_v12 = vadd.f32 %v556_v42, %v456_v3  ;;  %v656_v22 = vmul.f32 %v10106_v4, %v8002_v58  ;;  %v10128_v42 = vld [vmem:[#allocation14_spill] sm:$0xff] }
 0x19f   : > { %v787_v23 = vadd.f32 %v755_v21, %v687_v38  ;;  %v1454_v57 = vmul.f32 %v10126_v32, %v719_v19  ;;  %v2085_v10 = vadd.f32 %v2053_v45, %v1985_v62  ;;  %v2153_v11 = vmul.f32 %v10093_v40, %v719_v19  ;;  %v8030_v62 = vld [vmem:[#allocation2 + $0x191] sm:$0xff] }
 0x1a0   : > { %v8024_v48 = vadd.f32 %v3749_v35, %v3681_v56  ;;  %v2783_v63 = vadd.f32 %v2751_v31, %v2683_v7  ;;  %v3382_v13 = vadd.f32 %v3350_v8, %v3282_v20  ;;  %v688_v16 = vadd.f32 %v656_v22, %v588_v12  ;;  %v8043_v7 = vld [vmem:[#allocation2 + $0x18a] sm:$0xff]  ;;  %v8045_v31 = vld [vmem:[#allocation2 + $0x192] sm:$0xff] }
 0x1a1   : > { %v2851_v38 = vmul.f32 %v6264_v33, %v719_v19  ;;  %v3450_v3 = vmul.f32 %v6404_v54, %v619_v61  ;;  %v855_v21 = vmul.f32 %v10128_v42, %v8016_v46  ;;  %v1155_v35 = vmul.f32 %v5928_v50, %v7990_v51  ;;  %v8047_v8 = vld [vmem:[#allocation2 + $0x18b] sm:$0xff]  ;;  %v8049_v12 = vld [vmem:[#allocation2 + $0x193] sm:$0xff] }
 0x1a2   : > { %10127 = vst [vmem:[#allocation19_spill] sm:$0xff] %v8024_v48  ;;  %v1486_v56 = vadd.f32 %v1454_v57, %v1386_v5  ;;  %v3550_v20 = vmul.f32 %v6416_v9, %v719_v19  ;;  %v8039_v55 = vmul.f32 %v6672_v6, %v7940_v60  ;;  %v756_v15 = vmul.f32 %v10072_v0, %v8020_v27 }
 0x1a3   : > { %v2185_v61 = vadd.f32 %v2153_v11, %v2085_v10  ;;  %v887_v45 = vadd.f32 %v855_v21, %v787_v23  ;;  %v1187_v57 = vadd.f32 %v1155_v35, %v7930_v41  ;;  %v1255_v19 = vmul.f32 %v10070_v30, %v7992_v34  ;;  %v10130_v10 = vld [vmem:[#allocation15_spill] sm:$0xff] }
 0x1a4   : > { %10129 = vst [vmem:[#allocation94_spill] sm:$0xff] %v8039_v55  ;;  %v2883_v60 = vadd.f32 %v2851_v38, %v2783_v63  ;;  %v3482_v5 = vadd.f32 %v3450_v3, %v3382_v13  ;;  %v788_v22 = vadd.f32 %v756_v15, %v688_v16  ;;  %v856_v48 = vmul.f32 %v10128_v42, %v8030_v62  ;;  %v10131_v63 = vld [vmem:[#allocation16_spill] sm:$0xff] }
 0x1a5   : > { %v955_v23 = vmul.f32 %v10130_v10, %v8043_v7  ;;  %v1287_v11 = vadd.f32 %v1255_v19, %v1187_v57  ;;  %v1355_v21 = vmul.f32 %v10073_v24, %v8002_v58  ;;  %v1854_v55 = vmul.f32 %v6067_v2, %v7990_v51 }
 0x1a6   : > { %v956_v41 = vmul.f32 %v10130_v10, %v8045_v31  ;;  %v1055_v13 = vmul.f32 %v10131_v63, %v8047_v8  ;;  %v1056_v16 = vmul.f32 %v10131_v63, %v8049_v12  ;;  %v1455_v38 = vmul.f32 %v10126_v32, %v8020_v27  ;;  %v10132_v10 = vld [vmem:[#allocation20_spill] sm:$0xff] }
 0x1a7   : > { %v987_v3 = vadd.f32 %v955_v23, %v887_v45  ;;  %v1387_v35 = vadd.f32 %v1355_v21, %v1287_v11  ;;  %v1886_v15 = vadd.f32 %v1854_v55, %v7946_v44  ;;  %v1954_v57 = vmul.f32 %v6086_v1, %v7992_v34  ;;  %v10133_v23 = vld [vmem:[#allocation26_spill] sm:$0xff]  ;;  %v10134_v11 = vld [vmem:[#allocation21_spill] sm:$0xff] }
 0x1a8   : > { %v8073_v19 = vadd.f32 %v3550_v20, %v3482_v5  ;;  %v888_v42 = vadd.f32 %v856_v48, %v788_v22  ;;  %v1554_v24 = vmul.f32 %v10132_v10, %v8016_v46  ;;  %v1555_v0 = vmul.f32 %v10132_v10, %v8030_v62 }
 0x1a9   : > { %v1487_v63 = vadd.f32 %v1455_v38, %v1387_v35  ;;  %v1986_v30 = vadd.f32 %v1954_v57, %v1886_v15  ;;  %v2054_v45 = vmul.f32 %v10109_v36, %v8002_v58  ;;  %v2253_v44 = vmul.f32 %v10133_v23, %v8016_v46  ;;  %v10135_v57 = vld [vmem:[#allocation22_spill] sm:$0xff] }
 0x1aa   : > { %v1586_v55 = vadd.f32 %v1554_v24, %v1486_v56  ;;  %v1654_v20 = vmul.f32 %v10134_v11, %v8043_v7  ;;  %v1655_v48 = vmul.f32 %v10134_v11, %v8045_v31  ;;  %v2552_v5 = vmul.f32 %v6202_v53, %v7990_v51 }
 0x1ab   : > { %v8089_v22 = vadd.f32 %v1055_v13, %v987_v3  ;;  %v2086_v21 = vadd.f32 %v2054_v45, %v1986_v30  ;;  %v2154_v38 = vmul.f32 %v10093_v40, %v8020_v27  ;;  %v2285_v35 = vadd.f32 %v2253_v44, %v2185_v61 }
 0x1ac   : > { %v988_v15 = vadd.f32 %v956_v41, %v888_v42  ;;  %v1754_v24 = vmul.f32 %v10135_v57, %v8047_v8  ;;  %v2584_v56 = vadd.f32 %v2552_v5, %v7968_v28  ;;  %v2652_v10 = vmul.f32 %v6224_v18, %v7992_v34 }
 0x1ad   : > { %v1587_v11 = vadd.f32 %v1555_v0, %v1487_v63  ;;  %v2186_v36 = vadd.f32 %v2154_v38, %v2086_v21  ;;  %v2353_v13 = vmul.f32 %v6134_v25, %v8043_v7  ;;  %v2951_v30 = vmul.f32 %v6318_v17, %v8016_v46 }
 0x1ae   : > { %v1686_v3 = vadd.f32 %v1654_v20, %v1586_v55  ;;  %v1755_v42 = vmul.f32 %v10135_v57, %v8049_v12  ;;  %v2684_v61 = vadd.f32 %v2652_v10, %v2584_v56  ;;  %v2752_v41 = vmul.f32 %v6252_v37, %v8002_v58 }
 0x1af   : > { %v2254_v28 = vmul.f32 %v10133_v23, %v8030_v62  ;;  %v2385_v45 = vadd.f32 %v2353_v13, %v2285_v35  ;;  %v2983_v0 = vadd.f32 %v2951_v30, %v2883_v60  ;;  %v3251_v63 = vmul.f32 %v6389_v52, %v7990_v51  ;;  %v8119_v60 = vld [vmem:[#allocation2 + $0x1a5] sm:$0xff] }
 0x1b0   : > { %v8110_v44 = vadd.f32 %v1056_v16, %v988_v15  ;;  %v2453_v55 = vmul.f32 %v10117_v59, %v8047_v8  ;;  %v2784_v20 = vadd.f32 %v2752_v41, %v2684_v61  ;;  %v2852_v10 = vmul.f32 %v6264_v33, %v8020_v27  ;;  %v521_v30 = vld [vmem:[#allocation2 + $0x1a6] sm:$0xff] }
 0x1b1   : > { %v1687_v5 = vadd.f32 %v1655_v48, %v1587_v11  ;;  %v2286_v21 = vadd.f32 %v2254_v28, %v2186_v36  ;;  %v3051_v38 = vmul.f32 %v10118_v47, %v8043_v7  ;;  %v3283_v35 = vadd.f32 %v3251_v63, %v8008_v39 }
 0x1b2   : > { %v1786_v56 = vadd.f32 %v1754_v24, %v1686_v3  ;;  %v2354_v16 = vmul.f32 %v6134_v25, %v8045_v31  ;;  %v2454_v15 = vmul.f32 %v10117_v59, %v8049_v12  ;;  %v3351_v13 = vmul.f32 %v6400_v14, %v7992_v34 }
 0x1b3   : > { %v2485_v11 = vadd.f32 %v2453_v55, %v2385_v45  ;;  %v2884_v36 = vadd.f32 %v2852_v10, %v2784_v20  ;;  %v2952_v48 = vmul.f32 %v6318_v17, %v8030_v62  ;;  %v3083_v61 = vadd.f32 %v3051_v38, %v2983_v0  ;;  %v10136_v38 = vld [vmem:[#allocation40_spill] sm:$0xff] }
 0x1b4   : > { %v3052_v39 = vmul.f32 %v10118_v47, %v8045_v31  ;;  %v3151_v24 = vmul.f32 %v10119_v26, %v8047_v8  ;;  %v3383_v3 = vadd.f32 %v3351_v13, %v3283_v35  ;;  %v457_v41 = vmul.f32 %v10084_v29, %v8119_v60 }
 0x1b5   : > { %v8135_v28 = vadd.f32 %v1755_v42, %v1687_v5  ;;  %v2386_v34 = vadd.f32 %v2354_v16, %v2286_v21  ;;  %v3152_v45 = vmul.f32 %v10119_v26, %v8049_v12  ;;  %v557_v63 = vmul.f32 %v10085_v49, %v521_v30  ;;  %v621_v42 = vld [vmem:[#allocation2 + $0x1a7] sm:$0xff] }
 0x1b6   : > { %v3451_v0 = vmul.f32 %v6404_v54, %v8002_v58  ;;  %v3551_v55 = vmul.f32 %v6416_v9, %v8020_v27  ;;  %v3650_v20 = vmul.f32 %v10083_v43, %v8016_v46  ;;  %v3651_v10 = vmul.f32 %v10083_v43, %v8030_v62 }
 0x1b7   : > { %v2984_v5 = vadd.f32 %v2952_v48, %v2884_v36  ;;  %v3183_v21 = vadd.f32 %v3151_v24, %v3083_v61  ;;  %v3750_v35 = vmul.f32 %v10136_v38, %v8043_v7  ;;  %v589_v16 = vadd.f32 %v557_v63, %v457_v41  ;;  %v10137_v36 = vld [vmem:[#allocation41_spill] sm:$0xff] }
 0x1b8   : > { %v3483_v13 = vadd.f32 %v3451_v0, %v3383_v3  ;;  %v3751_v58 = vmul.f32 %v10136_v38, %v8045_v31  ;;  %v1156_v27 = vmul.f32 %v5928_v50, %v8119_v60  ;;  %v1855_v46 = vmul.f32 %v6067_v2, %v8119_v60  ;;  %v721_v31 = vld [vmem:[#allocation2 + $0x1a8] sm:$0xff] }
 0x1b9   : > { %v8156_v26 = vadd.f32 %v2454_v15, %v2386_v34  ;;  %v3682_v62 = vadd.f32 %v3650_v20, %v8073_v19  ;;  %v8161_v48 = vmul.f32 %v10137_v36, %v8047_v8  ;;  %v657_v7 = vmul.f32 %v10106_v4, %v621_v42  ;;  %v10141_v34 = vld [vmem:[#allocation17_spill] sm:$0xff] }
 0x1ba   : > { %v8166_v61 = vmul.f32 %v10137_v36, %v8049_v12  ;;  %v1188_v24 = vadd.f32 %v1156_v27, %v8089_v22  ;;  %v1887_v3 = vadd.f32 %v1855_v46, %v1786_v56  ;;  %v2553_v15 = vmul.f32 %v6202_v53, %v8119_v60  ;;  %v8179_v56 = vld [vmem:[#allocation2 + $0x1ad] sm:$0xff] }
 0x1bb   : > { %10138 = vst [vmem:[#allocation26_spill] sm:$0xff] %v8161_v48  ;;  %v3084_v19 = vadd.f32 %v3052_v39, %v2984_v5  ;;  %v8173_v8 = vmul.f32 %v6672_v6, %v7990_v51  ;;  %v689_v41 = vadd.f32 %v657_v7, %v589_v16  ;;  %v1256_v63 = vmul.f32 %v10141_v34, %v521_v30  ;;  %v8181_v27 = vld [vmem:[#allocation2 + $0x1ae] sm:$0xff]  ;;  %v10144_v51 = vld [vmem:[#allocation18_spill] sm:$0xff]  ;;  %v351_v7 = vld [vmem:[%s5854_s21 + $0xe0] sm:$0xff] }
 0x1bc   : > { %10139 = vst [vmem:[#allocation95_spill] sm:$0xff] %v8166_v61  ;;  %v3583_v0 = vadd.f32 %v3551_v55, %v3483_v13  ;;  %v1955_v12 = vmul.f32 %v6086_v1, %v521_v30  ;;  %v2585_v20 = vadd.f32 %v2553_v15, %v2485_v11  ;;  %v3252_v22 = vmul.f32 %v6389_v52, %v8119_v60  ;;  %v10143_v39 = vld [vmem:[#allocation13_spill] sm:$0xff]  ;;  %v352_v55 = vld [vmem:[%s5854_s21 + $0xe8] sm:$0xff] }
 0x1bd   : > { %10140 = vst [vmem:[#allocation96_spill] sm:$0xff] %v8173_v8  ;;  %v8183_v46 = vadd.f32 %v3750_v35, %v3682_v62  ;;  %v757_v5 = vmul.f32 %v10143_v39, %v721_v31  ;;  %v1356_v61 = vmul.f32 %v10144_v51, %v621_v42  ;;  %v1456_v16 = vmul.f32 %v10126_v32, %v721_v31  ;;  %v8191_v8 = vld [vmem:[#allocation2 + $0x1af] sm:$0xff] }
 0x1be   : > { %v1288_v13 = vadd.f32 %v1256_v63, %v1188_v24  ;;  %v1987_v48 = vadd.f32 %v1955_v12, %v1887_v3  ;;  %v2653_v11 = vmul.f32 %v6224_v18, %v521_v30  ;;  %v3284_v15 = vadd.f32 %v3252_v22, %v3183_v21  ;;  %v8193_v36 = vld [vmem:[#allocation2 + $0x1a9] sm:$0xff]  ;;  %384 = vst.msk [vmem:[#allocation2 + $0x228] sm:$0xff] %vm233_vm0, %v351_v7  ;;  %v10145_v63 = vld [vmem:[#allocation23_spill] sm:$0xff] }
 0x1bf   : > { %10142 = vst [vmem:[#allocation17_spill] sm:$0xff] %v8183_v46  ;;  %385 = vst.msk [vmem:[#allocation2 + $0x230] sm:$0xff] %vm233_vm0, %v352_v55  ;;  %v789_v35 = vadd.f32 %v757_v5, %v689_v41  ;;  %v3352_v62 = vmul.f32 %v6400_v14, %v521_v30  ;;  %v458_v46 = vmul.f32 %v10084_v29, %v8179_v56  ;;  %v8207_v41 = vld [vmem:[#allocation2 + $0x1b0] sm:$0xff]  ;;  %v10146_v30 = vld [vmem:[#allocation14_spill] sm:$0xff] }
 0x1c0   : > { %v558_v24 = vmul.f32 %v10085_v49, %v8181_v27  ;;  %v8202_v3 = vadd.f32 %v3152_v45, %v3084_v19  ;;  %v3683_v21 = vadd.f32 %v3651_v10, %v3583_v0  ;;  %v2055_v12 = vmul.f32 %v10145_v63, %v621_v42  ;;  %v8213_v10 = vld [vmem:[#allocation2 + $0x1aa] sm:$0xff] }
 0x1c1   : > { %v2685_v22 = vadd.f32 %v2653_v11, %v2585_v20  ;;  %v3384_v38 = vadd.f32 %v3352_v62, %v3284_v15  ;;  %v658_v7 = vmul.f32 %v10106_v4, %v8191_v8  ;;  %v857_v5 = vmul.f32 %v10146_v30, %v8193_v36 }
 0x1c2   : > { %v590_v43 = vadd.f32 %v558_v24, %v458_v46  ;;  %v1388_v55 = vadd.f32 %v1356_v61, %v1288_v13  ;;  %v2087_v29 = vadd.f32 %v2055_v12, %v1987_v48  ;;  %v2155_v49 = vmul.f32 %v10093_v40, %v721_v31  ;;  %v8223_v13 = vld [vmem:[#allocation2 + $0x1b1] sm:$0xff] }
 0x1c3   : > { %v2753_v45 = vmul.f32 %v6252_v37, %v621_v42  ;;  %v3452_v19 = vmul.f32 %v6404_v54, %v621_v42  ;;  %v889_v20 = vadd.f32 %v857_v5, %v789_v35  ;;  %v1157_v46 = vmul.f32 %v5928_v50, %v8179_v56  ;;  %v8225_v24 = vld [vmem:[#allocation2 + $0x1b2] sm:$0xff]  ;;  %v10148_v42 = vld [vmem:[#allocation15_spill] sm:$0xff] }
 0x1c4   : > { %v690_v0 = vadd.f32 %v658_v7, %v590_v43  ;;  %v8218_v11 = vadd.f32 %v3751_v58, %v3683_v21  ;;  %v2853_v62 = vmul.f32 %v6264_v33, %v721_v31  ;;  %v758_v48 = vmul.f32 %v10143_v39, %v8207_v41  ;;  %v8239_v5 = vld [vmem:[#allocation2 + $0x1b3] sm:$0xff] }
 0x1c5   : > { %v2785_v15 = vadd.f32 %v2753_v45, %v2685_v22  ;;  %v3484_v61 = vadd.f32 %v3452_v19, %v3384_v38  ;;  %v957_v43 = vmul.f32 %v10148_v42, %v8213_v10  ;;  %v1189_v35 = vadd.f32 %v1157_v46, %v8110_v44  ;;  %v8237_v38 = vld [vmem:[#allocation2 + $0x1ab] sm:$0xff] }
 0x1c6   : > { %10147 = vst [vmem:[#allocation13_spill] sm:$0xff] %v8218_v11  ;;  %v1257_v58 = vmul.f32 %v10141_v34, %v8181_v27  ;;  %v1488_v21 = vadd.f32 %v1456_v16, %v1388_v55  ;;  %v2187_v12 = vadd.f32 %v2155_v49, %v2087_v29  ;;  %v3552_v22 = vmul.f32 %v6416_v9, %v721_v31  ;;  %v10150_v16 = vld [vmem:[#allocation16_spill] sm:$0xff] }
 0x1c7   : > { %v8235_v7 = vmul.f32 %v6672_v6, %v8119_v60  ;;  %v790_v45 = vadd.f32 %v758_v48, %v690_v0  ;;  %v989_v19 = vadd.f32 %v957_v43, %v889_v20  ;;  %v1357_v44 = vmul.f32 %v10144_v51, %v8191_v8 }
 0x1c8   : > { %v1289_v11 = vadd.f32 %v1257_v58, %v1189_v35  ;;  %v2885_v46 = vadd.f32 %v2853_v62, %v2785_v15  ;;  %v858_v29 = vmul.f32 %v10146_v30, %v8223_v13  ;;  %v958_v49 = vmul.f32 %v10148_v42, %v8225_v24  ;;  %v10151_v62 = vld [vmem:[#allocation20_spill] sm:$0xff]  ;;  %v10152_v42 = vld [vmem:[#allocation21_spill] sm:$0xff]  ;;  %v354_v30 = vld [vmem:[%s5854_s21 + $0xf8] sm:$0xff] }
 0x1c9   : > { %10149 = vst [vmem:[#allocation18_spill] sm:$0xff] %v8235_v7  ;;  %v1856_v60 = vmul.f32 %v6067_v2, %v8179_v56  ;;  %v8249_v31 = vadd.f32 %v3552_v22, %v3484_v61  ;;  %v1057_v55 = vmul.f32 %v10150_v16, %v8237_v38  ;;  %v1058_v0 = vmul.f32 %v10150_v16, %v8239_v5 }
 0x1ca   : > { %v1389_v20 = vadd.f32 %v1357_v44, %v1289_v11  ;;  %v1457_v15 = vmul.f32 %v10126_v32, %v8207_v41  ;;  %v1556_v48 = vmul.f32 %v10151_v62, %v8193_v36  ;;  %v1956_v35 = vmul.f32 %v6086_v1, %v8181_v27  ;;  %387 = vst.msk [vmem:[#allocation2 + $0x250] sm:$0xff] %vm233_vm0, %v354_v30 }
 0x1cb   : > { %v1888_v43 = vadd.f32 %v1856_v60, %v8135_v28  ;;  %v890_v61 = vadd.f32 %v858_v29, %v790_v45  ;;  %v8262_v58 = vadd.f32 %v1057_v55, %v989_v19  ;;  %v1557_v22 = vmul.f32 %v10151_v62, %v8223_v13 }
 0x1cc   : > { %v2056_v11 = vmul.f32 %v10145_v63, %v8191_v8  ;;  %v1489_v44 = vadd.f32 %v1457_v15, %v1389_v20  ;;  %v2255_v16 = vmul.f32 %v10133_v23, %v8193_v36  ;;  %v2554_v28 = vmul.f32 %v6202_v53, %v8179_v56 }
 0x1cd   : > { %v1988_v7 = vadd.f32 %v1956_v35, %v1888_v43  ;;  %v1588_v60 = vadd.f32 %v1556_v48, %v1488_v21  ;;  %v1656_v45 = vmul.f32 %v10152_v42, %v8213_v10  ;;  %v1657_v19 = vmul.f32 %v10152_v42, %v8225_v24 }
 0x1ce   : > { %v2156_v29 = vmul.f32 %v10093_v40, %v8207_v41  ;;  %v2287_v20 = vadd.f32 %v2255_v16, %v2187_v12  ;;  %v2586_v15 = vadd.f32 %v2554_v28, %v8156_v26  ;;  %v2654_v43 = vmul.f32 %v6224_v18, %v8181_v27  ;;  %v353_v28 = vld [vmem:[%s5854_s21 + $0xf0] sm:$0xff] }
 0x1cf   : > { %v2088_v55 = vadd.f32 %v2056_v11, %v1988_v7  ;;  %v990_v35 = vadd.f32 %v958_v49, %v890_v61  ;;  %v1756_v21 = vmul.f32 %v10135_v57, %v8237_v38  ;;  %v2355_v48 = vmul.f32 %v6134_v25, %v8213_v10  ;;  %386 = vst.msk [vmem:[#allocation2 + $0x248] sm:$0xff] %vm233_vm0, %v353_v28  ;;  %v10155_v28 = vld [vmem:[#allocation6_spill] sm:$0xff] }
 0x1d0   : > { %v2953_v42 = vmul.f32 %v6318_v17, %v8193_v36  ;;  %v1589_v62 = vadd.f32 %v1557_v22, %v1489_v44  ;;  %v2686_v11 = vadd.f32 %v2654_v43, %v2586_v15  ;;  %v2754_v12 = vmul.f32 %v6252_v37, %v8191_v8 }
 0x1d1   : > { %v2188_v7 = vadd.f32 %v2156_v29, %v2088_v55  ;;  %v1688_v26 = vadd.f32 %v1656_v45, %v1588_v60  ;;  %v2256_v16 = vmul.f32 %v10133_v23, %v8223_v13  ;;  %v3253_v61 = vmul.f32 %v6389_v52, %v8179_v56 }
 0x1d2   : > { %v2985_v49 = vadd.f32 %v2953_v42, %v2885_v46  ;;  %v1757_v40 = vmul.f32 %v10135_v57, %v8239_v5  ;;  %v2356_v22 = vmul.f32 %v6134_v25, %v8225_v24  ;;  %v2387_v44 = vadd.f32 %v2355_v48, %v2287_v20  ;;  %v8312_v48 = vld [vmem:[#allocation2 + $0x1c5] sm:$0xff] }
 0x1d3   : > { %v2786_v29 = vadd.f32 %v2754_v12, %v2686_v11  ;;  %v2288_v60 = vadd.f32 %v2256_v16, %v2188_v7  ;;  %v3053_v42 = vmul.f32 %v10118_v47, %v8213_v10  ;;  %v3285_v46 = vadd.f32 %v3253_v61, %v8202_v3  ;;  %v523_v12 = vld [vmem:[#allocation2 + $0x1c6] sm:$0xff] }
 0x1d4   : > { %v3353_v45 = vmul.f32 %v6400_v14, %v8181_v27  ;;  %v8306_v55 = vadd.f32 %v1058_v0, %v990_v35  ;;  %v1689_v15 = vadd.f32 %v1657_v19, %v1589_v62  ;;  %v2455_v20 = vmul.f32 %v10117_v59, %v8237_v38  ;;  %v10153_v35 = vld [vmem:[#allocation28_spill] sm:$0xff] }
 0x1d5   : > { %v2854_v43 = vmul.f32 %v6264_v33, %v8207_v41  ;;  %v1788_v30 = vadd.f32 %v1756_v21, %v1688_v26  ;;  %v2456_v7 = vmul.f32 %v10117_v59, %v8239_v5  ;;  %v3085_v11 = vadd.f32 %v3053_v42, %v2985_v49  ;;  %v10154_v21 = vld [vmem:[#allocation29_spill] sm:$0xff]  ;;  %v623_v59 = vld [vmem:[#allocation2 + $0x1c7] sm:$0xff] }
 0x1d6   : > { %v3385_v3 = vadd.f32 %v3353_v45, %v3285_v46  ;;  %v2487_v16 = vadd.f32 %v2455_v20, %v2387_v44  ;;  %v2954_v0 = vmul.f32 %v6318_v17, %v8223_v13  ;;  %v3453_v62 = vmul.f32 %v6404_v54, %v8191_v8  ;;  %v10156_v46 = vld [vmem:[#allocation7_spill] sm:$0xff] }
 0x1d7   : > { %v2886_v27 = vadd.f32 %v2854_v43, %v2786_v29  ;;  %v2388_v19 = vadd.f32 %v2356_v22, %v2288_v60  ;;  %v3153_v61 = vmul.f32 %v10153_v35, %v8237_v38  ;;  %v3652_v26 = vmul.f32 %v10154_v21, %v8193_v36 }
 0x1d8   : > { %v459_v49 = vmul.f32 %v10155_v28, %v8312_v48  ;;  %v8326_v42 = vadd.f32 %v1757_v40, %v1689_v15  ;;  %v3054_v44 = vmul.f32 %v10118_v47, %v8225_v24  ;;  %v3485_v29 = vadd.f32 %v3453_v62, %v3385_v3  ;;  %v10157_v15 = vld [vmem:[#allocation40_spill] sm:$0xff] }
 0x1d9   : > { %v559_v45 = vmul.f32 %v10156_v46, %v523_v12  ;;  %v3154_v8 = vmul.f32 %v10153_v35, %v8239_v5  ;;  %v3185_v22 = vadd.f32 %v3153_v61, %v3085_v11  ;;  %v3553_v60 = vmul.f32 %v6416_v9, %v8207_v41 }
 0x1da   : > { %v3684_v36 = vadd.f32 %v3652_v26, %v8249_v31  ;;  %v2986_v20 = vadd.f32 %v2954_v0, %v2886_v27  ;;  %v3653_v40 = vmul.f32 %v10154_v21, %v8223_v13  ;;  %v3752_v43 = vmul.f32 %v10157_v15, %v8213_v10  ;;  %v10158_v27 = vld [vmem:[#allocation41_spill] sm:$0xff]  ;;  %v723_v0 = vld [vmem:[#allocation2 + $0x1c8] sm:$0xff] }
 0x1db   : > { %v1158_v3 = vmul.f32 %v5928_v50, %v8312_v48  ;;  %v8342_v62 = vadd.f32 %v2456_v7, %v2388_v19  ;;  %v3753_v11 = vmul.f32 %v10157_v15, %v8225_v24  ;;  %v591_v61 = vadd.f32 %v559_v45, %v459_v49 }
 0x1dc   : > { %v1857_v41 = vmul.f32 %v6067_v2, %v8312_v48  ;;  %v3585_v31 = vadd.f32 %v3553_v60, %v3485_v29  ;;  %v8350_v13 = vmul.f32 %v10158_v27, %v8237_v38  ;;  %v2555_v26 = vmul.f32 %v6202_v53, %v8312_v48  ;;  %v8367_v60 = vld [vmem:[#allocation2 + $0x1cd] sm:$0xff] }
 0x1dd   : > { %v1190_v10 = vadd.f32 %v1158_v3, %v8262_v58  ;;  %v8355_v7 = vadd.f32 %v3752_v43, %v3684_v36  ;;  %v8359_v24 = vmul.f32 %v10158_v27, %v8239_v5  ;;  %v659_v19 = vmul.f32 %v10106_v4, %v623_v59  ;;  %v8369_v3 = vld [vmem:[#allocation2 + $0x1ce] sm:$0xff] }
 0x1de   : > { %10159 = vst [vmem:[#allocation28_spill] sm:$0xff] %v8350_v13  ;;  %v1889_v49 = vadd.f32 %v1857_v41, %v1788_v30  ;;  %v3086_v29 = vadd.f32 %v3054_v44, %v2986_v20  ;;  %v8364_v38 = vmul.f32 %v6672_v6, %v8179_v56  ;;  %v1258_v45 = vmul.f32 %v10141_v34, %v523_v12 }
 0x1df   : > { %10160 = vst [vmem:[#allocation6_spill] sm:$0xff] %v8355_v7  ;;  %10161 = vst [vmem:[#allocation97_spill] sm:$0xff] %v8359_v24  ;;  %v2587_v58 = vadd.f32 %v2555_v26, %v2487_v16  ;;  %v691_v36 = vadd.f32 %v659_v19, %v591_v61  ;;  %v759_v43 = vmul.f32 %v10143_v39, %v723_v0  ;;  %v8377_v24 = vld [vmem:[#allocation2 + $0x1cf] sm:$0xff] }
 0x1e0   : > { %10162 = vst [vmem:[#allocation98_spill] sm:$0xff] %v8364_v38  ;;  %v1957_v5 = vmul.f32 %v6086_v1, %v523_v12  ;;  %v3254_v30 = vmul.f32 %v6389_v52, %v8312_v48  ;;  %v3685_v44 = vadd.f32 %v3653_v40, %v3585_v31  ;;  %v1290_v20 = vadd.f32 %v1258_v45, %v1190_v10  ;;  %v8387_v10 = vld [vmem:[#allocation2 + $0x1c9] sm:$0xff] }
 0x1e1   : > { %v1358_v56 = vmul.f32 %v10144_v51, %v623_v59  ;;  %v2655_v41 = vmul.f32 %v6224_v18, %v523_v12  ;;  %v460_v61 = vmul.f32 %v10155_v28, %v8367_v60  ;;  %v560_v19 = vmul.f32 %v10156_v46, %v8369_v3 }
 0x1e2   : > { %v1989_v16 = vadd.f32 %v1957_v5, %v1889_v49  ;;  %v3286_v26 = vadd.f32 %v3254_v30, %v3185_v22  ;;  %v8383_v13 = vadd.f32 %v3154_v8, %v3086_v29  ;;  %v1458_v7 = vmul.f32 %v10126_v32, %v723_v0  ;;  %v8392_v5 = vld [vmem:[#allocation2 + $0x1d0] sm:$0xff]  ;;  %v10164_v29 = vld [vmem:[#allocation24_spill] sm:$0xff] }
 0x1e3   : > { %v2057_v40 = vmul.f32 %v10145_v63, %v623_v59  ;;  %v2687_v31 = vadd.f32 %v2655_v41, %v2587_v58  ;;  %v791_v45 = vadd.f32 %v759_v43, %v691_v36  ;;  %v3354_v38 = vmul.f32 %v6400_v14, %v523_v12  ;;  %v10165_v36 = vld [vmem:[#allocation14_spill] sm:$0xff] }
 0x1e4   : > { %v592_v49 = vadd.f32 %v560_v19, %v460_v61  ;;  %v660_v22 = vmul.f32 %v10106_v4, %v8377_v24  ;;  %v8394_v30 = vadd.f32 %v3753_v11, %v3685_v44  ;;  %v1390_v8 = vadd.f32 %v1358_v56, %v1290_v20  ;;  %v8403_v4 = vld [vmem:[#allocation2 + $0x1d1] sm:$0xff] }
 0x1e5   : > { %v2157_v27 = vmul.f32 %v10164_v29, %v723_v0  ;;  %v2755_v15 = vmul.f32 %v6252_v37, %v623_v59  ;;  %v2089_v46 = vadd.f32 %v2057_v40, %v1989_v16  ;;  %v3386_v58 = vadd.f32 %v3354_v38, %v3286_v26  ;;  %v8405_v11 = vld [vmem:[#allocation2 + $0x1ca] sm:$0xff]  ;;  %v8415_v40 = vld [vmem:[#allocation2 + $0x1d2] sm:$0xff] }
 0x1e6   : > { %10163 = vst [vmem:[#allocation99_spill] sm:$0xff] %v8394_v30  ;;  %v692_v41 = vadd.f32 %v660_v22, %v592_v49  ;;  %v859_v43 = vmul.f32 %v10165_v36, %v8387_v10  ;;  %v2855_v61 = vmul.f32 %v6264_v33, %v723_v0  ;;  %v760_v19 = vmul.f32 %v10143_v39, %v8392_v5 }
 0x1e7   : > { %v2787_v12 = vadd.f32 %v2755_v15, %v2687_v31  ;;  %v1159_v44 = vmul.f32 %v5928_v50, %v8367_v60  ;;  %v3454_v20 = vmul.f32 %v6404_v54, %v623_v59  ;;  %v3554_v38 = vmul.f32 %v6416_v9, %v723_v0  ;;  %v8417_v31 = vld [vmem:[#allocation2 + $0x1cb] sm:$0xff] }
 0x1e8   : > { %v8413_v56 = vmul.f32 %v6672_v6, %v8312_v48  ;;  %v891_v15 = vadd.f32 %v859_v43, %v791_v45  ;;  %v1490_v16 = vadd.f32 %v1458_v7, %v1390_v8  ;;  %v792_v26 = vadd.f32 %v760_v19, %v692_v41  ;;  %v10167_v48 = vld [vmem:[#allocation15_spill] sm:$0xff]  ;;  %v8426_v7 = vld [vmem:[#allocation2 + $0x1d3] sm:$0xff]  ;;  %v10169_v19 = vld [vmem:[#allocation20_spill] sm:$0xff] }
 0x1e9   : > { %v1191_v49 = vadd.f32 %v1159_v44, %v8306_v55  ;;  %v1259_v22 = vmul.f32 %v10141_v34, %v8369_v3  ;;  %v2189_v30 = vadd.f32 %v2157_v27, %v2089_v46  ;;  %v3486_v59 = vadd.f32 %v3454_v20, %v3386_v58  ;;  %v10168_v58 = vld [vmem:[#allocation16_spill] sm:$0xff] }
 0x1ea   : > { %10166 = vst [vmem:[#allocation24_spill] sm:$0xff] %v8413_v56  ;;  %v860_v0 = vmul.f32 %v10165_v36, %v8403_v4  ;;  %v959_v56 = vmul.f32 %v10167_v48, %v8405_v11  ;;  %v2887_v45 = vadd.f32 %v2855_v61, %v2787_v12  ;;  %v1359_v41 = vmul.f32 %v10144_v51, %v8377_v24 }
 0x1eb   : > { %v1291_v8 = vadd.f32 %v1259_v22, %v1191_v49  ;;  %v1858_v55 = vmul.f32 %v6067_v2, %v8367_v60  ;;  %v960_v46 = vmul.f32 %v10167_v48, %v8415_v40  ;;  %v1059_v43 = vmul.f32 %v10168_v58, %v8417_v31 }
 0x1ec   : > { %v991_v27 = vadd.f32 %v959_v56, %v891_v15  ;;  %v1558_v44 = vmul.f32 %v10169_v19, %v8387_v10  ;;  %v892_v12 = vadd.f32 %v860_v0, %v792_v26  ;;  %v1958_v49 = vmul.f32 %v6086_v1, %v8369_v3  ;;  %v10170_v26 = vld [vmem:[#allocation21_spill] sm:$0xff] }
 0x1ed   : > { %v1391_v61 = vadd.f32 %v1359_v41, %v1291_v8  ;;  %v1890_v20 = vadd.f32 %v1858_v55, %v8326_v42  ;;  %v8441_v22 = vadd.f32 %v3554_v38, %v3486_v59  ;;  %v1060_v36 = vmul.f32 %v10168_v58, %v8426_v7 }
 0x1ee   : > { %v1459_v56 = vmul.f32 %v10126_v32, %v8392_v5  ;;  %v1590_v15 = vadd.f32 %v1558_v44, %v1490_v16  ;;  %v1559_v48 = vmul.f32 %v10169_v19, %v8403_v4  ;;  %v1658_v0 = vmul.f32 %v10170_v26, %v8405_v11 }
 0x1ef   : > { %v1990_v8 = vadd.f32 %v1958_v49, %v1890_v20  ;;  %v2058_v42 = vmul.f32 %v10145_v63, %v8377_v24  ;;  %v1659_v38 = vmul.f32 %v10170_v26, %v8415_v40  ;;  %v2257_v59 = vmul.f32 %v10133_v23, %v8387_v10 }
 0x1f0   : > { %v1491_v41 = vadd.f32 %v1459_v56, %v1391_v61  ;;  %v2556_v16 = vmul.f32 %v6202_v53, %v8367_v60  ;;  %v992_v55 = vadd.f32 %v960_v46, %v892_v12  ;;  %v8459_v44 = vadd.f32 %v1059_v43, %v991_v27 }
 0x1f1   : > { %v2090_v19 = vadd.f32 %v2058_v42, %v1990_v8  ;;  %v2158_v20 = vmul.f32 %v10164_v29, %v8392_v5  ;;  %v1690_v49 = vadd.f32 %v1658_v0, %v1590_v15  ;;  %v2289_v58 = vadd.f32 %v2257_v59, %v2189_v30 }
 0x1f2   : > { %v2588_v61 = vadd.f32 %v2556_v16, %v8342_v62  ;;  %v2656_v56 = vmul.f32 %v6224_v18, %v8369_v3  ;;  %v1758_v26 = vmul.f32 %v10135_v57, %v8417_v31  ;;  %v2258_v46 = vmul.f32 %v10133_v23, %v8403_v4 }
 0x1f3   : > { %v2190_v63 = vadd.f32 %v2158_v20, %v2090_v19  ;;  %v2955_v27 = vmul.f32 %v6318_v17, %v8387_v10  ;;  %v1591_v43 = vadd.f32 %v1559_v48, %v1491_v41  ;;  %v2357_v12 = vmul.f32 %v6134_v25, %v8405_v11 }
 0x1f4   : > { %v2688_v30 = vadd.f32 %v2656_v56, %v2588_v61  ;;  %v2756_v62 = vmul.f32 %v6252_v37, %v8377_v24  ;;  %v8476_v15 = vadd.f32 %v1060_v36, %v992_v55  ;;  %v1759_v0 = vmul.f32 %v10135_v57, %v8426_v7  ;;  %v525_v56 = vld [vmem:[#allocation2 + $0x1e6] sm:$0xff] }
 0x1f5   : > { %v2987_v19 = vadd.f32 %v2955_v27, %v2887_v45  ;;  %v3255_v8 = vmul.f32 %v6389_v52, %v8367_v60  ;;  %v1790_v42 = vadd.f32 %v1758_v26, %v1690_v49  ;;  %v2290_v59 = vadd.f32 %v2258_v46, %v2190_v63  ;;  %v10171_v26 = vld [vmem:[#allocation27_spill] sm:$0xff] }
 0x1f6   : > { %v2389_v16 = vadd.f32 %v2357_v12, %v2289_v58  ;;  %v2788_v48 = vadd.f32 %v2756_v62, %v2688_v30  ;;  %v2856_v41 = vmul.f32 %v6264_v33, %v8392_v5  ;;  %v3055_v20 = vmul.f32 %v10118_v47, %v8405_v11  ;;  %v8495_v49 = vld [vmem:[#allocation2 + $0x1e5] sm:$0xff] }
 0x1f7   : > { %v3287_v36 = vadd.f32 %v3255_v8, %v8383_v13  ;;  %v3355_v55 = vmul.f32 %v6400_v14, %v8369_v3  ;;  %v1691_v61 = vadd.f32 %v1659_v38, %v1591_v43  ;;  %v2358_v45 = vmul.f32 %v6134_v25, %v8415_v40 }
 0x1f8   : > { %v2457_v63 = vmul.f32 %v10171_v26, %v8417_v31  ;;  %v2458_v58 = vmul.f32 %v10171_v26, %v8426_v7  ;;  %v2888_v46 = vadd.f32 %v2856_v41, %v2788_v48  ;;  %v3087_v27 = vadd.f32 %v3055_v20, %v2987_v19  ;;  %v10172_v19 = vld [vmem:[#allocation7_spill] sm:$0xff] }
 0x1f9   : > { %v3387_v12 = vadd.f32 %v3355_v55, %v3287_v36  ;;  %v3455_v13 = vmul.f32 %v6404_v54, %v8377_v24  ;;  %v2390_v3 = vadd.f32 %v2358_v45, %v2290_v59  ;;  %v2956_v43 = vmul.f32 %v6318_v17, %v8403_v4 }
 0x1fa   : > { %v2489_v38 = vadd.f32 %v2457_v63, %v2389_v16  ;;  %v3155_v30 = vmul.f32 %v10153_v35, %v8417_v31  ;;  %v3654_v8 = vmul.f32 %v10154_v21, %v8387_v10  ;;  %v461_v48 = vmul.f32 %v10155_v28, %v8495_v49  ;;  %v10173_v63 = vld [vmem:[#allocation40_spill] sm:$0xff] }
 0x1fb   : > { %v3487_v62 = vadd.f32 %v3455_v13, %v3387_v12  ;;  %v561_v41 = vmul.f32 %v10172_v19, %v525_v56  ;;  %v8508_v20 = vadd.f32 %v1759_v0, %v1691_v61  ;;  %v3056_v24 = vmul.f32 %v10118_v47, %v8415_v40  ;;  %v625_v12 = vld [vmem:[#allocation2 + $0x1e7] sm:$0xff] }
 0x1fc   : > { %v3156_v59 = vmul.f32 %v10153_v35, %v8426_v7  ;;  %v3555_v16 = vmul.f32 %v6416_v9, %v8392_v5  ;;  %v2988_v36 = vadd.f32 %v2956_v43, %v2888_v46  ;;  %v3187_v55 = vadd.f32 %v3155_v30, %v3087_v27 }
 0x1fd   : > { %v3655_v10 = vmul.f32 %v10154_v21, %v8403_v4  ;;  %v3686_v45 = vadd.f32 %v3654_v8, %v8441_v22  ;;  %v3754_v0 = vmul.f32 %v10173_v63, %v8405_v11  ;;  %v3755_v61 = vmul.f32 %v10173_v63, %v8415_v40  ;;  %v10174_v4 = vld [vmem:[#allocation41_spill] sm:$0xff]  ;;  %v725_v40 = vld [vmem:[#allocation2 + $0x1e8] sm:$0xff] }
 0x1fe   : > { %v1160_v13 = vmul.f32 %v5928_v50, %v8495_v49  ;;  %v1859_v5 = vmul.f32 %v6067_v2, %v8495_v49  ;;  %v8527_v46 = vadd.f32 %v2458_v58, %v2390_v3  ;;  %v3587_v27 = vadd.f32 %v3555_v16, %v3487_v62  ;;  %v8553_v16 = vld [vmem:[#allocation2 + $0x1ee] sm:$0xff] }
 0x1ff   : > { %v8531_v43 = vmul.f32 %v10174_v4, %v8417_v31  ;;  %v593_v22 = vadd.f32 %v561_v41, %v461_v48  ;;  %v8535_v11 = vmul.f32 %v10174_v4, %v8426_v7  ;;  %v2557_v63 = vmul.f32 %v6202_v53, %v8495_v49  ;;  %v10179_v31 = vld [vmem:[#allocation11_spill] sm:$0xff]  ;;  %v8577_v4 = vld [vmem:[#allocation2 + $0x1f0] sm:$0xff] }
 0x200   : > { %v1192_v30 = vadd.f32 %v1160_v13, %v8459_v44  ;;  %v1891_v8 = vadd.f32 %v1859_v5, %v1790_v42  ;;  %v3088_v21 = vadd.f32 %v3056_v24, %v2988_v36  ;;  %v8540_v58 = vadd.f32 %v3754_v0, %v3686_v45  ;;  %v8551_v42 = vld [vmem:[#allocation2 + $0x1ed] sm:$0xff] }
 0x201   : > { %10175 = vst [vmem:[#allocation27_spill] sm:$0xff] %v8531_v43  ;;  %10176 = vst [vmem:[#allocation7_spill] sm:$0xff] %v8535_v11  ;;  %v8544_v3 = vmul.f32 %v6672_v6, %v8367_v60  ;;  %v661_v62 = vmul.f32 %v10179_v31, %v625_v12  ;;  %v1260_v48 = vmul.f32 %v10141_v34, %v525_v56  ;;  %v8558_v43 = vld [vmem:[#allocation2 + $0x1ef] sm:$0xff] }
 0x202   : > { %10177 = vst [vmem:[#allocation100_spill] sm:$0xff] %v8540_v58  ;;  %v1959_v7 = vmul.f32 %v6086_v1, %v525_v56  ;;  %v2589_v41 = vadd.f32 %v2557_v63, %v2489_v38  ;;  %v3256_v44 = vmul.f32 %v6389_v52, %v8495_v49  ;;  %v3687_v24 = vadd.f32 %v3655_v10, %v3587_v27  ;;  %v10180_v27 = vld [vmem:[#allocation23_spill] sm:$0xff] }
 0x203   : > { %10178 = vst [vmem:[#allocation101_spill] sm:$0xff] %v8544_v3  ;;  %v693_v36 = vadd.f32 %v661_v62, %v593_v22  ;;  %v761_v45 = vmul.f32 %v10143_v39, %v725_v40  ;;  %v1360_v60 = vmul.f32 %v10144_v51, %v625_v12  ;;  %v1292_v0 = vadd.f32 %v1260_v48, %v1192_v30 }
 0x204   : > { %v1991_v13 = vadd.f32 %v1959_v7, %v1891_v8  ;;  %v2657_v5 = vmul.f32 %v6224_v18, %v525_v56  ;;  %v3288_v11 = vadd.f32 %v3256_v44, %v3187_v55  ;;  %v8560_v38 = vadd.f32 %v3156_v59, %v3088_v21  ;;  %v8570_v55 = vld [vmem:[#allocation2 + $0x1e9] sm:$0xff] }
 0x205   : > { %v1460_v63 = vmul.f32 %v10126_v32, %v725_v40  ;;  %v462_v58 = vmul.f32 %v10155_v28, %v8551_v42  ;;  %v562_v10 = vmul.f32 %v10172_v19, %v8553_v16  ;;  %v2059_v22 = vmul.f32 %v10180_v27, %v625_v12 }
 0x206   : > { %v2159_v30 = vmul.f32 %v10164_v29, %v725_v40  ;;  %v2689_v8 = vadd.f32 %v2657_v5, %v2589_v41  ;;  %v3356_v62 = vmul.f32 %v6400_v14, %v525_v56  ;;  %v8572_v48 = vadd.f32 %v3755_v61, %v3687_v24  ;;  %v8580_v56 = vld [vmem:[#allocation2 + $0x1f1] sm:$0xff] }
 0x207   : > { %v793_v21 = vadd.f32 %v761_v45, %v693_v36  ;;  %v594_v59 = vadd.f32 %v562_v10, %v462_v58  ;;  %v662_v7 = vmul.f32 %v10179_v31, %v8558_v43  ;;  %v1392_v28 = vadd.f32 %v1360_v60, %v1292_v0  ;;  %v10182_v61 = vld [vmem:[#allocation14_spill] sm:$0xff]  ;;  %v8592_v60 = vld [vmem:[#allocation2 + $0x1ea] sm:$0xff] }
 0x208   : > { %10181 = vst [vmem:[#allocation11_spill] sm:$0xff] %v8572_v48  ;;  %v2091_v44 = vadd.f32 %v2059_v22, %v1991_v13  ;;  %v2757_v19 = vmul.f32 %v6252_v37, %v625_v12  ;;  %v3388_v3 = vadd.f32 %v3356_v62, %v3288_v11  ;;  %v2857_v41 = vmul.f32 %v6264_v33, %v725_v40  ;;  %v8596_v10 = vld [vmem:[#allocation2 + $0x1f2] sm:$0xff] }
 0x209   : > { %v694_v5 = vadd.f32 %v662_v7, %v594_v59  ;;  %v861_v24 = vmul.f32 %v10182_v61, %v8570_v55  ;;  %v1161_v58 = vmul.f32 %v5928_v50, %v8551_v42  ;;  %v3456_v31 = vmul.f32 %v6404_v54, %v625_v12  ;;  %v8598_v22 = vld [vmem:[#allocation2 + $0x1eb] sm:$0xff]  ;;  %v8605_v7 = vld [vmem:[#allocation2 + $0x1f3] sm:$0xff] }
 0x20a   : > { %v2789_v36 = vadd.f32 %v2757_v19, %v2689_v8  ;;  %v3556_v45 = vmul.f32 %v6416_v9, %v725_v40  ;;  %v8590_v11 = vmul.f32 %v6672_v6, %v8495_v49  ;;  %v762_v0 = vmul.f32 %v10143_v39, %v8577_v4  ;;  %v10184_v39 = vld [vmem:[#allocation15_spill] sm:$0xff] }
 0x20b   : > { %v893_v13 = vadd.f32 %v861_v24, %v793_v21  ;;  %v1193_v8 = vadd.f32 %v1161_v58, %v8476_v15  ;;  %v1261_v12 = vmul.f32 %v10141_v34, %v8553_v16  ;;  %v1492_v40 = vadd.f32 %v1460_v63, %v1392_v28  ;;  %v10185_v63 = vld [vmem:[#allocation16_spill] sm:$0xff] }
 0x20c   : > { %10183 = vst [vmem:[#allocation23_spill] sm:$0xff] %v8590_v11  ;;  %v2191_v62 = vadd.f32 %v2159_v30, %v2091_v44  ;;  %v3488_v59 = vadd.f32 %v3456_v31, %v3388_v3  ;;  %v862_v49 = vmul.f32 %v10182_v61, %v8580_v56  ;;  %v794_v19 = vadd.f32 %v762_v0, %v694_v5 }
 0x20d   : > { %v961_v21 = vmul.f32 %v10184_v39, %v8592_v60  ;;  %v1293_v24 = vadd.f32 %v1261_v12, %v1193_v8  ;;  %v1361_v48 = vmul.f32 %v10144_v51, %v8558_v43  ;;  %v2889_v15 = vadd.f32 %v2857_v41, %v2789_v36  ;;  %v10186_v41 = vld [vmem:[#allocation20_spill] sm:$0xff] }
 0x20e   : > { %v962_v58 = vmul.f32 %v10184_v39, %v8596_v10  ;;  %v1061_v3 = vmul.f32 %v10185_v63, %v8598_v22  ;;  %v1860_v30 = vmul.f32 %v6067_v2, %v8551_v42  ;;  %v1062_v44 = vmul.f32 %v10185_v63, %v8605_v7  ;;  %v10187_v63 = vld [vmem:[#allocation21_spill] sm:$0xff] }
 0x20f   : > { %v993_v28 = vadd.f32 %v961_v21, %v893_v13  ;;  %v1393_v5 = vadd.f32 %v1361_v48, %v1293_v24  ;;  %v1461_v61 = vmul.f32 %v10126_v32, %v8577_v4  ;;  %v8621_v31 = vadd.f32 %v3556_v45, %v3488_v59 }
 0x210   : > { %v1560_v36 = vmul.f32 %v10186_v41, %v8570_v55  ;;  %v1892_v0 = vadd.f32 %v1860_v30, %v8508_v20  ;;  %v1960_v8 = vmul.f32 %v6086_v1, %v8553_v16  ;;  %v894_v12 = vadd.f32 %v862_v49, %v794_v19 }
 0x211   : > { %v1493_v39 = vadd.f32 %v1461_v61, %v1393_v5  ;;  %v1561_v13 = vmul.f32 %v10186_v41, %v8580_v56  ;;  %v2259_v48 = vmul.f32 %v10133_v23, %v8570_v55  ;;  %v2060_v45 = vmul.f32 %v10180_v27, %v8558_v43 }
 0x212   : > { %v1592_v21 = vadd.f32 %v1560_v36, %v1492_v40  ;;  %v1992_v24 = vadd.f32 %v1960_v8, %v1892_v0  ;;  %v2558_v59 = vmul.f32 %v6202_v53, %v8551_v42  ;;  %v1093_v20 = vadd.f32 %v1061_v3, %v993_v28 }
 0x213   : > { %v1660_v30 = vmul.f32 %v10187_v63, %v8592_v60  ;;  %v1661_v49 = vmul.f32 %v10187_v63, %v8596_v10  ;;  %v2291_v19 = vadd.f32 %v2259_v48, %v2191_v62  ;;  %v1760_v5 = vmul.f32 %v10135_v57, %v8598_v22 }
 0x214   : > { %v2092_v61 = vadd.f32 %v2060_v45, %v1992_v24  ;;  %v2590_v40 = vadd.f32 %v2558_v59, %v8527_v46  ;;  %v2658_v36 = vmul.f32 %v6224_v18, %v8553_v16  ;;  %v994_v0 = vadd.f32 %v962_v58, %v894_v12 }
 0x215   : > { %v1593_v8 = vadd.f32 %v1561_v13, %v1493_v39  ;;  %v2160_v3 = vmul.f32 %v10164_v29, %v8577_v4  ;;  %v2359_v28 = vmul.f32 %v6134_v25, %v8592_v60  ;;  %v1692_v11 = vadd.f32 %v1660_v30, %v1592_v21 }
 0x216   : > { %v2690_v63 = vadd.f32 %v2658_v36, %v2590_v40  ;;  %v2758_v62 = vmul.f32 %v6252_v37, %v8558_v43  ;;  %v2957_v48 = vmul.f32 %v6318_v17, %v8570_v55  ;;  %v1761_v46 = vmul.f32 %v10135_v57, %v8605_v7  ;;  %v8670_v57 = vld [vmem:[#allocation2 + $0x205] sm:$0xff] }
 0x217   : > { %v2192_v24 = vadd.f32 %v2160_v3, %v2092_v61  ;;  %v2391_v58 = vadd.f32 %v2359_v28, %v2291_v19  ;;  %v3257_v12 = vmul.f32 %v6389_v52, %v8551_v42  ;;  %v2260_v39 = vmul.f32 %v10133_v23, %v8580_v56 }
 0x218   : > { %v2360_v13 = vmul.f32 %v6134_v25, %v8596_v10  ;;  %v2790_v21 = vadd.f32 %v2758_v62, %v2690_v63  ;;  %v2989_v45 = vadd.f32 %v2957_v48, %v2889_v15  ;;  %v1693_v59 = vadd.f32 %v1661_v49, %v1593_v8 }
 0x219   : > { %v2459_v30 = vmul.f32 %v10171_v26, %v8598_v22  ;;  %v3289_v40 = vadd.f32 %v3257_v12, %v8560_v38  ;;  %v3357_v19 = vmul.f32 %v6400_v14, %v8553_v16  ;;  %v1094_v61 = vadd.f32 %v1062_v44, %v994_v0 }
 0x21a   : > { %v1792_v36 = vadd.f32 %v1760_v5, %v1692_v11  ;;  %v2858_v3 = vmul.f32 %v6264_v33, %v8577_v4  ;;  %v3057_v28 = vmul.f32 %v10118_v47, %v8592_v60  ;;  %v2292_v15 = vadd.f32 %v2260_v39, %v2192_v24  ;;  %v1226_v5 = vld [vmem:[#allocation2 + $0x206] sm:$0xff] }
 0x21b   : > { %v2460_v63 = vmul.f32 %v10171_v26, %v8605_v7  ;;  %v2491_v49 = vadd.f32 %v2459_v30, %v2391_v58  ;;  %v3389_v8 = vadd.f32 %v3357_v19, %v3289_v40  ;;  %v2958_v16 = vmul.f32 %v6318_v17, %v8580_v56 }
 0x21c   : > { %v2890_v38 = vadd.f32 %v2858_v3, %v2790_v21  ;;  %v3089_v44 = vadd.f32 %v3057_v28, %v2989_v45  ;;  %v3457_v11 = vmul.f32 %v6404_v54, %v8558_v43  ;;  %v8678_v0 = vadd.f32 %v1761_v46, %v1693_v59  ;;  %v10188_v43 = vld [vmem:[#allocation29_spill] sm:$0xff]  ;;  %v1326_v28 = vld [vmem:[#allocation2 + $0x207] sm:$0xff] }
 0x21d   : > { %v3058_v62 = vmul.f32 %v10118_v47, %v8596_v10  ;;  %v3157_v48 = vmul.f32 %v10153_v35, %v8598_v22  ;;  %v1162_v24 = vmul.f32 %v5928_v50, %v8670_v57  ;;  %v3158_v58 = vmul.f32 %v10153_v35, %v8605_v7 }
 0x21e   : > { %v3489_v12 = vadd.f32 %v3457_v11, %v3389_v8  ;;  %v3557_v39 = vmul.f32 %v6416_v9, %v8577_v4  ;;  %v3656_v46 = vmul.f32 %v10188_v43, %v8570_v55  ;;  %v2392_v21 = vadd.f32 %v2360_v13, %v2292_v15  ;;  %v10189_v15 = vld [vmem:[#allocation40_spill] sm:$0xff] }
 0x21f   : > { %v1194_v45 = vadd.f32 %v1162_v24, %v1093_v20  ;;  %v1262_v59 = vmul.f32 %v10141_v34, %v1226_v5  ;;  %v1861_v30 = vmul.f32 %v6067_v2, %v8670_v57  ;;  %v2990_v40 = vadd.f32 %v2958_v16, %v2890_v38 }
 0x220   : > { %v3189_v19 = vadd.f32 %v3157_v48, %v3089_v44  ;;  %v3657_v3 = vmul.f32 %v10188_v43, %v8580_v56  ;;  %v2559_v8 = vmul.f32 %v6202_v53, %v8670_v57  ;;  %v3688_v4 = vadd.f32 %v3656_v46, %v8621_v31  ;;  %v8705_v44 = vld [vmem:[#allocation2 + $0x20d] sm:$0xff] }
 0x221   : > { %v1294_v11 = vadd.f32 %v1262_v59, %v1194_v45  ;;  %v1893_v55 = vadd.f32 %v1861_v30, %v1792_v36  ;;  %v1961_v20 = vmul.f32 %v6086_v1, %v1226_v5  ;;  %v3589_v13 = vadd.f32 %v3557_v39, %v3489_v12  ;;  %v1426_v43 = vld [vmem:[#allocation2 + $0x208] sm:$0xff]  ;;  %v10190_v12 = vld [vmem:[#allocation41_spill] sm:$0xff] }
 0x222   : > { %v3756_v24 = vmul.f32 %v10189_v15, %v8592_v60  ;;  %v3757_v38 = vmul.f32 %v10189_v15, %v8596_v10  ;;  %v2591_v16 = vadd.f32 %v2559_v8, %v2491_v49  ;;  %v8707_v56 = vadd.f32 %v2460_v63, %v2392_v21  ;;  %v8721_v63 = vld [vmem:[#allocation2 + $0x20e] sm:$0xff] }
 0x223   : > { %v1362_v48 = vmul.f32 %v10144_v51, %v1326_v28  ;;  %v1993_v31 = vadd.f32 %v1961_v20, %v1893_v55  ;;  %v2659_v36 = vmul.f32 %v6224_v18, %v1226_v5  ;;  %v3090_v46 = vadd.f32 %v3058_v62, %v2990_v40 }
 0x224   : > { %v8713_v39 = vmul.f32 %v10190_v12, %v8598_v22  ;;  %v8717_v60 = vmul.f32 %v10190_v12, %v8605_v7  ;;  %v3258_v10 = vmul.f32 %v6389_v52, %v8670_v57  ;;  %v2061_v21 = vmul.f32 %v10180_v27, %v1326_v28  ;;  %v8729_v7 = vld [vmem:[#allocation2 + $0x20f] sm:$0xff] }
 0x225   : > { %v1394_v49 = vadd.f32 %v1362_v48, %v1294_v11  ;;  %v2691_v45 = vadd.f32 %v2659_v36, %v2591_v16  ;;  %v1163_v62 = vmul.f32 %v5928_v50, %v8705_v44  ;;  %v3689_v59 = vadd.f32 %v3657_v3, %v3589_v13  ;;  %v8744_v13 = vld [vmem:[#allocation2 + $0x209] sm:$0xff] }
 0x226   : > { %10191 = vst [vmem:[#allocation14_spill] sm:$0xff] %v8713_v39  ;;  %10192 = vst [vmem:[#allocation15_spill] sm:$0xff] %v8717_v60  ;;  %v8726_v30 = vadd.f32 %v3756_v24, %v3688_v4  ;;  %v1462_v22 = vmul.f32 %v10126_v32, %v1426_v43  ;;  %v3290_v40 = vadd.f32 %v3258_v10, %v3189_v19  ;;  %v8742_v19 = vld [vmem:[#allocation2 + $0x210] sm:$0xff]  ;;  %v8839_v60 = vld [vmem:[#allocation2 + $0x228] sm:$0xff] }
 0x227   : > { %v2093_v8 = vadd.f32 %v2061_v21, %v1993_v31  ;;  %v2759_v55 = vmul.f32 %v6252_v37, %v1326_v28  ;;  %v1195_v20 = vadd.f32 %v1163_v62, %v1094_v61  ;;  %v1263_v11 = vmul.f32 %v10141_v34, %v8721_v63  ;;  %v8755_v21 = vld [vmem:[#allocation2 + $0x211] sm:$0xff] }
 0x228   : > { %v8734_v48 = vadd.f32 %v3158_v58, %v3090_v46  ;;  %v8738_v50 = vmul.f32 %v6672_v6, %v8551_v42  ;;  %v2161_v3 = vmul.f32 %v10164_v29, %v1426_v43  ;;  %v3358_v4 = vmul.f32 %v6400_v14, %v1226_v5 }
 0x229   : > { %v1494_v24 = vadd.f32 %v1462_v22, %v1394_v49  ;;  %v2791_v16 = vadd.f32 %v2759_v55, %v2691_v45  ;;  %v1295_v61 = vadd.f32 %v1263_v11, %v1195_v20  ;;  %v1363_v34 = vmul.f32 %v10144_v51, %v8729_v7  ;;  %v8761_v45 = vld [vmem:[#allocation2 + $0x20a] sm:$0xff]  ;;  %v8770_v20 = vld [vmem:[#allocation2 + $0x212] sm:$0xff] }
 0x22a   : > { %v8748_v58 = vadd.f32 %v3757_v38, %v3689_v59  ;;  %v2859_v31 = vmul.f32 %v6264_v33, %v1426_v43  ;;  %v3390_v42 = vadd.f32 %v3358_v4, %v3290_v40  ;;  %v1862_v36 = vmul.f32 %v6067_v2, %v8705_v44 }
 0x22b   : > { %v2193_v46 = vadd.f32 %v2161_v3, %v2093_v8  ;;  %v1395_v5 = vadd.f32 %v1363_v34, %v1295_v61  ;;  %v1463_v10 = vmul.f32 %v10126_v32, %v8742_v19  ;;  %v1562_v49 = vmul.f32 %v10186_v41, %v8744_v13  ;;  %v10194_v3 = vld [vmem:[#allocation21_spill] sm:$0xff] }
 0x22c   : > { %10193 = vst [vmem:[#allocation16_spill] sm:$0xff] %v8748_v58  ;;  %v3458_v51 = vmul.f32 %v6404_v54, %v1326_v28  ;;  %v3558_v38 = vmul.f32 %v6416_v9, %v1426_v43  ;;  %v1894_v62 = vadd.f32 %v1862_v36, %v8678_v0  ;;  %v1962_v59 = vmul.f32 %v6086_v1, %v8721_v63  ;;  %v8780_v34 = vld [vmem:[#allocation2 + $0x20b] sm:$0xff] }
 0x22d   : > { %v2891_v22 = vadd.f32 %v2859_v31, %v2791_v16  ;;  %v1495_v40 = vadd.f32 %v1463_v10, %v1395_v5  ;;  %v1594_v8 = vadd.f32 %v1562_v49, %v1494_v24  ;;  %v2261_v32 = vmul.f32 %v10133_v23, %v8744_v13  ;;  %v8793_v49 = vld [vmem:[#allocation2 + $0x213] sm:$0xff] }
 0x22e   : > { %v1563_v55 = vmul.f32 %v10186_v41, %v8755_v21  ;;  %v1994_v28 = vadd.f32 %v1962_v59, %v1894_v62  ;;  %v2062_v43 = vmul.f32 %v10180_v27, %v8729_v7  ;;  %v2560_v0 = vmul.f32 %v6202_v53, %v8705_v44 }
 0x22f   : > { %v3490_v11 = vadd.f32 %v3458_v51, %v3390_v42  ;;  %v1662_v4 = vmul.f32 %v10194_v3, %v8761_v45  ;;  %v2162_v24 = vmul.f32 %v10164_v29, %v8742_v19  ;;  %v2293_v16 = vadd.f32 %v2261_v32, %v2193_v46 }
 0x230   : > { %v1595_v61 = vadd.f32 %v1563_v55, %v1495_v40  ;;  %v2094_v41 = vadd.f32 %v2062_v43, %v1994_v28  ;;  %v2592_v31 = vadd.f32 %v2560_v0, %v8707_v56  ;;  %v2660_v36 = vmul.f32 %v6224_v18, %v8721_v63 }
 0x231   : > { %v8787_v5 = vmul.f32 %v6672_v6, %v8670_v57  ;;  %v1663_v42 = vmul.f32 %v10194_v3, %v8770_v20  ;;  %v1694_v10 = vadd.f32 %v1662_v4, %v1594_v8  ;;  %v2959_v46 = vmul.f32 %v6318_v17, %v8744_v13  ;;  %v10196_v57 = vld [vmem:[#allocation22_spill] sm:$0xff] }
 0x232   : > { %v2194_v51 = vadd.f32 %v2162_v24, %v2094_v41  ;;  %v2361_v56 = vmul.f32 %v6134_v25, %v8761_v45  ;;  %v2692_v62 = vadd.f32 %v2660_v36, %v2592_v31  ;;  %v2760_v59 = vmul.f32 %v6252_v37, %v8729_v7  ;;  %v8816_v31 = vld [vmem:[#allocation2 + $0x225] sm:$0xff] }
 0x233   : > { %10195 = vst [vmem:[#allocation20_spill] sm:$0xff] %v8787_v5  ;;  %v3590_v40 = vadd.f32 %v3558_v38, %v3490_v11  ;;  %v1762_v32 = vmul.f32 %v10196_v57, %v8780_v34  ;;  %v2262_v8 = vmul.f32 %v10133_v23, %v8755_v21  ;;  %v2991_v55 = vadd.f32 %v2959_v46, %v2891_v22 }
 0x234   : > { %v1695_v28 = vadd.f32 %v1663_v42, %v1595_v61  ;;  %v2393_v43 = vadd.f32 %v2361_v56, %v2293_v16  ;;  %v2792_v0 = vadd.f32 %v2760_v59, %v2692_v62  ;;  %v3259_v3 = vmul.f32 %v6389_v52, %v8705_v44 }
 0x235   : > { %v1763_v4 = vmul.f32 %v10196_v57, %v8793_v49  ;;  %v1794_v24 = vadd.f32 %v1762_v32, %v1694_v10  ;;  %v2362_v38 = vmul.f32 %v6134_v25, %v8770_v20  ;;  %v3059_v11 = vmul.f32 %v10118_v47, %v8761_v45  ;;  %v1927_v57 = vld [vmem:[#allocation2 + $0x226] sm:$0xff] }
 0x236   : > { %v2294_v41 = vadd.f32 %v2262_v8, %v2194_v51  ;;  %v2461_v22 = vmul.f32 %v10171_v26, %v8780_v34  ;;  %v2860_v16 = vmul.f32 %v6264_v33, %v8742_v19  ;;  %v3291_v61 = vadd.f32 %v3259_v3, %v8734_v48 }
 0x237   : > { %v2462_v36 = vmul.f32 %v10171_v26, %v8793_v49  ;;  %v2960_v42 = vmul.f32 %v6318_v17, %v8755_v21  ;;  %v3060_v10 = vmul.f32 %v10118_v47, %v8770_v20  ;;  %v3091_v46 = vadd.f32 %v3059_v11, %v2991_v55 }
 0x238   : > { %v1795_v51 = vadd.f32 %v1763_v4, %v1695_v28  ;;  %v2493_v56 = vadd.f32 %v2461_v22, %v2393_v43  ;;  %v2892_v62 = vadd.f32 %v2860_v16, %v2792_v0  ;;  %v3359_v59 = vmul.f32 %v6400_v14, %v8721_v63  ;;  %v10197_v63 = vld [vmem:[#allocation29_spill] sm:$0xff]  ;;  %v2027_v4 = vld [vmem:[#allocation2 + $0x227] sm:$0xff] }
 0x239   : > { %v3159_v48 = vmul.f32 %v10153_v35, %v8780_v34  ;;  %v3160_v32 = vmul.f32 %v10153_v35, %v8793_v49  ;;  %v3459_v8 = vmul.f32 %v6404_v54, %v8729_v7  ;;  %v1863_v3 = vmul.f32 %v6067_v2, %v8816_v31 }
 0x23a   : > { %v2394_v55 = vadd.f32 %v2362_v38, %v2294_v41  ;;  %v3391_v28 = vadd.f32 %v3359_v59, %v3291_v61  ;;  %v3559_v43 = vmul.f32 %v6416_v9, %v8742_v19  ;;  %v3658_v0 = vmul.f32 %v10197_v63, %v8744_v13  ;;  %v8847_v61 = vld [vmem:[#allocation2 + $0x22d] sm:$0xff] }
 0x23b   : > { %v3191_v11 = vadd.f32 %v3159_v48, %v3091_v46  ;;  %v1895_v22 = vadd.f32 %v1863_v3, %v1794_v24  ;;  %v1963_v16 = vmul.f32 %v6086_v1, %v1927_v57  ;;  %v2561_v7 = vmul.f32 %v6202_v53, %v8816_v31 }
 0x23c   : > { %v2992_v58 = vadd.f32 %v2960_v42, %v2892_v62  ;;  %v3659_v38 = vmul.f32 %v10197_v63, %v8755_v21  ;;  %v3690_v41 = vadd.f32 %v3658_v0, %v3590_v40  ;;  %v3758_v19 = vmul.f32 %v10189_v15, %v8761_v45  ;;  %v8859_v45 = vld [vmem:[#allocation2 + $0x22e] sm:$0xff] }
 0x23d   : > { %v1995_v13 = vadd.f32 %v1963_v16, %v1895_v22  ;;  %v2063_v24 = vmul.f32 %v10180_v27, %v2027_v4  ;;  %v2593_v46 = vadd.f32 %v2561_v7, %v2493_v56  ;;  %v2661_v59 = vmul.f32 %v6224_v18, %v1927_v57  ;;  %v8870_v7 = vld [vmem:[#allocation2 + $0x22f] sm:$0xff] }
 0x23e   : > { %v3491_v48 = vadd.f32 %v3459_v8, %v3391_v28  ;;  %v8853_v3 = vmul.f32 %v10189_v15, %v8770_v20  ;;  %v2163_v21 = vmul.f32 %v10164_v29, %v8839_v60  ;;  %v3260_v40 = vmul.f32 %v6389_v52, %v8816_v31  ;;  %v8864_v8 = vld [vmem:[#allocation2 + $0x229] sm:$0xff] }
 0x23f   : > { %v2095_v42 = vadd.f32 %v2063_v24, %v1995_v13  ;;  %v2693_v62 = vadd.f32 %v2661_v59, %v2593_v46  ;;  %v2761_v0 = vmul.f32 %v6252_v37, %v2027_v4  ;;  %v1864_v56 = vmul.f32 %v6067_v2, %v8847_v61 }
 0x240   : > { %v2494_v28 = vadd.f32 %v2462_v36, %v2394_v55  ;;  %v3092_v20 = vadd.f32 %v3060_v10, %v2992_v58  ;;  %v8868_v22 = vmul.f32 %v10190_v12, %v8780_v34  ;;  %v3292_v16 = vadd.f32 %v3260_v40, %v3191_v11  ;;  %v8882_v34 = vld [vmem:[#allocation2 + $0x230] sm:$0xff] }
 0x241   : > { %v2195_v5 = vadd.f32 %v2163_v21, %v2095_v42  ;;  %v2793_v39 = vadd.f32 %v2761_v0, %v2693_v62  ;;  %v1896_v13 = vadd.f32 %v1864_v56, %v1795_v51  ;;  %v1964_v24 = vmul.f32 %v6086_v1, %v8859_v45  ;;  %v8889_v11 = vld [vmem:[#allocation2 + $0x22a] sm:$0xff]  ;;  %v2328_v56 = vld [vmem:[#allocation2 + $0x232] sm:$0xff] }
 0x242   : > { %v8874_v46 = vadd.f32 %v3758_v19, %v3690_v41  ;;  %v8878_v2 = vmul.f32 %v10190_v12, %v8793_v49  ;;  %v2861_v58 = vmul.f32 %v6264_v33, %v8839_v60  ;;  %v2263_v36 = vmul.f32 %v10133_v23, %v8864_v8  ;;  %v2228_v19 = vld [vmem:[#allocation2 + $0x231] sm:$0xff] }
 0x243   : > { %v3591_v10 = vadd.f32 %v3559_v43, %v3491_v48  ;;  %v3360_v51 = vmul.f32 %v6400_v14, %v1927_v57  ;;  %v1996_v55 = vadd.f32 %v1964_v24, %v1896_v13  ;;  %v2064_v1 = vmul.f32 %v10180_v27, %v8870_v7 }
 0x244   : > { %v8893_v49 = vmul.f32 %v6672_v6, %v8705_v44  ;;  %v2893_v41 = vadd.f32 %v2861_v58, %v2793_v39  ;;  %v2295_v59 = vadd.f32 %v2263_v36, %v2195_v5  ;;  %v2562_v21 = vmul.f32 %v6202_v53, %v8847_v61 }
 0x245   : > { %v3192_v40 = vadd.f32 %v3160_v32, %v3092_v20  ;;  %v3392_v43 = vadd.f32 %v3360_v51, %v3292_v16  ;;  %v2096_v48 = vadd.f32 %v2064_v1, %v1996_v55  ;;  %v2164_v57 = vmul.f32 %v10164_v29, %v8882_v34  ;;  %v8907_v20 = vld [vmem:[#allocation2 + $0x22b] sm:$0xff] }
 0x246   : > { %v2363_v27 = vmul.f32 %v6134_v25, %v8889_v11  ;;  %v2594_v42 = vadd.f32 %v2562_v21, %v2494_v28  ;;  %v2662_v44 = vmul.f32 %v6224_v18, %v8859_v45  ;;  %v2961_v39 = vmul.f32 %v6318_v17, %v8864_v8 }
 0x247   : > { %v3691_v5 = vadd.f32 %v3659_v38, %v3591_v10  ;;  %v3460_v62 = vmul.f32 %v6404_v54, %v2027_v4  ;;  %v2196_v0 = vadd.f32 %v2164_v57, %v2096_v48  ;;  %v2264_v32 = vmul.f32 %v10133_v23, %v2228_v19 }
 0x248   : > { %v2395_v29 = vadd.f32 %v2363_v27, %v2295_v59  ;;  %v2694_v16 = vadd.f32 %v2662_v44, %v2594_v42  ;;  %v2762_v28 = vmul.f32 %v6252_v37, %v8870_v7  ;;  %v2993_v13 = vadd.f32 %v2961_v39, %v2893_v41  ;;  %v2428_v41 = vld [vmem:[#allocation2 + $0x233] sm:$0xff]  ;;  %v2627_v39 = vld [vmem:[#allocation2 + $0x246] sm:$0xff] }
 0x249   : > { %v3492_v24 = vadd.f32 %v3460_v62, %v3392_v43  ;;  %v2296_v58 = vadd.f32 %v2264_v32, %v2196_v0  ;;  %v3061_v36 = vmul.f32 %v10118_v47, %v8889_v11  ;;  %v3261_v4 = vmul.f32 %v6389_v52, %v8847_v61  ;;  %v8926_v43 = vld [vmem:[#allocation2 + $0x245] sm:$0xff] }
 0x24a   : > { %v2364_v38 = vmul.f32 %v6134_v25, %v2328_v56  ;;  %v2463_v23 = vmul.f32 %v10171_v26, %v8907_v20  ;;  %v2794_v10 = vadd.f32 %v2762_v28, %v2694_v16  ;;  %v2862_v51 = vmul.f32 %v6264_v33, %v8882_v34  ;;  %v2727_v28 = vld [vmem:[#allocation2 + $0x247] sm:$0xff] }
 0x24b   : > { %v3560_v55 = vmul.f32 %v6416_v9, %v8839_v60  ;;  %v8924_v1 = vmul.f32 %v6672_v6, %v8816_v31  ;;  %v3093_v59 = vadd.f32 %v3061_v36, %v2993_v13  ;;  %v3293_v21 = vadd.f32 %v3261_v4, %v3192_v40  ;;  %v8943_v13 = vld [vmem:[#allocation2 + $0x24d] sm:$0xff] }
 0x24c   : > { %v2396_v25 = vadd.f32 %v2364_v38, %v2296_v58  ;;  %v2495_v48 = vadd.f32 %v2463_v23, %v2395_v29  ;;  %v2894_v57 = vadd.f32 %v2862_v51, %v2794_v10  ;;  %v2962_v27 = vmul.f32 %v6318_v17, %v2228_v19  ;;  %v2827_v23 = vld [vmem:[#allocation2 + $0x248] sm:$0xff] }
 0x24d   : > { %v8930_v42 = vadd.f32 %v8853_v3, %v3691_v5  ;;  %v3592_v44 = vadd.f32 %v3560_v55, %v3492_v24  ;;  %v3161_v60 = vmul.f32 %v10153_v35, %v8907_v20  ;;  %v3361_v31 = vmul.f32 %v6400_v14, %v8859_v45  ;;  %v2628_v10 = vld [vmem:[#allocation2 + $0x24e] sm:$0xff] }
 0x24e   : > { %v2464_v40 = vmul.f32 %v10171_v26, %v2428_v41  ;;  %v2994_v62 = vadd.f32 %v2962_v27, %v2894_v57  ;;  %v3062_v0 = vmul.f32 %v10118_v47, %v2328_v56  ;;  %v2563_v32 = vmul.f32 %v6202_v53, %v8926_v43  ;;  %v8963_v57 = vld [vmem:[#allocation2 + $0x249] sm:$0xff] }
 0x24f   : > { %v3162_v29 = vmul.f32 %v10153_v35, %v2428_v41  ;;  %v3193_v3 = vadd.f32 %v3161_v60, %v3093_v59  ;;  %v3393_v5 = vadd.f32 %v3361_v31, %v3293_v21  ;;  %v3461_v16 = vmul.f32 %v6404_v54, %v8870_v7 }
 0x250   : > { %v2496_v45 = vadd.f32 %v2464_v40, %v2396_v25  ;;  %v3561_v26 = vmul.f32 %v6416_v9, %v8882_v34  ;;  %v2595_v24 = vadd.f32 %v2563_v32, %v2495_v48  ;;  %v2663_v58 = vmul.f32 %v6224_v18, %v2627_v39  ;;  %v2728_v48 = vld [vmem:[#allocation2 + $0x24f] sm:$0xff] }
 0x251   : > { %v3094_v36 = vadd.f32 %v3062_v0, %v2994_v62  ;;  %v3660_v4 = vmul.f32 %v10197_v63, %v8864_v8  ;;  %v3661_v38 = vmul.f32 %v10197_v63, %v2228_v19  ;;  %v3262_v7 = vmul.f32 %v6389_v52, %v8926_v43  ;;  %v8975_v0 = vld [vmem:[#allocation2 + $0x24a] sm:$0xff] }
 0x252   : > { %v8955_v51 = vmul.f32 %v10189_v15, %v8889_v11  ;;  %v2695_v55 = vadd.f32 %v2663_v58, %v2595_v24  ;;  %v2763_v34 = vmul.f32 %v6252_v37, %v2727_v28  ;;  %v2564_v59 = vmul.f32 %v6202_v53, %v8943_v13 }
 0x253   : > { %v3493_v21 = vadd.f32 %v3461_v16, %v3393_v5  ;;  %v3692_v25 = vadd.f32 %v3660_v4, %v3592_v44  ;;  %v8961_v8 = vmul.f32 %v10189_v15, %v2328_v56  ;;  %v3294_v19 = vadd.f32 %v3262_v7, %v3193_v3  ;;  %v2828_v44 = vld [vmem:[#allocation2 + $0x250] sm:$0xff] }
 0x254   : > { %v2795_v27 = vadd.f32 %v2763_v34, %v2695_v55  ;;  %v2863_v60 = vmul.f32 %v6264_v33, %v2827_v23  ;;  %v2596_v11 = vadd.f32 %v2564_v59, %v2496_v45  ;;  %v2664_v31 = vmul.f32 %v6224_v18, %v2628_v10  ;;  %v8984_v45 = vld [vmem:[#allocation2 + $0x24b] sm:$0xff] }
 0x255   : > { %v3194_v40 = vadd.f32 %v3162_v29, %v3094_v36  ;;  %v8969_v62 = vmul.f32 %v10190_v12, %v8907_v20  ;;  %v8972_v53 = vmul.f32 %v10190_v12, %v2428_v41  ;;  %v3362_v56 = vmul.f32 %v6400_v14, %v2627_v39  ;;  %v2928_v41 = vld [vmem:[#allocation2 + $0x251] sm:$0xff] }
 0x256   : > { %v2895_v32 = vadd.f32 %v2863_v60, %v2795_v27  ;;  %v2696_v3 = vadd.f32 %v2664_v31, %v2596_v11  ;;  %v2764_v5 = vmul.f32 %v6252_v37, %v2728_v48  ;;  %v2963_v18 = vmul.f32 %v6318_v17, %v8963_v57  ;;  %v10199_v11 = vld [vmem:[#allocation47_spill] sm:$0xff]  ;;  %v10200_v31 = vld [vmem:[#allocation42_spill] sm:$0xff] }
 0x257   : > { %10198 = vst [vmem:[#allocation40_spill] sm:$0xff] %v8972_v53  ;;  %v3593_v29 = vadd.f32 %v3561_v26, %v3493_v21  ;;  %v8982_v20 = vmul.f32 %v6672_v6, %v8847_v61  ;;  %v3394_v16 = vadd.f32 %v3362_v56, %v3294_v19  ;;  %v3263_v39 = vmul.f32 %v6389_v52, %v8943_v13  ;;  %v3028_v61 = vld [vmem:[#allocation2 + $0x252] sm:$0xff] }
 0x258   : > { %v2796_v24 = vadd.f32 %v2764_v5, %v2696_v3  ;;  %v2864_v58 = vmul.f32 %v6264_v33, %v2828_v44  ;;  %v2995_v36 = vadd.f32 %v2963_v18, %v2895_v32  ;;  %v3063_v37 = vmul.f32 %v10118_v47, %v8975_v0  ;;  %v3128_v52 = vld [vmem:[#allocation2 + $0x253] sm:$0xff]  ;;  %v10202_v3 = vld [vmem:[#allocation52_spill] sm:$0xff] }
 0x259   : > { %v3462_v26 = vmul.f32 %v6404_v54, %v2727_v28  ;;  %v3562_v4 = vmul.f32 %v6416_v9, %v2827_v23  ;;  %v3295_v7 = vadd.f32 %v3263_v39, %v3194_v40  ;;  %v3363_v55 = vmul.f32 %v6400_v14, %v2628_v10  ;;  %v5555_v14 = vld [vmem:[%s9745_s1 + $0x28] sm:$0x7f] }
 0x25a   : > { %v2896_v34 = vadd.f32 %v2864_v58, %v2796_v24  ;;  %v2964_v59 = vmul.f32 %v6318_v17, %v2928_v41  ;;  %v3095_v21 = vadd.f32 %v3063_v37, %v2995_v36  ;;  %v3163_v33 = vmul.f32 %v10153_v35, %v8984_v45  ;;  %v10201_v17 = vld [vmem:[#allocation4_spill] sm:$0xff] }
 0x25b   : > { %v3693_v19 = vadd.f32 %v3661_v38, %v3593_v29  ;;  %v3494_v27 = vadd.f32 %v3462_v26, %v3394_v16  ;;  %v3395_v60 = vadd.f32 %v3363_v55, %v3295_v7  ;;  %v3866_v28 = vadd.f32 %v10200_v31, %v10199_v11  ;;  %v4099_v18 = vld [vmem:[#allocation2 + $0xa7] sm:$0xff]  ;;  %v10203_v29 = vld [vmem:[#allocation5_spill] sm:$0xff] }
 0x25c   : > { %v2996_v56 = vadd.f32 %v2964_v59, %v2896_v34  ;;  %v3064_v23 = vmul.f32 %v10118_v47, %v3028_v61  ;;  %v3195_v40 = vadd.f32 %v3163_v33, %v3095_v21  ;;  %v9004_v10 = vrot.slane %v5555_v14, %v10201_v17  ;;  %v10204_v47 = vld [vmem:[#allocation32_spill] sm:$0xff]  ;;  %v10206_v55 = vld [vmem:[#allocation9_spill] sm:$0xff]  ;;  %v10207_v21 = vld [vmem:[#allocation34_spill] sm:$0xff] }
 0x25d   : > { %v3164_v32 = vmul.f32 %v10153_v35, %v3128_v52  ;;  %v3463_v38 = vmul.f32 %v6404_v54, %v2728_v48  ;;  %v3967_v5 = vadd.f32 %v10202_v3, %v3866_v28  ;;  %v9010_v16 = vrot.slane %v5555_v14, %v10203_v29  ;;  %v5556_v58 = vld [vmem:[#allocation2 + $0xa6] sm:$0xff] }
 0x25e   : > { %v3096_v39 = vadd.f32 %v3064_v23, %v2996_v56  ;;  %v3296_v24 = vadd.f32 %v10204_v47, %v3195_v40  ;;  %v4035_v36 = vmul.f32 %v5556_v58, %v9004_v10  ;;  %v10205_v37 = vld [vmem:[#allocation8_spill] sm:$0xff]  ;;  %v9018_v7 = vadd.f32 %v8955_v51, %v3692_v25 }
 0x25f   : > { %v9015_v26 = vrot.slane %v5555_v14, %v10205_v37  ;;  %v3594_v35 = vadd.f32 %v3562_v4, %v3494_v27  ;;  %v3495_v54 = vadd.f32 %v3463_v38, %v3395_v60  ;;  %v4199_v48 = vld [vmem:[#allocation2 + $0xa8] sm:$0xff]  ;;  %v9021_v34 = vrot.slane %v5555_v14, %v10206_v55  ;;  %v10208_v27 = vld [vmem:[#allocation33_spill] sm:$0xff] }
 0x260   : > { %v3196_v59 = vadd.f32 %v3164_v32, %v3096_v39  ;;  %v3396_v33 = vadd.f32 %v10207_v21, %v3296_v24  ;;  %v4067_v11 = vadd.f32 %v4035_v36, %v3967_v5  ;;  %v4135_v31 = vmul.f32 %v9010_v16, %v4099_v18  ;;  %v4299_v4 = vld [vmem:[#allocation2 + $0xa9] sm:$0xff]  ;;  %v10209_v32 = vld [vmem:[#allocation10_spill] sm:$0xff]  ;;  %v10216_v21 = vld [vmem:[#allocation3_spill] sm:$0xff] }
 0x261   : > { %v9026_v28 = vadd.f32 %v8961_v8, %v3693_v19  ;;  %v9030_v56 = vmul.f32 %v6672_v6, %v8926_v43  ;;  %v3563_v51 = vmul.f32 %v6416_v9, %v2828_v44  ;;  %v3662_v25 = vmul.f32 %v10197_v63, %v8963_v57  ;;  %v10210_v43 = vld [vmem:[#allocation36_spill] sm:$0xff]  ;;  %v394_v9 = vld [vmem:[%s9745_s1 + $0x30] sm:$0x7f]  ;;  %v10211_v44 = vld [vmem:[#allocation35_spill] sm:$0xff] }
 0x262   : > { %v3297_v60 = vadd.f32 %v10208_v27, %v3196_v59  ;;  %v4167_v23 = vadd.f32 %v4135_v31, %v4067_v11  ;;  %v4235_v40 = vmul.f32 %v9015_v26, %v4199_v48  ;;  %v9038_v38 = vrot.slane %v5555_v14, %v10209_v32  ;;  %v4399_v57 = vld [vmem:[#allocation2 + $0xaa] sm:$0xff]  ;;  %v10219_v31 = vld [vmem:[#allocation51_spill] sm:$0xff] }
 0x263   : > { %v3595_v8 = vadd.f32 %v3563_v51, %v3495_v54  ;;  %v3663_v19 = vmul.f32 %v10197_v63, %v2928_v41  ;;  %v3694_v3 = vadd.f32 %v3662_v25, %v3594_v35  ;;  %v3496_v5 = vadd.f32 %v10210_v43, %v3396_v33  ;;  %v10212_v24 = vld [vmem:[#allocation12_spill] sm:$0xff]  ;;  %v10221_v51 = vld [vmem:[#allocation37_spill] sm:$0xff] }
 0x264   : > { %v3397_v18 = vadd.f32 %v10211_v44, %v3297_v60  ;;  %v4267_v39 = vadd.f32 %v4235_v40, %v4167_v23  ;;  %v4335_v47 = vmul.f32 %v9021_v34, %v4299_v4  ;;  %v9048_v58 = vrot.slane %v5555_v14, %v10212_v24  ;;  %v4499_v54 = vld [vmem:[#allocation2 + $0xab] sm:$0xff] }
 0x265   : > { %v3762_v36 = vmul.f32 %v10189_v15, %v8975_v0  ;;  %v3763_v63 = vmul.f32 %v10189_v15, %v3028_v61  ;;  %v9055_v41 = vmul.f32 %v10190_v12, %v8984_v45  ;;  %v9058_v35 = vmul.f32 %v10190_v12, %v3128_v52  ;;  %v10218_v61 = vld [vmem:[#allocation38_spill] sm:$0xff]  ;;  %v4600_v11 = vld [vmem:[#allocation2 + $0xc5] sm:$0xff]  ;;  %v4100_v27 = vld [vmem:[#allocation2 + $0xaf] sm:$0xff] }
 0x266   : > { %v9062_v48 = vmul.f32 %v6672_v6, %v8943_v13  ;;  %v4367_v59 = vadd.f32 %v4335_v47, %v4267_v39  ;;  %v4435_v14 = vmul.f32 %v9038_v38, %v4399_v57  ;;  %v9066_v33 = vrot.slane %v394_v9, %v10216_v21  ;;  %v10220_v12 = vld [vmem:[#allocation43_spill] sm:$0xff]  ;;  %v10223_v47 = vld [vmem:[#allocation44_spill] sm:$0xff] }
 0x267   : > { %10213 = vst [vmem:[#allocation41_spill] sm:$0xff] %v9055_v41  ;;  %10214 = vst [vmem:[#allocation21_spill] sm:$0xff] %v9058_v35  ;;  %v3695_v0 = vadd.f32 %v3663_v19, %v3595_v8  ;;  %v9068_v15 = vadd.f32 %v3762_v36, %v3694_v3  ;;  %v3596_v45 = vadd.f32 %v10218_v61, %v3496_v5  ;;  %v4700_v60 = vld [vmem:[#allocation2 + $0xc6] sm:$0xff]  ;;  %v10222_v8 = vld [vmem:[#allocation58_spill] sm:$0xff] }
 0x268   : > { %10215 = vst [vmem:[#allocation22_spill] sm:$0xff] %v9062_v48  ;;  %v3867_v52 = vadd.f32 %v10220_v12, %v10219_v31  ;;  %v3497_v25 = vadd.f32 %v10221_v51, %v3397_v18  ;;  %v4467_v4 = vadd.f32 %v4435_v14, %v4367_v59  ;;  %v4535_v6 = vmul.f32 %v9048_v58, %v4499_v54  ;;  %v5557_v3 = vld [vmem:[#allocation2 + $0xae] sm:$0xff]  ;;  %v5558_v41 = vld [vmem:[#allocation2 + $0xc6] sm:$0xff] }
 0x269   : > { %10217 = vst [vmem:[#allocation29_spill] sm:$0xff] %v9068_v15  ;;  %v9076_v13 = vrot.slane %v394_v9, %v10201_v17  ;;  %v9079_v23 = vrot.slane %v394_v9, %v10203_v29  ;;  %v9082_v40 = vrot.slane %v394_v9, %v10205_v37  ;;  %v4036_v43 = vmul.f32 %v5557_v3, %v9004_v10  ;;  %v4800_v44 = vld [vmem:[#allocation2 + $0xc7] sm:$0xff]  ;;  %v4200_v29 = vld [vmem:[#allocation2 + $0xb0] sm:$0xff]  ;;  %v10228_v3 = vld [vmem:[#allocation46_spill] sm:$0xff] }
 0x26a   : > { %v3968_v19 = vadd.f32 %v10222_v8, %v3867_v52  ;;  %v4567_v5 = vadd.f32 %v4535_v6, %v4467_v4  ;;  %v4636_v57 = vmul.f32 %v9066_v33, %v4600_v11  ;;  %v4900_v18 = vld [vmem:[#allocation2 + $0xc8] sm:$0xff]  ;;  %v9088_v17 = vrot.slane %v394_v9, %v10206_v55  ;;  %v10225_v11 = vld [vmem:[#allocation39_spill] sm:$0xff]  ;;  %v4300_v52 = vld [vmem:[#allocation2 + $0xb1] sm:$0xff] }
 0x26b   : > { %v9091_v39 = vrot.slane %v394_v9, %v10209_v32  ;;  %v3696_v37 = vadd.f32 %v10223_v47, %v3596_v45  ;;  %v5000_v36 = vld [vmem:[#allocation2 + $0xc9] sm:$0xff]  ;;  %v9097_v59 = vrot.slane %v394_v9, %v10212_v24  ;;  %v4136_v21 = vmul.f32 %v9010_v16, %v4100_v27  ;;  %v10227_v8 = vld [vmem:[#allocation55_spill] sm:$0xff] }
 0x26c   : > { %v9094_v54 = vld [vmem:[#allocation2 + $0xca] sm:$0xff]  ;;  %v4068_v14 = vadd.f32 %v4036_v43, %v3968_v19  ;;  %v9100_v61 = vadd.f32 %v3763_v63, %v3695_v0  ;;  %v3597_v55 = vadd.f32 %v10225_v11, %v3497_v25  ;;  %v4668_v31 = vadd.f32 %v4636_v57, %v4567_v5  ;;  %v4400_v0 = vld [vmem:[#allocation2 + $0xb2] sm:$0xff] }
 0x26d   : > { %v4736_v32 = vmul.f32 %v9076_v13, %v4700_v60  ;;  %v9104_v12 = vld [vmem:[#allocation2 + $0xcb] sm:$0xff]  ;;  %v4836_v45 = vmul.f32 %v9079_v23, %v4800_v44  ;;  %v4936_v51 = vmul.f32 %v9082_v40, %v4900_v18  ;;  %v4236_v9 = vmul.f32 %v9015_v26, %v4200_v29  ;;  %v4500_v25 = vld [vmem:[#allocation2 + $0xb3] sm:$0xff] }
 0x26e   : > { %10224 = vst [vmem:[#allocation47_spill] sm:$0xff] %v9100_v61  ;;  %v4168_v4 = vadd.f32 %v4136_v21, %v4068_v14  ;;  %v5036_v6 = vmul.f32 %v9088_v17, %v5000_v36  ;;  %v5136_v63 = vmul.f32 %v9091_v39, %v9094_v54  ;;  %v4601_v27 = vld [vmem:[#allocation2 + $0xcd] sm:$0xff]  ;;  %v9115_v43 = vadd.f32 %v10228_v3, %v3696_v37 }
 0x26f   : > { %v4768_v24 = vadd.f32 %v4736_v32, %v4668_v31  ;;  %v10226_v60 = vld [vmem:[#allocation56_spill] sm:$0xff]  ;;  %v5236_v5 = vmul.f32 %v9097_v59, %v9104_v12  ;;  %v4336_v29 = vmul.f32 %v9021_v34, %v4300_v52  ;;  %v10230_v14 = vld [vmem:[#allocation45_spill] sm:$0xff]  ;;  %v4536_v3 = vmul.f32 %v9048_v58, %v4500_v25 }
 0x270   : > { %v3868_v19 = vadd.f32 %v10227_v8, %v10226_v60  ;;  %10229 = vst [vmem:[#allocation42_spill] sm:$0xff] %v9115_v43  ;;  %v4268_v57 = vadd.f32 %v4236_v9, %v4168_v4  ;;  %v4701_v47 = vld [vmem:[#allocation2 + $0xce] sm:$0xff]  ;;  %v9121_v21 = vadd.f32 %v10230_v14, %v3597_v55  ;;  %v4037_v60 = vmul.f32 %v5558_v41, %v9004_v10 }
 0x271   : > { %v4868_v11 = vadd.f32 %v4836_v45, %v4768_v24  ;;  %v4801_v31 = vld [vmem:[#allocation2 + $0xcf] sm:$0xff]  ;;  %v4436_v8 = vmul.f32 %v9038_v38, %v4400_v0  ;;  %v4637_v4 = vmul.f32 %v9066_v33, %v4601_v27  ;;  %v4737_v55 = vmul.f32 %v9076_v13, %v4701_v47  ;;  %v10232_v0 = vld [vmem:[#allocation59_spill] sm:$0xff] }
 0x272   : > { %v4901_v32 = vld [vmem:[#allocation2 + $0xd0] sm:$0xff]  ;;  %v10231_v35 = vld [vmem:[#allocation60_spill] sm:$0xff]  ;;  %v4368_v37 = vadd.f32 %v4336_v29, %v4268_v57  ;;  %v4137_v24 = vmul.f32 %v4800_v44, %v9010_v16  ;;  %v4237_v47 = vmul.f32 %v4900_v18, %v9015_v26  ;;  %v9149_v18 = vld [vmem:[%s9746_s2] ss:$0 sm:$0xff] }
 0x273   : > { %v3969_v61 = vadd.f32 %v10231_v35, %v3868_v19  ;;  %v5001_v52 = vld [vmem:[#allocation2 + $0xd1] sm:$0xff]  ;;  %v4968_v9 = vadd.f32 %v4936_v51, %v4868_v11  ;;  %v4837_v35 = vmul.f32 %v9079_v23, %v4801_v31  ;;  %v4937_v41 = vmul.f32 %v9082_v40, %v4901_v32  ;;  %v4602_v44 = vld [vmem:[#allocation2 + $0xe5] sm:$0xff] }
 0x274   : > { %v5101_v14 = vld [vmem:[#allocation2 + $0xd2] sm:$0xff]  ;;  %v4468_v43 = vadd.f32 %v4436_v8, %v4368_v37  ;;  %v5037_v27 = vmul.f32 %v9088_v17, %v5001_v52 }
 0x275   : > { %v4069_v45 = vadd.f32 %v4037_v60, %v3969_v61  ;;  %v9132_v19 = vld [vmem:[#allocation2 + $0xd3] sm:$0xff]  ;;  %v5068_v29 = vadd.f32 %v5036_v6, %v4968_v9  ;;  %v5137_v61 = vmul.f32 %v9091_v39, %v5101_v14  ;;  %v10234_v60 = vld [vmem:[#allocation63_spill] sm:$0xff]  ;;  %v4337_v9 = vmul.f32 %v5000_v36, %v9021_v34 }
 0x276   : > { %v10233_v57 = vld [vmem:[#allocation57_spill] sm:$0xff]  ;;  %v4568_v11 = vadd.f32 %v4536_v3, %v4468_v43  ;;  %v9143_v53 = vmul.f32 %v9097_v59, %v9132_v19  ;;  %v4437_v3 = vmul.f32 %v9094_v54, %v9038_v38  ;;  %v4537_v36 = vmul.f32 %v9104_v12, %v9048_v58 }
 0x277   : > { %v3869_v25 = vadd.f32 %v10233_v57, %v10232_v0  ;;  %v4169_v51 = vadd.f32 %v4137_v24, %v4069_v45  ;;  %v5559_v8 = vld [vmem:[#allocation2 + $0xce] sm:$0xff]  ;;  %v5168_v48 = vadd.f32 %v5136_v63, %v5068_v29  ;;  %v4702_v45 = vld [vmem:[#allocation2 + $0xe6] sm:$0xff]  ;;  %v4138_v63 = vmul.f32 %v4801_v31, %v9010_v16 }
 0x278   : > { %v4038_v15 = vmul.f32 %v5559_v8, %v9004_v10  ;;  %v4669_v43 = vadd.f32 %v4637_v4, %v4568_v11  ;;  %v4802_v24 = vld [vmem:[#allocation2 + $0xe7] sm:$0xff]  ;;  %v4638_v29 = vmul.f32 %v9066_v33, %v4602_v44  ;;  %v4238_v11 = vmul.f32 %v4901_v32, %v9015_v26 }
 0x279   : > { %v3970_v37 = vadd.f32 %v10234_v60, %v3869_v25  ;;  %v4269_v6 = vadd.f32 %v4237_v47, %v4169_v51  ;;  %v5268_v57 = vadd.f32 %v5236_v5, %v5168_v48  ;;  %v4902_v51 = vld [vmem:[#allocation2 + $0xe8] sm:$0xff]  ;;  %v4738_v60 = vmul.f32 %v9076_v13, %v4702_v45  ;;  %v10236_v5 = vld [vmem:[#allocation61_spill] sm:$0xff] }
 0x27a   : > { %v4769_v47 = vadd.f32 %v4737_v55, %v4669_v43  ;;  %v5002_v31 = vld [vmem:[#allocation2 + $0xe9] sm:$0xff]  ;;  %v4938_v55 = vmul.f32 %v9082_v40, %v4902_v51 }
 0x27b   : > { %v4070_v0 = vadd.f32 %v4038_v15, %v3970_v37  ;;  %v4369_v25 = vadd.f32 %v4337_v9, %v4269_v6  ;;  %v5307_v54 = vadd.f32 %v9149_v18, %v5268_v57  ;;  %v4838_v37 = vmul.f32 %v9079_v23, %v4802_v24  ;;  %v10235_v48 = vld [vmem:[#allocation64_spill] sm:$0xff] }
 0x27c   : > { %v3870_v8 = vadd.f32 %v10236_v5, %v10235_v48  ;;  %v4869_v12 = vadd.f32 %v4837_v35, %v4769_v47  ;;  %v5102_v32 = vld [vmem:[#allocation2 + $0xea] sm:$0xff]  ;;  %v4338_v6 = vmul.f32 %v5001_v52, %v9021_v34  ;;  %v5038_v48 = vmul.f32 %v9088_v17, %v5002_v31 }
 0x27d   : > { %v4170_v4 = vadd.f32 %v4138_v63, %v4070_v0  ;;  %v4469_v15 = vadd.f32 %v4437_v3, %v4369_v25  ;;  %v5339_v9 = vmax.f32 %v5307_v54, 0.0  ;;  %v5202_v43 = vld [vmem:[#allocation2 + $0xeb] sm:$0xff]  ;;  %v10237_v3 = vld [vmem:[#allocation66_spill] sm:$0xff]  ;;  %v4438_v35 = vmul.f32 %v5101_v14, %v9038_v38 }
 0x27e   : > { %v3971_v0 = vadd.f32 %v10237_v3, %v3870_v8  ;;  %v5560_v63 = vld [vmem:[#allocation2 + $0xe6] sm:$0xff]  ;;  %v4969_v25 = vadd.f32 %v4937_v41, %v4869_v12  ;;  %v5138_v52 = vmul.f32 %v9091_v39, %v5102_v32  ;;  %v4139_v54 = vmul.f32 %v4802_v24, %v9010_v16  ;;  %v4803_v12 = vld [vmem:[#allocation2 + $0xef] sm:$0xff] }
 0x27f   : > { %v4270_v44 = vadd.f32 %v4238_v11, %v4170_v4  ;;  %v4569_v45 = vadd.f32 %v4537_v36, %v4469_v15  ;;  %v4039_v57 = vmul.f32 %v5560_v63, %v9004_v10  ;;  %v4603_v47 = vld [vmem:[#allocation2 + $0xed] sm:$0xff]  ;;  %5371 = vst.msk [vmem:[%s9168_s17] sm:$0xff] %vm233_vm0, %v5339_v9  ;;  %v5238_v8 = vmul.f32 %v9097_v59, %v5202_v43 }
 0x280   : > { %v4703_v11 = vld [vmem:[#allocation2 + $0xee] sm:$0xff]  ;;  %v5069_v15 = vadd.f32 %v5037_v27, %v4969_v25  ;;  %v4538_v41 = vmul.f32 %v9132_v19, %v9048_v58  ;;  %v4639_v14 = vmul.f32 %v9066_v33, %v4603_v47  ;;  %v10239_v27 = vld [vmem:[#allocation62_spill] sm:$0xff]  ;;  %v4339_v19 = vmul.f32 %v5002_v31, %v9021_v34  ;;  %v4604_v31 = vld [vmem:[#allocation2 + $0x105] sm:$0xff] }
 0x281   : > { %v4370_v5 = vadd.f32 %v4338_v6, %v4270_v44  ;;  %v4670_v4 = vadd.f32 %v4638_v29, %v4569_v45  ;;  %v4071_v36 = vadd.f32 %v4039_v57, %v3971_v0  ;;  %v4239_v29 = vmul.f32 %v4902_v51, %v9015_v26  ;;  %v4903_v63 = vld [vmem:[#allocation2 + $0xf0] sm:$0xff] }
 0x282   : > { %v5169_v9 = vadd.f32 %v5137_v61, %v5069_v15  ;;  %v4739_v0 = vmul.f32 %v9076_v13, %v4703_v11  ;;  %v10238_v24 = vld [vmem:[#allocation65_spill] sm:$0xff]  ;;  %v4939_v15 = vmul.f32 %v9082_v40, %v4903_v63 }
 0x283   : > { %v4470_v3 = vadd.f32 %v4438_v35, %v4370_v5  ;;  %v4770_v44 = vadd.f32 %v4738_v60, %v4670_v4  ;;  %v4171_v6 = vadd.f32 %v4139_v54, %v4071_v36  ;;  %v3871_v57 = vadd.f32 %v10239_v27, %v10238_v24  ;;  %v5003_v4 = vld [vmem:[#allocation2 + $0xf1] sm:$0xff] }
 0x284   : > { %v4839_v5 = vmul.f32 %v9079_v23, %v4803_v12  ;;  %v5269_v60 = vadd.f32 %v9143_v53, %v5169_v9  ;;  %v10240_v36 = vld [vmem:[#allocation70_spill] sm:$0xff]  ;;  %v5561_v61 = vld [vmem:[#allocation2 + $0xee] sm:$0xff]  ;;  %v4140_v53 = vmul.f32 %v4803_v12, %v9010_v16  ;;  %v5039_v9 = vmul.f32 %v9088_v17, %v5003_v4 }
 0x285   : > { %v4570_v45 = vadd.f32 %v4538_v41, %v4470_v3  ;;  %v4870_v25 = vadd.f32 %v4838_v37, %v4770_v44  ;;  %v4271_v35 = vadd.f32 %v4239_v29, %v4171_v6  ;;  %v3972_v51 = vadd.f32 %v10240_v36, %v3871_v57  ;;  %v5103_v6 = vld [vmem:[#allocation2 + $0xf2] sm:$0xff] }
 0x286   : > { %v4040_v54 = vmul.f32 %v5561_v61, %v9004_v10  ;;  %v4439_v37 = vmul.f32 %v5102_v32, %v9038_v38  ;;  %v5308_v41 = vadd.f32 %v9149_v18, %v5269_v60  ;;  %v4640_v12 = vmul.f32 %v9066_v33, %v4604_v31 }
 0x287   : > { %v4671_v47 = vadd.f32 %v4639_v14, %v4570_v45  ;;  %v4970_v11 = vadd.f32 %v4938_v55, %v4870_v25  ;;  %v4371_v3 = vadd.f32 %v4339_v19, %v4271_v35  ;;  %v5203_v45 = vld [vmem:[#allocation2 + $0xf3] sm:$0xff]  ;;  %v4539_v55 = vmul.f32 %v5202_v43, %v9048_v58  ;;  %v4704_v25 = vld [vmem:[#allocation2 + $0x106] sm:$0xff] }
 0x288   : > { %v4072_v29 = vadd.f32 %v4040_v54, %v3972_v51  ;;  %v5340_v27 = vmax.f32 %v5308_v41, 0.0  ;;  %v4240_v35 = vmul.f32 %v4903_v63, %v9015_v26  ;;  %v5139_v19 = vmul.f32 %v9091_v39, %v5103_v6  ;;  %v4904_v63 = vld [vmem:[#allocation2 + $0x108] sm:$0xff] }
 0x289   : > { %v4771_v44 = vadd.f32 %v4739_v0, %v4671_v47  ;;  %v5070_v14 = vadd.f32 %v5038_v48, %v4970_v11  ;;  %v4471_v24 = vadd.f32 %v4439_v37, %v4371_v3  ;;  %v4804_v47 = vld [vmem:[#allocation2 + $0x107] sm:$0xff]  ;;  %v5239_v36 = vmul.f32 %v9097_v59, %v5203_v45 }
 0x28a   : > { %v4172_v32 = vadd.f32 %v4140_v53, %v4072_v29  ;;  %5372 = vst.msk [vmem:[%s9168_s17 + $0x8] sm:$0xff] %vm233_vm0, %v5340_v27  ;;  %v4340_v43 = vmul.f32 %v5003_v4, %v9021_v34  ;;  %v4740_v54 = vmul.f32 %v9076_v13, %v4704_v25  ;;  %v10242_v11 = vld [vmem:[#allocation68_spill] sm:$0xff]  ;;  %v4840_v41 = vmul.f32 %v9079_v23, %v4804_v47 }
 0x28b   : > { %v4871_v57 = vadd.f32 %v4839_v5, %v4771_v44  ;;  %v5170_v0 = vadd.f32 %v5138_v52, %v5070_v14  ;;  %v4571_v60 = vadd.f32 %v4539_v55, %v4471_v24  ;;  %v10241_v52 = vld [vmem:[#allocation67_spill] sm:$0xff]  ;;  %v4440_v31 = vmul.f32 %v5103_v6, %v9038_v38  ;;  %v5004_v53 = vld [vmem:[#allocation2 + $0x109] sm:$0xff] }
 0x28c   : > { %v4272_v51 = vadd.f32 %v4240_v35, %v4172_v32  ;;  %v3872_v3 = vadd.f32 %v10242_v11, %v10241_v52  ;;  %v4605_v14 = vld [vmem:[#allocation2 + $0x10d] sm:$0xff]  ;;  %v4540_v32 = vmul.f32 %v5203_v45, %v9048_v58  ;;  %v4241_v11 = vmul.f32 %v4904_v63, %v9015_v26 }
 0x28d   : > { %v4971_v48 = vadd.f32 %v4939_v15, %v4871_v57  ;;  %v5270_v5 = vadd.f32 %v5238_v8, %v5170_v0  ;;  %v4672_v61 = vadd.f32 %v4640_v12, %v4571_v60  ;;  %v10243_v4 = vld [vmem:[#allocation72_spill] sm:$0xff]  ;;  %v4940_v57 = vmul.f32 %v9082_v40, %v4904_v63 }
 0x28e   : > { %v4372_v44 = vadd.f32 %v4340_v43, %v4272_v51  ;;  %v3973_v8 = vadd.f32 %v10243_v4, %v3872_v3  ;;  %v5562_v24 = vld [vmem:[#allocation2 + $0x106] sm:$0xff]  ;;  %v4705_v60 = vld [vmem:[#allocation2 + $0x10e] sm:$0xff]  ;;  %v5040_v43 = vmul.f32 %v9088_v17, %v5004_v53 }
 0x28f   : > { %v5071_v37 = vadd.f32 %v5039_v9, %v4971_v48  ;;  %v5309_v15 = vadd.f32 %v9149_v18, %v5270_v5  ;;  %v4772_v29 = vadd.f32 %v4740_v54, %v4672_v61  ;;  %v4041_v55 = vmul.f32 %v5562_v24, %v9004_v10  ;;  %v5104_v9 = vld [vmem:[#allocation2 + $0x10a] sm:$0xff] }
 0x290   : > { %v4472_v25 = vadd.f32 %v4440_v31, %v4372_v44  ;;  %v5204_v0 = vld [vmem:[#allocation2 + $0x10b] sm:$0xff]  ;;  %v4141_v48 = vmul.f32 %v4804_v47, %v9010_v16  ;;  %v4641_v61 = vmul.f32 %v9066_v33, %v4605_v14  ;;  %v5140_v54 = vmul.f32 %v9091_v39, %v5104_v9  ;;  %v10244_v14 = vld [vmem:[#allocation71_spill] sm:$0xff] }
 0x291   : > { %v5171_v27 = vadd.f32 %v5139_v19, %v5071_v37  ;;  %v5341_v35 = vmax.f32 %v5309_v15, 0.0  ;;  %v4872_v6 = vadd.f32 %v4840_v41, %v4772_v29  ;;  %v4073_v12 = vadd.f32 %v4041_v55, %v3973_v8  ;;  %v4805_v52 = vld [vmem:[#allocation2 + $0x10f] sm:$0xff] }
 0x292   : > { %v4572_v5 = vadd.f32 %v4540_v32, %v4472_v25  ;;  %v5240_v37 = vmul.f32 %v9097_v59, %v5204_v0  ;;  %v4905_v44 = vld [vmem:[#allocation2 + $0x110] sm:$0xff]  ;;  %v4341_v29 = vmul.f32 %v5004_v53, %v9021_v34  ;;  %v4841_v63 = vmul.f32 %v9079_v23, %v4805_v52 }
 0x293   : > { %v5271_v51 = vadd.f32 %v5239_v36, %v5171_v27  ;;  %5373 = vst.msk [vmem:[%s9168_s17 + $0x10] sm:$0xff] %vm233_vm0, %v5341_v35  ;;  %v4972_v19 = vadd.f32 %v4940_v57, %v4872_v6  ;;  %v4173_v45 = vadd.f32 %v4141_v48, %v4073_v12  ;;  %v4741_v36 = vmul.f32 %v9076_v13, %v4705_v60  ;;  %v5005_v31 = vld [vmem:[#allocation2 + $0x111] sm:$0xff]  ;;  %v4606_v6 = vld [vmem:[#allocation2 + $0x125] sm:$0xff] }
 0x294   : > { %v4673_v47 = vadd.f32 %v4641_v61, %v4572_v5  ;;  %v10245_v4 = vld [vmem:[#allocation69_spill] sm:$0xff]  ;;  %v4441_v27 = vmul.f32 %v5104_v9, %v9038_v38  ;;  %v10246_v60 = vld [vmem:[#allocation75_spill] sm:$0xff]  ;;  %v5041_v5 = vmul.f32 %v9088_v17, %v5005_v31  ;;  %v4541_v61 = vmul.f32 %v5204_v0, %v9048_v58 }
 0x295   : > { %v5310_v3 = vadd.f32 %v9149_v18, %v5271_v51  ;;  %v5072_v41 = vadd.f32 %v5040_v43, %v4972_v19  ;;  %v4273_v15 = vadd.f32 %v4241_v11, %v4173_v45  ;;  %v3873_v8 = vadd.f32 %v10245_v4, %v10244_v14  ;;  %v5105_v25 = vld [vmem:[#allocation2 + $0x112] sm:$0xff]  ;;  %v4806_v45 = vld [vmem:[#allocation2 + $0x127] sm:$0xff] }
 0x296   : > { %v4773_v55 = vadd.f32 %v4741_v36, %v4673_v47  ;;  %v5205_v32 = vld [vmem:[#allocation2 + $0x113] sm:$0xff]  ;;  %v4941_v43 = vmul.f32 %v9082_v40, %v4905_v44  ;;  %v5141_v36 = vmul.f32 %v9091_v39, %v5105_v25  ;;  %v4906_v4 = vld [vmem:[#allocation2 + $0x128] sm:$0xff]  ;;  %v4242_v0 = vmul.f32 %v4905_v44, %v9015_v26 }
 0x297   : > { %v5342_v24 = vmax.f32 %v5310_v3, 0.0  ;;  %v5172_v57 = vadd.f32 %v5140_v54, %v5072_v41  ;;  %v4373_v35 = vadd.f32 %v4341_v29, %v4273_v15  ;;  %v3974_v12 = vadd.f32 %v10246_v60, %v3873_v8  ;;  %v5563_v48 = vld [vmem:[#allocation2 + $0x10e] sm:$0xff]  ;;  %v4706_v54 = vld [vmem:[#allocation2 + $0x126] sm:$0xff] }
 0x298   : > { %v4042_v51 = vmul.f32 %v5563_v48, %v9004_v10  ;;  %v4873_v53 = vadd.f32 %v4841_v63, %v4773_v55  ;;  %v4142_v3 = vmul.f32 %v4805_v52, %v9010_v16  ;;  %v5241_v41 = vmul.f32 %v9097_v59, %v5205_v32  ;;  %v5006_v55 = vld [vmem:[#allocation2 + $0x129] sm:$0xff] }
 0x299   : > { %5374 = vst.msk [vmem:[%s9168_s17 + $0x18] sm:$0xff] %vm233_vm0, %v5342_v24  ;;  %v5272_v9 = vadd.f32 %v5240_v37, %v5172_v57  ;;  %v4473_v19 = vadd.f32 %v4441_v27, %v4373_v35  ;;  %v4642_v15 = vmul.f32 %v9066_v33, %v4606_v6  ;;  %v4742_v24 = vmul.f32 %v9076_v13, %v4706_v54  ;;  %v10247_v63 = vld [vmem:[#allocation76_spill] sm:$0xff]  ;;  %v10248_v27 = vld [vmem:[#allocation73_spill] sm:$0xff] }
 0x29a   : > { %v4074_v11 = vadd.f32 %v4042_v51, %v3974_v12  ;;  %v4973_v47 = vadd.f32 %v4941_v43, %v4873_v53  ;;  %v4842_v52 = vmul.f32 %v9079_v23, %v4806_v45  ;;  %v3874_v57 = vadd.f32 %v10248_v27, %v10247_v63  ;;  %v5106_v6 = vld [vmem:[#allocation2 + $0x12a] sm:$0xff]  ;;  %v10249_v43 = vld [vmem:[#allocation78_spill] sm:$0xff] }
 0x29b   : > { %v5311_v29 = vadd.f32 %v9149_v18, %v5272_v9  ;;  %v4573_v14 = vadd.f32 %v4541_v61, %v4473_v19  ;;  %v4342_v48 = vmul.f32 %v5005_v31, %v9021_v34  ;;  %v4942_v53 = vmul.f32 %v9082_v40, %v4906_v4  ;;  %v5206_v44 = vld [vmem:[#allocation2 + $0x12b] sm:$0xff] }
 0x29c   : > { %v4174_v8 = vadd.f32 %v4142_v3, %v4074_v11  ;;  %v5073_v37 = vadd.f32 %v5041_v5, %v4973_v47  ;;  %v3975_v5 = vadd.f32 %v10249_v43, %v3874_v57  ;;  %v5564_v61 = vld [vmem:[#allocation2 + $0x126] sm:$0xff]  ;;  %v5042_v54 = vmul.f32 %v9088_v17, %v5006_v55 }
 0x29d   : > { %v5343_v35 = vmax.f32 %v5311_v29, 0.0  ;;  %v4674_v60 = vadd.f32 %v4642_v15, %v4573_v14  ;;  %v4043_v9 = vmul.f32 %v5564_v61, %v9004_v10  ;;  %v4442_v3 = vmul.f32 %v5105_v25, %v9038_v38  ;;  %v4607_v47 = vld [vmem:[#allocation2 + $0x12d] sm:$0xff] }
 0x29e   : > { %v4274_v12 = vadd.f32 %v4242_v0, %v4174_v8  ;;  %v5173_v51 = vadd.f32 %v5141_v36, %v5073_v37  ;;  %v5142_v31 = vmul.f32 %v9091_v39, %v5106_v6  ;;  %v4707_v36 = vld [vmem:[#allocation2 + $0x12e] sm:$0xff]  ;;  %v4143_v14 = vmul.f32 %v4806_v45, %v9010_v16 }
 0x29f   : > { %5375 = vst.msk [vmem:[%s9168_s17 + $0x20] sm:$0xff] %vm233_vm0, %v5343_v35  ;;  %v4774_v19 = vadd.f32 %v4742_v24, %v4674_v60  ;;  %v4075_v29 = vadd.f32 %v4043_v9, %v3975_v5  ;;  %v5242_v0 = vmul.f32 %v9097_v59, %v5206_v44  ;;  %v4542_v63 = vmul.f32 %v5205_v32, %v9048_v58  ;;  %v4807_v24 = vld [vmem:[#allocation2 + $0x12f] sm:$0xff] }
 0x2a0   : > { %v4374_v11 = vadd.f32 %v4342_v48, %v4274_v12  ;;  %v5273_v15 = vadd.f32 %v5241_v41, %v5173_v51  ;;  %v4643_v57 = vmul.f32 %v9066_v33, %v4607_v47  ;;  %v4243_v41 = vmul.f32 %v4906_v4, %v9015_v26  ;;  %v4907_v45 = vld [vmem:[#allocation2 + $0x130] sm:$0xff]  ;;  %v10251_v51 = vld [vmem:[#allocation74_spill] sm:$0xff] }
 0x2a1   : > { %v4874_v8 = vadd.f32 %v4842_v52, %v4774_v19  ;;  %v4175_v25 = vadd.f32 %v4143_v14, %v4075_v29  ;;  %v4743_v12 = vmul.f32 %v9076_v13, %v4707_v36  ;;  %v5007_v52 = vld [vmem:[#allocation2 + $0x131] sm:$0xff]  ;;  %v4843_v32 = vmul.f32 %v9079_v23, %v4807_v24 }
 0x2a2   : > { %v4474_v37 = vadd.f32 %v4442_v3, %v4374_v11  ;;  %v5312_v27 = vadd.f32 %v9149_v18, %v5273_v15  ;;  %v10250_v48 = vld [vmem:[#allocation77_spill] sm:$0xff]  ;;  %v4343_v9 = vmul.f32 %v5006_v55, %v9021_v34  ;;  %v4943_v29 = vmul.f32 %v9082_v40, %v4907_v45 }
 0x2a3   : > { %v4974_v35 = vadd.f32 %v4942_v53, %v4874_v8  ;;  %v3875_v43 = vadd.f32 %v10251_v51, %v10250_v48  ;;  %v4275_v61 = vadd.f32 %v4243_v41, %v4175_v25  ;;  %v5107_v3 = vld [vmem:[#allocation2 + $0x132] sm:$0xff]  ;;  %v5043_v14 = vmul.f32 %v9088_v17, %v5007_v52 }
 0x2a4   : > { %v4574_v60 = vadd.f32 %v4542_v63, %v4474_v37  ;;  %v5344_v5 = vmax.f32 %v5312_v27, 0.0  ;;  %v5207_v4 = vld [vmem:[#allocation2 + $0x133] sm:$0xff]  ;;  %v4443_v37 = vmul.f32 %v5106_v6, %v9038_v38  ;;  %v4708_v27 = vld [vmem:[#allocation2 + $0x146] sm:$0xff]  ;;  %v4144_v25 = vmul.f32 %v4807_v24, %v9010_v16 }
 0x2a5   : > { %v5074_v19 = vadd.f32 %v5042_v54, %v4974_v35  ;;  %v10252_v53 = vld [vmem:[#allocation82_spill] sm:$0xff]  ;;  %v5565_v15 = vld [vmem:[#allocation2 + $0x12e] sm:$0xff]  ;;  %v4375_v8 = vadd.f32 %v4343_v9, %v4275_v61  ;;  %v4608_v54 = vld [vmem:[#allocation2 + $0x145] sm:$0xff]  ;;  %v5143_v41 = vmul.f32 %v9091_v39, %v5107_v3  ;;  %v5243_v35 = vmul.f32 %v9097_v59, %v5207_v4 }
 0x2a6   : > { %v4675_v11 = vadd.f32 %v4643_v57, %v4574_v60  ;;  %v3976_v47 = vadd.f32 %v10252_v53, %v3875_v43  ;;  %v4044_v36 = vmul.f32 %v5565_v15, %v9004_v10  ;;  %5376 = vst.msk [vmem:[%s9168_s17 + $0x28] sm:$0xff] %vm233_vm0, %v5344_v5  ;;  %v4543_v48 = vmul.f32 %v5206_v44, %v9048_v58  ;;  %v4808_v5 = vld [vmem:[#allocation2 + $0x147] sm:$0xff] }
 0x2a7   : > { %v5174_v63 = vadd.f32 %v5142_v31, %v5074_v19  ;;  %v4475_v60 = vadd.f32 %v4443_v37, %v4375_v8  ;;  %v4244_v6 = vmul.f32 %v4907_v45, %v9015_v26  ;;  %v4744_v9 = vmul.f32 %v9076_v13, %v4708_v27  ;;  %v10253_v19 = vld [vmem:[#allocation80_spill] sm:$0xff]  ;;  %v10254_v24 = vld [vmem:[#allocation79_spill] sm:$0xff] }
 0x2a8   : > { %v4775_v55 = vadd.f32 %v4743_v12, %v4675_v11  ;;  %v4076_v57 = vadd.f32 %v4044_v36, %v3976_v47  ;;  %v4644_v12 = vmul.f32 %v9066_v33, %v4608_v54  ;;  %v3876_v11 = vadd.f32 %v10254_v24, %v10253_v19  ;;  %v4908_v15 = vld [vmem:[#allocation2 + $0x148] sm:$0xff] }
 0x2a9   : > { %v5274_v51 = vadd.f32 %v5242_v0, %v5174_v63  ;;  %v4575_v31 = vadd.f32 %v4543_v48, %v4475_v60  ;;  %v4344_v44 = vmul.f32 %v5007_v52, %v9021_v34  ;;  %v5008_v45 = vld [vmem:[#allocation2 + $0x149] sm:$0xff]  ;;  %v4944_v48 = vmul.f32 %v9082_v40, %v4908_v15 }
 0x2aa   : > { %v4875_v43 = vadd.f32 %v4843_v32, %v4775_v55  ;;  %v4176_v61 = vadd.f32 %v4144_v25, %v4076_v57  ;;  %v4844_v32 = vmul.f32 %v9079_v23, %v4808_v5  ;;  %v10255_v8 = vld [vmem:[#allocation84_spill] sm:$0xff] }
 0x2ab   : > { %v5313_v53 = vadd.f32 %v9149_v18, %v5274_v51  ;;  %v4676_v0 = vadd.f32 %v4644_v12, %v4575_v31  ;;  %v3977_v37 = vadd.f32 %v10255_v8, %v3876_v11  ;;  %v5566_v63 = vld [vmem:[#allocation2 + $0x146] sm:$0xff]  ;;  %v5044_v31 = vmul.f32 %v9088_v17, %v5008_v45 }
 0x2ac   : > { %v4975_v47 = vadd.f32 %v4943_v29, %v4875_v43  ;;  %v4276_v36 = vadd.f32 %v4244_v6, %v4176_v61  ;;  %v4045_v55 = vmul.f32 %v5566_v63, %v9004_v10  ;;  %v5108_v57 = vld [vmem:[#allocation2 + $0x14a] sm:$0xff]  ;;  %v4444_v29 = vmul.f32 %v5107_v3, %v9038_v38 }
 0x2ad   : > { %v5345_v54 = vmax.f32 %v5313_v53, 0.0  ;;  %v4776_v60 = vadd.f32 %v4744_v9, %v4676_v0  ;;  %v5208_v52 = vld [vmem:[#allocation2 + $0x14b] sm:$0xff]  ;;  %v4145_v61 = vmul.f32 %v4808_v5, %v9010_v16  ;;  %v5144_v24 = vmul.f32 %v9091_v39, %v5108_v57 }
 0x2ae   : > { %v5075_v27 = vadd.f32 %v5043_v14, %v4975_v47  ;;  %v4376_v25 = vadd.f32 %v4344_v44, %v4276_v36  ;;  %v4609_v51 = vld [vmem:[#allocation2 + $0x14d] sm:$0xff]  ;;  %v4077_v43 = vadd.f32 %v4045_v55, %v3977_v37  ;;  %v4544_v14 = vmul.f32 %v5207_v4, %v9048_v58  ;;  %v10256_v37 = vld [vmem:[#allocation83_spill] sm:$0xff] }
 0x2af   : > { %5377 = vst.msk [vmem:[%s9168_s17 + $0x30] sm:$0xff] %vm233_vm0, %v5345_v54  ;;  %v4876_v19 = vadd.f32 %v4844_v32, %v4776_v60  ;;  %v4709_v3 = vld [vmem:[#allocation2 + $0x14e] sm:$0xff]  ;;  %v4245_v11 = vmul.f32 %v4908_v15, %v9015_v26  ;;  %v5244_v47 = vmul.f32 %v9097_v59, %v5208_v52  ;;  %v4645_v5 = vmul.f32 %v9066_v33, %v4609_v51  ;;  %v4610_v60 = vld [vmem:[#allocation2 + $0x165] sm:$0xff] }
 0x2b0   : > { %v5175_v6 = vadd.f32 %v5143_v41, %v5075_v27  ;;  %v4476_v12 = vadd.f32 %v4444_v29, %v4376_v25  ;;  %v4177_v9 = vadd.f32 %v4145_v61, %v4077_v43  ;;  %v4809_v41 = vld [vmem:[#allocation2 + $0x14f] sm:$0xff]  ;;  %v4345_v8 = vmul.f32 %v5008_v45, %v9021_v34 }
 0x2b1   : > { %v4976_v44 = vadd.f32 %v4944_v48, %v4876_v19  ;;  %v10257_v4 = vld [vmem:[#allocation81_spill] sm:$0xff]  ;;  %v4745_v54 = vmul.f32 %v9076_v13, %v4709_v3  ;;  %v10258_v48 = vld [vmem:[#allocation87_spill] sm:$0xff] }
 0x2b2   : > { %v5275_v53 = vadd.f32 %v5243_v35, %v5175_v6  ;;  %v4576_v36 = vadd.f32 %v4544_v14, %v4476_v12  ;;  %v4277_v0 = vadd.f32 %v4245_v11, %v4177_v9  ;;  %v3877_v32 = vadd.f32 %v10257_v4, %v10256_v37  ;;  %v4909_v27 = vld [vmem:[#allocation2 + $0x150] sm:$0xff]  ;;  %v4810_v37 = vld [vmem:[#allocation2 + $0x167] sm:$0xff] }
 0x2b3   : > { %v4445_v35 = vmul.f32 %v5108_v57, %v9038_v38  ;;  %v5076_v15 = vadd.f32 %v5044_v31, %v4976_v44  ;;  %v5009_v25 = vld [vmem:[#allocation2 + $0x151] sm:$0xff]  ;;  %v4845_v12 = vmul.f32 %v9079_v23, %v4809_v41  ;;  %v4545_v14 = vmul.f32 %v5208_v52, %v9048_v58  ;;  %v4710_v31 = vld [vmem:[#allocation2 + $0x166] sm:$0xff] }
 0x2b4   : > { %v5314_v63 = vadd.f32 %v9149_v18, %v5275_v53  ;;  %v4677_v55 = vadd.f32 %v4645_v5, %v4576_v36  ;;  %v4377_v29 = vadd.f32 %v4345_v8, %v4277_v0  ;;  %v3978_v51 = vadd.f32 %v10258_v48, %v3877_v32  ;;  %v5567_v43 = vld [vmem:[#allocation2 + $0x14e] sm:$0xff] }
 0x2b5   : > { %v4046_v45 = vmul.f32 %v5567_v43, %v9004_v10  ;;  %v5176_v19 = vadd.f32 %v5144_v24, %v5076_v15  ;;  %v5109_v3 = vld [vmem:[#allocation2 + $0x152] sm:$0xff]  ;;  %v4146_v11 = vmul.f32 %v4809_v41, %v9010_v16  ;;  %v4945_v36 = vmul.f32 %v9082_v40, %v4909_v27  ;;  %v4910_v15 = vld [vmem:[#allocation2 + $0x168] sm:$0xff] }
 0x2b6   : > { %v5346_v61 = vmax.f32 %v5314_v63, 0.0  ;;  %v4777_v6 = vadd.f32 %v4745_v54, %v4677_v55  ;;  %v4477_v57 = vadd.f32 %v4445_v35, %v4377_v29  ;;  %v5045_v5 = vmul.f32 %v9088_v17, %v5009_v25  ;;  %v5209_v54 = vld [vmem:[#allocation2 + $0x153] sm:$0xff] }
 0x2b7   : > { %v4078_v9 = vadd.f32 %v4046_v45, %v3978_v51  ;;  %v4646_v44 = vmul.f32 %v9066_v33, %v4610_v60  ;;  %v5276_v0 = vadd.f32 %v5244_v47, %v5176_v19  ;;  %v4246_v24 = vmul.f32 %v4909_v27, %v9015_v26  ;;  %v10259_v60 = vld [vmem:[#allocation88_spill] sm:$0xff]  ;;  %v10260_v47 = vld [vmem:[#allocation85_spill] sm:$0xff] }
 0x2b8   : > { %5378 = vst.msk [vmem:[%s9168_s17 + $0x38] sm:$0xff] %vm233_vm0, %v5346_v61  ;;  %v4877_v53 = vadd.f32 %v4845_v12, %v4777_v6  ;;  %v4577_v8 = vadd.f32 %v4545_v14, %v4477_v57  ;;  %v5145_v32 = vmul.f32 %v9091_v39, %v5109_v3  ;;  %v4746_v41 = vmul.f32 %v9076_v13, %v4710_v31  ;;  %v5568_v45 = vld [vmem:[#allocation2 + $0x166] sm:$0xff]  ;;  %v10261_v31 = vld [vmem:[#allocation90_spill] sm:$0xff] }
 0x2b9   : > { %v4178_v52 = vadd.f32 %v4146_v11, %v4078_v9  ;;  %v4346_v63 = vmul.f32 %v5009_v25, %v9021_v34  ;;  %v5315_v55 = vadd.f32 %v9149_v18, %v5276_v0  ;;  %v3878_v48 = vadd.f32 %v10260_v47, %v10259_v60  ;;  %v5010_v12 = vld [vmem:[#allocation2 + $0x169] sm:$0xff] }
 0x2ba   : > { %v4977_v4 = vadd.f32 %v4945_v36, %v4877_v53  ;;  %v4678_v35 = vadd.f32 %v4646_v44, %v4577_v8  ;;  %v4846_v27 = vmul.f32 %v9079_v23, %v4810_v37  ;;  %v4446_v43 = vmul.f32 %v5109_v3, %v9038_v38  ;;  %v5110_v14 = vld [vmem:[#allocation2 + $0x16a] sm:$0xff] }
 0x2bb   : > { %v4278_v29 = vadd.f32 %v4246_v24, %v4178_v52  ;;  %v4047_v61 = vmul.f32 %v5568_v45, %v9004_v10  ;;  %v5347_v6 = vmax.f32 %v5315_v55, 0.0  ;;  %v4611_v57 = vld [vmem:[#allocation2 + $0x16d] sm:$0xff]  ;;  %v3979_v9 = vadd.f32 %v10261_v31, %v3878_v48 }
 0x2bc   : > { %v5077_v51 = vadd.f32 %v5045_v5, %v4977_v4  ;;  %v4778_v25 = vadd.f32 %v4746_v41, %v4678_v35  ;;  %v5245_v53 = vmul.f32 %v9097_v59, %v5209_v54  ;;  %v4946_v36 = vmul.f32 %v9082_v40, %v4910_v15  ;;  %v5210_v44 = vld [vmem:[#allocation2 + $0x16b] sm:$0xff] }
 0x2bd   : > { %v4378_v19 = vadd.f32 %v4346_v63, %v4278_v29  ;;  %v4546_v5 = vmul.f32 %v5209_v54, %v9048_v58  ;;  %5379 = vst.msk [vmem:[%s9168_s17 + $0x40] sm:$0xff] %vm233_vm0, %v5347_v6  ;;  %v4711_v8 = vld [vmem:[#allocation2 + $0x16e] sm:$0xff]  ;;  %v4079_v52 = vadd.f32 %v4047_v61, %v3979_v9  ;;  %v4147_v24 = vmul.f32 %v4810_v37, %v9010_v16 }
 0x2be   : > { %v5177_v11 = vadd.f32 %v5145_v32, %v5077_v51  ;;  %v4878_v3 = vadd.f32 %v4846_v27, %v4778_v25  ;;  %v5046_v41 = vmul.f32 %v9088_v17, %v5010_v12  ;;  %v5146_v32 = vmul.f32 %v9091_v39, %v5110_v14  ;;  %v4811_v29 = vld [vmem:[#allocation2 + $0x16f] sm:$0xff]  ;;  %v10263_v27 = vld [vmem:[#allocation86_spill] sm:$0xff] }
 0x2bf   : > { %v4478_v0 = vadd.f32 %v4446_v43, %v4378_v19  ;;  %v4647_v63 = vmul.f32 %v9066_v33, %v4611_v57  ;;  %v4179_v54 = vadd.f32 %v4147_v24, %v4079_v52  ;;  %v4247_v60 = vmul.f32 %v4910_v15, %v9015_v26  ;;  %v10262_v37 = vld [vmem:[#allocation89_spill] sm:$0xff]  ;;  %v10265_v24 = vld [vmem:[#allocation48_spill] sm:$0xff] }
 0x2c0   : > { %v5277_v4 = vadd.f32 %v5245_v53, %v5177_v11  ;;  %v4978_v55 = vadd.f32 %v4946_v36, %v4878_v3  ;;  %v5246_v48 = vmul.f32 %v9097_v59, %v5210_v44  ;;  %v4747_v51 = vmul.f32 %v9076_v13, %v4711_v8  ;;  %v4911_v6 = vld [vmem:[#allocation2 + $0x170] sm:$0xff] }
 0x2c1   : > { %v4578_v35 = vadd.f32 %v4546_v5, %v4478_v0  ;;  %v3879_v43 = vadd.f32 %v10263_v27, %v10262_v37  ;;  %v4279_v25 = vadd.f32 %v4247_v60, %v4179_v54  ;;  %v4347_v19 = vmul.f32 %v5010_v12, %v9021_v34  ;;  %v10264_v15 = vld [vmem:[#allocation93_spill] sm:$0xff] }
 0x2c2   : > { %v5316_v47 = vadd.f32 %v9149_v18, %v5277_v4  ;;  %v5078_v45 = vadd.f32 %v5046_v41, %v4978_v55  ;;  %v4847_v31 = vmul.f32 %v9079_v23, %v4811_v29  ;;  %v5569_v11 = vld [vmem:[#allocation2 + $0x16e] sm:$0xff]  ;;  %v4447_v52 = vmul.f32 %v5110_v14, %v9038_v38  ;;  %v4612_v41 = vld [vmem:[#allocation2 + $0x185] sm:$0xff] }
 0x2c3   : > { %v4679_v61 = vadd.f32 %v4647_v63, %v4578_v35  ;;  %v3980_v9 = vadd.f32 %v10264_v15, %v3879_v43  ;;  %v4048_v53 = vmul.f32 %v5569_v11, %v9004_v10  ;;  %v5011_v3 = vld [vmem:[#allocation2 + $0x171] sm:$0xff]  ;;  %v4379_v8 = vadd.f32 %v4347_v19, %v4279_v25  ;;  %v4812_v25 = vld [vmem:[#allocation2 + $0x187] sm:$0xff] }
 0x2c4   : > { %v5348_v57 = vmax.f32 %v5316_v47, 0.0  ;;  %v5178_v36 = vadd.f32 %v5146_v32, %v5078_v45  ;;  %v5111_v0 = vld [vmem:[#allocation2 + $0x172] sm:$0xff]  ;;  %v9349_v4 = vadd.f32 %v10265_v24, %v9121_v21  ;;  %v4947_v12 = vmul.f32 %v9082_v40, %v4911_v6  ;;  %v4712_v21 = vld [vmem:[#allocation2 + $0x186] sm:$0xff] }
 0x2c5   : > { %v4779_v5 = vadd.f32 %v4747_v51, %v4679_v61  ;;  %v4080_v63 = vadd.f32 %v4048_v53, %v3980_v9  ;;  %v4148_v55 = vmul.f32 %v4811_v29, %v9010_v16  ;;  %v5211_v54 = vld [vmem:[#allocation2 + $0x173] sm:$0xff]  ;;  %v4479_v60 = vadd.f32 %v4447_v52, %v4379_v8  ;;  %v4912_v19 = vld [vmem:[#allocation2 + $0x188] sm:$0xff]  ;;  %v10267_v15 = vld [vmem:[#allocation91_spill] sm:$0xff] }
 0x2c6   : > { %5380 = vst.msk [vmem:[%s9168_s17 + $0x48] sm:$0xff] %vm233_vm0, %v5348_v57  ;;  %v5278_v35 = vadd.f32 %v5246_v48, %v5178_v36  ;;  %v4547_v47 = vmul.f32 %v5210_v44, %v9048_v58  ;;  %v5047_v14 = vmul.f32 %v9088_v17, %v5011_v3  ;;  %v5147_v51 = vmul.f32 %v9091_v39, %v5111_v0  ;;  %v5112_v8 = vld [vmem:[#allocation2 + $0x18a] sm:$0xff] }
 0x2c7   : > { %v4879_v32 = vadd.f32 %v4847_v31, %v4779_v5  ;;  %v4180_v37 = vadd.f32 %v4148_v55, %v4080_v63  ;;  %v4248_v27 = vmul.f32 %v4911_v6, %v9015_v26  ;;  %v4648_v29 = vmul.f32 %v9066_v33, %v4612_v41  ;;  %v10266_v31 = vld [vmem:[#allocation25_spill] sm:$0xff]  ;;  %v5570_v63 = vld [vmem:[#allocation2 + $0x186] sm:$0xff] }
 0x2c8   : > { %v5317_v43 = vadd.f32 %v9149_v18, %v5278_v35  ;;  %v4579_v61 = vadd.f32 %v4547_v47, %v4479_v60  ;;  %v5247_v48 = vmul.f32 %v9097_v59, %v5211_v54  ;;  %v4348_v57 = vmul.f32 %v5011_v3, %v9021_v34  ;;  %v5012_v5 = vld [vmem:[#allocation2 + $0x189] sm:$0xff] }
 0x2c9   : > { %v4979_v45 = vadd.f32 %v4947_v12, %v4879_v32  ;;  %v4280_v44 = vadd.f32 %v4248_v27, %v4180_v37  ;;  %v3880_v9 = vadd.f32 %v10267_v15, %v10266_v31  ;;  %v4748_v36 = vmul.f32 %v9076_v13, %v4712_v21  ;;  %v10268_v12 = vld [vmem:[#allocation94_spill] sm:$0xff]  ;;  %v4613_v47 = vld [vmem:[#allocation2 + $0x18d] sm:$0xff] }
 0x2ca   : > { %v5349_v11 = vmax.f32 %v5317_v43, 0.0  ;;  %v4680_v6 = vadd.f32 %v4648_v29, %v4579_v61  ;;  %v4448_v24 = vmul.f32 %v5111_v0, %v9038_v38  ;;  %v4049_v55 = vmul.f32 %v5570_v63, %v9004_v10 }
 0x2cb   : > { %v5079_v53 = vadd.f32 %v5047_v14, %v4979_v45  ;;  %v4380_v52 = vadd.f32 %v4348_v57, %v4280_v44  ;;  %v3981_v41 = vadd.f32 %v10268_v12, %v3880_v9  ;;  %v4848_v32 = vmul.f32 %v9079_v23, %v4812_v25  ;;  %v5212_v14 = vld [vmem:[#allocation2 + $0x18b] sm:$0xff] }
 0x2cc   : > { %5381 = vst.msk [vmem:[%s9168_s17 + $0x50] sm:$0xff] %vm233_vm0, %v5349_v11  ;;  %v4780_v35 = vadd.f32 %v4748_v36, %v4680_v6  ;;  %v4948_v60 = vmul.f32 %v9082_v40, %v4912_v19  ;;  %v4548_v37 = vmul.f32 %v5211_v54, %v9048_v58  ;;  %v4149_v0 = vmul.f32 %v4812_v25, %v9010_v16  ;;  %v10269_v25 = vld [vmem:[#allocation19_spill] sm:$0xff] }
 0x2cd   : > { %v5179_v3 = vadd.f32 %v5147_v51, %v5079_v53  ;;  %v4480_v21 = vadd.f32 %v4448_v24, %v4380_v52  ;;  %v4081_v27 = vadd.f32 %v4049_v55, %v3981_v41  ;;  %v5048_v61 = vmul.f32 %v9088_v17, %v5012_v5  ;;  %v4713_v51 = vld [vmem:[#allocation2 + $0x18e] sm:$0xff] }
 0x2ce   : > { %v4880_v45 = vadd.f32 %v4848_v32, %v4780_v35  ;;  %v5148_v29 = vmul.f32 %v9091_v39, %v5112_v8  ;;  %v4649_v57 = vmul.f32 %v9066_v33, %v4613_v47  ;;  %v4249_v15 = vmul.f32 %v4912_v19, %v9015_v26  ;;  %v4813_v53 = vld [vmem:[#allocation2 + $0x18f] sm:$0xff] }
 0x2cf   : > { %v5279_v43 = vadd.f32 %v5247_v48, %v5179_v3  ;;  %v4580_v44 = vadd.f32 %v4548_v37, %v4480_v21  ;;  %v4181_v31 = vadd.f32 %v4149_v0, %v4081_v27  ;;  %v5248_v54 = vmul.f32 %v9097_v59, %v5212_v14  ;;  %v10270_v48 = vld [vmem:[#allocation92_spill] sm:$0xff]  ;;  %v4913_v24 = vld [vmem:[#allocation2 + $0x190] sm:$0xff] }
 0x2d0   : > { %v4980_v11 = vadd.f32 %v4948_v60, %v4880_v45  ;;  %v3881_v6 = vadd.f32 %v10270_v48, %v10269_v25  ;;  %v4749_v52 = vmul.f32 %v9076_v13, %v4713_v51  ;;  %v4349_v41 = vmul.f32 %v5012_v5, %v9021_v34  ;;  %v5013_v19 = vld [vmem:[#allocation2 + $0x191] sm:$0xff]  ;;  %v10271_v3 = vld [vmem:[#allocation96_spill] sm:$0xff] }
 0x2d1   : > { %v5318_v9 = vadd.f32 %v9149_v18, %v5279_v43  ;;  %v4681_v36 = vadd.f32 %v4649_v57, %v4580_v44  ;;  %v4281_v12 = vadd.f32 %v4249_v15, %v4181_v31  ;;  %v5571_v32 = vld [vmem:[#allocation2 + $0x18e] sm:$0xff]  ;;  %v4849_v21 = vmul.f32 %v9079_v23, %v4813_v53 }
 0x2d2   : > { %v5080_v55 = vadd.f32 %v5048_v61, %v4980_v11  ;;  %v3982_v35 = vadd.f32 %v10271_v3, %v3881_v6  ;;  %v4050_v60 = vmul.f32 %v5571_v32, %v9004_v10  ;;  %v5113_v37 = vld [vmem:[#allocation2 + $0x192] sm:$0xff]  ;;  %v4449_v0 = vmul.f32 %v5112_v8, %v9038_v38  ;;  %v4614_v61 = vld [vmem:[#allocation2 + $0x1a5] sm:$0xff] }
 0x2d3   : > { %v5350_v63 = vmax.f32 %v5318_v9, 0.0  ;;  %v4781_v47 = vadd.f32 %v4749_v52, %v4681_v36  ;;  %v4381_v27 = vadd.f32 %v4349_v41, %v4281_v12  ;;  %v4949_v5 = vmul.f32 %v9082_v40, %v4913_v24  ;;  %v5213_v45 = vld [vmem:[#allocation2 + $0x193] sm:$0xff]  ;;  %v4714_v8 = vld [vmem:[#allocation2 + $0x1a6] sm:$0xff] }
 0x2d4   : > { %v5180_v43 = vadd.f32 %v5148_v29, %v5080_v55  ;;  %v4082_v51 = vadd.f32 %v4050_v60, %v3982_v35  ;;  %v4150_v44 = vmul.f32 %v4813_v53, %v9010_v16  ;;  %v5049_v31 = vmul.f32 %v9088_v17, %v5013_v19  ;;  %v4814_v41 = vld [vmem:[#allocation2 + $0x1a7] sm:$0xff]  ;;  %v10273_v3 = vld [vmem:[#allocation26_spill] sm:$0xff] }
 0x2d5   : > { %5382 = vst.msk [vmem:[%s9168_s17 + $0x58] sm:$0xff] %vm233_vm0, %v5350_v63  ;;  %v4881_v57 = vadd.f32 %v4849_v21, %v4781_v47  ;;  %v4481_v15 = vadd.f32 %v4449_v0, %v4381_v27  ;;  %v4549_v9 = vmul.f32 %v5212_v14, %v9048_v58  ;;  %v5149_v25 = vmul.f32 %v9091_v39, %v5113_v37  ;;  %v4914_v63 = vld [vmem:[#allocation2 + $0x1a8] sm:$0xff] }
 0x2d6   : > { %v5280_v11 = vadd.f32 %v5248_v54, %v5180_v43  ;;  %v4182_v48 = vadd.f32 %v4150_v44, %v4082_v51  ;;  %v4250_v29 = vmul.f32 %v4913_v24, %v9015_v26  ;;  %v5249_v36 = vmul.f32 %v9097_v59, %v5213_v45  ;;  %v10272_v54 = vld [vmem:[#allocation17_spill] sm:$0xff]  ;;  %v5572_v51 = vld [vmem:[#allocation2 + $0x1a6] sm:$0xff] }
 0x2d7   : > { %v4981_v6 = vadd.f32 %v4949_v5, %v4881_v57  ;;  %v4581_v52 = vadd.f32 %v4549_v9, %v4481_v15  ;;  %v4650_v12 = vmul.f32 %v9066_v33, %v4614_v61  ;;  %v4350_v14 = vmul.f32 %v5013_v19, %v9021_v34  ;;  %v5014_v27 = vld [vmem:[#allocation2 + $0x1a9] sm:$0xff]  ;;  %v10274_v5 = vld [vmem:[#allocation18_spill] sm:$0xff] }
 0x2d8   : > { %v5319_v53 = vadd.f32 %v9149_v18, %v5280_v11  ;;  %v4282_v55 = vadd.f32 %v4250_v29, %v4182_v48  ;;  %v3882_v35 = vadd.f32 %v10273_v3, %v10272_v54  ;;  %v4750_v24 = vmul.f32 %v9076_v13, %v4714_v8  ;;  %v5114_v0 = vld [vmem:[#allocation2 + $0x1aa] sm:$0xff] }
 0x2d9   : > { %v5081_v32 = vadd.f32 %v5049_v31, %v4981_v6  ;;  %v4682_v60 = vadd.f32 %v4650_v12, %v4581_v52  ;;  %v4450_v47 = vmul.f32 %v5113_v37, %v9038_v38  ;;  %v4051_v44 = vmul.f32 %v5572_v51, %v9004_v10  ;;  %v4615_v9 = vld [vmem:[#allocation2 + $0x1ad] sm:$0xff] }
 0x2da   : > { %v5351_v21 = vmax.f32 %v5319_v53, 0.0  ;;  %v4382_v43 = vadd.f32 %v4350_v14, %v4282_v55  ;;  %v3983_v61 = vadd.f32 %v10274_v5, %v3882_v35  ;;  %v4850_v15 = vmul.f32 %v9079_v23, %v4814_v41  ;;  %v5214_v11 = vld [vmem:[#allocation2 + $0x1ab] sm:$0xff] }
 0x2db   : > { %v5181_v19 = vadd.f32 %v5149_v25, %v5081_v32  ;;  %v4782_v57 = vadd.f32 %v4750_v24, %v4682_v60  ;;  %v4950_v31 = vmul.f32 %v9082_v40, %v4914_v63  ;;  %v4550_v8 = vmul.f32 %v5213_v45, %v9048_v58  ;;  %v4715_v53 = vld [vmem:[#allocation2 + $0x1ae] sm:$0xff] }
 0x2dc   : > { %5383 = vst.msk [vmem:[%s9168_s17 + $0x60] sm:$0xff] %vm233_vm0, %v5351_v21  ;;  %v4482_v37 = vadd.f32 %v4450_v47, %v4382_v43  ;;  %v4083_v48 = vadd.f32 %v4051_v44, %v3983_v61  ;;  %v4151_v29 = vmul.f32 %v4814_v41, %v9010_v16  ;;  %v5050_v12 = vmul.f32 %v9088_v17, %v5014_v27  ;;  %v4815_v60 = vld [vmem:[#allocation2 + $0x1af] sm:$0xff] }
 0x2dd   : > { %v5281_v6 = vadd.f32 %v5249_v36, %v5181_v19  ;;  %v4882_v52 = vadd.f32 %v4850_v15, %v4782_v57  ;;  %v5150_v25 = vmul.f32 %v9091_v39, %v5114_v0  ;;  %v4651_v14 = vmul.f32 %v9066_v33, %v4615_v9  ;;  %v10275_v41 = vld [vmem:[#allocation13_spill] sm:$0xff]  ;;  %v10276_v36 = vld [vmem:[#allocation95_spill] sm:$0xff]  ;;  %v10277_v19 = vld [vmem:[#allocation98_spill] sm:$0xff] }
 0x2de   : > { %v4582_v55 = vadd.f32 %v4550_v8, %v4482_v37  ;;  %v4183_v54 = vadd.f32 %v4151_v29, %v4083_v48  ;;  %v4251_v3 = vmul.f32 %v4914_v63, %v9015_v26  ;;  %v5250_v45 = vmul.f32 %v9097_v59, %v5214_v11  ;;  %v4915_v43 = vld [vmem:[#allocation2 + $0x1b0] sm:$0xff] }
 0x2df   : > { %v5320_v35 = vadd.f32 %v9149_v18, %v5281_v6  ;;  %v4982_v32 = vadd.f32 %v4950_v31, %v4882_v52  ;;  %v3883_v24 = vadd.f32 %v10276_v36, %v10275_v41  ;;  %v4751_v21 = vmul.f32 %v9076_v13, %v4715_v53  ;;  %v5015_v63 = vld [vmem:[#allocation2 + $0x1b1] sm:$0xff]  ;;  %v4616_v52 = vld [vmem:[#allocation2 + $0x1c5] sm:$0xff] }
 0x2e0   : > { %v4683_v47 = vadd.f32 %v4651_v14, %v4582_v55  ;;  %v4283_v5 = vadd.f32 %v4251_v3, %v4183_v54  ;;  %v4351_v61 = vmul.f32 %v5014_v27, %v9021_v34  ;;  %v5573_v57 = vld [vmem:[#allocation2 + $0x1ae] sm:$0xff]  ;;  %v4851_v9 = vmul.f32 %v9079_v23, %v4815_v60 }
 0x2e1   : > { %v5352_v51 = vmax.f32 %v5320_v35, 0.0  ;;  %v5082_v44 = vadd.f32 %v5050_v12, %v4982_v32  ;;  %v3984_v18 = vadd.f32 %v10277_v19, %v3883_v24  ;;  %v4052_v15 = vmul.f32 %v5573_v57, %v9004_v10  ;;  %v5115_v37 = vld [vmem:[#allocation2 + $0x1b2] sm:$0xff] }
 0x2e2   : > { %v4783_v31 = vadd.f32 %v4751_v21, %v4683_v47  ;;  %v4383_v8 = vadd.f32 %v4351_v61, %v4283_v5  ;;  %v4451_v48 = vmul.f32 %v5114_v0, %v9038_v38  ;;  %v4951_v27 = vmul.f32 %v9082_v40, %v4915_v43  ;;  %v5215_v6 = vld [vmem:[#allocation2 + $0x1b3] sm:$0xff]  ;;  %v4716_v0 = vld [vmem:[#allocation2 + $0x1c6] sm:$0xff] }
 0x2e3   : > { %5384 = vst.msk [vmem:[%s9168_s17 + $0x68] sm:$0xff] %vm233_vm0, %v5352_v51  ;;  %v5182_v29 = vadd.f32 %v5150_v25, %v5082_v44  ;;  %v4084_v12 = vadd.f32 %v4052_v15, %v3984_v18  ;;  %v4152_v53 = vmul.f32 %v4815_v60, %v9010_v16  ;;  %v5051_v14 = vmul.f32 %v9088_v17, %v5015_v63  ;;  %v9440_v60 = vld [vmem:[%s9746_s2] ss:$0 sm:$0xff]  ;;  %v4916_v5 = vld [vmem:[#allocation2 + $0x1c8] sm:$0xff]  ;;  %v10278_v44 = vld [vmem:[#allocation6_spill] sm:$0xff] }
 0x2e4   : > { %v4883_v55 = vadd.f32 %v4851_v9, %v4783_v31  ;;  %v4483_v54 = vadd.f32 %v4451_v48, %v4383_v8  ;;  %v4551_v3 = vmul.f32 %v5214_v11, %v9048_v58  ;;  %v5151_v32 = vmul.f32 %v9091_v39, %v5115_v37  ;;  %v5016_v8 = vld [vmem:[#allocation2 + $0x1c9] sm:$0xff] }
 0x2e5   : > { %v5282_v35 = vadd.f32 %v5250_v45, %v5182_v29  ;;  %v4184_v41 = vadd.f32 %v4152_v53, %v4084_v12  ;;  %v4252_v25 = vmul.f32 %v4915_v43, %v9015_v26  ;;  %v5251_v24 = vmul.f32 %v9097_v59, %v5215_v6  ;;  %v4816_v45 = vld [vmem:[#allocation2 + $0x1c7] sm:$0xff] }
 0x2e6   : > { %v4983_v36 = vadd.f32 %v4951_v27, %v4883_v55  ;;  %v4583_v47 = vadd.f32 %v4551_v3, %v4483_v54  ;;  %v4652_v21 = vmul.f32 %v9066_v33, %v4616_v52  ;;  %v4352_v51 = vmul.f32 %v5015_v63, %v9021_v34  ;;  %v10279_v43 = vld [vmem:[#allocation28_spill] sm:$0xff] }
 0x2e7   : > { %v5321_v11 = vadd.f32 %v9440_v60, %v5282_v35  ;;  %v4284_v61 = vadd.f32 %v4252_v25, %v4184_v41  ;;  %v3884_v19 = vadd.f32 %v10279_v43, %v10278_v44  ;;  %v4752_v15 = vmul.f32 %v9076_v13, %v4716_v0  ;;  %v5116_v48 = vld [vmem:[#allocation2 + $0x1ca] sm:$0xff] }
 0x2e8   : > { %v5083_v18 = vadd.f32 %v5051_v14, %v4983_v36  ;;  %v4684_v57 = vadd.f32 %v4652_v21, %v4583_v47  ;;  %v4452_v31 = vmul.f32 %v5115_v37, %v9038_v38  ;;  %v10280_v27 = vld [vmem:[#allocation24_spill] sm:$0xff]  ;;  %v4852_v54 = vmul.f32 %v9079_v23, %v4816_v45 }
 0x2e9   : > { %v5353_v9 = vmax.f32 %v5321_v11, 0.0  ;;  %v4384_v29 = vadd.f32 %v4352_v51, %v4284_v61  ;;  %v3985_v52 = vadd.f32 %v10280_v27, %v3884_v19  ;;  %v5575_v12 = vld [vmem:[#allocation2 + $0x1c6] sm:$0xff]  ;;  %v4952_v14 = vmul.f32 %v9082_v40, %v4916_v5  ;;  %v4717_v11 = vld [vmem:[#allocation2 + $0x1ce] sm:$0xff] }
 0x2ea   : > { %v4053_v53 = vmul.f32 %v5575_v12, %v9004_v10  ;;  %v5183_v63 = vadd.f32 %v5151_v32, %v5083_v18  ;;  %v4784_v55 = vadd.f32 %v4752_v15, %v4684_v57  ;;  %v4617_v3 = vld [vmem:[#allocation2 + $0x1cd] sm:$0xff]  ;;  %v4552_v0 = vmul.f32 %v5215_v6, %v9048_v58 }
 0x2eb   : > { %5385 = vst.msk [vmem:[%s9168_s17 + $0x70] sm:$0xff] %vm233_vm0, %v5353_v9  ;;  %v5216_v35 = vld [vmem:[#allocation2 + $0x1cb] sm:$0xff]  ;;  %v4484_v37 = vadd.f32 %v4452_v31, %v4384_v29  ;;  %v4153_v25 = vmul.f32 %v4816_v45, %v9010_v16  ;;  %v5052_v21 = vmul.f32 %v9088_v17, %v5016_v8  ;;  %v5152_v32 = vmul.f32 %v9091_v39, %v5116_v48  ;;  %v10281_v45 = vld [vmem:[#allocation99_spill] sm:$0xff] }
 0x2ec   : > { %v4085_v41 = vadd.f32 %v4053_v53, %v3985_v52  ;;  %v5283_v36 = vadd.f32 %v5251_v24, %v5183_v63  ;;  %v4884_v47 = vadd.f32 %v4852_v54, %v4784_v55  ;;  %v4653_v51 = vmul.f32 %v9066_v33, %v4617_v3  ;;  %v4817_v57 = vld [vmem:[#allocation2 + $0x1cf] sm:$0xff] }
 0x2ed   : > { %v4584_v61 = vadd.f32 %v4552_v0, %v4484_v37  ;;  %v4253_v43 = vmul.f32 %v4916_v5, %v9015_v26  ;;  %v5252_v6 = vmul.f32 %v9097_v59, %v5216_v35  ;;  %v10282_v24 = vld [vmem:[#allocation97_spill] sm:$0xff]  ;;  %v4753_v9 = vmul.f32 %v9076_v13, %v4717_v11 }
 0x2ee   : > { %v4185_v44 = vadd.f32 %v4153_v25, %v4085_v41  ;;  %v5322_v19 = vadd.f32 %v9440_v60, %v5283_v36  ;;  %v4984_v18 = vadd.f32 %v4952_v14, %v4884_v47  ;;  %v3885_v15 = vadd.f32 %v10282_v24, %v10281_v45  ;;  %v4917_v29 = vld [vmem:[#allocation2 + $0x1d0] sm:$0xff] }
 0x2ef   : > { %v4685_v31 = vadd.f32 %v4653_v51, %v4584_v61  ;;  %v4353_v52 = vmul.f32 %v5016_v8, %v9021_v34  ;;  %v5017_v5 = vld [vmem:[#allocation2 + $0x1d1] sm:$0xff]  ;;  %v4853_v37 = vmul.f32 %v9079_v23, %v4817_v57  ;;  %v4453_v25 = vmul.f32 %v5116_v48, %v9038_v38  ;;  %v4718_v48 = vld [vmem:[#allocation2 + $0x1e6] sm:$0xff] }
 0x2f0   : > { %v4285_v27 = vadd.f32 %v4253_v43, %v4185_v44  ;;  %v5354_v12 = vmax.f32 %v5322_v19, 0.0  ;;  %v5084_v53 = vadd.f32 %v5052_v21, %v4984_v18  ;;  %v10283_v63 = vld [vmem:[#allocation101_spill] sm:$0xff]  ;;  %v4953_v8 = vmul.f32 %v9082_v40, %v4917_v29  ;;  %v4618_v21 = vld [vmem:[#allocation2 + $0x1e5] sm:$0xff] }
 0x2f1   : > { %v3986_v55 = vadd.f32 %v10283_v63, %v3885_v15  ;;  %v5576_v54 = vld [vmem:[#allocation2 + $0x1ce] sm:$0xff]  ;;  %v4785_v3 = vadd.f32 %v4753_v9, %v4685_v31  ;;  %v4154_v61 = vmul.f32 %v4817_v57, %v9010_v16  ;;  %v5053_v44 = vmul.f32 %v9088_v17, %v5017_v5  ;;  %v10285_v63 = vld [vmem:[#allocation27_spill] sm:$0xff] }
 0x2f2   : > { %v4054_v14 = vmul.f32 %v5576_v54, %v9004_v10  ;;  %v5117_v0 = vld [vmem:[#allocation2 + $0x1d2] sm:$0xff]  ;;  %v4385_v41 = vadd.f32 %v4353_v52, %v4285_v27  ;;  %5386 = vst.msk [vmem:[%s9168_s17 + $0x78] sm:$0xff] %vm233_vm0, %v5354_v12  ;;  %v5184_v36 = vadd.f32 %v5152_v32, %v5084_v53  ;;  %v4553_v19 = vmul.f32 %v5216_v35, %v9048_v58  ;;  %v4818_v52 = vld [vmem:[#allocation2 + $0x1e7] sm:$0xff] }
 0x2f3   : > { %v5217_v47 = vld [vmem:[#allocation2 + $0x1d3] sm:$0xff]  ;;  %v4885_v51 = vadd.f32 %v4853_v37, %v4785_v3  ;;  %v5153_v45 = vmul.f32 %v9091_v39, %v5117_v0  ;;  %v4254_v32 = vmul.f32 %v4917_v29, %v9015_v26  ;;  %v4654_v27 = vmul.f32 %v9066_v33, %v4618_v21  ;;  %v4918_v12 = vld [vmem:[#allocation2 + $0x1e8] sm:$0xff] }
 0x2f4   : > { %v4086_v11 = vadd.f32 %v4054_v14, %v3986_v55  ;;  %v4485_v43 = vadd.f32 %v4453_v25, %v4385_v41  ;;  %v5284_v18 = vadd.f32 %v5252_v6, %v5184_v36  ;;  %v5253_v31 = vmul.f32 %v9097_v59, %v5217_v47  ;;  %v10284_v6 = vld [vmem:[#allocation100_spill] sm:$0xff] }
 0x2f5   : > { %v4985_v15 = vadd.f32 %v4953_v8, %v4885_v51  ;;  %v4354_v35 = vmul.f32 %v5017_v5, %v9021_v34  ;;  %v3886_v55 = vadd.f32 %v10285_v63, %v10284_v6  ;;  %v4754_v29 = vmul.f32 %v9076_v13, %v4718_v48  ;;  %v5018_v41 = vld [vmem:[#allocation2 + $0x1e9] sm:$0xff]  ;;  %v10286_v8 = vld [vmem:[#allocation23_spill] sm:$0xff] }
 0x2f6   : > { %v4186_v24 = vadd.f32 %v4154_v61, %v4086_v11  ;;  %v4585_v9 = vadd.f32 %v4553_v19, %v4485_v43  ;;  %v5323_v57 = vadd.f32 %v9440_v60, %v5284_v18  ;;  %v4454_v3 = vmul.f32 %v5117_v0, %v9038_v38  ;;  %v5118_v25 = vld [vmem:[#allocation2 + $0x1ea] sm:$0xff] }
 0x2f7   : > { %v5085_v54 = vadd.f32 %v5053_v44, %v4985_v15  ;;  %v3987_v21 = vadd.f32 %v10286_v8, %v3886_v55  ;;  %v5577_v11 = vld [vmem:[#allocation2 + $0x1e6] sm:$0xff]  ;;  %v4854_v43 = vmul.f32 %v9079_v23, %v4818_v52  ;;  %v4954_v44 = vmul.f32 %v9082_v40, %v4918_v12 }
 0x2f8   : > { %v4286_v53 = vadd.f32 %v4254_v32, %v4186_v24  ;;  %v4686_v14 = vadd.f32 %v4654_v27, %v4585_v9  ;;  %v5355_v37 = vmax.f32 %v5323_v57, 0.0  ;;  %v4055_v61 = vmul.f32 %v5577_v11, %v9004_v10  ;;  %v4619_v19 = vld [vmem:[#allocation2 + $0x1ed] sm:$0xff] }
 0x2f9   : > { %v5185_v5 = vadd.f32 %v5153_v45, %v5085_v54  ;;  %v5218_v18 = vld [vmem:[#allocation2 + $0x1eb] sm:$0xff]  ;;  %v4554_v48 = vmul.f32 %v5217_v47, %v9048_v58  ;;  %v4155_v32 = vmul.f32 %v4818_v52, %v9010_v16  ;;  %v5054_v27 = vmul.f32 %v9088_v17, %v5018_v41  ;;  %v10287_v52 = vld [vmem:[#allocation11_spill] sm:$0xff] }
 0x2fa   : > { %v4386_v36 = vadd.f32 %v4354_v35, %v4286_v53  ;;  %v4786_v51 = vadd.f32 %v4754_v29, %v4686_v14  ;;  %5387 = vst.msk [vmem:[%s9168_s17 + $0x80] sm:$0xff] %vm233_vm0, %v5355_v37  ;;  %v4087_v24 = vadd.f32 %v4055_v61, %v3987_v21  ;;  %v5154_v45 = vmul.f32 %v9091_v39, %v5118_v25  ;;  %v4719_v57 = vld [vmem:[#allocation2 + $0x1ee] sm:$0xff] }
 0x2fb   : > { %v5285_v15 = vadd.f32 %v5253_v31, %v5185_v5  ;;  %v4655_v35 = vmul.f32 %v9066_v33, %v4619_v19  ;;  %v4255_v63 = vmul.f32 %v4918_v12, %v9015_v26  ;;  %v5254_v47 = vmul.f32 %v9097_v59, %v5218_v18  ;;  %v4819_v14 = vld [vmem:[#allocation2 + $0x1ef] sm:$0xff]  ;;  %v10288_v31 = vld [vmem:[#allocation7_spill] sm:$0xff] }
 0x2fc   : > { %v4486_v0 = vadd.f32 %v4454_v3, %v4386_v36  ;;  %v4886_v9 = vadd.f32 %v4854_v43, %v4786_v51  ;;  %v4187_v6 = vadd.f32 %v4155_v32, %v4087_v24  ;;  %v3887_v29 = vadd.f32 %v10288_v31, %v10287_v52  ;;  %v4919_v36 = vld [vmem:[#allocation2 + $0x1f0] sm:$0xff] }
 0x2fd   : > { %v5324_v55 = vadd.f32 %v9440_v60, %v5285_v15  ;;  %v4755_v37 = vmul.f32 %v9076_v13, %v4719_v57  ;;  %v4355_v21 = vmul.f32 %v5018_v41, %v9021_v34  ;;  %v5019_v12 = vld [vmem:[#allocation2 + $0x1f1] sm:$0xff]  ;;  %v4855_v19 = vmul.f32 %v9079_v23, %v4819_v14 }
 0x2fe   : > { %v4586_v53 = vadd.f32 %v4554_v48, %v4486_v0  ;;  %v4986_v54 = vadd.f32 %v4954_v44, %v4886_v9  ;;  %v4287_v8 = vadd.f32 %v4255_v63, %v4187_v6  ;;  %v3988_v5 = vadd.f32 %v8738_v50, %v3887_v29  ;;  %v5578_v51 = vld [vmem:[#allocation2 + $0x1ee] sm:$0xff]  ;;  %v4620_v9 = vld [vmem:[#allocation2 + $0x205] sm:$0xff] }
 0x2ff   : > { %v5356_v11 = vmax.f32 %v5324_v55, 0.0  ;;  %v4056_v43 = vmul.f32 %v5578_v51, %v9004_v10  ;;  %v5119_v0 = vld [vmem:[#allocation2 + $0x1f2] sm:$0xff]  ;;  %v4455_v24 = vmul.f32 %v5118_v25, %v9038_v38  ;;  %v4955_v41 = vmul.f32 %v9082_v40, %v4919_v36  ;;  %v4720_v25 = vld [vmem:[#allocation2 + $0x206] sm:$0xff] }
 0x300   : > { %v4687_v3 = vadd.f32 %v4655_v35, %v4586_v53  ;;  %v5086_v61 = vadd.f32 %v5054_v27, %v4986_v54  ;;  %v4387_v48 = vadd.f32 %v4355_v21, %v4287_v8  ;;  %v5219_v15 = vld [vmem:[#allocation2 + $0x1f3] sm:$0xff]  ;;  %v4156_v50 = vmul.f32 %v4819_v14, %v9010_v16  ;;  %v4920_v8 = vld [vmem:[#allocation2 + $0x208] sm:$0xff] }
 0x301   : > { %5388 = vst.msk [vmem:[%s9168_s17 + $0x88] sm:$0xff] %vm233_vm0, %v5356_v11  ;;  %v4088_v27 = vadd.f32 %v4056_v43, %v3988_v5  ;;  %v5055_v53 = vmul.f32 %v9088_v17, %v5019_v12  ;;  %v4555_v6 = vmul.f32 %v5218_v18, %v9048_v58  ;;  %v5155_v55 = vmul.f32 %v9091_v39, %v5119_v0 }
 0x302   : > { %v4787_v44 = vadd.f32 %v4755_v37, %v4687_v3  ;;  %v5186_v32 = vadd.f32 %v5154_v45, %v5086_v61  ;;  %v4487_v35 = vadd.f32 %v4455_v24, %v4387_v48  ;;  %v4256_v45 = vmul.f32 %v4919_v36, %v9015_v26  ;;  %v4820_v37 = vld [vmem:[#allocation2 + $0x207] sm:$0xff] }
 0x303   : > { %v4188_v54 = vadd.f32 %v4156_v50, %v4088_v27  ;;  %v5255_v31 = vmul.f32 %v9097_v59, %v5219_v15  ;;  %v4656_v3 = vmul.f32 %v9066_v33, %v4620_v9  ;;  %v4356_v18 = vmul.f32 %v5019_v12, %v9021_v34  ;;  %v10290_v24 = vld [vmem:[#allocation20_spill] sm:$0xff] }
 0x304   : > { %v4887_v57 = vadd.f32 %v4855_v19, %v4787_v44  ;;  %v5286_v63 = vadd.f32 %v5254_v47, %v5186_v32  ;;  %v4587_v29 = vadd.f32 %v4555_v6, %v4487_v35  ;;  %v10289_v47 = vld [vmem:[#allocation14_spill] sm:$0xff]  ;;  %v4756_v36 = vmul.f32 %v9076_v13, %v4720_v25  ;;  %v5020_v44 = vld [vmem:[#allocation2 + $0x209] sm:$0xff] }
 0x305   : > { %v4288_v21 = vadd.f32 %v4256_v45, %v4188_v54  ;;  %v3888_v11 = vadd.f32 %v10289_v47, %v8726_v30  ;;  %v4456_v51 = vmul.f32 %v5119_v0, %v9038_v38  ;;  %v5120_v19 = vld [vmem:[#allocation2 + $0x20a] sm:$0xff]  ;;  %v4856_v30 = vmul.f32 %v9079_v23, %v4820_v37 }
 0x306   : > { %v4987_v52 = vadd.f32 %v4955_v41, %v4887_v57  ;;  %v5325_v14 = vadd.f32 %v9440_v60, %v5286_v63  ;;  %v4688_v5 = vadd.f32 %v4656_v3, %v4587_v29  ;;  %v5579_v41 = vld [vmem:[#allocation2 + $0x206] sm:$0xff]  ;;  %v4956_v50 = vmul.f32 %v9082_v40, %v4920_v8 }
 0x307   : > { %v4388_v48 = vadd.f32 %v4356_v18, %v4288_v21  ;;  %v3989_v32 = vadd.f32 %v10290_v24, %v3888_v11  ;;  %v4057_v9 = vmul.f32 %v5579_v41, %v9004_v10  ;;  %v4621_v57 = vld [vmem:[#allocation2 + $0x20d] sm:$0xff]  ;;  %v4556_v35 = vmul.f32 %v5219_v15, %v9048_v58 }
 0x308   : > { %v5087_v61 = vadd.f32 %v5055_v53, %v4987_v52  ;;  %v5357_v43 = vmax.f32 %v5325_v14, 0.0  ;;  %v4788_v27 = vadd.f32 %v4756_v36, %v4688_v5  ;;  %v5220_v53 = vld [vmem:[#allocation2 + $0x20b] sm:$0xff]  ;;  %v4157_v63 = vmul.f32 %v4820_v37, %v9010_v16 }
 0x309   : > { %v4488_v0 = vadd.f32 %v4456_v51, %v4388_v48  ;;  %v4089_v6 = vadd.f32 %v4057_v9, %v3989_v32  ;;  %v5056_v45 = vmul.f32 %v9088_v17, %v5020_v44  ;;  %v4721_v52 = vld [vmem:[#allocation2 + $0x20e] sm:$0xff]  ;;  %v4657_v3 = vmul.f32 %v9066_v33, %v4621_v57 }
 0x30a   : > { %v5187_v12 = vadd.f32 %v5155_v55, %v5087_v61  ;;  %5389 = vst.msk [vmem:[%s9168_s17 + $0x90] sm:$0xff] %vm233_vm0, %v5357_v43  ;;  %v4888_v54 = vadd.f32 %v4856_v30, %v4788_v27  ;;  %v5156_v55 = vmul.f32 %v9091_v39, %v5120_v19  ;;  %v4257_v21 = vmul.f32 %v4920_v8, %v9015_v26  ;;  %v4821_v11 = vld [vmem:[#allocation2 + $0x20f] sm:$0xff] }
 0x30b   : > { %v4588_v29 = vadd.f32 %v4556_v35, %v4488_v0  ;;  %v4189_v14 = vadd.f32 %v4157_v63, %v4089_v6  ;;  %v5256_v15 = vmul.f32 %v9097_v59, %v5220_v53  ;;  %v10291_v37 = vld [vmem:[#allocation16_spill] sm:$0xff]  ;;  %v4757_v36 = vmul.f32 %v9076_v13, %v4721_v52  ;;  %v4921_v51 = vld [vmem:[#allocation2 + $0x210] sm:$0xff] }
 0x30c   : > { %v5287_v25 = vadd.f32 %v5255_v31, %v5187_v12  ;;  %v4988_v47 = vadd.f32 %v4956_v50, %v4888_v54  ;;  %v10292_v31 = vld [vmem:[#allocation15_spill] sm:$0xff]  ;;  %v4357_v48 = vmul.f32 %v5020_v44, %v9021_v34  ;;  %v5021_v8 = vld [vmem:[#allocation2 + $0x211] sm:$0xff]  ;;  %v4857_v30 = vmul.f32 %v9079_v23, %v4821_v11 }
 0x30d   : > { %v3889_v61 = vadd.f32 %v10292_v31, %v10291_v37  ;;  %v4689_v5 = vadd.f32 %v4657_v3, %v4588_v29  ;;  %v4289_v43 = vadd.f32 %v4257_v21, %v4189_v14  ;;  %v5580_v9 = vld [vmem:[#allocation2 + $0x20e] sm:$0xff]  ;;  %v4457_v0 = vmul.f32 %v5120_v19, %v9038_v38  ;;  %v4622_v63 = vld [vmem:[#allocation2 + $0x225] sm:$0xff] }
 0x30e   : > { %v5326_v18 = vadd.f32 %v9440_v60, %v5287_v25  ;;  %v5088_v32 = vadd.f32 %v5056_v45, %v4988_v47  ;;  %v4058_v12 = vmul.f32 %v5580_v9, %v9004_v10  ;;  %v5121_v50 = vld [vmem:[#allocation2 + $0x212] sm:$0xff]  ;;  %v4957_v44 = vmul.f32 %v9082_v40, %v4921_v51  ;;  %v4722_v19 = vld [vmem:[#allocation2 + $0x226] sm:$0xff] }
 0x30f   : > { %v3990_v41 = vadd.f32 %v8893_v49, %v3889_v61  ;;  %v4789_v27 = vadd.f32 %v4757_v36, %v4689_v5  ;;  %v4389_v57 = vadd.f32 %v4357_v48, %v4289_v43  ;;  %v5221_v6 = vld [vmem:[#allocation2 + $0x213] sm:$0xff]  ;;  %v4158_v49 = vmul.f32 %v4821_v11, %v9010_v16  ;;  %v4822_v61 = vld [vmem:[#allocation2 + $0x227] sm:$0xff] }
 0x310   : > { %v5358_v24 = vmax.f32 %v5326_v18, 0.0  ;;  %v5188_v35 = vadd.f32 %v5156_v55, %v5088_v32  ;;  %v5057_v45 = vmul.f32 %v9088_v17, %v5021_v8  ;;  %v4557_v29 = vmul.f32 %v5220_v53, %v9048_v58  ;;  %v4922_v5 = vld [vmem:[#allocation2 + $0x228] sm:$0xff] }
 0x311   : > { %v4090_v25 = vadd.f32 %v4058_v12, %v3990_v41  ;;  %v4889_v54 = vadd.f32 %v4857_v30, %v4789_v27  ;;  %v4489_v52 = vadd.f32 %v4457_v0, %v4389_v57  ;;  %v5157_v14 = vmul.f32 %v9091_v39, %v5121_v50  ;;  %v5022_v41 = vld [vmem:[#allocation2 + $0x229] sm:$0xff] }
 0x312   : > { %5390 = vst.msk [vmem:[%s9168_s17 + $0x98] sm:$0xff] %vm233_vm0, %v5358_v24  ;;  %v5288_v3 = vadd.f32 %v5256_v15, %v5188_v35  ;;  %v4258_v55 = vmul.f32 %v4921_v51, %v9015_v26  ;;  %v5257_v47 = vmul.f32 %v9097_v59, %v5221_v6  ;;  %v4658_v31 = vmul.f32 %v9066_v33, %v4622_v63  ;;  %v5122_v9 = vld [vmem:[#allocation2 + $0x22a] sm:$0xff] }
 0x313   : > { %v4190_v21 = vadd.f32 %v4158_v49, %v4090_v25  ;;  %v4989_v18 = vadd.f32 %v4957_v44, %v4889_v54  ;;  %v4589_v37 = vadd.f32 %v4557_v29, %v4489_v52  ;;  %v4358_v53 = vmul.f32 %v5021_v8, %v9021_v34  ;;  %v5581_v30 = vld [vmem:[#allocation2 + $0x226] sm:$0xff]  ;;  %v4723_v29 = vld [vmem:[#allocation2 + $0x22e] sm:$0xff] }
 0x314   : > { %v5327_v11 = vadd.f32 %v9440_v60, %v5288_v3  ;;  %v3890_v15 = vadd.f32 %v8868_v22, %v8874_v46  ;;  %v4758_v51 = vmul.f32 %v9076_v13, %v4722_v19  ;;  %v4458_v24 = vmul.f32 %v5121_v50, %v9038_v38  ;;  %v4623_v35 = vld [vmem:[#allocation2 + $0x22d] sm:$0xff] }
 0x315   : > { %v4290_v36 = vadd.f32 %v4258_v55, %v4190_v21  ;;  %v5089_v43 = vadd.f32 %v5057_v45, %v4989_v18  ;;  %v4690_v48 = vadd.f32 %v4658_v31, %v4589_v37  ;;  %v4059_v57 = vmul.f32 %v5581_v30, %v9004_v10  ;;  %v5222_v44 = vld [vmem:[#allocation2 + $0x22b] sm:$0xff] }
 0x316   : > { %v5359_v32 = vmax.f32 %v5327_v11, 0.0  ;;  %v3991_v27 = vadd.f32 %v8924_v1, %v3890_v15  ;;  %v4858_v22 = vmul.f32 %v9079_v23, %v4822_v61  ;;  %v4958_v46 = vmul.f32 %v9082_v40, %v4922_v5  ;;  %v4823_v37 = vld [vmem:[#allocation2 + $0x22f] sm:$0xff] }
 0x317   : > { %v4390_v12 = vadd.f32 %v4358_v53, %v4290_v36  ;;  %v5189_v8 = vadd.f32 %v5157_v14, %v5089_v43  ;;  %v4790_v0 = vadd.f32 %v4758_v51, %v4690_v48  ;;  %v4558_v63 = vmul.f32 %v5221_v6, %v9048_v58  ;;  %v5582_v51 = vld [vmem:[#allocation2 + $0x22e] sm:$0xff] }
 0x318   : > { %5391 = vst.msk [vmem:[%s9168_s17 + $0xa0] sm:$0xff] %vm233_vm0, %v5359_v32  ;;  %v4091_v25 = vadd.f32 %v4059_v57, %v3991_v27  ;;  %v4159_v49 = vmul.f32 %v4822_v61, %v9010_v16  ;;  %v5058_v45 = vmul.f32 %v9088_v17, %v5022_v41  ;;  %v5158_v52 = vmul.f32 %v9091_v39, %v5122_v9  ;;  %v4923_v61 = vld [vmem:[#allocation2 + $0x230] sm:$0xff] }
 0x319   : > { %v4490_v50 = vadd.f32 %v4458_v24, %v4390_v12  ;;  %v5289_v1 = vadd.f32 %v5257_v47, %v5189_v8  ;;  %v4890_v54 = vadd.f32 %v4858_v22, %v4790_v0  ;;  %v4659_v14 = vmul.f32 %v9066_v33, %v4623_v35  ;;  %v5223_v57 = vld [vmem:[#allocation2 + $0x233] sm:$0xff]  ;;  %v4624_v8 = vld [vmem:[#allocation2 + $0x245] sm:$0xff] }
 0x31a   : > { %v4191_v19 = vadd.f32 %v4159_v49, %v4091_v25  ;;  %v4259_v21 = vmul.f32 %v4922_v5, %v9015_v26  ;;  %v5258_v6 = vmul.f32 %v9097_v59, %v5222_v44  ;;  %v3891_v47 = vadd.f32 %v8878_v2, %v8930_v42  ;;  %v5023_v5 = vld [vmem:[#allocation2 + $0x231] sm:$0xff] }
 0x31b   : > { %v4590_v3 = vadd.f32 %v4558_v63, %v4490_v50  ;;  %v5328_v55 = vadd.f32 %v9440_v60, %v5289_v1  ;;  %v4990_v18 = vadd.f32 %v4958_v46, %v4890_v54  ;;  %v4759_v11 = vmul.f32 %v9076_v13, %v4723_v29  ;;  %v5123_v2 = vld [vmem:[#allocation2 + $0x232] sm:$0xff] }
 0x31c   : > { %v4291_v36 = vadd.f32 %v4259_v21, %v4191_v19  ;;  %v4359_v53 = vmul.f32 %v5022_v41, %v9021_v34  ;;  %v3992_v48 = vadd.f32 %v8982_v20, %v3891_v47  ;;  %v4060_v24 = vmul.f32 %v5582_v51, %v9004_v10  ;;  %v4924_v19 = vld [vmem:[#allocation2 + $0x248] sm:$0xff] }
 0x31d   : > { %v4691_v31 = vadd.f32 %v4659_v14, %v4590_v3  ;;  %v5360_v15 = vmax.f32 %v5328_v55, 0.0  ;;  %v5090_v43 = vadd.f32 %v5058_v45, %v4990_v18  ;;  %v4859_v12 = vmul.f32 %v9079_v23, %v4823_v37  ;;  %v4824_v14 = vld [vmem:[#allocation2 + $0x247] sm:$0xff] }
 0x31e   : > { %v4391_v42 = vadd.f32 %v4359_v53, %v4291_v36  ;;  %v4459_v27 = vmul.f32 %v5122_v9, %v9038_v38  ;;  %v4959_v41 = vmul.f32 %v9082_v40, %v4923_v61  ;;  %v4092_v0 = vadd.f32 %v4060_v24, %v3992_v48  ;;  %v4724_v9 = vld [vmem:[#allocation2 + $0x246] sm:$0xff] }
 0x31f   : > { %v4791_v32 = vadd.f32 %v4759_v11, %v4691_v31  ;;  %5392 = vst.msk [vmem:[%s9168_s17 + $0xa8] sm:$0xff] %vm233_vm0, %v5360_v15  ;;  %v5190_v30 = vadd.f32 %v5158_v52, %v5090_v43  ;;  %v4160_v20 = vmul.f32 %v4823_v37, %v9010_v16  ;;  %v5059_v46 = vmul.f32 %v9088_v17, %v5023_v5  ;;  %v5024_v11 = vld [vmem:[#allocation2 + $0x249] sm:$0xff] }
 0x320   : > { %v4491_v35 = vadd.f32 %v4459_v27, %v4391_v42  ;;  %v4559_v50 = vmul.f32 %v5222_v44, %v9048_v58  ;;  %v5159_v25 = vmul.f32 %v9091_v39, %v5123_v2  ;;  %v4260_v1 = vmul.f32 %v4923_v61, %v9015_v26  ;;  %v5124_v61 = vld [vmem:[#allocation2 + $0x24a] sm:$0xff] }
 0x321   : > { %v4891_v22 = vadd.f32 %v4859_v12, %v4791_v32  ;;  %v5290_v63 = vadd.f32 %v5258_v6, %v5190_v30  ;;  %v4192_v49 = vadd.f32 %v4160_v20, %v4092_v0  ;;  %v5259_v45 = vmul.f32 %v9097_v59, %v5223_v57  ;;  %v5583_v15 = vld [vmem:[#allocation2 + $0x246] sm:$0xff] }
 0x322   : > { %v4591_v52 = vadd.f32 %v4559_v50, %v4491_v35  ;;  %v4660_v29 = vmul.f32 %v9066_v33, %v4624_v8  ;;  %v4360_v44 = vmul.f32 %v5023_v5, %v9021_v34  ;;  %v3892_v55 = vadd.f32 %v8969_v62, %v9018_v7  ;;  %v4625_v51 = vld [vmem:[#allocation2 + $0x24d] sm:$0xff] }
 0x323   : > { %v4991_v54 = vadd.f32 %v4959_v41, %v4891_v22  ;;  %v5329_v3 = vadd.f32 %v9440_v60, %v5290_v63  ;;  %v4292_v21 = vadd.f32 %v4260_v1, %v4192_v49  ;;  %v4760_v37 = vmul.f32 %v9076_v13, %v4724_v9  ;;  %v5224_v24 = vld [vmem:[#allocation2 + $0x24b] sm:$0xff] }
 0x324   : > { %v4692_v6 = vadd.f32 %v4660_v29, %v4591_v52  ;;  %v4460_v47 = vmul.f32 %v5123_v2, %v9038_v38  ;;  %v3993_v53 = vadd.f32 %v9030_v56, %v3892_v55  ;;  %v4061_v43 = vmul.f32 %v5583_v15, %v9004_v10  ;;  %v4725_v8 = vld [vmem:[#allocation2 + $0x24e] sm:$0xff] }
 0x325   : > { %v5091_v18 = vadd.f32 %v5059_v46, %v4991_v54  ;;  %v5361_v31 = vmax.f32 %v5329_v3, 0.0  ;;  %v4392_v36 = vadd.f32 %v4360_v44, %v4292_v21  ;;  %v4860_v62 = vmul.f32 %v9079_v23, %v4824_v14  ;;  %v4825_v63 = vld [vmem:[#allocation2 + $0x24f] sm:$0xff] }
 0x326   : > { %v4792_v48 = vadd.f32 %v4760_v37, %v4692_v6  ;;  %v4960_v7 = vmul.f32 %v9082_v40, %v4924_v19  ;;  %v4560_v12 = vmul.f32 %v5223_v57, %v9048_v58  ;;  %v4093_v2 = vadd.f32 %v4061_v43, %v3993_v53  ;;  %v4925_v54 = vld [vmem:[#allocation2 + $0x250] sm:$0xff]  ;;  %v4626_v53 = vld [vmem:[#allocation2 + $0x265] sm:$0xff] }
 0x327   : > { %v5191_v5 = vadd.f32 %v5159_v25, %v5091_v18  ;;  %5393 = vst.msk [vmem:[%s9168_s17 + $0xb0] sm:$0xff] %vm233_vm0, %v5361_v31  ;;  %v4492_v32 = vadd.f32 %v4460_v47, %v4392_v36  ;;  %v4161_v42 = vmul.f32 %v4824_v14, %v9010_v16  ;;  %v5060_v30 = vmul.f32 %v9088_v17, %v5024_v11  ;;  %v10293_v25 = vld [vmem:[#allocation40_spill] sm:$0xff]  ;;  %v5025_v14 = vld [vmem:[#allocation2 + $0x251] sm:$0xff] }
 0x328   : > { %v4892_v27 = vadd.f32 %v4860_v62, %v4792_v48  ;;  %v5160_v41 = vmul.f32 %v9091_v39, %v5124_v61  ;;  %v4661_v20 = vmul.f32 %v9066_v33, %v4625_v51  ;;  %v4261_v46 = vmul.f32 %v4924_v19, %v9015_v26  ;;  %v10294_v19 = vld [vmem:[#allocation22_spill] sm:$0xff]  ;;  %v5584_v44 = vld [vmem:[#allocation2 + $0x24e] sm:$0xff] }
 0x329   : > { %v5291_v56 = vadd.f32 %v5259_v45, %v5191_v5  ;;  %v4592_v0 = vadd.f32 %v4560_v12, %v4492_v32  ;;  %v4193_v22 = vadd.f32 %v4161_v42, %v4093_v2  ;;  %v5260_v57 = vmul.f32 %v9097_v59, %v5224_v24  ;;  %v5225_v36 = vld [vmem:[#allocation2 + $0x253] sm:$0xff] }
 0x32a   : > { %v4992_v50 = vadd.f32 %v4960_v7, %v4892_v27  ;;  %v3893_v9 = vadd.f32 %v10293_v25, %v9026_v28  ;;  %v4761_v1 = vmul.f32 %v9076_v13, %v4725_v8  ;;  %v4361_v52 = vmul.f32 %v5024_v11, %v9021_v34  ;;  %v5125_v28 = vld [vmem:[#allocation2 + $0x252] sm:$0xff]  ;;  %v4826_v8 = vld [vmem:[#allocation2 + $0x267] sm:$0xff] }
 0x32b   : > { %v5330_v35 = vadd.f32 %v9440_v60, %v5291_v56  ;;  %v4693_v49 = vadd.f32 %v4661_v20, %v4592_v0  ;;  %v4293_v45 = vadd.f32 %v4261_v46, %v4193_v22  ;;  %v4062_v55 = vmul.f32 %v5584_v44, %v9004_v10  ;;  %v4926_v0 = vld [vmem:[#allocation2 + $0x268] sm:$0xff]  ;;  %v10295_v22 = vld [vmem:[#allocation29_spill] sm:$0xff] }
 0x32c   : > { %v5092_v3 = vadd.f32 %v5060_v30, %v4992_v50  ;;  %v3994_v21 = vadd.f32 %v10294_v19, %v3893_v9  ;;  %v4861_v6 = vmul.f32 %v9079_v23, %v4825_v63  ;;  %v4461_v47 = vmul.f32 %v5124_v61, %v9038_v38  ;;  %v4726_v61 = vld [vmem:[#allocation2 + $0x266] sm:$0xff]  ;;  %v10296_v46 = vld [vmem:[#allocation41_spill] sm:$0xff] }
 0x32d   : > { %v5362_v29 = vmax.f32 %v5330_v35, 0.0  ;;  %v4793_v18 = vadd.f32 %v4761_v1, %v4693_v49  ;;  %v4393_v37 = vadd.f32 %v4361_v52, %v4293_v45  ;;  %v4961_v11 = vmul.f32 %v9082_v40, %v4925_v54  ;;  %v5026_v49 = vld [vmem:[#allocation2 + $0x269] sm:$0xff]  ;;  %v10297_v45 = vld [vmem:[#allocation30_spill] sm:$0xff] }
 0x32e   : > { %v5192_v31 = vadd.f32 %v5160_v41, %v5092_v3  ;;  %v4094_v15 = vadd.f32 %v4062_v55, %v3994_v21  ;;  %v4162_v43 = vmul.f32 %v4825_v63, %v9010_v16  ;;  %v5061_v48 = vmul.f32 %v9088_v17, %v5025_v14  ;;  %v5126_v1 = vld [vmem:[#allocation2 + $0x26a] sm:$0xff] }
 0x32f   : > { %5394 = vst.msk [vmem:[%s9168_s17 + $0xb8] sm:$0xff] %vm233_vm0, %v5362_v29  ;;  %v4893_v5 = vadd.f32 %v4861_v6, %v4793_v18  ;;  %v4493_v62 = vadd.f32 %v4461_v47, %v4393_v37  ;;  %v4561_v7 = vmul.f32 %v5224_v24, %v9048_v58  ;;  %v5161_v32 = vmul.f32 %v9091_v39, %v5125_v28  ;;  %v5585_v29 = vld [vmem:[#allocation2 + $0x266] sm:$0xff] }
 0x330   : > { %v5292_v51 = vadd.f32 %v5260_v57, %v5192_v31  ;;  %v4194_v12 = vadd.f32 %v4162_v43, %v4094_v15  ;;  %v4262_v2 = vmul.f32 %v4925_v54, %v9015_v26  ;;  %v5261_v56 = vmul.f32 %v9097_v59, %v5225_v36  ;;  %v4627_v55 = vld [vmem:[#allocation2 + $0x26d] sm:$0xff] }
 0x331   : > { %v4993_v42 = vadd.f32 %v4961_v11, %v4893_v5  ;;  %v4593_v27 = vadd.f32 %v4561_v7, %v4493_v62  ;;  %v4662_v30 = vmul.f32 %v9066_v33, %v4626_v53  ;;  %v4362_v24 = vmul.f32 %v5025_v14, %v9021_v34  ;;  %v5226_v18 = vld [vmem:[#allocation2 + $0x26b] sm:$0xff] }
 0x332   : > { %v5331_v41 = vadd.f32 %v9440_v60, %v5292_v51  ;;  %v4294_v20 = vadd.f32 %v4262_v2, %v4194_v12  ;;  %v3894_v35 = vadd.f32 %v10296_v46, %v10295_v22  ;;  %v4762_v63 = vmul.f32 %v9076_v13, %v4726_v61  ;;  %v4727_v43 = vld [vmem:[#allocation2 + $0x26e] sm:$0xff]  ;;  %v10298_v12 = vld [vmem:[#allocation47_spill] sm:$0xff] }
 0x333   : > { %v5093_v50 = vadd.f32 %v5061_v48, %v4993_v42  ;;  %v4694_v57 = vadd.f32 %v4662_v30, %v4593_v27  ;;  %v4462_v25 = vmul.f32 %v5125_v28, %v9038_v38  ;;  %v4063_v3 = vmul.f32 %v5585_v29, %v9004_v10  ;;  %v4827_v61 = vld [vmem:[#allocation2 + $0x26f] sm:$0xff]  ;;  %v10300_v22 = vld [vmem:[#allocation31_spill] sm:$0xff] }
 0x334   : > { %v5363_v9 = vmax.f32 %v5331_v41, 0.0  ;;  %v4394_v54 = vadd.f32 %v4362_v24, %v4294_v20  ;;  %v3995_v52 = vadd.f32 %v10297_v45, %v3894_v35  ;;  %v4862_v21 = vmul.f32 %v9079_v23, %v4826_v8  ;;  %v10299_v2 = vld [vmem:[#allocation21_spill] sm:$0xff]  ;;  %v4628_v29 = vld [vmem:[#allocation2 + $0x285] sm:$0xff] }
 0x335   : > { %v5193_v14 = vadd.f32 %v5161_v32, %v5093_v50  ;;  %v4794_v19 = vadd.f32 %v4762_v63, %v4694_v57  ;;  %v4962_v44 = vmul.f32 %v9082_v40, %v4926_v0  ;;  %v4562_v28 = vmul.f32 %v5225_v36, %v9048_v58  ;;  %v4927_v30 = vld [vmem:[#allocation2 + $0x270] sm:$0xff] }
 0x336   : > { %5395 = vst.msk [vmem:[%s9168_s17 + $0xc0] sm:$0xff] %vm233_vm0, %v5363_v9  ;;  %v4494_v6 = vadd.f32 %v4462_v25, %v4394_v54  ;;  %v4095_v37 = vadd.f32 %v4063_v3, %v3995_v52  ;;  %v4163_v47 = vmul.f32 %v4826_v8, %v9010_v16  ;;  %v5062_v53 = vmul.f32 %v9088_v17, %v5026_v49  ;;  %v5586_v35 = vld [vmem:[#allocation2 + $0x26e] sm:$0xff] }
 0x337   : > { %v5293_v31 = vadd.f32 %v5261_v56, %v5193_v14  ;;  %v4894_v11 = vadd.f32 %v4862_v21, %v4794_v19  ;;  %v5162_v15 = vmul.f32 %v9091_v39, %v5126_v1  ;;  %v4663_v48 = vmul.f32 %v9066_v33, %v4627_v55  ;;  %v5127_v25 = vld [vmem:[#allocation2 + $0x272] sm:$0xff] }
 0x338   : > { %v4594_v5 = vadd.f32 %v4562_v28, %v4494_v6  ;;  %v4195_v62 = vadd.f32 %v4163_v47, %v4095_v37  ;;  %v4263_v7 = vmul.f32 %v4926_v0, %v9015_v26  ;;  %v5262_v36 = vmul.f32 %v9097_v59, %v5226_v18  ;;  %v5027_v0 = vld [vmem:[#allocation2 + $0x271] sm:$0xff] }
 0x339   : > { %v5332_v51 = vadd.f32 %v9440_v60, %v5293_v31  ;;  %v4994_v32 = vadd.f32 %v4962_v44, %v4894_v11  ;;  %v3895_v42 = vadd.f32 %v10299_v2, %v10298_v12  ;;  %v4763_v27 = vmul.f32 %v9076_v13, %v4727_v43  ;;  %v5227_v52 = vld [vmem:[#allocation2 + $0x273] sm:$0xff]  ;;  %v4029_v31 = vld [vmem:[#allocation2 + $0x286] sm:$0xff] }
 0x33a   : > { %v4695_v56 = vadd.f32 %v4663_v48, %v4594_v5  ;;  %v4295_v41 = vadd.f32 %v4263_v7, %v4195_v62  ;;  %v4363_v8 = vmul.f32 %v5026_v49, %v9021_v34  ;;  %v4064_v50 = vmul.f32 %v5586_v35, %v9004_v10  ;;  %v4828_v48 = vld [vmem:[#allocation2 + $0x287] sm:$0xff] }
 0x33b   : > { %v5364_v20 = vmax.f32 %v5332_v51, 0.0  ;;  %v5094_v24 = vadd.f32 %v5062_v53, %v4994_v32  ;;  %v3996_v46 = vadd.f32 %v10300_v22, %v3895_v42  ;;  %v4863_v63 = vmul.f32 %v9079_v23, %v4827_v61  ;;  %v4928_v62 = vld [vmem:[#allocation2 + $0x288] sm:$0xff]  ;;  %v10301_v51 = vld [vmem:[#allocation42_spill] sm:$0xff]  ;;  %v10302_v32 = vld [vmem:[#allocation49_spill] sm:$0xff] }
 0x33c   : > { %v4795_v57 = vadd.f32 %v4763_v27, %v4695_v56  ;;  %v4395_v9 = vadd.f32 %v4363_v8, %v4295_v41  ;;  %v4463_v54 = vmul.f32 %v5126_v1, %v9038_v38  ;;  %v4963_v49 = vmul.f32 %v9082_v40, %v4927_v30  ;;  %v4728_v1 = vld [vmem:[#allocation2 + $0x286] sm:$0xff]  ;;  %v10303_v8 = vld [vmem:[#allocation53_spill] sm:$0xff] }
 0x33d   : > { %5396 = vst.msk [vmem:[%s9168_s17 + $0xc8] sm:$0xff] %vm233_vm0, %v5364_v20  ;;  %v5194_v45 = vadd.f32 %v5162_v15, %v5094_v24  ;;  %v4096_v3 = vadd.f32 %v4064_v50, %v3996_v46  ;;  %v4164_v14 = vmul.f32 %v4827_v61, %v9010_v16  ;;  %v5063_v21 = vmul.f32 %v9088_v17, %v5027_v0  ;;  %v5028_v27 = vld [vmem:[#allocation2 + $0x289] sm:$0xff] }
 0x33e   : > { %v4895_v19 = vadd.f32 %v4863_v63, %v4795_v57  ;;  %v4495_v44 = vadd.f32 %v4463_v54, %v4395_v9  ;;  %v4563_v55 = vmul.f32 %v5226_v18, %v9048_v58  ;;  %v5163_v28 = vmul.f32 %v9091_v39, %v5127_v25  ;;  %v4629_v50 = vld [vmem:[#allocation2 + $0x28d] sm:$0xff] }
 0x33f   : > { %v5294_v6 = vadd.f32 %v5262_v36, %v5194_v45  ;;  %v4196_v37 = vadd.f32 %v4164_v14, %v4096_v3  ;;  %v4264_v47 = vmul.f32 %v4927_v30, %v9015_v26  ;;  %v5263_v53 = vmul.f32 %v9097_v59, %v5227_v52  ;;  %v5128_v30 = vld [vmem:[#allocation2 + $0x28a] sm:$0xff] }
 0x340   : > { %v4995_v11 = vadd.f32 %v4963_v49, %v4895_v19  ;;  %v4595_v15 = vadd.f32 %v4563_v55, %v4495_v44  ;;  %v4664_v43 = vmul.f32 %v9066_v33, %v4628_v29  ;;  %v4364_v18 = vmul.f32 %v5027_v0, %v9021_v34  ;;  %v5228_v57 = vld [vmem:[#allocation2 + $0x28b] sm:$0xff] }
 0x341   : > { %v5333_v5 = vadd.f32 %v9440_v60, %v5294_v6  ;;  %v4296_v7 = vadd.f32 %v4264_v47, %v4196_v37  ;;  %v3896_v36 = vadd.f32 %v10302_v32, %v10301_v51  ;;  %v4764_v2 = vmul.f32 %v9076_v13, %v4728_v1  ;;  %v4729_v14 = vld [vmem:[#allocation2 + $0x28e] sm:$0xff]  ;;  %v10304_v47 = vld [vmem:[#allocation50_spill] sm:$0xff] }
 0x342   : > { %v5095_v61 = vadd.f32 %v5063_v21, %v4995_v11  ;;  %v4696_v12 = vadd.f32 %v4664_v43, %v4595_v15  ;;  %v4464_v42 = vmul.f32 %v5127_v25, %v9038_v38  ;;  %v4065_v24 = vmul.f32 %v9004_v10, %v4029_v31  ;;  %v4030_v19 = vld [vmem:[#allocation2 + $0x28e] sm:$0xff] }
 0x343   : > { %v5365_v56 = vmax.f32 %v5333_v5, 0.0  ;;  %v4396_v41 = vadd.f32 %v4364_v18, %v4296_v7  ;;  %v3997_v20 = vadd.f32 %v10303_v8, %v3896_v36  ;;  %v4864_v46 = vmul.f32 %v9079_v23, %v4828_v48  ;;  %v4829_v37 = vld [vmem:[#allocation2 + $0x28f] sm:$0xff]  ;;  %v10305_v18 = vld [vmem:[#allocation54_spill] sm:$0xff] }
 0x344   : > { %v5195_v22 = vadd.f32 %v5163_v28, %v5095_v61  ;;  %v4796_v0 = vadd.f32 %v4764_v2, %v4696_v12  ;;  %v4964_v35 = vmul.f32 %v9082_v40, %v4928_v62  ;;  %v4564_v25 = vmul.f32 %v5227_v52, %v9048_v58  ;;  %v4929_v15 = vld [vmem:[#allocation2 + $0x290] sm:$0xff] }
 0x345   : > { %5397 = vst.msk [vmem:[%s9168_s17 + $0xd0] sm:$0xff] %vm233_vm0, %v5365_v56  ;;  %v4496_v63 = vadd.f32 %v4464_v42, %v4396_v41  ;;  %v4097_v9 = vadd.f32 %v4065_v24, %v3997_v20  ;;  %v4165_v54 = vmul.f32 %v4828_v48, %v9010_v16  ;;  %v5064_v29 = vmul.f32 %v9088_v17, %v5028_v27  ;;  %v5029_v42 = vld [vmem:[#allocation2 + $0x291] sm:$0xff] }
 0x346   : > { %v5295_v45 = vadd.f32 %v5263_v53, %v5195_v22  ;;  %v4896_v49 = vadd.f32 %v4864_v46, %v4796_v0  ;;  %v5164_v3 = vmul.f32 %v9091_v39, %v5128_v30  ;;  %v4665_v44 = vmul.f32 %v9066_v33, %v4629_v50  ;;  %v5129_v22 = vld [vmem:[#allocation2 + $0x292] sm:$0xff]  ;;  %v4730_v0 = vld [vmem:[#allocation2 + $0x2a6] sm:$0xff] }
 0x347   : > { %v4596_v21 = vadd.f32 %v4564_v25, %v4496_v63  ;;  %v4197_v55 = vadd.f32 %v4165_v54, %v4097_v9  ;;  %v4265_v6 = vmul.f32 %v4928_v62, %v9015_v26  ;;  %v5264_v1 = vmul.f32 %v9097_v59, %v5228_v57  ;;  %v4630_v62 = vld [vmem:[#allocation2 + $0x2a5] sm:$0xff]  ;;  %v5229_v9 = vld [vmem:[#allocation2 + $0x293] sm:$0xff] }
 0x348   : > { %v5334_v28 = vadd.f32 %v9440_v60, %v5295_v45  ;;  %v4996_v52 = vadd.f32 %v4964_v35, %v4896_v49  ;;  %v3897_v31 = vadd.f32 %v10304_v47, %v9349_v4  ;;  %v4765_v53 = vmul.f32 %v9076_v13, %v4729_v14  ;;  %v4830_v54 = vld [vmem:[#allocation2 + $0x2a7] sm:$0xff] }
 0x349   : > { %v4697_v11 = vadd.f32 %v4665_v44, %v4596_v21  ;;  %v4297_v43 = vadd.f32 %v4265_v6, %v4197_v55  ;;  %v4365_v5 = vmul.f32 %v5028_v27, %v9021_v34  ;;  %v4066_v51 = vmul.f32 %v9004_v10, %v4030_v19  ;;  %v4631_v14 = vld [vmem:[#allocation2 + $0x2ad] sm:$0xff] }
 0x34a   : > { %v5366_v48 = vmax.f32 %v5334_v28, 0.0  ;;  %v5096_v7 = vadd.f32 %v5064_v29, %v4996_v52  ;;  %v3998_v60 = vadd.f32 %v10305_v18, %v3897_v31  ;;  %v4865_v36 = vmul.f32 %v9079_v23, %v4829_v37  ;;  %v4930_v21 = vld [vmem:[#allocation2 + $0x2a8] sm:$0xff] }
 0x34b   : > { %v4797_v32 = vadd.f32 %v4765_v53, %v4697_v11  ;;  %v4397_v61 = vadd.f32 %v4365_v5, %v4297_v43  ;;  %v4465_v4 = vmul.f32 %v5128_v30, %v9038_v38  ;;  %v4965_v2 = vmul.f32 %v9082_v40, %v4929_v15  ;;  %v4731_v43 = vld [vmem:[#allocation2 + $0x2ae] sm:$0xff] }
 0x34c   : > { %5398 = vst.msk [vmem:[%s9168_s17 + $0xd8] sm:$0xff] %vm233_vm0, %v5366_v48  ;;  %v5196_v12 = vadd.f32 %v5164_v3, %v5096_v7  ;;  %v4098_v56 = vadd.f32 %v4066_v51, %v3998_v60  ;;  %v4166_v27 = vmul.f32 %v4829_v37, %v9010_v16  ;;  %v4565_v20 = vmul.f32 %v5228_v57, %v9048_v58  ;;  %v5587_v16 = vld [vmem:[%s9746_s2] ss:$0 sm:$0xff]  ;;  %v4831_v18 = vld [vmem:[#allocation2 + $0x2af] sm:$0xff] }
 0x34d   : > { %v4897_v41 = vadd.f32 %v4865_v36, %v4797_v32  ;;  %v4497_v8 = vadd.f32 %v4465_v4, %v4397_v61  ;;  %v4666_v10 = vmul.f32 %v9066_v33, %v4630_v62  ;;  %v4266_v30 = vmul.f32 %v4929_v15, %v9015_v26  ;;  %v5230_v60 = vld [vmem:[#allocation2 + $0x2ab] sm:$0xff] }
 0x34e   : > { %v5296_v24 = vadd.f32 %v5264_v1, %v5196_v12  ;;  %v4198_v46 = vadd.f32 %v4166_v27, %v4098_v56  ;;  %v5065_v50 = vmul.f32 %v9088_v17, %v5029_v42  ;;  %v4366_v45 = vmul.f32 %v5029_v42, %v9021_v34  ;;  %v5030_v34 = vld [vmem:[#allocation2 + $0x2a9] sm:$0xff]  ;;  %v5031_v56 = vld [vmem:[#allocation2 + $0x2b1] sm:$0xff] }
 0x34f   : > { %v4997_v35 = vadd.f32 %v4965_v2, %v4897_v41  ;;  %v4597_v63 = vadd.f32 %v4565_v20, %v4497_v8  ;;  %v5165_v29 = vmul.f32 %v9091_v39, %v5129_v22  ;;  %v4766_v26 = vmul.f32 %v9076_v13, %v4730_v0  ;;  %v4931_v61 = vld [vmem:[#allocation2 + $0x2b0] sm:$0xff] }
 0x350   : > { %v5335_v25 = vadd.f32 %v5587_v16, %v5296_v24  ;;  %v4298_v57 = vadd.f32 %v4266_v30, %v4198_v46  ;;  %v4466_v55 = vmul.f32 %v5129_v22, %v9038_v38  ;;  %v5265_v28 = vmul.f32 %v9097_v59, %v5229_v9  ;;  %v5130_v38 = vld [vmem:[#allocation2 + $0x2aa] sm:$0xff]  ;;  %v5131_v8 = vld [vmem:[#allocation2 + $0x2b2] sm:$0xff] }
 0x351   : > { %v5097_v49 = vadd.f32 %v5065_v50, %v4997_v35  ;;  %v4698_v3 = vadd.f32 %v4666_v10, %v4597_v63  ;;  %v4866_v1 = vmul.f32 %v9079_v23, %v4830_v54  ;;  %v4566_v47 = vmul.f32 %v5229_v9, %v9048_v58  ;;  %v5231_v22 = vld [vmem:[#allocation2 + $0x2b3] sm:$0xff] }
 0x352   : > { %v5367_v19 = vmax.f32 %v5335_v25, 0.0  ;;  %v4398_v44 = vadd.f32 %v4366_v45, %v4298_v57  ;;  %v4667_v31 = vmul.f32 %v9066_v33, %v4631_v14  ;;  %v4966_v15 = vmul.f32 %v9082_v40, %v4930_v21 }
 0x353   : > { %v5197_v6 = vadd.f32 %v5165_v29, %v5097_v49  ;;  %v4798_v52 = vadd.f32 %v4766_v26, %v4698_v3  ;;  %v5066_v62 = vmul.f32 %v9088_v17, %v5030_v34  ;;  %v4767_v32 = vmul.f32 %v9076_v13, %v4731_v43 }
 0x354   : > { %5399 = vst.msk [vmem:[%s9168_s17 + $0xe0] sm:$0xff] %vm233_vm0, %v5367_v19  ;;  %v4498_v37 = vadd.f32 %v4466_v55, %v4398_v44  ;;  %v5166_v33 = vmul.f32 %v9091_v39, %v5130_v38  ;;  %v4867_v12 = vmul.f32 %v9079_v23, %v4831_v18  ;;  %v5266_v42 = vmul.f32 %v9097_v59, %v5230_v60 }
 0x355   : > { %v5297_v11 = vadd.f32 %v5265_v28, %v5197_v6  ;;  %v4898_v53 = vadd.f32 %v4866_v1, %v4798_v52  ;;  %v4967_v41 = vmul.f32 %v9082_v40, %v4931_v61  ;;  %v5067_v10 = vmul.f32 %v9088_v17, %v5031_v56 }
 0x356   : > { %v4598_v5 = vadd.f32 %v4566_v47, %v4498_v37  ;;  %v5167_v23 = vmul.f32 %v9091_v39, %v5131_v8  ;;  %v5267_v35 = vmul.f32 %v9097_v59, %v5231_v22 }
 0x357   : > { %v5336_v48 = vadd.f32 %v5587_v16, %v5297_v11  ;;  %v4998_v7 = vadd.f32 %v4966_v15, %v4898_v53 }
 0x358   : > { %v4699_v51 = vadd.f32 %v4667_v31, %v4598_v5 }
 0x359   : > { %v5368_v58 = vmax.f32 %v5336_v48, 0.0  ;;  %v5098_v36 = vadd.f32 %v5066_v62, %v4998_v7 }
 0x35a   : > { %v4799_v4 = vadd.f32 %v4767_v32, %v4699_v51 }
 0x35b   : > { %5400 = vst.msk [vmem:[%s9168_s17 + $0xe8] sm:$0xff] %vm233_vm0, %v5368_v58  ;;  %v5198_v2 = vadd.f32 %v5166_v33, %v5098_v36 }
 0x35c   : > { %v4899_v27 = vadd.f32 %v4867_v12, %v4799_v4 }
 0x35d   : > { %v5298_v13 = vadd.f32 %v5266_v42, %v5198_v2 }
 0x35e   : > { %v4999_v20 = vadd.f32 %v4967_v41, %v4899_v27 }
 0x35f   : > { %v5337_v24 = vadd.f32 %v5587_v16, %v5298_v13 }
 0x360   : > { %v5099_v0 = vadd.f32 %v5067_v10, %v4999_v20 }
 0x361   : > { %v5369_v46 = vmax.f32 %v5337_v24, 0.0 }
 0x362   : > { %v5199_v30 = vadd.f32 %v5167_v23, %v5099_v0 }
 0x363   : > { %5401 = vst.msk [vmem:[%s9168_s17 + $0xf0] sm:$0xff] %vm233_vm0, %v5369_v46 }
 0x364   : > { %v5299_v50 = vadd.f32 %v5267_v35, %v5199_v30 }
 0x366   : > { %v5338_v63 = vadd.f32 %v5587_v16, %v5299_v50 }
 0x368   : > { %v5370_v40 = vmax.f32 %v5338_v63, 0.0 }
 0x36a   : > { %5402 = vst.msk [vmem:[%s9168_s17 + $0xf8] sm:$0xff] %vm233_vm0, %v5370_v40 }
 0x36b PF: > { %s13_s14 = sadd.s32 1, %s5610_s14   ;;  %s10306_s12 = smov %s5606_s13 }
 0x36c   : > { %p10_p5 = scmp.ge.s32.totalorder %s13_s14, 4   ;;  %s10307_s13 = smov %s10309_s15 }
 0x36e   :  { %12 = sbr.rel (!%p10_p5) target bundleno = 2 (0x2), region = 74 }

</bundles_post_ra>
